<compile_context>
chip_gen: v7x
topology: tpu7x:2x2x1
jax: 0.10.0
libtpu: 0.0.40
codegen_flags: <defaults>
</compile_context>

<pallas_src>
import functools
import math

import jax
import jax.numpy as jnp
from jax.experimental import pallas as pl
from jax.experimental.pallas import tpu as pltpu


# ----------------------------------------------------------------------------
# helpers
# ----------------------------------------------------------------------------
def _layernorm(x, w, b, eps=1e-5):
    mu = jnp.mean(x, axis=-1, keepdims=True)
    var = jnp.mean(jnp.square(x - mu), axis=-1, keepdims=True)
    return (x - mu) * jax.lax.rsqrt(var + eps) * w + b


def _const_spec(shape, single_buffer):
    """Full-array block, same block on every grid step (stays VMEM-resident).
    With single_buffer=True request Buffered(1) so the constant isn't
    double-buffered (its index_map never changes)."""
    nd = len(shape)
    index_map = lambda i: (0,) * nd
    if single_buffer:
        try:
            return pl.BlockSpec(shape, index_map, pipeline_mode=pl.Buffered(1))
        except Exception:  # pl.Buffered / pipeline_mode unavailable -> default
            pass
    return pl.BlockSpec(shape, index_map)


def _choose_batch_tile(batch, seq_len, target_rows=512):
    """Largest batch tile with Bt*S rows <= target_rows (VMEM-friendly, MXU
    filling) under the (8,128) sublane rule: the (Bt*S, D) activation block
    and the (Bt, D) output block need Bt % 8 == 0, or Bt == batch (full
    block).  No forced multi-step split: on v5e/v6e the grid is a serial loop
    and at small sizes a v7x two-core split buys nothing."""
    valid = [dv for dv in range(1, batch + 1)
             if batch % dv == 0 and (dv == batch or dv % 8 == 0)]
    fitting = [dv for dv in valid if dv * seq_len <= target_rows]
    return max(fitting) if fitting else min(valid)


# ----------------------------------------------------------------------------
# fused kernel: pos-add + num_layers encoder layers + mean over seq
# ----------------------------------------------------------------------------
def _fused_transformer_kernel(
    x_ref,          # (N, D)      f32 activations, N = Bt*S (pos not yet added)
    pos_ref,        # (S, D)      f32 positional embedding
    wqkv_ref,       # (L, D, 3D)  cdt, Q columns pre-scaled by 1/sqrt(hd)
    bqkv_ref,       # (L, 1, 3D)  f32, Q part pre-scaled
    wo_ref,         # (L, D, D) if fuse_out_proj else (L, H, hd, D), cdt
    bo_ref,         # (L, 1, D)   f32
    ln1w_ref, ln1b_ref,          # (L, 1, D) f32
    w1_ref,         # (L, D, F)   cdt
    b1_ref,         # (L, 1, F)   f32
    w2_ref,         # (L, F, D)   cdt
    b2_ref,         # (L, 1, D)   f32
    ln2w_ref, ln2b_ref,          # (L, 1, D) f32
    o_ref,          # (Bt, D)     f32 pooled output
    *,
    num_layers: int,
    nhead: int,
    seq_len: int,
    fuse_out_proj: bool,
):
    f32 = jnp.float32
    cdt = wqkv_ref.dtype                      # matmul compute dtype (bf16)
    n, d = x_ref.shape                        # n = Bt*S rows
    s = seq_len
    bt = n // s
    nh = nhead
    hd = d // nh
    g = nh * bt                               # merged (head, batch) axis

    # ---- positional-embedding add (f32), broadcast over the batch tile ------
    x = (x_ref[...].astype(f32).reshape(bt, s, d) + pos_ref[...][None]).reshape(n, d)

    def layer_body(l, x):
        # ---- packed Q/K/V projection: one lane-dense (N,D)x(D,3D) GEMM ------
        qkv = (jnp.dot(x.astype(cdt), wqkv_ref[l],
                       preferred_element_type=f32) + bqkv_ref[l]).astype(cdt)

        # split heads: lane slices + leading-dim stack (no transposes).
        # g = head*Bt + batch, so each g attends strictly within its sequence.
        def heads(which):                     # -> (G, S, hd) in compute dtype
            parts = [qkv[:, which * d + h * hd: which * d + (h + 1) * hd]
                     .reshape(1, bt, s, hd) for h in range(nh)]
            return jnp.concatenate(parts, axis=0).reshape(g, s, hd)

        qg, kg, vg = heads(0), heads(1), heads(2)

        scores = jnp.einsum('gie,gje->gij', qg, kg,
                            preferred_element_type=f32)     # scale pre-folded
        scores = scores - jnp.max(scores, axis=-1, keepdims=True)
        p = jnp.exp(scores)
        p = p * pl.reciprocal(jnp.sum(p, axis=-1, keepdims=True), approx=True)

        ctx = jnp.einsum('gij,gje->gie', p.astype(cdt), vg,
                         preferred_element_type=f32).astype(cdt)     # (G, S, hd)

        # ---- output projection with the head reduction fused into the MXU ---
        if fuse_out_proj:
            cat = jnp.concatenate(
                [ctx[h * bt:(h + 1) * bt].reshape(n, hd) for h in range(nh)],
                axis=-1)                                             # (N, D) cdt
            attn_out = jnp.dot(cat, wo_ref[l],
                               preferred_element_type=f32) + bo_ref[l]
        else:
            # robustness fallback: per-head GEMMs accumulated one at a time
            # (only one (N,D) f32 slab live at once).
            wo_l = wo_ref[l]                                         # (H, hd, D)
            acc = None
            for h in range(nh):
                part = jnp.dot(ctx[h * bt:(h + 1) * bt].reshape(n, hd), wo_l[h],
                               preferred_element_type=f32)
                acc = part if acc is None else acc + part
            attn_out = acc + bo_ref[l]

        # ---- residual + LayerNorm 1 (f32) ------------------------------------
        x = _layernorm(x + attn_out, ln1w_ref[l], ln1b_ref[l])

        # ---- feed-forward (relu), lane-dense GEMMs ---------------------------
        h1 = jnp.dot(x.astype(cdt), w1_ref[l],
                     preferred_element_type=f32) + b1_ref[l]
        h1 = jnp.maximum(h1, 0.0)
        # TODO(synk): on v7x, optionally run the FFN GEMMs in fp8 (e4m3) behind
        # an accuracy gate; keep bf16 on v5e/v6e (no fp8 MXU there).
        h2 = jnp.dot(h1.astype(cdt), w2_ref[l],
                     preferred_element_type=f32) + b2_ref[l]

        # ---- residual + LayerNorm 2 (f32) ------------------------------------
        return _layernorm(x + h2, ln2w_ref[l], ln2b_ref[l])

    if num_layers <= 4:
        for l in range(num_layers):
            x = layer_body(l, x)
    else:
        # fori_loop bounds code size / vreg live ranges for deep stacks; the
        # stacked weight refs are indexed with the traced layer id.
        # TODO(synk): on v7x (64 MiB VMEM), stream per-layer weights with
        # pltpu.emit_pipeline over l instead of keeping all L layers resident
        # once L*(4*D^2 + 2*D*F)*2B approaches ~40 MiB.
        x = jax.lax.fori_loop(0, num_layers, layer_body, x)

    # ---- mean over the sequence axis -> lane-dense (Bt, D) store -------------
    o_ref[...] = jnp.mean(x.reshape(bt, s, d), axis=1).astype(o_ref.dtype)


# ----------------------------------------------------------------------------
# wrapper-side parameter plumbing (layout work done once, outside the kernel)
# ----------------------------------------------------------------------------
def prepare_params(params, compute_dtype=jnp.bfloat16):
    layers = params["layers"]
    nh = params["nhead"]
    d = layers[0]["wqkv"].shape[0]
    hd = d // nh
    scale = 1.0 / math.sqrt(hd)
    f32 = jnp.float32

    def stack(fn, dtype):
        return jnp.stack([fn(l) for l in layers], axis=0).astype(dtype)

    wqkv = stack(lambda l: jnp.concatenate(
        [l["wqkv"][:, :d] * scale, l["wqkv"][:, d:]], axis=1), compute_dtype)   # (L,D,3D)
    bqkv = stack(lambda l: jnp.concatenate(
        [l["bqkv"][:d] * scale, l["bqkv"][d:]]).reshape(1, 3 * d), f32)         # (L,1,3D)
    wo4 = stack(lambda l: l["wo"].reshape(nh, hd, d), compute_dtype)            # (L,H,hd,D)
    rest = (
        stack(lambda l: l["bo"].reshape(1, d), f32),
        stack(lambda l: l["ln1_w"].reshape(1, d), f32),
        stack(lambda l: l["ln1_b"].reshape(1, d), f32),
        stack(lambda l: l["w1"], compute_dtype),
        stack(lambda l: l["b1"].reshape(1, -1), f32),
        stack(lambda l: l["w2"], compute_dtype),
        stack(lambda l: l["b2"].reshape(1, d), f32),
        stack(lambda l: l["ln2_w"].reshape(1, d), f32),
        stack(lambda l: l["ln2_b"].reshape(1, d), f32),
    )
    return wqkv, bqkv, wo4, rest


def temporal_transformer_forward(features, params, *,
                                 compute_dtype=jnp.bfloat16,
                                 batch_tile=None):
    """features: (B, S, D) float32 -> (B, D) float32."""
    b, s, d = features.shape
    num_layers = len(params["layers"])
    nh = params["nhead"]
    ff = params["layers"][0]["w1"].shape[1]
    bt = batch_tile if batch_tile is not None else _choose_batch_tile(b, s)
    assert b % bt == 0 and (bt == b or bt % 8 == 0)

    wqkv, bqkv, wo4, rest = prepare_params(params, compute_dtype)
    pos = params["pos_embedding"][0, :s, :].astype(jnp.float32)     # (S, D)
    x2 = features.reshape(b * s, d).astype(jnp.float32)             # row-packed slab

    # explicit scoped-VMEM budget: constants (double-buffered worst case) +
    # pipelined activation blocks + f32 per-layer working set + headroom.
    def total_bytes(arrs):
        return sum(int(a.size) * a.dtype.itemsize for a in arrs)

    const_bytes = total_bytes((wqkv, bqkv, wo4, pos) + rest)
    act_bytes = bt * s * d * 4
    work_bytes = 4 * (bt * s * (3 * d + ff) + nh * bt * s * s * 2)
    vmem_limit = 2 * const_bytes + 4 * act_bytes + 2 * work_bytes + (4 << 20)
    vmem_limit = int(min(max(vmem_limit, 16 << 20), 64 << 20))

    def run(fuse_out_proj, single_buffer_consts):
        wo = wo4.reshape(num_layers, d, d) if fuse_out_proj else wo4
        weights = (wqkv, bqkv, wo) + rest
        kernel = functools.partial(
            _fused_transformer_kernel,
            num_layers=num_layers, nhead=nh, seq_len=s,
            fuse_out_proj=fuse_out_proj)
        in_specs = [pl.BlockSpec((bt * s, d), lambda i: (i, 0)),
                    _const_spec(pos.shape, single_buffer_consts)]
        in_specs += [_const_spec(w.shape, single_buffer_consts) for w in weights]
        call = pl.pallas_call(
            kernel,
            out_shape=jax.ShapeDtypeStruct((b, d), jnp.float32),
            grid_spec=pltpu.PrefetchScalarGridSpec(
                num_scalar_prefetch=0,
                grid=(b // bt,),
                in_specs=in_specs,
                out_specs=pl.BlockSpec((bt, d), lambda i: (i, 0)),
            ),
            compiler_params=pltpu.CompilerParams(
                dimension_semantics=("parallel",),
                vmem_limit_bytes=vmem_limit),
        )
        return call(x2, pos, *weights)

    # Preferred config first; degrade gracefully if a Pallas/Mosaic feature
    # (single-buffered constants, fused lane-concat head merge) is unavailable.
    attempts = ((True, True), (True, False), (False, False))
    err = None
    for fuse, single in attempts:
        try:
            return jax.block_until_ready(run(fuse, single))
        except Exception as e:   # noqa: BLE001 - fall through to a safer config
            err = e
    raise err


# ----------------------------------------------------------------------------
# Parameter construction (deterministic, synthetic)
# ----------------------------------------------------------------------------
def init_params(key, d_model, num_layers, nhead, dim_feedforward, max_seq_len):
    params = {"layers": [], "nhead": nhead}
    scale = 0.05
    for _ in range(num_layers):
        key, *ks = jax.random.split(key, 7)
        layer = {
            # attention in-projection, stored transposed (used as x @ w)
            "wqkv": scale * jax.random.normal(ks[0], (d_model, 3 * d_model), jnp.float32),
            "bqkv": scale * jax.random.normal(ks[1], (3 * d_model,), jnp.float32),
            "wo": scale * jax.random.normal(ks[2], (d_model, d_model), jnp.float32),
            "bo": jnp.zeros((d_model,), jnp.float32),
            "ln1_w": jnp.ones((d_model,), jnp.float32),
            "ln1_b": jnp.zeros((d_model,), jnp.float32),
            "w1": scale * jax.random.normal(ks[3], (d_model, dim_feedforward), jnp.float32),
            "b1": scale * jax.random.normal(ks[4], (dim_feedforward,), jnp.float32),
            "w2": scale * jax.random.normal(ks[5], (dim_feedforward, d_model), jnp.float32),
            "b2": jnp.zeros((d_model,), jnp.float32),
            "ln2_w": jnp.ones((d_model,), jnp.float32),
            "ln2_b": jnp.zeros((d_model,), jnp.float32),
        }
        params["layers"].append(layer)
    key, kpos = jax.random.split(key)
    # nn.Parameter(torch.zeros(...)) in the module; small random values keep
    # the pos-embedding addition non-trivial for the check.
    params["pos_embedding"] = 0.02 * jax.random.normal(
        kpos, (1, max_seq_len, d_model), jnp.float32)
    return params


# ----------------------------------------------------------------------------
# Pure-JAX reference (same math as the PyTorch module, eval mode)
# ----------------------------------------------------------------------------
def _reference_layer(x, p, nhead):
    d = x.shape[-1]
    hd = d // nhead
    qkv = x @ p["wqkv"] + p["bqkv"]
    q, k, v = qkv[..., :d], qkv[..., d:2 * d], qkv[..., 2 * d:]
    outs = []
    for h in range(nhead):
        sl = slice(h * hd, (h + 1) * hd)
        s = jnp.einsum("bqd,bkd->bqk", q[..., sl], k[..., sl]) / math.sqrt(hd)
        a = jax.nn.softmax(s, axis=-1)
        outs.append(jnp.einsum("bqk,bkd->bqd", a, v[..., sl]))
    attn = jnp.concatenate(outs, axis=-1) @ p["wo"] + p["bo"]
    x = x + attn
    mu = x.mean(-1, keepdims=True)
    var = ((x - mu) ** 2).mean(-1, keepdims=True)
    x = (x - mu) * jax.lax.rsqrt(var + 1e-5) * p["ln1_w"] + p["ln1_b"]
    h1 = jnp.maximum(x @ p["w1"] + p["b1"], 0.0)
    x = x + (h1 @ p["w2"] + p["b2"])
    mu = x.mean(-1, keepdims=True)
    var = ((x - mu) ** 2).mean(-1, keepdims=True)
    return (x - mu) * jax.lax.rsqrt(var + 1e-5) * p["ln2_w"] + p["ln2_b"]


def reference_forward(features, params):
    s = features.shape[1]
    x = features + params["pos_embedding"][:, :s, :]
    for layer in params["layers"]:
        x = _reference_layer(x, layer, params["nhead"])
    return x.mean(axis=1)


# ----------------------------------------------------------------------------
if __name__ == "__main__":
    batch, seq_len, d_model = 2, 8, 32
    num_layers, nhead, dim_feedforward, max_seq_len = 2, 4, 256, 64

    key = jax.random.PRNGKey(0)
    key, kx = jax.random.split(key)
    features = jax.random.normal(kx, (batch, seq_len, d_model), jnp.float32)

    params = init_params(key, d_model, num_layers, nhead,
                         dim_feedforward, max_seq_len)

    out = temporal_transformer_forward(features, params)    # bf16 matmuls
    out = jax.block_until_ready(out)

    ref = reference_forward(features, params)                # f32 reference
    assert out.shape == (batch, d_model)
    # Tolerance covers bf16 matmul inputs (f32 accumulation) and the EUP
    # approximate reciprocal used for the softmax denominator.
    assert jnp.allclose(out, ref, atol=2e-2, rtol=2e-2), "mismatch vs reference"

    print("KERNEL_OK")
</pallas_src>

<mosaic_0001>
module attributes {stable_mosaic.version = 11 : i64} {
  func.func @_fused_transformer_kernel(%arg0: i32, %arg1: memref<16x32xf32, #tpu.memory_space<vmem>>, %arg2: memref<8x32xf32, #tpu.memory_space<vmem>>, %arg3: memref<2x32x96xbf16, #tpu.memory_space<vmem>>, %arg4: memref<2x1x96xf32, #tpu.memory_space<vmem>>, %arg5: memref<2x32x32xbf16, #tpu.memory_space<vmem>>, %arg6: memref<2x1x32xf32, #tpu.memory_space<vmem>>, %arg7: memref<2x1x32xf32, #tpu.memory_space<vmem>>, %arg8: memref<2x1x32xf32, #tpu.memory_space<vmem>>, %arg9: memref<2x32x256xbf16, #tpu.memory_space<vmem>>, %arg10: memref<2x1x256xf32, #tpu.memory_space<vmem>>, %arg11: memref<2x256x32xbf16, #tpu.memory_space<vmem>>, %arg12: memref<2x1x32xf32, #tpu.memory_space<vmem>>, %arg13: memref<2x1x32xf32, #tpu.memory_space<vmem>>, %arg14: memref<2x1x32xf32, #tpu.memory_space<vmem>>, %arg15: memref<2x32xf32, #tpu.memory_space<vmem>>) attributes {dimension_semantics = [#tpu.dimension_semantics<parallel>], iteration_bounds = array<i64: 1>, scalar_prefetch = 0 : i64, scratch_operands = 0 : i64, tpu.core_type = #tpu.core_type<tc>, window_params = [{transform_indices = @transform_0, window_bounds = array<i64: 16, 32>}, {pipeline_mode = #tpu.pipeline_mode<synchronous>, transform_indices = @transform_1, window_bounds = array<i64: 8, 32>}, {pipeline_mode = #tpu.pipeline_mode<synchronous>, transform_indices = @transform_2, window_bounds = array<i64: 2, 32, 96>}, {pipeline_mode = #tpu.pipeline_mode<synchronous>, transform_indices = @transform_3, window_bounds = array<i64: 2, 1, 96>}, {pipeline_mode = #tpu.pipeline_mode<synchronous>, transform_indices = @transform_4, window_bounds = array<i64: 2, 32, 32>}, {pipeline_mode = #tpu.pipeline_mode<synchronous>, transform_indices = @transform_5, window_bounds = array<i64: 2, 1, 32>}, {pipeline_mode = #tpu.pipeline_mode<synchronous>, transform_indices = @transform_6, window_bounds = array<i64: 2, 1, 32>}, {pipeline_mode = #tpu.pipeline_mode<synchronous>, transform_indices = @transform_7, window_bounds = array<i64: 2, 1, 32>}, {pipeline_mode = #tpu.pipeline_mode<synchronous>, transform_indices = @transform_8, window_bounds = array<i64: 2, 32, 256>}, {pipeline_mode = #tpu.pipeline_mode<synchronous>, transform_indices = @transform_9, window_bounds = array<i64: 2, 1, 256>}, {pipeline_mode = #tpu.pipeline_mode<synchronous>, transform_indices = @transform_10, window_bounds = array<i64: 2, 256, 32>}, {pipeline_mode = #tpu.pipeline_mode<synchronous>, transform_indices = @transform_11, window_bounds = array<i64: 2, 1, 32>}, {pipeline_mode = #tpu.pipeline_mode<synchronous>, transform_indices = @transform_12, window_bounds = array<i64: 2, 1, 32>}, {pipeline_mode = #tpu.pipeline_mode<synchronous>, transform_indices = @transform_13, window_bounds = array<i64: 2, 1, 32>}, {transform_indices = @transform_14, window_bounds = array<i64: 2, 32>}]} {
    %c0 = arith.constant 0 : index
    %c0_0 = arith.constant 0 : index
    %0 = vector.load %arg1[%c0, %c0_0] : memref<16x32xf32, #tpu.memory_space<vmem>>, vector<16x32xf32>
    %1 = vector.shape_cast %0 : vector<16x32xf32> to vector<2x8x32xf32>
    %c0_1 = arith.constant 0 : index
    %c0_2 = arith.constant 0 : index
    %2 = vector.load %arg2[%c0_1, %c0_2] : memref<8x32xf32, #tpu.memory_space<vmem>>, vector<8x32xf32>
    %3 = vector.shape_cast %2 : vector<8x32xf32> to vector<1x8x32xf32>
    %4 = vector.broadcast %3 : vector<1x8x32xf32> to vector<2x8x32xf32>
    %5 = arith.addf %1, %4 : vector<2x8x32xf32>
    %6 = vector.shape_cast %5 : vector<2x8x32xf32> to vector<16x32xf32>
    %7 = arith.truncf %6 : vector<16x32xf32> to vector<16x32xbf16>
    %c0_3 = arith.constant 0 : index
    %c0_4 = arith.constant 0 : index
    %c0_5 = arith.constant 0 : index
    %8 = vector.load %arg3[%c0_3, %c0_4, %c0_5] : memref<2x32x96xbf16, #tpu.memory_space<vmem>>, vector<1x32x96xbf16>
    %9 = vector.shape_cast %8 : vector<1x32x96xbf16> to vector<32x96xbf16>
    %cst = arith.constant dense<0.000000e+00> : vector<16x96xf32>
    %10 = tpu.matmul %7, %9, %cst {dimension_numbers = #tpu.dot_dimension_numbers<[1], [0], [0], [1], [0, 0, 1, 1], [], []>} : vector<16x32xbf16>, vector<32x96xbf16>, vector<16x96xf32> -> vector<16x96xf32>
    %c0_6 = arith.constant 0 : index
    %c0_7 = arith.constant 0 : index
    %c0_8 = arith.constant 0 : index
    %11 = vector.load %arg4[%c0_6, %c0_7, %c0_8] : memref<2x1x96xf32, #tpu.memory_space<vmem>>, vector<1x1x96xf32>
    %12 = vector.shape_cast %11 : vector<1x1x96xf32> to vector<1x96xf32>
    %13 = vector.broadcast %12 : vector<1x96xf32> to vector<16x96xf32>
    %14 = arith.addf %10, %13 : vector<16x96xf32>
    %15 = arith.truncf %14 : vector<16x96xf32> to vector<16x96xbf16>
    %16 = vector.extract_strided_slice %15 {offsets = [0, 0], sizes = [16, 8], strides = [1, 1]} : vector<16x96xbf16> to vector<16x8xbf16>
    %17 = vector.shape_cast %16 : vector<16x8xbf16> to vector<1x2x8x8xbf16>
    %18 = vector.extract_strided_slice %15 {offsets = [0, 8], sizes = [16, 8], strides = [1, 1]} : vector<16x96xbf16> to vector<16x8xbf16>
    %19 = vector.shape_cast %18 : vector<16x8xbf16> to vector<1x2x8x8xbf16>
    %20 = vector.extract_strided_slice %15 {offsets = [0, 16], sizes = [16, 8], strides = [1, 1]} : vector<16x96xbf16> to vector<16x8xbf16>
    %21 = vector.shape_cast %20 : vector<16x8xbf16> to vector<1x2x8x8xbf16>
    %22 = vector.extract_strided_slice %15 {offsets = [0, 24], sizes = [16, 8], strides = [1, 1]} : vector<16x96xbf16> to vector<16x8xbf16>
    %23 = vector.shape_cast %22 : vector<16x8xbf16> to vector<1x2x8x8xbf16>
    %24 = tpu.concatenate %17, %19, %21, %23 in 0 : vector<1x2x8x8xbf16>, vector<1x2x8x8xbf16>, vector<1x2x8x8xbf16>, vector<1x2x8x8xbf16> -> vector<4x2x8x8xbf16>
    %25 = vector.shape_cast %24 : vector<4x2x8x8xbf16> to vector<8x8x8xbf16>
    %26 = vector.extract_strided_slice %15 {offsets = [0, 32], sizes = [16, 8], strides = [1, 1]} : vector<16x96xbf16> to vector<16x8xbf16>
    %27 = vector.shape_cast %26 : vector<16x8xbf16> to vector<1x2x8x8xbf16>
    %28 = vector.extract_strided_slice %15 {offsets = [0, 40], sizes = [16, 8], strides = [1, 1]} : vector<16x96xbf16> to vector<16x8xbf16>
    %29 = vector.shape_cast %28 : vector<16x8xbf16> to vector<1x2x8x8xbf16>
    %30 = vector.extract_strided_slice %15 {offsets = [0, 48], sizes = [16, 8], strides = [1, 1]} : vector<16x96xbf16> to vector<16x8xbf16>
    %31 = vector.shape_cast %30 : vector<16x8xbf16> to vector<1x2x8x8xbf16>
    %32 = vector.extract_strided_slice %15 {offsets = [0, 56], sizes = [16, 8], strides = [1, 1]} : vector<16x96xbf16> to vector<16x8xbf16>
    %33 = vector.shape_cast %32 : vector<16x8xbf16> to vector<1x2x8x8xbf16>
    %34 = tpu.concatenate %27, %29, %31, %33 in 0 : vector<1x2x8x8xbf16>, vector<1x2x8x8xbf16>, vector<1x2x8x8xbf16>, vector<1x2x8x8xbf16> -> vector<4x2x8x8xbf16>
    %35 = vector.shape_cast %34 : vector<4x2x8x8xbf16> to vector<8x8x8xbf16>
    %36 = vector.extract_strided_slice %15 {offsets = [0, 64], sizes = [16, 8], strides = [1, 1]} : vector<16x96xbf16> to vector<16x8xbf16>
    %37 = vector.shape_cast %36 : vector<16x8xbf16> to vector<1x2x8x8xbf16>
    %38 = vector.extract_strided_slice %15 {offsets = [0, 72], sizes = [16, 8], strides = [1, 1]} : vector<16x96xbf16> to vector<16x8xbf16>
    %39 = vector.shape_cast %38 : vector<16x8xbf16> to vector<1x2x8x8xbf16>
    %40 = vector.extract_strided_slice %15 {offsets = [0, 80], sizes = [16, 8], strides = [1, 1]} : vector<16x96xbf16> to vector<16x8xbf16>
    %41 = vector.shape_cast %40 : vector<16x8xbf16> to vector<1x2x8x8xbf16>
    %42 = vector.extract_strided_slice %15 {offsets = [0, 88], sizes = [16, 8], strides = [1, 1]} : vector<16x96xbf16> to vector<16x8xbf16>
    %43 = vector.shape_cast %42 : vector<16x8xbf16> to vector<1x2x8x8xbf16>
    %44 = tpu.concatenate %37, %39, %41, %43 in 0 : vector<1x2x8x8xbf16>, vector<1x2x8x8xbf16>, vector<1x2x8x8xbf16>, vector<1x2x8x8xbf16> -> vector<4x2x8x8xbf16>
    %45 = vector.shape_cast %44 : vector<4x2x8x8xbf16> to vector<8x8x8xbf16>
    "tpu.trace_start"() <{level = 10 : i32, message = "gie,gje->gij"}> : () -> ()
    %cst_9 = arith.constant dense<0.000000e+00> : vector<8x8x8xf32>
    %46 = tpu.matmul %25, %35, %cst_9 {dimension_numbers = #tpu.dot_dimension_numbers<[2], [2], [1], [1], [0, 0, 0, 1, 1, 1], [0], [0]>} : vector<8x8x8xbf16>, vector<8x8x8xbf16>, vector<8x8x8xf32> -> vector<8x8x8xf32>
    "tpu.trace_stop"() : () -> ()
    %cst_10 = arith.constant dense<0xFF800000> : vector<8x8xf32>
    %47 = vector.multi_reduction <maximumf>, %46, %cst_10 [2] : vector<8x8x8xf32> to vector<8x8xf32>
    %48 = vector.shape_cast %47 : vector<8x8xf32> to vector<8x8x1xf32>
    %49 = vector.broadcast %48 : vector<8x8x1xf32> to vector<8x8x8xf32>
    %50 = arith.subf %46, %49 : vector<8x8x8xf32>
    %51 = math.exp %50 : vector<8x8x8xf32>
    %cst_11 = arith.constant dense<0.000000e+00> : vector<8x8xf32>
    %52 = vector.multi_reduction <add>, %51, %cst_11 [2] : vector<8x8x8xf32> to vector<8x8xf32>
    %53 = vector.shape_cast %52 : vector<8x8xf32> to vector<8x8x1xf32>
    %54 = tpu.reciprocal %53 {approx = true} : vector<8x8x1xf32> -> vector<8x8x1xf32>
    %55 = vector.broadcast %54 : vector<8x8x1xf32> to vector<8x8x8xf32>
    %56 = arith.mulf %51, %55 : vector<8x8x8xf32>
    %57 = arith.truncf %56 : vector<8x8x8xf32> to vector<8x8x8xbf16>
    "tpu.trace_start"() <{level = 10 : i32, message = "gij,gje->gie"}> : () -> ()
    %cst_12 = arith.constant dense<0.000000e+00> : vector<8x8x8xf32>
    %58 = tpu.matmul %57, %45, %cst_12 {dimension_numbers = #tpu.dot_dimension_numbers<[2], [1], [1], [2], [0, 0, 0, 1, 1, 2], [0], [0]>} : vector<8x8x8xbf16>, vector<8x8x8xbf16>, vector<8x8x8xf32> -> vector<8x8x8xf32>
    "tpu.trace_stop"() : () -> ()
    %59 = arith.truncf %58 : vector<8x8x8xf32> to vector<8x8x8xbf16>
    %60 = vector.extract_strided_slice %59 {offsets = [0, 0, 0], sizes = [2, 8, 8], strides = [1, 1, 1]} : vector<8x8x8xbf16> to vector<2x8x8xbf16>
    %61 = vector.shape_cast %60 : vector<2x8x8xbf16> to vector<16x8xbf16>
    %62 = vector.extract_strided_slice %59 {offsets = [2, 0, 0], sizes = [2, 8, 8], strides = [1, 1, 1]} : vector<8x8x8xbf16> to vector<2x8x8xbf16>
    %63 = vector.shape_cast %62 : vector<2x8x8xbf16> to vector<16x8xbf16>
    %64 = vector.extract_strided_slice %59 {offsets = [4, 0, 0], sizes = [2, 8, 8], strides = [1, 1, 1]} : vector<8x8x8xbf16> to vector<2x8x8xbf16>
    %65 = vector.shape_cast %64 : vector<2x8x8xbf16> to vector<16x8xbf16>
    %66 = vector.extract_strided_slice %59 {offsets = [6, 0, 0], sizes = [2, 8, 8], strides = [1, 1, 1]} : vector<8x8x8xbf16> to vector<2x8x8xbf16>
    %67 = vector.shape_cast %66 : vector<2x8x8xbf16> to vector<16x8xbf16>
    %68 = tpu.concatenate %61, %63, %65, %67 in 1 : vector<16x8xbf16>, vector<16x8xbf16>, vector<16x8xbf16>, vector<16x8xbf16> -> vector<16x32xbf16>
    %c0_13 = arith.constant 0 : index
    %c0_14 = arith.constant 0 : index
    %c0_15 = arith.constant 0 : index
    %69 = vector.load %arg5[%c0_13, %c0_14, %c0_15] : memref<2x32x32xbf16, #tpu.memory_space<vmem>>, vector<1x32x32xbf16>
    %70 = vector.shape_cast %69 : vector<1x32x32xbf16> to vector<32x32xbf16>
    %cst_16 = arith.constant dense<0.000000e+00> : vector<16x32xf32>
    %71 = tpu.matmul %68, %70, %cst_16 {dimension_numbers = #tpu.dot_dimension_numbers<[1], [0], [0], [1], [0, 0, 1, 1], [], []>} : vector<16x32xbf16>, vector<32x32xbf16>, vector<16x32xf32> -> vector<16x32xf32>
    %c0_17 = arith.constant 0 : index
    %c0_18 = arith.constant 0 : index
    %c0_19 = arith.constant 0 : index
    %72 = vector.load %arg6[%c0_17, %c0_18, %c0_19] : memref<2x1x32xf32, #tpu.memory_space<vmem>>, vector<1x1x32xf32>
    %73 = vector.shape_cast %72 : vector<1x1x32xf32> to vector<1x32xf32>
    %74 = vector.broadcast %73 : vector<1x32xf32> to vector<16x32xf32>
    %75 = arith.addf %71, %74 : vector<16x32xf32>
    %76 = arith.addf %6, %75 : vector<16x32xf32>
    %c0_20 = arith.constant 0 : index
    %c0_21 = arith.constant 0 : index
    %c0_22 = arith.constant 0 : index
    %77 = vector.load %arg7[%c0_20, %c0_21, %c0_22] : memref<2x1x32xf32, #tpu.memory_space<vmem>>, vector<1x1x32xf32>
    %78 = vector.shape_cast %77 : vector<1x1x32xf32> to vector<1x32xf32>
    %c0_23 = arith.constant 0 : index
    %c0_24 = arith.constant 0 : index
    %c0_25 = arith.constant 0 : index
    %79 = vector.load %arg8[%c0_23, %c0_24, %c0_25] : memref<2x1x32xf32, #tpu.memory_space<vmem>>, vector<1x1x32xf32>
    %80 = vector.shape_cast %79 : vector<1x1x32xf32> to vector<1x32xf32>
    %cst_26 = arith.constant dense<0.000000e+00> : vector<16xf32>
    %81 = vector.multi_reduction <add>, %76, %cst_26 [1] : vector<16x32xf32> to vector<16xf32>
    %82 = vector.shape_cast %81 : vector<16xf32> to vector<16x1xf32>
    %cst_27 = arith.constant 3.200000e+01 : f32
    %83 = vector.broadcast %cst_27 : f32 to vector<16x1xf32>
    %84 = arith.divf %82, %83 : vector<16x1xf32>
    %85 = vector.broadcast %84 : vector<16x1xf32> to vector<16x32xf32>
    %86 = arith.subf %76, %85 : vector<16x32xf32>
    %87 = arith.mulf %86, %86 : vector<16x32xf32>
    %cst_28 = arith.constant dense<0.000000e+00> : vector<16xf32>
    %88 = vector.multi_reduction <add>, %87, %cst_28 [1] : vector<16x32xf32> to vector<16xf32>
    %89 = vector.shape_cast %88 : vector<16xf32> to vector<16x1xf32>
    %cst_29 = arith.constant 3.200000e+01 : f32
    %90 = vector.broadcast %cst_29 : f32 to vector<16x1xf32>
    %91 = arith.divf %89, %90 : vector<16x1xf32>
    %92 = vector.broadcast %84 : vector<16x1xf32> to vector<16x32xf32>
    %93 = arith.subf %76, %92 : vector<16x32xf32>
    %cst_30 = arith.constant 9.99999974E-6 : f32
    %94 = vector.broadcast %cst_30 : f32 to vector<16x1xf32>
    %95 = arith.addf %91, %94 : vector<16x1xf32>
    %96 = math.rsqrt %95 : vector<16x1xf32>
    %97 = vector.broadcast %96 : vector<16x1xf32> to vector<16x32xf32>
    %98 = arith.mulf %93, %97 : vector<16x32xf32>
    %99 = vector.broadcast %78 : vector<1x32xf32> to vector<16x32xf32>
    %100 = arith.mulf %98, %99 : vector<16x32xf32>
    %101 = vector.broadcast %80 : vector<1x32xf32> to vector<16x32xf32>
    %102 = arith.addf %100, %101 : vector<16x32xf32>
    %103 = arith.truncf %102 : vector<16x32xf32> to vector<16x32xbf16>
    %c0_31 = arith.constant 0 : index
    %c0_32 = arith.constant 0 : index
    %c0_33 = arith.constant 0 : index
    %104 = vector.load %arg9[%c0_31, %c0_32, %c0_33] : memref<2x32x256xbf16, #tpu.memory_space<vmem>>, vector<1x32x256xbf16>
    %105 = vector.shape_cast %104 : vector<1x32x256xbf16> to vector<32x256xbf16>
    %cst_34 = arith.constant dense<0.000000e+00> : vector<16x256xf32>
    %106 = tpu.matmul %103, %105, %cst_34 {dimension_numbers = #tpu.dot_dimension_numbers<[1], [0], [0], [1], [0, 0, 1, 1], [], []>} : vector<16x32xbf16>, vector<32x256xbf16>, vector<16x256xf32> -> vector<16x256xf32>
    %c0_35 = arith.constant 0 : index
    %c0_36 = arith.constant 0 : index
    %c0_37 = arith.constant 0 : index
    %107 = vector.load %arg10[%c0_35, %c0_36, %c0_37] : memref<2x1x256xf32, #tpu.memory_space<vmem>>, vector<1x1x256xf32>
    %108 = vector.shape_cast %107 : vector<1x1x256xf32> to vector<1x256xf32>
    %109 = vector.broadcast %108 : vector<1x256xf32> to vector<16x256xf32>
    %110 = arith.addf %106, %109 : vector<16x256xf32>
    %cst_38 = arith.constant 0.000000e+00 : f32
    %111 = vector.broadcast %cst_38 : f32 to vector<16x256xf32>
    %112 = arith.maximumf %110, %111 : vector<16x256xf32>
    %113 = arith.truncf %112 : vector<16x256xf32> to vector<16x256xbf16>
    %c0_39 = arith.constant 0 : index
    %c0_40 = arith.constant 0 : index
    %c0_41 = arith.constant 0 : index
    %114 = vector.load %arg11[%c0_39, %c0_40, %c0_41] : memref<2x256x32xbf16, #tpu.memory_space<vmem>>, vector<1x256x32xbf16>
    %115 = vector.shape_cast %114 : vector<1x256x32xbf16> to vector<256x32xbf16>
    %cst_42 = arith.constant dense<0.000000e+00> : vector<16x32xf32>
    %116 = tpu.matmul %113, %115, %cst_42 {dimension_numbers = #tpu.dot_dimension_numbers<[1], [0], [0], [1], [0, 0, 1, 1], [], []>} : vector<16x256xbf16>, vector<256x32xbf16>, vector<16x32xf32> -> vector<16x32xf32>
    %c0_43 = arith.constant 0 : index
    %c0_44 = arith.constant 0 : index
    %c0_45 = arith.constant 0 : index
    %117 = vector.load %arg12[%c0_43, %c0_44, %c0_45] : memref<2x1x32xf32, #tpu.memory_space<vmem>>, vector<1x1x32xf32>
    %118 = vector.shape_cast %117 : vector<1x1x32xf32> to vector<1x32xf32>
    %119 = vector.broadcast %118 : vector<1x32xf32> to vector<16x32xf32>
    %120 = arith.addf %116, %119 : vector<16x32xf32>
    %121 = arith.addf %102, %120 : vector<16x32xf32>
    %c0_46 = arith.constant 0 : index
    %c0_47 = arith.constant 0 : index
    %c0_48 = arith.constant 0 : index
    %122 = vector.load %arg13[%c0_46, %c0_47, %c0_48] : memref<2x1x32xf32, #tpu.memory_space<vmem>>, vector<1x1x32xf32>
    %123 = vector.shape_cast %122 : vector<1x1x32xf32> to vector<1x32xf32>
    %c0_49 = arith.constant 0 : index
    %c0_50 = arith.constant 0 : index
    %c0_51 = arith.constant 0 : index
    %124 = vector.load %arg14[%c0_49, %c0_50, %c0_51] : memref<2x1x32xf32, #tpu.memory_space<vmem>>, vector<1x1x32xf32>
    %125 = vector.shape_cast %124 : vector<1x1x32xf32> to vector<1x32xf32>
    %cst_52 = arith.constant dense<0.000000e+00> : vector<16xf32>
    %126 = vector.multi_reduction <add>, %121, %cst_52 [1] : vector<16x32xf32> to vector<16xf32>
    %127 = vector.shape_cast %126 : vector<16xf32> to vector<16x1xf32>
    %cst_53 = arith.constant 3.200000e+01 : f32
    %128 = vector.broadcast %cst_53 : f32 to vector<16x1xf32>
    %129 = arith.divf %127, %128 : vector<16x1xf32>
    %130 = vector.broadcast %129 : vector<16x1xf32> to vector<16x32xf32>
    %131 = arith.subf %121, %130 : vector<16x32xf32>
    %132 = arith.mulf %131, %131 : vector<16x32xf32>
    %cst_54 = arith.constant dense<0.000000e+00> : vector<16xf32>
    %133 = vector.multi_reduction <add>, %132, %cst_54 [1] : vector<16x32xf32> to vector<16xf32>
    %134 = vector.shape_cast %133 : vector<16xf32> to vector<16x1xf32>
    %cst_55 = arith.constant 3.200000e+01 : f32
    %135 = vector.broadcast %cst_55 : f32 to vector<16x1xf32>
    %136 = arith.divf %134, %135 : vector<16x1xf32>
    %137 = vector.broadcast %129 : vector<16x1xf32> to vector<16x32xf32>
    %138 = arith.subf %121, %137 : vector<16x32xf32>
    %cst_56 = arith.constant 9.99999974E-6 : f32
    %139 = vector.broadcast %cst_56 : f32 to vector<16x1xf32>
    %140 = arith.addf %136, %139 : vector<16x1xf32>
    %141 = math.rsqrt %140 : vector<16x1xf32>
    %142 = vector.broadcast %141 : vector<16x1xf32> to vector<16x32xf32>
    %143 = arith.mulf %138, %142 : vector<16x32xf32>
    %144 = vector.broadcast %123 : vector<1x32xf32> to vector<16x32xf32>
    %145 = arith.mulf %143, %144 : vector<16x32xf32>
    %146 = vector.broadcast %125 : vector<1x32xf32> to vector<16x32xf32>
    %147 = arith.addf %145, %146 : vector<16x32xf32>
    %148 = arith.truncf %147 : vector<16x32xf32> to vector<16x32xbf16>
    %c1 = arith.constant 1 : index
    %c0_57 = arith.constant 0 : index
    %c0_58 = arith.constant 0 : index
    %149 = vector.load %arg3[%c1, %c0_57, %c0_58] : memref<2x32x96xbf16, #tpu.memory_space<vmem>>, vector<1x32x96xbf16>
    %150 = vector.shape_cast %149 : vector<1x32x96xbf16> to vector<32x96xbf16>
    %cst_59 = arith.constant dense<0.000000e+00> : vector<16x96xf32>
    %151 = tpu.matmul %148, %150, %cst_59 {dimension_numbers = #tpu.dot_dimension_numbers<[1], [0], [0], [1], [0, 0, 1, 1], [], []>} : vector<16x32xbf16>, vector<32x96xbf16>, vector<16x96xf32> -> vector<16x96xf32>
    %c1_60 = arith.constant 1 : index
    %c0_61 = arith.constant 0 : index
    %c0_62 = arith.constant 0 : index
    %152 = vector.load %arg4[%c1_60, %c0_61, %c0_62] : memref<2x1x96xf32, #tpu.memory_space<vmem>>, vector<1x1x96xf32>
    %153 = vector.shape_cast %152 : vector<1x1x96xf32> to vector<1x96xf32>
    %154 = vector.broadcast %153 : vector<1x96xf32> to vector<16x96xf32>
    %155 = arith.addf %151, %154 : vector<16x96xf32>
    %156 = arith.truncf %155 : vector<16x96xf32> to vector<16x96xbf16>
    %157 = vector.extract_strided_slice %156 {offsets = [0, 0], sizes = [16, 8], strides = [1, 1]} : vector<16x96xbf16> to vector<16x8xbf16>
    %158 = vector.shape_cast %157 : vector<16x8xbf16> to vector<1x2x8x8xbf16>
    %159 = vector.extract_strided_slice %156 {offsets = [0, 8], sizes = [16, 8], strides = [1, 1]} : vector<16x96xbf16> to vector<16x8xbf16>
    %160 = vector.shape_cast %159 : vector<16x8xbf16> to vector<1x2x8x8xbf16>
    %161 = vector.extract_strided_slice %156 {offsets = [0, 16], sizes = [16, 8], strides = [1, 1]} : vector<16x96xbf16> to vector<16x8xbf16>
    %162 = vector.shape_cast %161 : vector<16x8xbf16> to vector<1x2x8x8xbf16>
    %163 = vector.extract_strided_slice %156 {offsets = [0, 24], sizes = [16, 8], strides = [1, 1]} : vector<16x96xbf16> to vector<16x8xbf16>
    %164 = vector.shape_cast %163 : vector<16x8xbf16> to vector<1x2x8x8xbf16>
    %165 = tpu.concatenate %158, %160, %162, %164 in 0 : vector<1x2x8x8xbf16>, vector<1x2x8x8xbf16>, vector<1x2x8x8xbf16>, vector<1x2x8x8xbf16> -> vector<4x2x8x8xbf16>
    %166 = vector.shape_cast %165 : vector<4x2x8x8xbf16> to vector<8x8x8xbf16>
    %167 = vector.extract_strided_slice %156 {offsets = [0, 32], sizes = [16, 8], strides = [1, 1]} : vector<16x96xbf16> to vector<16x8xbf16>
    %168 = vector.shape_cast %167 : vector<16x8xbf16> to vector<1x2x8x8xbf16>
    %169 = vector.extract_strided_slice %156 {offsets = [0, 40], sizes = [16, 8], strides = [1, 1]} : vector<16x96xbf16> to vector<16x8xbf16>
    %170 = vector.shape_cast %169 : vector<16x8xbf16> to vector<1x2x8x8xbf16>
    %171 = vector.extract_strided_slice %156 {offsets = [0, 48], sizes = [16, 8], strides = [1, 1]} : vector<16x96xbf16> to vector<16x8xbf16>
    %172 = vector.shape_cast %171 : vector<16x8xbf16> to vector<1x2x8x8xbf16>
    %173 = vector.extract_strided_slice %156 {offsets = [0, 56], sizes = [16, 8], strides = [1, 1]} : vector<16x96xbf16> to vector<16x8xbf16>
    %174 = vector.shape_cast %173 : vector<16x8xbf16> to vector<1x2x8x8xbf16>
    %175 = tpu.concatenate %168, %170, %172, %174 in 0 : vector<1x2x8x8xbf16>, vector<1x2x8x8xbf16>, vector<1x2x8x8xbf16>, vector<1x2x8x8xbf16> -> vector<4x2x8x8xbf16>
    %176 = vector.shape_cast %175 : vector<4x2x8x8xbf16> to vector<8x8x8xbf16>
    %177 = vector.extract_strided_slice %156 {offsets = [0, 64], sizes = [16, 8], strides = [1, 1]} : vector<16x96xbf16> to vector<16x8xbf16>
    %178 = vector.shape_cast %177 : vector<16x8xbf16> to vector<1x2x8x8xbf16>
    %179 = vector.extract_strided_slice %156 {offsets = [0, 72], sizes = [16, 8], strides = [1, 1]} : vector<16x96xbf16> to vector<16x8xbf16>
    %180 = vector.shape_cast %179 : vector<16x8xbf16> to vector<1x2x8x8xbf16>
    %181 = vector.extract_strided_slice %156 {offsets = [0, 80], sizes = [16, 8], strides = [1, 1]} : vector<16x96xbf16> to vector<16x8xbf16>
    %182 = vector.shape_cast %181 : vector<16x8xbf16> to vector<1x2x8x8xbf16>
    %183 = vector.extract_strided_slice %156 {offsets = [0, 88], sizes = [16, 8], strides = [1, 1]} : vector<16x96xbf16> to vector<16x8xbf16>
    %184 = vector.shape_cast %183 : vector<16x8xbf16> to vector<1x2x8x8xbf16>
    %185 = tpu.concatenate %178, %180, %182, %184 in 0 : vector<1x2x8x8xbf16>, vector<1x2x8x8xbf16>, vector<1x2x8x8xbf16>, vector<1x2x8x8xbf16> -> vector<4x2x8x8xbf16>
    %186 = vector.shape_cast %185 : vector<4x2x8x8xbf16> to vector<8x8x8xbf16>
    "tpu.trace_start"() <{level = 10 : i32, message = "gie,gje->gij"}> : () -> ()
    %cst_63 = arith.constant dense<0.000000e+00> : vector<8x8x8xf32>
    %187 = tpu.matmul %166, %176, %cst_63 {dimension_numbers = #tpu.dot_dimension_numbers<[2], [2], [1], [1], [0, 0, 0, 1, 1, 1], [0], [0]>} : vector<8x8x8xbf16>, vector<8x8x8xbf16>, vector<8x8x8xf32> -> vector<8x8x8xf32>
    "tpu.trace_stop"() : () -> ()
    %cst_64 = arith.constant dense<0xFF800000> : vector<8x8xf32>
    %188 = vector.multi_reduction <maximumf>, %187, %cst_64 [2] : vector<8x8x8xf32> to vector<8x8xf32>
    %189 = vector.shape_cast %188 : vector<8x8xf32> to vector<8x8x1xf32>
    %190 = vector.broadcast %189 : vector<8x8x1xf32> to vector<8x8x8xf32>
    %191 = arith.subf %187, %190 : vector<8x8x8xf32>
    %192 = math.exp %191 : vector<8x8x8xf32>
    %cst_65 = arith.constant dense<0.000000e+00> : vector<8x8xf32>
    %193 = vector.multi_reduction <add>, %192, %cst_65 [2] : vector<8x8x8xf32> to vector<8x8xf32>
    %194 = vector.shape_cast %193 : vector<8x8xf32> to vector<8x8x1xf32>
    %195 = tpu.reciprocal %194 {approx = true} : vector<8x8x1xf32> -> vector<8x8x1xf32>
    %196 = vector.broadcast %195 : vector<8x8x1xf32> to vector<8x8x8xf32>
    %197 = arith.mulf %192, %196 : vector<8x8x8xf32>
    %198 = arith.truncf %197 : vector<8x8x8xf32> to vector<8x8x8xbf16>
    "tpu.trace_start"() <{level = 10 : i32, message = "gij,gje->gie"}> : () -> ()
    %cst_66 = arith.constant dense<0.000000e+00> : vector<8x8x8xf32>
    %199 = tpu.matmul %198, %186, %cst_66 {dimension_numbers = #tpu.dot_dimension_numbers<[2], [1], [1], [2], [0, 0, 0, 1, 1, 2], [0], [0]>} : vector<8x8x8xbf16>, vector<8x8x8xbf16>, vector<8x8x8xf32> -> vector<8x8x8xf32>
    "tpu.trace_stop"() : () -> ()
    %200 = arith.truncf %199 : vector<8x8x8xf32> to vector<8x8x8xbf16>
    %201 = vector.extract_strided_slice %200 {offsets = [0, 0, 0], sizes = [2, 8, 8], strides = [1, 1, 1]} : vector<8x8x8xbf16> to vector<2x8x8xbf16>
    %202 = vector.shape_cast %201 : vector<2x8x8xbf16> to vector<16x8xbf16>
    %203 = vector.extract_strided_slice %200 {offsets = [2, 0, 0], sizes = [2, 8, 8], strides = [1, 1, 1]} : vector<8x8x8xbf16> to vector<2x8x8xbf16>
    %204 = vector.shape_cast %203 : vector<2x8x8xbf16> to vector<16x8xbf16>
    %205 = vector.extract_strided_slice %200 {offsets = [4, 0, 0], sizes = [2, 8, 8], strides = [1, 1, 1]} : vector<8x8x8xbf16> to vector<2x8x8xbf16>
    %206 = vector.shape_cast %205 : vector<2x8x8xbf16> to vector<16x8xbf16>
    %207 = vector.extract_strided_slice %200 {offsets = [6, 0, 0], sizes = [2, 8, 8], strides = [1, 1, 1]} : vector<8x8x8xbf16> to vector<2x8x8xbf16>
    %208 = vector.shape_cast %207 : vector<2x8x8xbf16> to vector<16x8xbf16>
    %209 = tpu.concatenate %202, %204, %206, %208 in 1 : vector<16x8xbf16>, vector<16x8xbf16>, vector<16x8xbf16>, vector<16x8xbf16> -> vector<16x32xbf16>
    %c1_67 = arith.constant 1 : index
    %c0_68 = arith.constant 0 : index
    %c0_69 = arith.constant 0 : index
    %210 = vector.load %arg5[%c1_67, %c0_68, %c0_69] : memref<2x32x32xbf16, #tpu.memory_space<vmem>>, vector<1x32x32xbf16>
    %211 = vector.shape_cast %210 : vector<1x32x32xbf16> to vector<32x32xbf16>
    %cst_70 = arith.constant dense<0.000000e+00> : vector<16x32xf32>
    %212 = tpu.matmul %209, %211, %cst_70 {dimension_numbers = #tpu.dot_dimension_numbers<[1], [0], [0], [1], [0, 0, 1, 1], [], []>} : vector<16x32xbf16>, vector<32x32xbf16>, vector<16x32xf32> -> vector<16x32xf32>
    %c1_71 = arith.constant 1 : index
    %c0_72 = arith.constant 0 : index
    %c0_73 = arith.constant 0 : index
    %213 = vector.load %arg6[%c1_71, %c0_72, %c0_73] : memref<2x1x32xf32, #tpu.memory_space<vmem>>, vector<1x1x32xf32>
    %214 = vector.shape_cast %213 : vector<1x1x32xf32> to vector<1x32xf32>
    %215 = vector.broadcast %214 : vector<1x32xf32> to vector<16x32xf32>
    %216 = arith.addf %212, %215 : vector<16x32xf32>
    %217 = arith.addf %147, %216 : vector<16x32xf32>
    %c1_74 = arith.constant 1 : index
    %c0_75 = arith.constant 0 : index
    %c0_76 = arith.constant 0 : index
    %218 = vector.load %arg7[%c1_74, %c0_75, %c0_76] : memref<2x1x32xf32, #tpu.memory_space<vmem>>, vector<1x1x32xf32>
    %219 = vector.shape_cast %218 : vector<1x1x32xf32> to vector<1x32xf32>
    %c1_77 = arith.constant 1 : index
    %c0_78 = arith.constant 0 : index
    %c0_79 = arith.constant 0 : index
    %220 = vector.load %arg8[%c1_77, %c0_78, %c0_79] : memref<2x1x32xf32, #tpu.memory_space<vmem>>, vector<1x1x32xf32>
    %221 = vector.shape_cast %220 : vector<1x1x32xf32> to vector<1x32xf32>
    %cst_80 = arith.constant dense<0.000000e+00> : vector<16xf32>
    %222 = vector.multi_reduction <add>, %217, %cst_80 [1] : vector<16x32xf32> to vector<16xf32>
    %223 = vector.shape_cast %222 : vector<16xf32> to vector<16x1xf32>
    %cst_81 = arith.constant 3.200000e+01 : f32
    %224 = vector.broadcast %cst_81 : f32 to vector<16x1xf32>
    %225 = arith.divf %223, %224 : vector<16x1xf32>
    %226 = vector.broadcast %225 : vector<16x1xf32> to vector<16x32xf32>
    %227 = arith.subf %217, %226 : vector<16x32xf32>
    %228 = arith.mulf %227, %227 : vector<16x32xf32>
    %cst_82 = arith.constant dense<0.000000e+00> : vector<16xf32>
    %229 = vector.multi_reduction <add>, %228, %cst_82 [1] : vector<16x32xf32> to vector<16xf32>
    %230 = vector.shape_cast %229 : vector<16xf32> to vector<16x1xf32>
    %cst_83 = arith.constant 3.200000e+01 : f32
    %231 = vector.broadcast %cst_83 : f32 to vector<16x1xf32>
    %232 = arith.divf %230, %231 : vector<16x1xf32>
    %233 = vector.broadcast %225 : vector<16x1xf32> to vector<16x32xf32>
    %234 = arith.subf %217, %233 : vector<16x32xf32>
    %cst_84 = arith.constant 9.99999974E-6 : f32
    %235 = vector.broadcast %cst_84 : f32 to vector<16x1xf32>
    %236 = arith.addf %232, %235 : vector<16x1xf32>
    %237 = math.rsqrt %236 : vector<16x1xf32>
    %238 = vector.broadcast %237 : vector<16x1xf32> to vector<16x32xf32>
    %239 = arith.mulf %234, %238 : vector<16x32xf32>
    %240 = vector.broadcast %219 : vector<1x32xf32> to vector<16x32xf32>
    %241 = arith.mulf %239, %240 : vector<16x32xf32>
    %242 = vector.broadcast %221 : vector<1x32xf32> to vector<16x32xf32>
    %243 = arith.addf %241, %242 : vector<16x32xf32>
    %244 = arith.truncf %243 : vector<16x32xf32> to vector<16x32xbf16>
    %c1_85 = arith.constant 1 : index
    %c0_86 = arith.constant 0 : index
    %c0_87 = arith.constant 0 : index
    %245 = vector.load %arg9[%c1_85, %c0_86, %c0_87] : memref<2x32x256xbf16, #tpu.memory_space<vmem>>, vector<1x32x256xbf16>
    %246 = vector.shape_cast %245 : vector<1x32x256xbf16> to vector<32x256xbf16>
    %cst_88 = arith.constant dense<0.000000e+00> : vector<16x256xf32>
    %247 = tpu.matmul %244, %246, %cst_88 {dimension_numbers = #tpu.dot_dimension_numbers<[1], [0], [0], [1], [0, 0, 1, 1], [], []>} : vector<16x32xbf16>, vector<32x256xbf16>, vector<16x256xf32> -> vector<16x256xf32>
    %c1_89 = arith.constant 1 : index
    %c0_90 = arith.constant 0 : index
    %c0_91 = arith.constant 0 : index
    %248 = vector.load %arg10[%c1_89, %c0_90, %c0_91] : memref<2x1x256xf32, #tpu.memory_space<vmem>>, vector<1x1x256xf32>
    %249 = vector.shape_cast %248 : vector<1x1x256xf32> to vector<1x256xf32>
    %250 = vector.broadcast %249 : vector<1x256xf32> to vector<16x256xf32>
    %251 = arith.addf %247, %250 : vector<16x256xf32>
    %cst_92 = arith.constant 0.000000e+00 : f32
    %252 = vector.broadcast %cst_92 : f32 to vector<16x256xf32>
    %253 = arith.maximumf %251, %252 : vector<16x256xf32>
    %254 = arith.truncf %253 : vector<16x256xf32> to vector<16x256xbf16>
    %c1_93 = arith.constant 1 : index
    %c0_94 = arith.constant 0 : index
    %c0_95 = arith.constant 0 : index
    %255 = vector.load %arg11[%c1_93, %c0_94, %c0_95] : memref<2x256x32xbf16, #tpu.memory_space<vmem>>, vector<1x256x32xbf16>
    %256 = vector.shape_cast %255 : vector<1x256x32xbf16> to vector<256x32xbf16>
    %cst_96 = arith.constant dense<0.000000e+00> : vector<16x32xf32>
    %257 = tpu.matmul %254, %256, %cst_96 {dimension_numbers = #tpu.dot_dimension_numbers<[1], [0], [0], [1], [0, 0, 1, 1], [], []>} : vector<16x256xbf16>, vector<256x32xbf16>, vector<16x32xf32> -> vector<16x32xf32>
    %c1_97 = arith.constant 1 : index
    %c0_98 = arith.constant 0 : index
    %c0_99 = arith.constant 0 : index
    %258 = vector.load %arg12[%c1_97, %c0_98, %c0_99] : memref<2x1x32xf32, #tpu.memory_space<vmem>>, vector<1x1x32xf32>
    %259 = vector.shape_cast %258 : vector<1x1x32xf32> to vector<1x32xf32>
    %260 = vector.broadcast %259 : vector<1x32xf32> to vector<16x32xf32>
    %261 = arith.addf %257, %260 : vector<16x32xf32>
    %262 = arith.addf %243, %261 : vector<16x32xf32>
    %c1_100 = arith.constant 1 : index
    %c0_101 = arith.constant 0 : index
    %c0_102 = arith.constant 0 : index
    %263 = vector.load %arg13[%c1_100, %c0_101, %c0_102] : memref<2x1x32xf32, #tpu.memory_space<vmem>>, vector<1x1x32xf32>
    %264 = vector.shape_cast %263 : vector<1x1x32xf32> to vector<1x32xf32>
    %c1_103 = arith.constant 1 : index
    %c0_104 = arith.constant 0 : index
    %c0_105 = arith.constant 0 : index
    %265 = vector.load %arg14[%c1_103, %c0_104, %c0_105] : memref<2x1x32xf32, #tpu.memory_space<vmem>>, vector<1x1x32xf32>
    %266 = vector.shape_cast %265 : vector<1x1x32xf32> to vector<1x32xf32>
    %cst_106 = arith.constant dense<0.000000e+00> : vector<16xf32>
    %267 = vector.multi_reduction <add>, %262, %cst_106 [1] : vector<16x32xf32> to vector<16xf32>
    %268 = vector.shape_cast %267 : vector<16xf32> to vector<16x1xf32>
    %cst_107 = arith.constant 3.200000e+01 : f32
    %269 = vector.broadcast %cst_107 : f32 to vector<16x1xf32>
    %270 = arith.divf %268, %269 : vector<16x1xf32>
    %271 = vector.broadcast %270 : vector<16x1xf32> to vector<16x32xf32>
    %272 = arith.subf %262, %271 : vector<16x32xf32>
    %273 = arith.mulf %272, %272 : vector<16x32xf32>
    %cst_108 = arith.constant dense<0.000000e+00> : vector<16xf32>
    %274 = vector.multi_reduction <add>, %273, %cst_108 [1] : vector<16x32xf32> to vector<16xf32>
    %275 = vector.shape_cast %274 : vector<16xf32> to vector<16x1xf32>
    %cst_109 = arith.constant 3.200000e+01 : f32
    %276 = vector.broadcast %cst_109 : f32 to vector<16x1xf32>
    %277 = arith.divf %275, %276 : vector<16x1xf32>
    %278 = vector.broadcast %270 : vector<16x1xf32> to vector<16x32xf32>
    %279 = arith.subf %262, %278 : vector<16x32xf32>
    %cst_110 = arith.constant 9.99999974E-6 : f32
    %280 = vector.broadcast %cst_110 : f32 to vector<16x1xf32>
    %281 = arith.addf %277, %280 : vector<16x1xf32>
    %282 = math.rsqrt %281 : vector<16x1xf32>
    %283 = vector.broadcast %282 : vector<16x1xf32> to vector<16x32xf32>
    %284 = arith.mulf %279, %283 : vector<16x32xf32>
    %285 = vector.broadcast %264 : vector<1x32xf32> to vector<16x32xf32>
    %286 = arith.mulf %284, %285 : vector<16x32xf32>
    %287 = vector.broadcast %266 : vector<1x32xf32> to vector<16x32xf32>
    %288 = arith.addf %286, %287 : vector<16x32xf32>
    %289 = vector.shape_cast %288 : vector<16x32xf32> to vector<2x8x32xf32>
    %cst_111 = arith.constant dense<0.000000e+00> : vector<2x32xf32>
    %290 = vector.multi_reduction <add>, %289, %cst_111 [1] : vector<2x8x32xf32> to vector<2x32xf32>
    %cst_112 = arith.constant 8.000000e+00 : f32
    %291 = vector.broadcast %cst_112 : f32 to vector<2x32xf32>
    %292 = arith.divf %290, %291 : vector<2x32xf32>
    %c0_113 = arith.constant 0 : index
    %c0_114 = arith.constant 0 : index
    %293 = vector.load %arg15[%c0_113, %c0_114] : memref<2x32xf32, #tpu.memory_space<vmem>>, vector<2x32xf32>
    tpu.vector_store %arg15[%c0_113, %c0_114], %292 {strides = array<i32>} : memref<2x32xf32, #tpu.memory_space<vmem>>, vector<2x32xf32>,
    return
  }
  func.func @transform_0(%arg0: i32) -> (i32, i32) {
    %c0_i32 = arith.constant 0 : i32
    %c0_i32_0 = arith.constant 0 : i32
    return %arg0, %c0_i32 : i32, i32
  }
  func.func @transform_1(%arg0: i32) -> (i32, i32) {
    %c0_i32 = arith.constant 0 : i32
    %c0_i32_0 = arith.constant 0 : i32
    %c0_i32_1 = arith.constant 0 : i32
    return %c0_i32, %c0_i32_0 : i32, i32
  }
  func.func @transform_2(%arg0: i32) -> (i32, i32, i32) {
    %c0_i32 = arith.constant 0 : i32
    %c0_i32_0 = arith.constant 0 : i32
    %c0_i32_1 = arith.constant 0 : i32
    %c0_i32_2 = arith.constant 0 : i32
    return %c0_i32, %c0_i32_0, %c0_i32_1 : i32, i32, i32
  }
  func.func @transform_3(%arg0: i32) -> (i32, i32, i32) {
    %c0_i32 = arith.constant 0 : i32
    %c0_i32_0 = arith.constant 0 : i32
    %c0_i32_1 = arith.constant 0 : i32
    %c0_i32_2 = arith.constant 0 : i32
    return %c0_i32, %c0_i32_0, %c0_i32_1 : i32, i32, i32
  }
  func.func @transform_4(%arg0: i32) -> (i32, i32, i32) {
    %c0_i32 = arith.constant 0 : i32
    %c0_i32_0 = arith.constant 0 : i32
    %c0_i32_1 = arith.constant 0 : i32
    %c0_i32_2 = arith.constant 0 : i32
    return %c0_i32, %c0_i32_0, %c0_i32_1 : i32, i32, i32
  }
  func.func @transform_5(%arg0: i32) -> (i32, i32, i32) {
    %c0_i32 = arith.constant 0 : i32
    %c0_i32_0 = arith.constant 0 : i32
    %c0_i32_1 = arith.constant 0 : i32
    %c0_i32_2 = arith.constant 0 : i32
    return %c0_i32, %c0_i32_0, %c0_i32_1 : i32, i32, i32
  }
  func.func @transform_6(%arg0: i32) -> (i32, i32, i32) {
    %c0_i32 = arith.constant 0 : i32
    %c0_i32_0 = arith.constant 0 : i32
    %c0_i32_1 = arith.constant 0 : i32
    %c0_i32_2 = arith.constant 0 : i32
    return %c0_i32, %c0_i32_0, %c0_i32_1 : i32, i32, i32
  }
  func.func @transform_7(%arg0: i32) -> (i32, i32, i32) {
    %c0_i32 = arith.constant 0 : i32
    %c0_i32_0 = arith.constant 0 : i32
    %c0_i32_1 = arith.constant 0 : i32
    %c0_i32_2 = arith.constant 0 : i32
    return %c0_i32, %c0_i32_0, %c0_i32_1 : i32, i32, i32
  }
  func.func @transform_8(%arg0: i32) -> (i32, i32, i32) {
    %c0_i32 = arith.constant 0 : i32
    %c0_i32_0 = arith.constant 0 : i32
    %c0_i32_1 = arith.constant 0 : i32
    %c0_i32_2 = arith.constant 0 : i32
    return %c0_i32, %c0_i32_0, %c0_i32_1 : i32, i32, i32
  }
  func.func @transform_9(%arg0: i32) -> (i32, i32, i32) {
    %c0_i32 = arith.constant 0 : i32
    %c0_i32_0 = arith.constant 0 : i32
    %c0_i32_1 = arith.constant 0 : i32
    %c0_i32_2 = arith.constant 0 : i32
    return %c0_i32, %c0_i32_0, %c0_i32_1 : i32, i32, i32
  }
  func.func @transform_10(%arg0: i32) -> (i32, i32, i32) {
    %c0_i32 = arith.constant 0 : i32
    %c0_i32_0 = arith.constant 0 : i32
    %c0_i32_1 = arith.constant 0 : i32
    %c0_i32_2 = arith.constant 0 : i32
    return %c0_i32, %c0_i32_0, %c0_i32_1 : i32, i32, i32
  }
  func.func @transform_11(%arg0: i32) -> (i32, i32, i32) {
    %c0_i32 = arith.constant 0 : i32
    %c0_i32_0 = arith.constant 0 : i32
    %c0_i32_1 = arith.constant 0 : i32
    %c0_i32_2 = arith.constant 0 : i32
    return %c0_i32, %c0_i32_0, %c0_i32_1 : i32, i32, i32
  }
  func.func @transform_12(%arg0: i32) -> (i32, i32, i32) {
    %c0_i32 = arith.constant 0 : i32
    %c0_i32_0 = arith.constant 0 : i32
    %c0_i32_1 = arith.constant 0 : i32
    %c0_i32_2 = arith.constant 0 : i32
    return %c0_i32, %c0_i32_0, %c0_i32_1 : i32, i32, i32
  }
  func.func @transform_13(%arg0: i32) -> (i32, i32, i32) {
    %c0_i32 = arith.constant 0 : i32
    %c0_i32_0 = arith.constant 0 : i32
    %c0_i32_1 = arith.constant 0 : i32
    %c0_i32_2 = arith.constant 0 : i32
    return %c0_i32, %c0_i32_0, %c0_i32_1 : i32, i32, i32
  }
  func.func @transform_14(%arg0: i32) -> (i32, i32) {
    %c0_i32 = arith.constant 0 : i32
    %c0_i32_0 = arith.constant 0 : i32
    return %arg0, %c0_i32 : i32, i32
  }
}

module attributes {stable_mosaic.version = 11 : i64} {
  func.func @_fused_transformer_kernel(%arg0: i32, %arg1: memref<16x32xf32, #tpu.memory_space<vmem>>, %arg2: memref<8x32xf32, #tpu.memory_space<vmem>>, %arg3: memref<2x32x96xbf16, #tpu.memory_space<vmem>>, %arg4: memref<2x1x96xf32, #tpu.memory_space<vmem>>, %arg5: memref<2x32x32xbf16, #tpu.memory_space<vmem>>, %arg6: memref<2x1x32xf32, #tpu.memory_space<vmem>>, %arg7: memref<2x1x32xf32, #tpu.memory_space<vmem>>, %arg8: memref<2x1x32xf32, #tpu.memory_space<vmem>>, %arg9: memref<2x32x256xbf16, #tpu.memory_space<vmem>>, %arg10: memref<2x1x256xf32, #tpu.memory_space<vmem>>, %arg11: memref<2x256x32xbf16, #tpu.memory_space<vmem>>, %arg12: memref<2x1x32xf32, #tpu.memory_space<vmem>>, %arg13: memref<2x1x32xf32, #tpu.memory_space<vmem>>, %arg14: memref<2x1x32xf32, #tpu.memory_space<vmem>>, %arg15: memref<2x32xf32, #tpu.memory_space<vmem>>) attributes {dimension_semantics = [#tpu.dimension_semantics<parallel>], iteration_bounds = array<i64: 1>, scalar_prefetch = 0 : i64, scratch_operands = 0 : i64, tpu.core_type = #tpu.core_type<tc>, window_params = [{transform_indices = @transform_0, window_bounds = array<i64: 16, 32>}, {pipeline_mode = #tpu.pipeline_mode<synchronous>, transform_indices = @transform_1, window_bounds = array<i64: 8, 32>}, {pipeline_mode = #tpu.pipeline_mode<synchronous>, transform_indices = @transform_2, window_bounds = array<i64: 2, 32, 96>}, {pipeline_mode = #tpu.pipeline_mode<synchronous>, transform_indices = @transform_3, window_bounds = array<i64: 2, 1, 96>}, {pipeline_mode = #tpu.pipeline_mode<synchronous>, transform_indices = @transform_4, window_bounds = array<i64: 2, 32, 32>}, {pipeline_mode = #tpu.pipeline_mode<synchronous>, transform_indices = @transform_5, window_bounds = array<i64: 2, 1, 32>}, {pipeline_mode = #tpu.pipeline_mode<synchronous>, transform_indices = @transform_6, window_bounds = array<i64: 2, 1, 32>}, {pipeline_mode = #tpu.pipeline_mode<synchronous>, transform_indices = @transform_7, window_bounds = array<i64: 2, 1, 32>}, {pipeline_mode = #tpu.pipeline_mode<synchronous>, transform_indices = @transform_8, window_bounds = array<i64: 2, 32, 256>}, {pipeline_mode = #tpu.pipeline_mode<synchronous>, transform_indices = @transform_9, window_bounds = array<i64: 2, 1, 256>}, {pipeline_mode = #tpu.pipeline_mode<synchronous>, transform_indices = @transform_10, window_bounds = array<i64: 2, 256, 32>}, {pipeline_mode = #tpu.pipeline_mode<synchronous>, transform_indices = @transform_11, window_bounds = array<i64: 2, 1, 32>}, {pipeline_mode = #tpu.pipeline_mode<synchronous>, transform_indices = @transform_12, window_bounds = array<i64: 2, 1, 32>}, {pipeline_mode = #tpu.pipeline_mode<synchronous>, transform_indices = @transform_13, window_bounds = array<i64: 2, 1, 32>}, {transform_indices = @transform_14, window_bounds = array<i64: 2, 32>}]} {
    %c0 = arith.constant 0 : index
    %c0_0 = arith.constant 0 : index
    %0 = vector.load %arg1[%c0, %c0_0] : memref<16x32xf32, #tpu.memory_space<vmem>>, vector<16x32xf32>
    %1 = vector.shape_cast %0 : vector<16x32xf32> to vector<2x8x32xf32>
    %c0_1 = arith.constant 0 : index
    %c0_2 = arith.constant 0 : index
    %2 = vector.load %arg2[%c0_1, %c0_2] : memref<8x32xf32, #tpu.memory_space<vmem>>, vector<8x32xf32>
    %3 = vector.shape_cast %2 : vector<8x32xf32> to vector<1x8x32xf32>
    %4 = vector.broadcast %3 : vector<1x8x32xf32> to vector<2x8x32xf32>
    %5 = arith.addf %1, %4 : vector<2x8x32xf32>
    %6 = vector.shape_cast %5 : vector<2x8x32xf32> to vector<16x32xf32>
    %7 = arith.truncf %6 : vector<16x32xf32> to vector<16x32xbf16>
    %c0_3 = arith.constant 0 : index
    %c0_4 = arith.constant 0 : index
    %c0_5 = arith.constant 0 : index
    %8 = vector.load %arg3[%c0_3, %c0_4, %c0_5] : memref<2x32x96xbf16, #tpu.memory_space<vmem>>, vector<1x32x96xbf16>
    %9 = vector.shape_cast %8 : vector<1x32x96xbf16> to vector<32x96xbf16>
    %cst = arith.constant dense<0.000000e+00> : vector<16x96xf32>
    %10 = tpu.matmul %7, %9, %cst {dimension_numbers = #tpu.dot_dimension_numbers<[1], [0], [0], [1], [0, 0, 1, 1], [], []>} : vector<16x32xbf16>, vector<32x96xbf16>, vector<16x96xf32> -> vector<16x96xf32>
    %c0_6 = arith.constant 0 : index
    %c0_7 = arith.constant 0 : index
    %c0_8 = arith.constant 0 : index
    %11 = vector.load %arg4[%c0_6, %c0_7, %c0_8] : memref<2x1x96xf32, #tpu.memory_space<vmem>>, vector<1x1x96xf32>
    %12 = vector.shape_cast %11 : vector<1x1x96xf32> to vector<1x96xf32>
    %13 = vector.broadcast %12 : vector<1x96xf32> to vector<16x96xf32>
    %14 = arith.addf %10, %13 : vector<16x96xf32>
    %15 = arith.truncf %14 : vector<16x96xf32> to vector<16x96xbf16>
    %16 = vector.extract_strided_slice %15 {offsets = [0, 0], sizes = [16, 8], strides = [1, 1]} : vector<16x96xbf16> to vector<16x8xbf16>
    %17 = vector.shape_cast %16 : vector<16x8xbf16> to vector<1x2x8x8xbf16>
    %18 = vector.extract_strided_slice %15 {offsets = [0, 8], sizes = [16, 8], strides = [1, 1]} : vector<16x96xbf16> to vector<16x8xbf16>
    %19 = vector.shape_cast %18 : vector<16x8xbf16> to vector<1x2x8x8xbf16>
    %20 = vector.extract_strided_slice %15 {offsets = [0, 16], sizes = [16, 8], strides = [1, 1]} : vector<16x96xbf16> to vector<16x8xbf16>
    %21 = vector.shape_cast %20 : vector<16x8xbf16> to vector<1x2x8x8xbf16>
    %22 = vector.extract_strided_slice %15 {offsets = [0, 24], sizes = [16, 8], strides = [1, 1]} : vector<16x96xbf16> to vector<16x8xbf16>
    %23 = vector.shape_cast %22 : vector<16x8xbf16> to vector<1x2x8x8xbf16>
    %24 = tpu.concatenate %17, %19, %21, %23 in 0 : vector<1x2x8x8xbf16>, vector<1x2x8x8xbf16>, vector<1x2x8x8xbf16>, vector<1x2x8x8xbf16> -> vector<4x2x8x8xbf16>
    %25 = vector.shape_cast %24 : vector<4x2x8x8xbf16> to vector<8x8x8xbf16>
    %26 = vector.extract_strided_slice %15 {offsets = [0, 32], sizes = [16, 8], strides = [1, 1]} : vector<16x96xbf16> to vector<16x8xbf16>
    %27 = vector.shape_cast %26 : vector<16x8xbf16> to vector<1x2x8x8xbf16>
    %28 = vector.extract_strided_slice %15 {offsets = [0, 40], sizes = [16, 8], strides = [1, 1]} : vector<16x96xbf16> to vector<16x8xbf16>
    %29 = vector.shape_cast %28 : vector<16x8xbf16> to vector<1x2x8x8xbf16>
    %30 = vector.extract_strided_slice %15 {offsets = [0, 48], sizes = [16, 8], strides = [1, 1]} : vector<16x96xbf16> to vector<16x8xbf16>
    %31 = vector.shape_cast %30 : vector<16x8xbf16> to vector<1x2x8x8xbf16>
    %32 = vector.extract_strided_slice %15 {offsets = [0, 56], sizes = [16, 8], strides = [1, 1]} : vector<16x96xbf16> to vector<16x8xbf16>
    %33 = vector.shape_cast %32 : vector<16x8xbf16> to vector<1x2x8x8xbf16>
    %34 = tpu.concatenate %27, %29, %31, %33 in 0 : vector<1x2x8x8xbf16>, vector<1x2x8x8xbf16>, vector<1x2x8x8xbf16>, vector<1x2x8x8xbf16> -> vector<4x2x8x8xbf16>
    %35 = vector.shape_cast %34 : vector<4x2x8x8xbf16> to vector<8x8x8xbf16>
    %36 = vector.extract_strided_slice %15 {offsets = [0, 64], sizes = [16, 8], strides = [1, 1]} : vector<16x96xbf16> to vector<16x8xbf16>
    %37 = vector.shape_cast %36 : vector<16x8xbf16> to vector<1x2x8x8xbf16>
    %38 = vector.extract_strided_slice %15 {offsets = [0, 72], sizes = [16, 8], strides = [1, 1]} : vector<16x96xbf16> to vector<16x8xbf16>
    %39 = vector.shape_cast %38 : vector<16x8xbf16> to vector<1x2x8x8xbf16>
    %40 = vector.extract_strided_slice %15 {offsets = [0, 80], sizes = [16, 8], strides = [1, 1]} : vector<16x96xbf16> to vector<16x8xbf16>
    %41 = vector.shape_cast %40 : vector<16x8xbf16> to vector<1x2x8x8xbf16>
    %42 = vector.extract_strided_slice %15 {offsets = [0, 88], sizes = [16, 8], strides = [1, 1]} : vector<16x96xbf16> to vector<16x8xbf16>
    %43 = vector.shape_cast %42 : vector<16x8xbf16> to vector<1x2x8x8xbf16>
    %44 = tpu.concatenate %37, %39, %41, %43 in 0 : vector<1x2x8x8xbf16>, vector<1x2x8x8xbf16>, vector<1x2x8x8xbf16>, vector<1x2x8x8xbf16> -> vector<4x2x8x8xbf16>
    %45 = vector.shape_cast %44 : vector<4x2x8x8xbf16> to vector<8x8x8xbf16>
    "tpu.trace_start"() <{level = 10 : i32, message = "gie,gje->gij"}> : () -> ()
    %cst_9 = arith.constant dense<0.000000e+00> : vector<8x8x8xf32>
    %46 = tpu.matmul %25, %35, %cst_9 {dimension_numbers = #tpu.dot_dimension_numbers<[2], [2], [1], [1], [0, 0, 0, 1, 1, 1], [0], [0]>} : vector<8x8x8xbf16>, vector<8x8x8xbf16>, vector<8x8x8xf32> -> vector<8x8x8xf32>
    "tpu.trace_stop"() : () -> ()
    %cst_10 = arith.constant dense<0xFF800000> : vector<8x8xf32>
    %47 = vector.multi_reduction <maximumf>, %46, %cst_10 [2] : vector<8x8x8xf32> to vector<8x8xf32>
    %48 = vector.shape_cast %47 : vector<8x8xf32> to vector<8x8x1xf32>
    %49 = vector.broadcast %48 : vector<8x8x1xf32> to vector<8x8x8xf32>
    %50 = arith.subf %46, %49 : vector<8x8x8xf32>
    %51 = math.exp %50 : vector<8x8x8xf32>
    %cst_11 = arith.constant dense<0.000000e+00> : vector<8x8xf32>
    %52 = vector.multi_reduction <add>, %51, %cst_11 [2] : vector<8x8x8xf32> to vector<8x8xf32>
    %53 = vector.shape_cast %52 : vector<8x8xf32> to vector<8x8x1xf32>
    %54 = tpu.reciprocal %53 {approx = true} : vector<8x8x1xf32> -> vector<8x8x1xf32>
    %55 = vector.broadcast %54 : vector<8x8x1xf32> to vector<8x8x8xf32>
    %56 = arith.mulf %51, %55 : vector<8x8x8xf32>
    %57 = arith.truncf %56 : vector<8x8x8xf32> to vector<8x8x8xbf16>
    "tpu.trace_start"() <{level = 10 : i32, message = "gij,gje->gie"}> : () -> ()
    %cst_12 = arith.constant dense<0.000000e+00> : vector<8x8x8xf32>
    %58 = tpu.matmul %57, %45, %cst_12 {dimension_numbers = #tpu.dot_dimension_numbers<[2], [1], [1], [2], [0, 0, 0, 1, 1, 2], [0], [0]>} : vector<8x8x8xbf16>, vector<8x8x8xbf16>, vector<8x8x8xf32> -> vector<8x8x8xf32>
    "tpu.trace_stop"() : () -> ()
    %59 = arith.truncf %58 : vector<8x8x8xf32> to vector<8x8x8xbf16>
    %60 = vector.extract_strided_slice %59 {offsets = [0, 0, 0], sizes = [2, 8, 8], strides = [1, 1, 1]} : vector<8x8x8xbf16> to vector<2x8x8xbf16>
    %61 = vector.shape_cast %60 : vector<2x8x8xbf16> to vector<16x8xbf16>
    %62 = vector.extract_strided_slice %59 {offsets = [2, 0, 0], sizes = [2, 8, 8], strides = [1, 1, 1]} : vector<8x8x8xbf16> to vector<2x8x8xbf16>
    %63 = vector.shape_cast %62 : vector<2x8x8xbf16> to vector<16x8xbf16>
    %64 = vector.extract_strided_slice %59 {offsets = [4, 0, 0], sizes = [2, 8, 8], strides = [1, 1, 1]} : vector<8x8x8xbf16> to vector<2x8x8xbf16>
    %65 = vector.shape_cast %64 : vector<2x8x8xbf16> to vector<16x8xbf16>
    %66 = vector.extract_strided_slice %59 {offsets = [6, 0, 0], sizes = [2, 8, 8], strides = [1, 1, 1]} : vector<8x8x8xbf16> to vector<2x8x8xbf16>
    %67 = vector.shape_cast %66 : vector<2x8x8xbf16> to vector<16x8xbf16>
    %68 = tpu.concatenate %61, %63, %65, %67 in 1 : vector<16x8xbf16>, vector<16x8xbf16>, vector<16x8xbf16>, vector<16x8xbf16> -> vector<16x32xbf16>
    %c0_13 = arith.constant 0 : index
    %c0_14 = arith.constant 0 : index
    %c0_15 = arith.constant 0 : index
    %69 = vector.load %arg5[%c0_13, %c0_14, %c0_15] : memref<2x32x32xbf16, #tpu.memory_space<vmem>>, vector<1x32x32xbf16>
    %70 = vector.shape_cast %69 : vector<1x32x32xbf16> to vector<32x32xbf16>
    %cst_16 = arith.constant dense<0.000000e+00> : vector<16x32xf32>
    %71 = tpu.matmul %68, %70, %cst_16 {dimension_numbers = #tpu.dot_dimension_numbers<[1], [0], [0], [1], [0, 0, 1, 1], [], []>} : vector<16x32xbf16>, vector<32x32xbf16>, vector<16x32xf32> -> vector<16x32xf32>
    %c0_17 = arith.constant 0 : index
    %c0_18 = arith.constant 0 : index
    %c0_19 = arith.constant 0 : index
    %72 = vector.load %arg6[%c0_17, %c0_18, %c0_19] : memref<2x1x32xf32, #tpu.memory_space<vmem>>, vector<1x1x32xf32>
    %73 = vector.shape_cast %72 : vector<1x1x32xf32> to vector<1x32xf32>
    %74 = vector.broadcast %73 : vector<1x32xf32> to vector<16x32xf32>
    %75 = arith.addf %71, %74 : vector<16x32xf32>
    %76 = arith.addf %6, %75 : vector<16x32xf32>
    %c0_20 = arith.constant 0 : index
    %c0_21 = arith.constant 0 : index
    %c0_22 = arith.constant 0 : index
    %77 = vector.load %arg7[%c0_20, %c0_21, %c0_22] : memref<2x1x32xf32, #tpu.memory_space<vmem>>, vector<1x1x32xf32>
    %78 = vector.shape_cast %77 : vector<1x1x32xf32> to vector<1x32xf32>
    %c0_23 = arith.constant 0 : index
    %c0_24 = arith.constant 0 : index
    %c0_25 = arith.constant 0 : index
    %79 = vector.load %arg8[%c0_23, %c0_24, %c0_25] : memref<2x1x32xf32, #tpu.memory_space<vmem>>, vector<1x1x32xf32>
    %80 = vector.shape_cast %79 : vector<1x1x32xf32> to vector<1x32xf32>
    %cst_26 = arith.constant dense<0.000000e+00> : vector<16xf32>
    %81 = vector.multi_reduction <add>, %76, %cst_26 [1] : vector<16x32xf32> to vector<16xf32>
    %82 = vector.shape_cast %81 : vector<16xf32> to vector<16x1xf32>
    %cst_27 = arith.constant 3.200000e+01 : f32
    %83 = vector.broadcast %cst_27 : f32 to vector<16x1xf32>
    %84 = arith.divf %82, %83 : vector<16x1xf32>
    %85 = vector.broadcast %84 : vector<16x1xf32> to vector<16x32xf32>
    %86 = arith.subf %76, %85 : vector<16x32xf32>
    %87 = arith.mulf %86, %86 : vector<16x32xf32>
    %cst_28 = arith.constant dense<0.000000e+00> : vector<16xf32>
    %88 = vector.multi_reduction <add>, %87, %cst_28 [1] : vector<16x32xf32> to vector<16xf32>
    %89 = vector.shape_cast %88 : vector<16xf32> to vector<16x1xf32>
    %cst_29 = arith.constant 3.200000e+01 : f32
    %90 = vector.broadcast %cst_29 : f32 to vector<16x1xf32>
    %91 = arith.divf %89, %90 : vector<16x1xf32>
    %92 = vector.broadcast %84 : vector<16x1xf32> to vector<16x32xf32>
    %93 = arith.subf %76, %92 : vector<16x32xf32>
    %cst_30 = arith.constant 9.99999974E-6 : f32
    %94 = vector.broadcast %cst_30 : f32 to vector<16x1xf32>
    %95 = arith.addf %91, %94 : vector<16x1xf32>
    %96 = math.rsqrt %95 : vector<16x1xf32>
    %97 = vector.broadcast %96 : vector<16x1xf32> to vector<16x32xf32>
    %98 = arith.mulf %93, %97 : vector<16x32xf32>
    %99 = vector.broadcast %78 : vector<1x32xf32> to vector<16x32xf32>
    %100 = arith.mulf %98, %99 : vector<16x32xf32>
    %101 = vector.broadcast %80 : vector<1x32xf32> to vector<16x32xf32>
    %102 = arith.addf %100, %101 : vector<16x32xf32>
    %103 = arith.truncf %102 : vector<16x32xf32> to vector<16x32xbf16>
    %c0_31 = arith.constant 0 : index
    %c0_32 = arith.constant 0 : index
    %c0_33 = arith.constant 0 : index
    %104 = vector.load %arg9[%c0_31, %c0_32, %c0_33] : memref<2x32x256xbf16, #tpu.memory_space<vmem>>, vector<1x32x256xbf16>
    %105 = vector.shape_cast %104 : vector<1x32x256xbf16> to vector<32x256xbf16>
    %cst_34 = arith.constant dense<0.000000e+00> : vector<16x256xf32>
    %106 = tpu.matmul %103, %105, %cst_34 {dimension_numbers = #tpu.dot_dimension_numbers<[1], [0], [0], [1], [0, 0, 1, 1], [], []>} : vector<16x32xbf16>, vector<32x256xbf16>, vector<16x256xf32> -> vector<16x256xf32>
    %c0_35 = arith.constant 0 : index
    %c0_36 = arith.constant 0 : index
    %c0_37 = arith.constant 0 : index
    %107 = vector.load %arg10[%c0_35, %c0_36, %c0_37] : memref<2x1x256xf32, #tpu.memory_space<vmem>>, vector<1x1x256xf32>
    %108 = vector.shape_cast %107 : vector<1x1x256xf32> to vector<1x256xf32>
    %109 = vector.broadcast %108 : vector<1x256xf32> to vector<16x256xf32>
    %110 = arith.addf %106, %109 : vector<16x256xf32>
    %cst_38 = arith.constant 0.000000e+00 : f32
    %111 = vector.broadcast %cst_38 : f32 to vector<16x256xf32>
    %112 = arith.maximumf %110, %111 : vector<16x256xf32>
    %113 = arith.truncf %112 : vector<16x256xf32> to vector<16x256xbf16>
    %c0_39 = arith.constant 0 : index
    %c0_40 = arith.constant 0 : index
    %c0_41 = arith.constant 0 : index
    %114 = vector.load %arg11[%c0_39, %c0_40, %c0_41] : memref<2x256x32xbf16, #tpu.memory_space<vmem>>, vector<1x256x32xbf16>
    %115 = vector.shape_cast %114 : vector<1x256x32xbf16> to vector<256x32xbf16>
    %cst_42 = arith.constant dense<0.000000e+00> : vector<16x32xf32>
    %116 = tpu.matmul %113, %115, %cst_42 {dimension_numbers = #tpu.dot_dimension_numbers<[1], [0], [0], [1], [0, 0, 1, 1], [], []>} : vector<16x256xbf16>, vector<256x32xbf16>, vector<16x32xf32> -> vector<16x32xf32>
    %c0_43 = arith.constant 0 : index
    %c0_44 = arith.constant 0 : index
    %c0_45 = arith.constant 0 : index
    %117 = vector.load %arg12[%c0_43, %c0_44, %c0_45] : memref<2x1x32xf32, #tpu.memory_space<vmem>>, vector<1x1x32xf32>
    %118 = vector.shape_cast %117 : vector<1x1x32xf32> to vector<1x32xf32>
    %119 = vector.broadcast %118 : vector<1x32xf32> to vector<16x32xf32>
    %120 = arith.addf %116, %119 : vector<16x32xf32>
    %121 = arith.addf %102, %120 : vector<16x32xf32>
    %c0_46 = arith.constant 0 : index
    %c0_47 = arith.constant 0 : index
    %c0_48 = arith.constant 0 : index
    %122 = vector.load %arg13[%c0_46, %c0_47, %c0_48] : memref<2x1x32xf32, #tpu.memory_space<vmem>>, vector<1x1x32xf32>
    %123 = vector.shape_cast %122 : vector<1x1x32xf32> to vector<1x32xf32>
    %c0_49 = arith.constant 0 : index
    %c0_50 = arith.constant 0 : index
    %c0_51 = arith.constant 0 : index
    %124 = vector.load %arg14[%c0_49, %c0_50, %c0_51] : memref<2x1x32xf32, #tpu.memory_space<vmem>>, vector<1x1x32xf32>
    %125 = vector.shape_cast %124 : vector<1x1x32xf32> to vector<1x32xf32>
    %cst_52 = arith.constant dense<0.000000e+00> : vector<16xf32>
    %126 = vector.multi_reduction <add>, %121, %cst_52 [1] : vector<16x32xf32> to vector<16xf32>
    %127 = vector.shape_cast %126 : vector<16xf32> to vector<16x1xf32>
    %cst_53 = arith.constant 3.200000e+01 : f32
    %128 = vector.broadcast %cst_53 : f32 to vector<16x1xf32>
    %129 = arith.divf %127, %128 : vector<16x1xf32>
    %130 = vector.broadcast %129 : vector<16x1xf32> to vector<16x32xf32>
    %131 = arith.subf %121, %130 : vector<16x32xf32>
    %132 = arith.mulf %131, %131 : vector<16x32xf32>
    %cst_54 = arith.constant dense<0.000000e+00> : vector<16xf32>
    %133 = vector.multi_reduction <add>, %132, %cst_54 [1] : vector<16x32xf32> to vector<16xf32>
    %134 = vector.shape_cast %133 : vector<16xf32> to vector<16x1xf32>
    %cst_55 = arith.constant 3.200000e+01 : f32
    %135 = vector.broadcast %cst_55 : f32 to vector<16x1xf32>
    %136 = arith.divf %134, %135 : vector<16x1xf32>
    %137 = vector.broadcast %129 : vector<16x1xf32> to vector<16x32xf32>
    %138 = arith.subf %121, %137 : vector<16x32xf32>
    %cst_56 = arith.constant 9.99999974E-6 : f32
    %139 = vector.broadcast %cst_56 : f32 to vector<16x1xf32>
    %140 = arith.addf %136, %139 : vector<16x1xf32>
    %141 = math.rsqrt %140 : vector<16x1xf32>
    %142 = vector.broadcast %141 : vector<16x1xf32> to vector<16x32xf32>
    %143 = arith.mulf %138, %142 : vector<16x32xf32>
    %144 = vector.broadcast %123 : vector<1x32xf32> to vector<16x32xf32>
    %145 = arith.mulf %143, %144 : vector<16x32xf32>
    %146 = vector.broadcast %125 : vector<1x32xf32> to vector<16x32xf32>
    %147 = arith.addf %145, %146 : vector<16x32xf32>
    %148 = arith.truncf %147 : vector<16x32xf32> to vector<16x32xbf16>
    %c1 = arith.constant 1 : index
    %c0_57 = arith.constant 0 : index
    %c0_58 = arith.constant 0 : index
    %149 = vector.load %arg3[%c1, %c0_57, %c0_58] : memref<2x32x96xbf16, #tpu.memory_space<vmem>>, vector<1x32x96xbf16>
    %150 = vector.shape_cast %149 : vector<1x32x96xbf16> to vector<32x96xbf16>
    %cst_59 = arith.constant dense<0.000000e+00> : vector<16x96xf32>
    %151 = tpu.matmul %148, %150, %cst_59 {dimension_numbers = #tpu.dot_dimension_numbers<[1], [0], [0], [1], [0, 0, 1, 1], [], []>} : vector<16x32xbf16>, vector<32x96xbf16>, vector<16x96xf32> -> vector<16x96xf32>
    %c1_60 = arith.constant 1 : index
    %c0_61 = arith.constant 0 : index
    %c0_62 = arith.constant 0 : index
    %152 = vector.load %arg4[%c1_60, %c0_61, %c0_62] : memref<2x1x96xf32, #tpu.memory_space<vmem>>, vector<1x1x96xf32>
    %153 = vector.shape_cast %152 : vector<1x1x96xf32> to vector<1x96xf32>
    %154 = vector.broadcast %153 : vector<1x96xf32> to vector<16x96xf32>
    %155 = arith.addf %151, %154 : vector<16x96xf32>
    %156 = arith.truncf %155 : vector<16x96xf32> to vector<16x96xbf16>
    %157 = vector.extract_strided_slice %156 {offsets = [0, 0], sizes = [16, 8], strides = [1, 1]} : vector<16x96xbf16> to vector<16x8xbf16>
    %158 = vector.shape_cast %157 : vector<16x8xbf16> to vector<1x2x8x8xbf16>
    %159 = vector.extract_strided_slice %156 {offsets = [0, 8], sizes = [16, 8], strides = [1, 1]} : vector<16x96xbf16> to vector<16x8xbf16>
    %160 = vector.shape_cast %159 : vector<16x8xbf16> to vector<1x2x8x8xbf16>
    %161 = vector.extract_strided_slice %156 {offsets = [0, 16], sizes = [16, 8], strides = [1, 1]} : vector<16x96xbf16> to vector<16x8xbf16>
    %162 = vector.shape_cast %161 : vector<16x8xbf16> to vector<1x2x8x8xbf16>
    %163 = vector.extract_strided_slice %156 {offsets = [0, 24], sizes = [16, 8], strides = [1, 1]} : vector<16x96xbf16> to vector<16x8xbf16>
    %164 = vector.shape_cast %163 : vector<16x8xbf16> to vector<1x2x8x8xbf16>
    %165 = tpu.concatenate %158, %160, %162, %164 in 0 : vector<1x2x8x8xbf16>, vector<1x2x8x8xbf16>, vector<1x2x8x8xbf16>, vector<1x2x8x8xbf16> -> vector<4x2x8x8xbf16>
    %166 = vector.shape_cast %165 : vector<4x2x8x8xbf16> to vector<8x8x8xbf16>
    %167 = vector.extract_strided_slice %156 {offsets = [0, 32], sizes = [16, 8], strides = [1, 1]} : vector<16x96xbf16> to vector<16x8xbf16>
    %168 = vector.shape_cast %167 : vector<16x8xbf16> to vector<1x2x8x8xbf16>
    %169 = vector.extract_strided_slice %156 {offsets = [0, 40], sizes = [16, 8], strides = [1, 1]} : vector<16x96xbf16> to vector<16x8xbf16>
    %170 = vector.shape_cast %169 : vector<16x8xbf16> to vector<1x2x8x8xbf16>
    %171 = vector.extract_strided_slice %156 {offsets = [0, 48], sizes = [16, 8], strides = [1, 1]} : vector<16x96xbf16> to vector<16x8xbf16>
    %172 = vector.shape_cast %171 : vector<16x8xbf16> to vector<1x2x8x8xbf16>
    %173 = vector.extract_strided_slice %156 {offsets = [0, 56], sizes = [16, 8], strides = [1, 1]} : vector<16x96xbf16> to vector<16x8xbf16>
    %174 = vector.shape_cast %173 : vector<16x8xbf16> to vector<1x2x8x8xbf16>
    %175 = tpu.concatenate %168, %170, %172, %174 in 0 : vector<1x2x8x8xbf16>, vector<1x2x8x8xbf16>, vector<1x2x8x8xbf16>, vector<1x2x8x8xbf16> -> vector<4x2x8x8xbf16>
    %176 = vector.shape_cast %175 : vector<4x2x8x8xbf16> to vector<8x8x8xbf16>
    %177 = vector.extract_strided_slice %156 {offsets = [0, 64], sizes = [16, 8], strides = [1, 1]} : vector<16x96xbf16> to vector<16x8xbf16>
    %178 = vector.shape_cast %177 : vector<16x8xbf16> to vector<1x2x8x8xbf16>
    %179 = vector.extract_strided_slice %156 {offsets = [0, 72], sizes = [16, 8], strides = [1, 1]} : vector<16x96xbf16> to vector<16x8xbf16>
    %180 = vector.shape_cast %179 : vector<16x8xbf16> to vector<1x2x8x8xbf16>
    %181 = vector.extract_strided_slice %156 {offsets = [0, 80], sizes = [16, 8], strides = [1, 1]} : vector<16x96xbf16> to vector<16x8xbf16>
    %182 = vector.shape_cast %181 : vector<16x8xbf16> to vector<1x2x8x8xbf16>
    %183 = vector.extract_strided_slice %156 {offsets = [0, 88], sizes = [16, 8], strides = [1, 1]} : vector<16x96xbf16> to vector<16x8xbf16>
    %184 = vector.shape_cast %183 : vector<16x8xbf16> to vector<1x2x8x8xbf16>
    %185 = tpu.concatenate %178, %180, %182, %184 in 0 : vector<1x2x8x8xbf16>, vector<1x2x8x8xbf16>, vector<1x2x8x8xbf16>, vector<1x2x8x8xbf16> -> vector<4x2x8x8xbf16>
    %186 = vector.shape_cast %185 : vector<4x2x8x8xbf16> to vector<8x8x8xbf16>
    "tpu.trace_start"() <{level = 10 : i32, message = "gie,gje->gij"}> : () -> ()
    %cst_63 = arith.constant dense<0.000000e+00> : vector<8x8x8xf32>
    %187 = tpu.matmul %166, %176, %cst_63 {dimension_numbers = #tpu.dot_dimension_numbers<[2], [2], [1], [1], [0, 0, 0, 1, 1, 1], [0], [0]>} : vector<8x8x8xbf16>, vector<8x8x8xbf16>, vector<8x8x8xf32> -> vector<8x8x8xf32>
    "tpu.trace_stop"() : () -> ()
    %cst_64 = arith.constant dense<0xFF800000> : vector<8x8xf32>
    %188 = vector.multi_reduction <maximumf>, %187, %cst_64 [2] : vector<8x8x8xf32> to vector<8x8xf32>
    %189 = vector.shape_cast %188 : vector<8x8xf32> to vector<8x8x1xf32>
    %190 = vector.broadcast %189 : vector<8x8x1xf32> to vector<8x8x8xf32>
    %191 = arith.subf %187, %190 : vector<8x8x8xf32>
    %192 = math.exp %191 : vector<8x8x8xf32>
    %cst_65 = arith.constant dense<0.000000e+00> : vector<8x8xf32>
    %193 = vector.multi_reduction <add>, %192, %cst_65 [2] : vector<8x8x8xf32> to vector<8x8xf32>
    %194 = vector.shape_cast %193 : vector<8x8xf32> to vector<8x8x1xf32>
    %195 = tpu.reciprocal %194 {approx = true} : vector<8x8x1xf32> -> vector<8x8x1xf32>
    %196 = vector.broadcast %195 : vector<8x8x1xf32> to vector<8x8x8xf32>
    %197 = arith.mulf %192, %196 : vector<8x8x8xf32>
    %198 = arith.truncf %197 : vector<8x8x8xf32> to vector<8x8x8xbf16>
    "tpu.trace_start"() <{level = 10 : i32, message = "gij,gje->gie"}> : () -> ()
    %cst_66 = arith.constant dense<0.000000e+00> : vector<8x8x8xf32>
    %199 = tpu.matmul %198, %186, %cst_66 {dimension_numbers = #tpu.dot_dimension_numbers<[2], [1], [1], [2], [0, 0, 0, 1, 1, 2], [0], [0]>} : vector<8x8x8xbf16>, vector<8x8x8xbf16>, vector<8x8x8xf32> -> vector<8x8x8xf32>
    "tpu.trace_stop"() : () -> ()
    %200 = arith.truncf %199 : vector<8x8x8xf32> to vector<8x8x8xbf16>
    %201 = vector.extract_strided_slice %200 {offsets = [0, 0, 0], sizes = [2, 8, 8], strides = [1, 1, 1]} : vector<8x8x8xbf16> to vector<2x8x8xbf16>
    %202 = vector.shape_cast %201 : vector<2x8x8xbf16> to vector<16x8xbf16>
    %203 = vector.extract_strided_slice %200 {offsets = [2, 0, 0], sizes = [2, 8, 8], strides = [1, 1, 1]} : vector<8x8x8xbf16> to vector<2x8x8xbf16>
    %204 = vector.shape_cast %203 : vector<2x8x8xbf16> to vector<16x8xbf16>
    %205 = vector.extract_strided_slice %200 {offsets = [4, 0, 0], sizes = [2, 8, 8], strides = [1, 1, 1]} : vector<8x8x8xbf16> to vector<2x8x8xbf16>
    %206 = vector.shape_cast %205 : vector<2x8x8xbf16> to vector<16x8xbf16>
    %207 = vector.extract_strided_slice %200 {offsets = [6, 0, 0], sizes = [2, 8, 8], strides = [1, 1, 1]} : vector<8x8x8xbf16> to vector<2x8x8xbf16>
    %208 = vector.shape_cast %207 : vector<2x8x8xbf16> to vector<16x8xbf16>
    %209 = tpu.concatenate %202, %204, %206, %208 in 1 : vector<16x8xbf16>, vector<16x8xbf16>, vector<16x8xbf16>, vector<16x8xbf16> -> vector<16x32xbf16>
    %c1_67 = arith.constant 1 : index
    %c0_68 = arith.constant 0 : index
    %c0_69 = arith.constant 0 : index
    %210 = vector.load %arg5[%c1_67, %c0_68, %c0_69] : memref<2x32x32xbf16, #tpu.memory_space<vmem>>, vector<1x32x32xbf16>
    %211 = vector.shape_cast %210 : vector<1x32x32xbf16> to vector<32x32xbf16>
    %cst_70 = arith.constant dense<0.000000e+00> : vector<16x32xf32>
    %212 = tpu.matmul %209, %211, %cst_70 {dimension_numbers = #tpu.dot_dimension_numbers<[1], [0], [0], [1], [0, 0, 1, 1], [], []>} : vector<16x32xbf16>, vector<32x32xbf16>, vector<16x32xf32> -> vector<16x32xf32>
    %c1_71 = arith.constant 1 : index
    %c0_72 = arith.constant 0 : index
    %c0_73 = arith.constant 0 : index
    %213 = vector.load %arg6[%c1_71, %c0_72, %c0_73] : memref<2x1x32xf32, #tpu.memory_space<vmem>>, vector<1x1x32xf32>
    %214 = vector.shape_cast %213 : vector<1x1x32xf32> to vector<1x32xf32>
    %215 = vector.broadcast %214 : vector<1x32xf32> to vector<16x32xf32>
    %216 = arith.addf %212, %215 : vector<16x32xf32>
    %217 = arith.addf %147, %216 : vector<16x32xf32>
    %c1_74 = arith.constant 1 : index
    %c0_75 = arith.constant 0 : index
    %c0_76 = arith.constant 0 : index
    %218 = vector.load %arg7[%c1_74, %c0_75, %c0_76] : memref<2x1x32xf32, #tpu.memory_space<vmem>>, vector<1x1x32xf32>
    %219 = vector.shape_cast %218 : vector<1x1x32xf32> to vector<1x32xf32>
    %c1_77 = arith.constant 1 : index
    %c0_78 = arith.constant 0 : index
    %c0_79 = arith.constant 0 : index
    %220 = vector.load %arg8[%c1_77, %c0_78, %c0_79] : memref<2x1x32xf32, #tpu.memory_space<vmem>>, vector<1x1x32xf32>
    %221 = vector.shape_cast %220 : vector<1x1x32xf32> to vector<1x32xf32>
    %cst_80 = arith.constant dense<0.000000e+00> : vector<16xf32>
    %222 = vector.multi_reduction <add>, %217, %cst_80 [1] : vector<16x32xf32> to vector<16xf32>
    %223 = vector.shape_cast %222 : vector<16xf32> to vector<16x1xf32>
    %cst_81 = arith.constant 3.200000e+01 : f32
    %224 = vector.broadcast %cst_81 : f32 to vector<16x1xf32>
    %225 = arith.divf %223, %224 : vector<16x1xf32>
    %226 = vector.broadcast %225 : vector<16x1xf32> to vector<16x32xf32>
    %227 = arith.subf %217, %226 : vector<16x32xf32>
    %228 = arith.mulf %227, %227 : vector<16x32xf32>
    %cst_82 = arith.constant dense<0.000000e+00> : vector<16xf32>
    %229 = vector.multi_reduction <add>, %228, %cst_82 [1] : vector<16x32xf32> to vector<16xf32>
    %230 = vector.shape_cast %229 : vector<16xf32> to vector<16x1xf32>
    %cst_83 = arith.constant 3.200000e+01 : f32
    %231 = vector.broadcast %cst_83 : f32 to vector<16x1xf32>
    %232 = arith.divf %230, %231 : vector<16x1xf32>
    %233 = vector.broadcast %225 : vector<16x1xf32> to vector<16x32xf32>
    %234 = arith.subf %217, %233 : vector<16x32xf32>
    %cst_84 = arith.constant 9.99999974E-6 : f32
    %235 = vector.broadcast %cst_84 : f32 to vector<16x1xf32>
    %236 = arith.addf %232, %235 : vector<16x1xf32>
    %237 = math.rsqrt %236 : vector<16x1xf32>
    %238 = vector.broadcast %237 : vector<16x1xf32> to vector<16x32xf32>
    %239 = arith.mulf %234, %238 : vector<16x32xf32>
    %240 = vector.broadcast %219 : vector<1x32xf32> to vector<16x32xf32>
    %241 = arith.mulf %239, %240 : vector<16x32xf32>
    %242 = vector.broadcast %221 : vector<1x32xf32> to vector<16x32xf32>
    %243 = arith.addf %241, %242 : vector<16x32xf32>
    %244 = arith.truncf %243 : vector<16x32xf32> to vector<16x32xbf16>
    %c1_85 = arith.constant 1 : index
    %c0_86 = arith.constant 0 : index
    %c0_87 = arith.constant 0 : index
    %245 = vector.load %arg9[%c1_85, %c0_86, %c0_87] : memref<2x32x256xbf16, #tpu.memory_space<vmem>>, vector<1x32x256xbf16>
    %246 = vector.shape_cast %245 : vector<1x32x256xbf16> to vector<32x256xbf16>
    %cst_88 = arith.constant dense<0.000000e+00> : vector<16x256xf32>
    %247 = tpu.matmul %244, %246, %cst_88 {dimension_numbers = #tpu.dot_dimension_numbers<[1], [0], [0], [1], [0, 0, 1, 1], [], []>} : vector<16x32xbf16>, vector<32x256xbf16>, vector<16x256xf32> -> vector<16x256xf32>
    %c1_89 = arith.constant 1 : index
    %c0_90 = arith.constant 0 : index
    %c0_91 = arith.constant 0 : index
    %248 = vector.load %arg10[%c1_89, %c0_90, %c0_91] : memref<2x1x256xf32, #tpu.memory_space<vmem>>, vector<1x1x256xf32>
    %249 = vector.shape_cast %248 : vector<1x1x256xf32> to vector<1x256xf32>
    %250 = vector.broadcast %249 : vector<1x256xf32> to vector<16x256xf32>
    %251 = arith.addf %247, %250 : vector<16x256xf32>
    %cst_92 = arith.constant 0.000000e+00 : f32
    %252 = vector.broadcast %cst_92 : f32 to vector<16x256xf32>
    %253 = arith.maximumf %251, %252 : vector<16x256xf32>
    %254 = arith.truncf %253 : vector<16x256xf32> to vector<16x256xbf16>
    %c1_93 = arith.constant 1 : index
    %c0_94 = arith.constant 0 : index
    %c0_95 = arith.constant 0 : index
    %255 = vector.load %arg11[%c1_93, %c0_94, %c0_95] : memref<2x256x32xbf16, #tpu.memory_space<vmem>>, vector<1x256x32xbf16>
    %256 = vector.shape_cast %255 : vector<1x256x32xbf16> to vector<256x32xbf16>
    %cst_96 = arith.constant dense<0.000000e+00> : vector<16x32xf32>
    %257 = tpu.matmul %254, %256, %cst_96 {dimension_numbers = #tpu.dot_dimension_numbers<[1], [0], [0], [1], [0, 0, 1, 1], [], []>} : vector<16x256xbf16>, vector<256x32xbf16>, vector<16x32xf32> -> vector<16x32xf32>
    %c1_97 = arith.constant 1 : index
    %c0_98 = arith.constant 0 : index
    %c0_99 = arith.constant 0 : index
    %258 = vector.load %arg12[%c1_97, %c0_98, %c0_99] : memref<2x1x32xf32, #tpu.memory_space<vmem>>, vector<1x1x32xf32>
    %259 = vector.shape_cast %258 : vector<1x1x32xf32> to vector<1x32xf32>
    %260 = vector.broadcast %259 : vector<1x32xf32> to vector<16x32xf32>
    %261 = arith.addf %257, %260 : vector<16x32xf32>
    %262 = arith.addf %243, %261 : vector<16x32xf32>
    %c1_100 = arith.constant 1 : index
    %c0_101 = arith.constant 0 : index
    %c0_102 = arith.constant 0 : index
    %263 = vector.load %arg13[%c1_100, %c0_101, %c0_102] : memref<2x1x32xf32, #tpu.memory_space<vmem>>, vector<1x1x32xf32>
    %264 = vector.shape_cast %263 : vector<1x1x32xf32> to vector<1x32xf32>
    %c1_103 = arith.constant 1 : index
    %c0_104 = arith.constant 0 : index
    %c0_105 = arith.constant 0 : index
    %265 = vector.load %arg14[%c1_103, %c0_104, %c0_105] : memref<2x1x32xf32, #tpu.memory_space<vmem>>, vector<1x1x32xf32>
    %266 = vector.shape_cast %265 : vector<1x1x32xf32> to vector<1x32xf32>
    %cst_106 = arith.constant dense<0.000000e+00> : vector<16xf32>
    %267 = vector.multi_reduction <add>, %262, %cst_106 [1] : vector<16x32xf32> to vector<16xf32>
    %268 = vector.shape_cast %267 : vector<16xf32> to vector<16x1xf32>
    %cst_107 = arith.constant 3.200000e+01 : f32
    %269 = vector.broadcast %cst_107 : f32 to vector<16x1xf32>
    %270 = arith.divf %268, %269 : vector<16x1xf32>
    %271 = vector.broadcast %270 : vector<16x1xf32> to vector<16x32xf32>
    %272 = arith.subf %262, %271 : vector<16x32xf32>
    %273 = arith.mulf %272, %272 : vector<16x32xf32>
    %cst_108 = arith.constant dense<0.000000e+00> : vector<16xf32>
    %274 = vector.multi_reduction <add>, %273, %cst_108 [1] : vector<16x32xf32> to vector<16xf32>
    %275 = vector.shape_cast %274 : vector<16xf32> to vector<16x1xf32>
    %cst_109 = arith.constant 3.200000e+01 : f32
    %276 = vector.broadcast %cst_109 : f32 to vector<16x1xf32>
    %277 = arith.divf %275, %276 : vector<16x1xf32>
    %278 = vector.broadcast %270 : vector<16x1xf32> to vector<16x32xf32>
    %279 = arith.subf %262, %278 : vector<16x32xf32>
    %cst_110 = arith.constant 9.99999974E-6 : f32
    %280 = vector.broadcast %cst_110 : f32 to vector<16x1xf32>
    %281 = arith.addf %277, %280 : vector<16x1xf32>
    %282 = math.rsqrt %281 : vector<16x1xf32>
    %283 = vector.broadcast %282 : vector<16x1xf32> to vector<16x32xf32>
    %284 = arith.mulf %279, %283 : vector<16x32xf32>
    %285 = vector.broadcast %264 : vector<1x32xf32> to vector<16x32xf32>
    %286 = arith.mulf %284, %285 : vector<16x32xf32>
    %287 = vector.broadcast %266 : vector<1x32xf32> to vector<16x32xf32>
    %288 = arith.addf %286, %287 : vector<16x32xf32>
    %289 = vector.shape_cast %288 : vector<16x32xf32> to vector<2x8x32xf32>
    %cst_111 = arith.constant dense<0.000000e+00> : vector<2x32xf32>
    %290 = vector.multi_reduction <add>, %289, %cst_111 [1] : vector<2x8x32xf32> to vector<2x32xf32>
    %cst_112 = arith.constant 8.000000e+00 : f32
    %291 = vector.broadcast %cst_112 : f32 to vector<2x32xf32>
    %292 = arith.divf %290, %291 : vector<2x32xf32>
    %c0_113 = arith.constant 0 : index
    %c0_114 = arith.constant 0 : index
    %293 = vector.load %arg15[%c0_113, %c0_114] : memref<2x32xf32, #tpu.memory_space<vmem>>, vector<2x32xf32>
    tpu.vector_store %arg15[%c0_113, %c0_114], %292 {strides = array<i32>} : memref<2x32xf32, #tpu.memory_space<vmem>>, vector<2x32xf32>,
    return
  }
  func.func @transform_0(%arg0: i32) -> (i32, i32) {
    %c0_i32 = arith.constant 0 : i32
    %c0_i32_0 = arith.constant 0 : i32
    return %arg0, %c0_i32 : i32, i32
  }
  func.func @transform_1(%arg0: i32) -> (i32, i32) {
    %c0_i32 = arith.constant 0 : i32
    %c0_i32_0 = arith.constant 0 : i32
    %c0_i32_1 = arith.constant 0 : i32
    return %c0_i32, %c0_i32_0 : i32, i32
  }
  func.func @transform_2(%arg0: i32) -> (i32, i32, i32) {
    %c0_i32 = arith.constant 0 : i32
    %c0_i32_0 = arith.constant 0 : i32
    %c0_i32_1 = arith.constant 0 : i32
    %c0_i32_2 = arith.constant 0 : i32
    return %c0_i32, %c0_i32_0, %c0_i32_1 : i32, i32, i32
  }
  func.func @transform_3(%arg0: i32) -> (i32, i32, i32) {
    %c0_i32 = arith.constant 0 : i32
    %c0_i32_0 = arith.constant 0 : i32
    %c0_i32_1 = arith.constant 0 : i32
    %c0_i32_2 = arith.constant 0 : i32
    return %c0_i32, %c0_i32_0, %c0_i32_1 : i32, i32, i32
  }
  func.func @transform_4(%arg0: i32) -> (i32, i32, i32) {
    %c0_i32 = arith.constant 0 : i32
    %c0_i32_0 = arith.constant 0 : i32
    %c0_i32_1 = arith.constant 0 : i32
    %c0_i32_2 = arith.constant 0 : i32
    return %c0_i32, %c0_i32_0, %c0_i32_1 : i32, i32, i32
  }
  func.func @transform_5(%arg0: i32) -> (i32, i32, i32) {
    %c0_i32 = arith.constant 0 : i32
    %c0_i32_0 = arith.constant 0 : i32
    %c0_i32_1 = arith.constant 0 : i32
    %c0_i32_2 = arith.constant 0 : i32
    return %c0_i32, %c0_i32_0, %c0_i32_1 : i32, i32, i32
  }
  func.func @transform_6(%arg0: i32) -> (i32, i32, i32) {
    %c0_i32 = arith.constant 0 : i32
    %c0_i32_0 = arith.constant 0 : i32
    %c0_i32_1 = arith.constant 0 : i32
    %c0_i32_2 = arith.constant 0 : i32
    return %c0_i32, %c0_i32_0, %c0_i32_1 : i32, i32, i32
  }
  func.func @transform_7(%arg0: i32) -> (i32, i32, i32) {
    %c0_i32 = arith.constant 0 : i32
    %c0_i32_0 = arith.constant 0 : i32
    %c0_i32_1 = arith.constant 0 : i32
    %c0_i32_2 = arith.constant 0 : i32
    return %c0_i32, %c0_i32_0, %c0_i32_1 : i32, i32, i32
  }
  func.func @transform_8(%arg0: i32) -> (i32, i32, i32) {
    %c0_i32 = arith.constant 0 : i32
    %c0_i32_0 = arith.constant 0 : i32
    %c0_i32_1 = arith.constant 0 : i32
    %c0_i32_2 = arith.constant 0 : i32
    return %c0_i32, %c0_i32_0, %c0_i32_1 : i32, i32, i32
  }
  func.func @transform_9(%arg0: i32) -> (i32, i32, i32) {
    %c0_i32 = arith.constant 0 : i32
    %c0_i32_0 = arith.constant 0 : i32
    %c0_i32_1 = arith.constant 0 : i32
    %c0_i32_2 = arith.constant 0 : i32
    return %c0_i32, %c0_i32_0, %c0_i32_1 : i32, i32, i32
  }
  func.func @transform_10(%arg0: i32) -> (i32, i32, i32) {
    %c0_i32 = arith.constant 0 : i32
    %c0_i32_0 = arith.constant 0 : i32
    %c0_i32_1 = arith.constant 0 : i32
    %c0_i32_2 = arith.constant 0 : i32
    return %c0_i32, %c0_i32_0, %c0_i32_1 : i32, i32, i32
  }
  func.func @transform_11(%arg0: i32) -> (i32, i32, i32) {
    %c0_i32 = arith.constant 0 : i32
    %c0_i32_0 = arith.constant 0 : i32
    %c0_i32_1 = arith.constant 0 : i32
    %c0_i32_2 = arith.constant 0 : i32
    return %c0_i32, %c0_i32_0, %c0_i32_1 : i32, i32, i32
  }
  func.func @transform_12(%arg0: i32) -> (i32, i32, i32) {
    %c0_i32 = arith.constant 0 : i32
    %c0_i32_0 = arith.constant 0 : i32
    %c0_i32_1 = arith.constant 0 : i32
    %c0_i32_2 = arith.constant 0 : i32
    return %c0_i32, %c0_i32_0, %c0_i32_1 : i32, i32, i32
  }
  func.func @transform_13(%arg0: i32) -> (i32, i32, i32) {
    %c0_i32 = arith.constant 0 : i32
    %c0_i32_0 = arith.constant 0 : i32
    %c0_i32_1 = arith.constant 0 : i32
    %c0_i32_2 = arith.constant 0 : i32
    return %c0_i32, %c0_i32_0, %c0_i32_1 : i32, i32, i32
  }
  func.func @transform_14(%arg0: i32) -> (i32, i32) {
    %c0_i32 = arith.constant 0 : i32
    %c0_i32_0 = arith.constant 0 : i32
    return %arg0, %c0_i32 : i32, i32
  }
}

module attributes {stable_mosaic.version = 11 : i64} {
  func.func @_fused_transformer_kernel(%arg0: i32, %arg1: memref<16x32xf32, #tpu.memory_space<vmem>>, %arg2: memref<8x32xf32, #tpu.memory_space<vmem>>, %arg3: memref<2x32x96xbf16, #tpu.memory_space<vmem>>, %arg4: memref<2x1x96xf32, #tpu.memory_space<vmem>>, %arg5: memref<2x4x8x32xbf16, #tpu.memory_space<vmem>>, %arg6: memref<2x1x32xf32, #tpu.memory_space<vmem>>, %arg7: memref<2x1x32xf32, #tpu.memory_space<vmem>>, %arg8: memref<2x1x32xf32, #tpu.memory_space<vmem>>, %arg9: memref<2x32x256xbf16, #tpu.memory_space<vmem>>, %arg10: memref<2x1x256xf32, #tpu.memory_space<vmem>>, %arg11: memref<2x256x32xbf16, #tpu.memory_space<vmem>>, %arg12: memref<2x1x32xf32, #tpu.memory_space<vmem>>, %arg13: memref<2x1x32xf32, #tpu.memory_space<vmem>>, %arg14: memref<2x1x32xf32, #tpu.memory_space<vmem>>, %arg15: memref<2x32xf32, #tpu.memory_space<vmem>>) attributes {dimension_semantics = [#tpu.dimension_semantics<parallel>], iteration_bounds = array<i64: 1>, scalar_prefetch = 0 : i64, scratch_operands = 0 : i64, tpu.core_type = #tpu.core_type<tc>, window_params = [{transform_indices = @transform_0, window_bounds = array<i64: 16, 32>}, {pipeline_mode = #tpu.pipeline_mode<synchronous>, transform_indices = @transform_1, window_bounds = array<i64: 8, 32>}, {pipeline_mode = #tpu.pipeline_mode<synchronous>, transform_indices = @transform_2, window_bounds = array<i64: 2, 32, 96>}, {pipeline_mode = #tpu.pipeline_mode<synchronous>, transform_indices = @transform_3, window_bounds = array<i64: 2, 1, 96>}, {pipeline_mode = #tpu.pipeline_mode<synchronous>, transform_indices = @transform_4, window_bounds = array<i64: 2, 4, 8, 32>}, {pipeline_mode = #tpu.pipeline_mode<synchronous>, transform_indices = @transform_5, window_bounds = array<i64: 2, 1, 32>}, {pipeline_mode = #tpu.pipeline_mode<synchronous>, transform_indices = @transform_6, window_bounds = array<i64: 2, 1, 32>}, {pipeline_mode = #tpu.pipeline_mode<synchronous>, transform_indices = @transform_7, window_bounds = array<i64: 2, 1, 32>}, {pipeline_mode = #tpu.pipeline_mode<synchronous>, transform_indices = @transform_8, window_bounds = array<i64: 2, 32, 256>}, {pipeline_mode = #tpu.pipeline_mode<synchronous>, transform_indices = @transform_9, window_bounds = array<i64: 2, 1, 256>}, {pipeline_mode = #tpu.pipeline_mode<synchronous>, transform_indices = @transform_10, window_bounds = array<i64: 2, 256, 32>}, {pipeline_mode = #tpu.pipeline_mode<synchronous>, transform_indices = @transform_11, window_bounds = array<i64: 2, 1, 32>}, {pipeline_mode = #tpu.pipeline_mode<synchronous>, transform_indices = @transform_12, window_bounds = array<i64: 2, 1, 32>}, {pipeline_mode = #tpu.pipeline_mode<synchronous>, transform_indices = @transform_13, window_bounds = array<i64: 2, 1, 32>}, {transform_indices = @transform_14, window_bounds = array<i64: 2, 32>}]} {
    %c0 = arith.constant 0 : index
    %c0_0 = arith.constant 0 : index
    %0 = vector.load %arg1[%c0, %c0_0] : memref<16x32xf32, #tpu.memory_space<vmem>>, vector<16x32xf32>
    %1 = vector.shape_cast %0 : vector<16x32xf32> to vector<2x8x32xf32>
    %c0_1 = arith.constant 0 : index
    %c0_2 = arith.constant 0 : index
    %2 = vector.load %arg2[%c0_1, %c0_2] : memref<8x32xf32, #tpu.memory_space<vmem>>, vector<8x32xf32>
    %3 = vector.shape_cast %2 : vector<8x32xf32> to vector<1x8x32xf32>
    %4 = vector.broadcast %3 : vector<1x8x32xf32> to vector<2x8x32xf32>
    %5 = arith.addf %1, %4 : vector<2x8x32xf32>
    %6 = vector.shape_cast %5 : vector<2x8x32xf32> to vector<16x32xf32>
    %7 = arith.truncf %6 : vector<16x32xf32> to vector<16x32xbf16>
    %c0_3 = arith.constant 0 : index
    %c0_4 = arith.constant 0 : index
    %c0_5 = arith.constant 0 : index
    %8 = vector.load %arg3[%c0_3, %c0_4, %c0_5] : memref<2x32x96xbf16, #tpu.memory_space<vmem>>, vector<1x32x96xbf16>
    %9 = vector.shape_cast %8 : vector<1x32x96xbf16> to vector<32x96xbf16>
    %cst = arith.constant dense<0.000000e+00> : vector<16x96xf32>
    %10 = tpu.matmul %7, %9, %cst {dimension_numbers = #tpu.dot_dimension_numbers<[1], [0], [0], [1], [0, 0, 1, 1], [], []>} : vector<16x32xbf16>, vector<32x96xbf16>, vector<16x96xf32> -> vector<16x96xf32>
    %c0_6 = arith.constant 0 : index
    %c0_7 = arith.constant 0 : index
    %c0_8 = arith.constant 0 : index
    %11 = vector.load %arg4[%c0_6, %c0_7, %c0_8] : memref<2x1x96xf32, #tpu.memory_space<vmem>>, vector<1x1x96xf32>
    %12 = vector.shape_cast %11 : vector<1x1x96xf32> to vector<1x96xf32>
    %13 = vector.broadcast %12 : vector<1x96xf32> to vector<16x96xf32>
    %14 = arith.addf %10, %13 : vector<16x96xf32>
    %15 = arith.truncf %14 : vector<16x96xf32> to vector<16x96xbf16>
    %16 = vector.extract_strided_slice %15 {offsets = [0, 0], sizes = [16, 8], strides = [1, 1]} : vector<16x96xbf16> to vector<16x8xbf16>
    %17 = vector.shape_cast %16 : vector<16x8xbf16> to vector<1x2x8x8xbf16>
    %18 = vector.extract_strided_slice %15 {offsets = [0, 8], sizes = [16, 8], strides = [1, 1]} : vector<16x96xbf16> to vector<16x8xbf16>
    %19 = vector.shape_cast %18 : vector<16x8xbf16> to vector<1x2x8x8xbf16>
    %20 = vector.extract_strided_slice %15 {offsets = [0, 16], sizes = [16, 8], strides = [1, 1]} : vector<16x96xbf16> to vector<16x8xbf16>
    %21 = vector.shape_cast %20 : vector<16x8xbf16> to vector<1x2x8x8xbf16>
    %22 = vector.extract_strided_slice %15 {offsets = [0, 24], sizes = [16, 8], strides = [1, 1]} : vector<16x96xbf16> to vector<16x8xbf16>
    %23 = vector.shape_cast %22 : vector<16x8xbf16> to vector<1x2x8x8xbf16>
    %24 = tpu.concatenate %17, %19, %21, %23 in 0 : vector<1x2x8x8xbf16>, vector<1x2x8x8xbf16>, vector<1x2x8x8xbf16>, vector<1x2x8x8xbf16> -> vector<4x2x8x8xbf16>
    %25 = vector.shape_cast %24 : vector<4x2x8x8xbf16> to vector<8x8x8xbf16>
    %26 = vector.extract_strided_slice %15 {offsets = [0, 32], sizes = [16, 8], strides = [1, 1]} : vector<16x96xbf16> to vector<16x8xbf16>
    %27 = vector.shape_cast %26 : vector<16x8xbf16> to vector<1x2x8x8xbf16>
    %28 = vector.extract_strided_slice %15 {offsets = [0, 40], sizes = [16, 8], strides = [1, 1]} : vector<16x96xbf16> to vector<16x8xbf16>
    %29 = vector.shape_cast %28 : vector<16x8xbf16> to vector<1x2x8x8xbf16>
    %30 = vector.extract_strided_slice %15 {offsets = [0, 48], sizes = [16, 8], strides = [1, 1]} : vector<16x96xbf16> to vector<16x8xbf16>
    %31 = vector.shape_cast %30 : vector<16x8xbf16> to vector<1x2x8x8xbf16>
    %32 = vector.extract_strided_slice %15 {offsets = [0, 56], sizes = [16, 8], strides = [1, 1]} : vector<16x96xbf16> to vector<16x8xbf16>
    %33 = vector.shape_cast %32 : vector<16x8xbf16> to vector<1x2x8x8xbf16>
    %34 = tpu.concatenate %27, %29, %31, %33 in 0 : vector<1x2x8x8xbf16>, vector<1x2x8x8xbf16>, vector<1x2x8x8xbf16>, vector<1x2x8x8xbf16> -> vector<4x2x8x8xbf16>
    %35 = vector.shape_cast %34 : vector<4x2x8x8xbf16> to vector<8x8x8xbf16>
    %36 = vector.extract_strided_slice %15 {offsets = [0, 64], sizes = [16, 8], strides = [1, 1]} : vector<16x96xbf16> to vector<16x8xbf16>
    %37 = vector.shape_cast %36 : vector<16x8xbf16> to vector<1x2x8x8xbf16>
    %38 = vector.extract_strided_slice %15 {offsets = [0, 72], sizes = [16, 8], strides = [1, 1]} : vector<16x96xbf16> to vector<16x8xbf16>
    %39 = vector.shape_cast %38 : vector<16x8xbf16> to vector<1x2x8x8xbf16>
    %40 = vector.extract_strided_slice %15 {offsets = [0, 80], sizes = [16, 8], strides = [1, 1]} : vector<16x96xbf16> to vector<16x8xbf16>
    %41 = vector.shape_cast %40 : vector<16x8xbf16> to vector<1x2x8x8xbf16>
    %42 = vector.extract_strided_slice %15 {offsets = [0, 88], sizes = [16, 8], strides = [1, 1]} : vector<16x96xbf16> to vector<16x8xbf16>
    %43 = vector.shape_cast %42 : vector<16x8xbf16> to vector<1x2x8x8xbf16>
    %44 = tpu.concatenate %37, %39, %41, %43 in 0 : vector<1x2x8x8xbf16>, vector<1x2x8x8xbf16>, vector<1x2x8x8xbf16>, vector<1x2x8x8xbf16> -> vector<4x2x8x8xbf16>
    %45 = vector.shape_cast %44 : vector<4x2x8x8xbf16> to vector<8x8x8xbf16>
    "tpu.trace_start"() <{level = 10 : i32, message = "gie,gje->gij"}> : () -> ()
    %cst_9 = arith.constant dense<0.000000e+00> : vector<8x8x8xf32>
    %46 = tpu.matmul %25, %35, %cst_9 {dimension_numbers = #tpu.dot_dimension_numbers<[2], [2], [1], [1], [0, 0, 0, 1, 1, 1], [0], [0]>} : vector<8x8x8xbf16>, vector<8x8x8xbf16>, vector<8x8x8xf32> -> vector<8x8x8xf32>
    "tpu.trace_stop"() : () -> ()
    %cst_10 = arith.constant dense<0xFF800000> : vector<8x8xf32>
    %47 = vector.multi_reduction <maximumf>, %46, %cst_10 [2] : vector<8x8x8xf32> to vector<8x8xf32>
    %48 = vector.shape_cast %47 : vector<8x8xf32> to vector<8x8x1xf32>
    %49 = vector.broadcast %48 : vector<8x8x1xf32> to vector<8x8x8xf32>
    %50 = arith.subf %46, %49 : vector<8x8x8xf32>
    %51 = math.exp %50 : vector<8x8x8xf32>
    %cst_11 = arith.constant dense<0.000000e+00> : vector<8x8xf32>
    %52 = vector.multi_reduction <add>, %51, %cst_11 [2] : vector<8x8x8xf32> to vector<8x8xf32>
    %53 = vector.shape_cast %52 : vector<8x8xf32> to vector<8x8x1xf32>
    %54 = tpu.reciprocal %53 {approx = true} : vector<8x8x1xf32> -> vector<8x8x1xf32>
    %55 = vector.broadcast %54 : vector<8x8x1xf32> to vector<8x8x8xf32>
    %56 = arith.mulf %51, %55 : vector<8x8x8xf32>
    %57 = arith.truncf %56 : vector<8x8x8xf32> to vector<8x8x8xbf16>
    "tpu.trace_start"() <{level = 10 : i32, message = "gij,gje->gie"}> : () -> ()
    %cst_12 = arith.constant dense<0.000000e+00> : vector<8x8x8xf32>
    %58 = tpu.matmul %57, %45, %cst_12 {dimension_numbers = #tpu.dot_dimension_numbers<[2], [1], [1], [2], [0, 0, 0, 1, 1, 2], [0], [0]>} : vector<8x8x8xbf16>, vector<8x8x8xbf16>, vector<8x8x8xf32> -> vector<8x8x8xf32>
    "tpu.trace_stop"() : () -> ()
    %59 = arith.truncf %58 : vector<8x8x8xf32> to vector<8x8x8xbf16>
    %c0_13 = arith.constant 0 : index
    %c0_14 = arith.constant 0 : index
    %c0_15 = arith.constant 0 : index
    %c0_16 = arith.constant 0 : index
    %60 = vector.load %arg5[%c0_13, %c0_14, %c0_15, %c0_16] : memref<2x4x8x32xbf16, #tpu.memory_space<vmem>>, vector<1x4x8x32xbf16>
    %61 = vector.shape_cast %60 : vector<1x4x8x32xbf16> to vector<4x8x32xbf16>
    %62 = vector.extract_strided_slice %59 {offsets = [0, 0, 0], sizes = [2, 8, 8], strides = [1, 1, 1]} : vector<8x8x8xbf16> to vector<2x8x8xbf16>
    %63 = vector.shape_cast %62 : vector<2x8x8xbf16> to vector<16x8xbf16>
    %64 = vector.extract_strided_slice %61 {offsets = [0, 0, 0], sizes = [1, 8, 32], strides = [1, 1, 1]} : vector<4x8x32xbf16> to vector<1x8x32xbf16>
    %65 = vector.shape_cast %64 : vector<1x8x32xbf16> to vector<8x32xbf16>
    %cst_17 = arith.constant dense<0.000000e+00> : vector<16x32xf32>
    %66 = tpu.matmul %63, %65, %cst_17 {dimension_numbers = #tpu.dot_dimension_numbers<[1], [0], [0], [1], [0, 0, 1, 1], [], []>} : vector<16x8xbf16>, vector<8x32xbf16>, vector<16x32xf32> -> vector<16x32xf32>
    %67 = vector.extract_strided_slice %59 {offsets = [2, 0, 0], sizes = [2, 8, 8], strides = [1, 1, 1]} : vector<8x8x8xbf16> to vector<2x8x8xbf16>
    %68 = vector.shape_cast %67 : vector<2x8x8xbf16> to vector<16x8xbf16>
    %69 = vector.extract_strided_slice %61 {offsets = [1, 0, 0], sizes = [1, 8, 32], strides = [1, 1, 1]} : vector<4x8x32xbf16> to vector<1x8x32xbf16>
    %70 = vector.shape_cast %69 : vector<1x8x32xbf16> to vector<8x32xbf16>
    %cst_18 = arith.constant dense<0.000000e+00> : vector<16x32xf32>
    %71 = tpu.matmul %68, %70, %cst_18 {dimension_numbers = #tpu.dot_dimension_numbers<[1], [0], [0], [1], [0, 0, 1, 1], [], []>} : vector<16x8xbf16>, vector<8x32xbf16>, vector<16x32xf32> -> vector<16x32xf32>
    %72 = arith.addf %66, %71 : vector<16x32xf32>
    %73 = vector.extract_strided_slice %59 {offsets = [4, 0, 0], sizes = [2, 8, 8], strides = [1, 1, 1]} : vector<8x8x8xbf16> to vector<2x8x8xbf16>
    %74 = vector.shape_cast %73 : vector<2x8x8xbf16> to vector<16x8xbf16>
    %75 = vector.extract_strided_slice %61 {offsets = [2, 0, 0], sizes = [1, 8, 32], strides = [1, 1, 1]} : vector<4x8x32xbf16> to vector<1x8x32xbf16>
    %76 = vector.shape_cast %75 : vector<1x8x32xbf16> to vector<8x32xbf16>
    %cst_19 = arith.constant dense<0.000000e+00> : vector<16x32xf32>
    %77 = tpu.matmul %74, %76, %cst_19 {dimension_numbers = #tpu.dot_dimension_numbers<[1], [0], [0], [1], [0, 0, 1, 1], [], []>} : vector<16x8xbf16>, vector<8x32xbf16>, vector<16x32xf32> -> vector<16x32xf32>
    %78 = arith.addf %72, %77 : vector<16x32xf32>
    %79 = vector.extract_strided_slice %59 {offsets = [6, 0, 0], sizes = [2, 8, 8], strides = [1, 1, 1]} : vector<8x8x8xbf16> to vector<2x8x8xbf16>
    %80 = vector.shape_cast %79 : vector<2x8x8xbf16> to vector<16x8xbf16>
    %81 = vector.extract_strided_slice %61 {offsets = [3, 0, 0], sizes = [1, 8, 32], strides = [1, 1, 1]} : vector<4x8x32xbf16> to vector<1x8x32xbf16>
    %82 = vector.shape_cast %81 : vector<1x8x32xbf16> to vector<8x32xbf16>
    %cst_20 = arith.constant dense<0.000000e+00> : vector<16x32xf32>
    %83 = tpu.matmul %80, %82, %cst_20 {dimension_numbers = #tpu.dot_dimension_numbers<[1], [0], [0], [1], [0, 0, 1, 1], [], []>} : vector<16x8xbf16>, vector<8x32xbf16>, vector<16x32xf32> -> vector<16x32xf32>
    %84 = arith.addf %78, %83 : vector<16x32xf32>
    %c0_21 = arith.constant 0 : index
    %c0_22 = arith.constant 0 : index
    %c0_23 = arith.constant 0 : index
    %85 = vector.load %arg6[%c0_21, %c0_22, %c0_23] : memref<2x1x32xf32, #tpu.memory_space<vmem>>, vector<1x1x32xf32>
    %86 = vector.shape_cast %85 : vector<1x1x32xf32> to vector<1x32xf32>
    %87 = vector.broadcast %86 : vector<1x32xf32> to vector<16x32xf32>
    %88 = arith.addf %84, %87 : vector<16x32xf32>
    %89 = arith.addf %6, %88 : vector<16x32xf32>
    %c0_24 = arith.constant 0 : index
    %c0_25 = arith.constant 0 : index
    %c0_26 = arith.constant 0 : index
    %90 = vector.load %arg7[%c0_24, %c0_25, %c0_26] : memref<2x1x32xf32, #tpu.memory_space<vmem>>, vector<1x1x32xf32>
    %91 = vector.shape_cast %90 : vector<1x1x32xf32> to vector<1x32xf32>
    %c0_27 = arith.constant 0 : index
    %c0_28 = arith.constant 0 : index
    %c0_29 = arith.constant 0 : index
    %92 = vector.load %arg8[%c0_27, %c0_28, %c0_29] : memref<2x1x32xf32, #tpu.memory_space<vmem>>, vector<1x1x32xf32>
    %93 = vector.shape_cast %92 : vector<1x1x32xf32> to vector<1x32xf32>
    %cst_30 = arith.constant dense<0.000000e+00> : vector<16xf32>
    %94 = vector.multi_reduction <add>, %89, %cst_30 [1] : vector<16x32xf32> to vector<16xf32>
    %95 = vector.shape_cast %94 : vector<16xf32> to vector<16x1xf32>
    %cst_31 = arith.constant 3.200000e+01 : f32
    %96 = vector.broadcast %cst_31 : f32 to vector<16x1xf32>
    %97 = arith.divf %95, %96 : vector<16x1xf32>
    %98 = vector.broadcast %97 : vector<16x1xf32> to vector<16x32xf32>
    %99 = arith.subf %89, %98 : vector<16x32xf32>
    %100 = arith.mulf %99, %99 : vector<16x32xf32>
    %cst_32 = arith.constant dense<0.000000e+00> : vector<16xf32>
    %101 = vector.multi_reduction <add>, %100, %cst_32 [1] : vector<16x32xf32> to vector<16xf32>
    %102 = vector.shape_cast %101 : vector<16xf32> to vector<16x1xf32>
    %cst_33 = arith.constant 3.200000e+01 : f32
    %103 = vector.broadcast %cst_33 : f32 to vector<16x1xf32>
    %104 = arith.divf %102, %103 : vector<16x1xf32>
    %105 = vector.broadcast %97 : vector<16x1xf32> to vector<16x32xf32>
    %106 = arith.subf %89, %105 : vector<16x32xf32>
    %cst_34 = arith.constant 9.99999974E-6 : f32
    %107 = vector.broadcast %cst_34 : f32 to vector<16x1xf32>
    %108 = arith.addf %104, %107 : vector<16x1xf32>
    %109 = math.rsqrt %108 : vector<16x1xf32>
    %110 = vector.broadcast %109 : vector<16x1xf32> to vector<16x32xf32>
    %111 = arith.mulf %106, %110 : vector<16x32xf32>
    %112 = vector.broadcast %91 : vector<1x32xf32> to vector<16x32xf32>
    %113 = arith.mulf %111, %112 : vector<16x32xf32>
    %114 = vector.broadcast %93 : vector<1x32xf32> to vector<16x32xf32>
    %115 = arith.addf %113, %114 : vector<16x32xf32>
    %116 = arith.truncf %115 : vector<16x32xf32> to vector<16x32xbf16>
    %c0_35 = arith.constant 0 : index
    %c0_36 = arith.constant 0 : index
    %c0_37 = arith.constant 0 : index
    %117 = vector.load %arg9[%c0_35, %c0_36, %c0_37] : memref<2x32x256xbf16, #tpu.memory_space<vmem>>, vector<1x32x256xbf16>
    %118 = vector.shape_cast %117 : vector<1x32x256xbf16> to vector<32x256xbf16>
    %cst_38 = arith.constant dense<0.000000e+00> : vector<16x256xf32>
    %119 = tpu.matmul %116, %118, %cst_38 {dimension_numbers = #tpu.dot_dimension_numbers<[1], [0], [0], [1], [0, 0, 1, 1], [], []>} : vector<16x32xbf16>, vector<32x256xbf16>, vector<16x256xf32> -> vector<16x256xf32>
    %c0_39 = arith.constant 0 : index
    %c0_40 = arith.constant 0 : index
    %c0_41 = arith.constant 0 : index
    %120 = vector.load %arg10[%c0_39, %c0_40, %c0_41] : memref<2x1x256xf32, #tpu.memory_space<vmem>>, vector<1x1x256xf32>
    %121 = vector.shape_cast %120 : vector<1x1x256xf32> to vector<1x256xf32>
    %122 = vector.broadcast %121 : vector<1x256xf32> to vector<16x256xf32>
    %123 = arith.addf %119, %122 : vector<16x256xf32>
    %cst_42 = arith.constant 0.000000e+00 : f32
    %124 = vector.broadcast %cst_42 : f32 to vector<16x256xf32>
    %125 = arith.maximumf %123, %124 : vector<16x256xf32>
    %126 = arith.truncf %125 : vector<16x256xf32> to vector<16x256xbf16>
    %c0_43 = arith.constant 0 : index
    %c0_44 = arith.constant 0 : index
    %c0_45 = arith.constant 0 : index
    %127 = vector.load %arg11[%c0_43, %c0_44, %c0_45] : memref<2x256x32xbf16, #tpu.memory_space<vmem>>, vector<1x256x32xbf16>
    %128 = vector.shape_cast %127 : vector<1x256x32xbf16> to vector<256x32xbf16>
    %cst_46 = arith.constant dense<0.000000e+00> : vector<16x32xf32>
    %129 = tpu.matmul %126, %128, %cst_46 {dimension_numbers = #tpu.dot_dimension_numbers<[1], [0], [0], [1], [0, 0, 1, 1], [], []>} : vector<16x256xbf16>, vector<256x32xbf16>, vector<16x32xf32> -> vector<16x32xf32>
    %c0_47 = arith.constant 0 : index
    %c0_48 = arith.constant 0 : index
    %c0_49 = arith.constant 0 : index
    %130 = vector.load %arg12[%c0_47, %c0_48, %c0_49] : memref<2x1x32xf32, #tpu.memory_space<vmem>>, vector<1x1x32xf32>
    %131 = vector.shape_cast %130 : vector<1x1x32xf32> to vector<1x32xf32>
    %132 = vector.broadcast %131 : vector<1x32xf32> to vector<16x32xf32>
    %133 = arith.addf %129, %132 : vector<16x32xf32>
    %134 = arith.addf %115, %133 : vector<16x32xf32>
    %c0_50 = arith.constant 0 : index
    %c0_51 = arith.constant 0 : index
    %c0_52 = arith.constant 0 : index
    %135 = vector.load %arg13[%c0_50, %c0_51, %c0_52] : memref<2x1x32xf32, #tpu.memory_space<vmem>>, vector<1x1x32xf32>
    %136 = vector.shape_cast %135 : vector<1x1x32xf32> to vector<1x32xf32>
    %c0_53 = arith.constant 0 : index
    %c0_54 = arith.constant 0 : index
    %c0_55 = arith.constant 0 : index
    %137 = vector.load %arg14[%c0_53, %c0_54, %c0_55] : memref<2x1x32xf32, #tpu.memory_space<vmem>>, vector<1x1x32xf32>
    %138 = vector.shape_cast %137 : vector<1x1x32xf32> to vector<1x32xf32>
    %cst_56 = arith.constant dense<0.000000e+00> : vector<16xf32>
    %139 = vector.multi_reduction <add>, %134, %cst_56 [1] : vector<16x32xf32> to vector<16xf32>
    %140 = vector.shape_cast %139 : vector<16xf32> to vector<16x1xf32>
    %cst_57 = arith.constant 3.200000e+01 : f32
    %141 = vector.broadcast %cst_57 : f32 to vector<16x1xf32>
    %142 = arith.divf %140, %141 : vector<16x1xf32>
    %143 = vector.broadcast %142 : vector<16x1xf32> to vector<16x32xf32>
    %144 = arith.subf %134, %143 : vector<16x32xf32>
    %145 = arith.mulf %144, %144 : vector<16x32xf32>
    %cst_58 = arith.constant dense<0.000000e+00> : vector<16xf32>
    %146 = vector.multi_reduction <add>, %145, %cst_58 [1] : vector<16x32xf32> to vector<16xf32>
    %147 = vector.shape_cast %146 : vector<16xf32> to vector<16x1xf32>
    %cst_59 = arith.constant 3.200000e+01 : f32
    %148 = vector.broadcast %cst_59 : f32 to vector<16x1xf32>
    %149 = arith.divf %147, %148 : vector<16x1xf32>
    %150 = vector.broadcast %142 : vector<16x1xf32> to vector<16x32xf32>
    %151 = arith.subf %134, %150 : vector<16x32xf32>
    %cst_60 = arith.constant 9.99999974E-6 : f32
    %152 = vector.broadcast %cst_60 : f32 to vector<16x1xf32>
    %153 = arith.addf %149, %152 : vector<16x1xf32>
    %154 = math.rsqrt %153 : vector<16x1xf32>
    %155 = vector.broadcast %154 : vector<16x1xf32> to vector<16x32xf32>
    %156 = arith.mulf %151, %155 : vector<16x32xf32>
    %157 = vector.broadcast %136 : vector<1x32xf32> to vector<16x32xf32>
    %158 = arith.mulf %156, %157 : vector<16x32xf32>
    %159 = vector.broadcast %138 : vector<1x32xf32> to vector<16x32xf32>
    %160 = arith.addf %158, %159 : vector<16x32xf32>
    %161 = arith.truncf %160 : vector<16x32xf32> to vector<16x32xbf16>
    %c1 = arith.constant 1 : index
    %c0_61 = arith.constant 0 : index
    %c0_62 = arith.constant 0 : index
    %162 = vector.load %arg3[%c1, %c0_61, %c0_62] : memref<2x32x96xbf16, #tpu.memory_space<vmem>>, vector<1x32x96xbf16>
    %163 = vector.shape_cast %162 : vector<1x32x96xbf16> to vector<32x96xbf16>
    %cst_63 = arith.constant dense<0.000000e+00> : vector<16x96xf32>
    %164 = tpu.matmul %161, %163, %cst_63 {dimension_numbers = #tpu.dot_dimension_numbers<[1], [0], [0], [1], [0, 0, 1, 1], [], []>} : vector<16x32xbf16>, vector<32x96xbf16>, vector<16x96xf32> -> vector<16x96xf32>
    %c1_64 = arith.constant 1 : index
    %c0_65 = arith.constant 0 : index
    %c0_66 = arith.constant 0 : index
    %165 = vector.load %arg4[%c1_64, %c0_65, %c0_66] : memref<2x1x96xf32, #tpu.memory_space<vmem>>, vector<1x1x96xf32>
    %166 = vector.shape_cast %165 : vector<1x1x96xf32> to vector<1x96xf32>
    %167 = vector.broadcast %166 : vector<1x96xf32> to vector<16x96xf32>
    %168 = arith.addf %164, %167 : vector<16x96xf32>
    %169 = arith.truncf %168 : vector<16x96xf32> to vector<16x96xbf16>
    %170 = vector.extract_strided_slice %169 {offsets = [0, 0], sizes = [16, 8], strides = [1, 1]} : vector<16x96xbf16> to vector<16x8xbf16>
    %171 = vector.shape_cast %170 : vector<16x8xbf16> to vector<1x2x8x8xbf16>
    %172 = vector.extract_strided_slice %169 {offsets = [0, 8], sizes = [16, 8], strides = [1, 1]} : vector<16x96xbf16> to vector<16x8xbf16>
    %173 = vector.shape_cast %172 : vector<16x8xbf16> to vector<1x2x8x8xbf16>
    %174 = vector.extract_strided_slice %169 {offsets = [0, 16], sizes = [16, 8], strides = [1, 1]} : vector<16x96xbf16> to vector<16x8xbf16>
    %175 = vector.shape_cast %174 : vector<16x8xbf16> to vector<1x2x8x8xbf16>
    %176 = vector.extract_strided_slice %169 {offsets = [0, 24], sizes = [16, 8], strides = [1, 1]} : vector<16x96xbf16> to vector<16x8xbf16>
    %177 = vector.shape_cast %176 : vector<16x8xbf16> to vector<1x2x8x8xbf16>
    %178 = tpu.concatenate %171, %173, %175, %177 in 0 : vector<1x2x8x8xbf16>, vector<1x2x8x8xbf16>, vector<1x2x8x8xbf16>, vector<1x2x8x8xbf16> -> vector<4x2x8x8xbf16>
    %179 = vector.shape_cast %178 : vector<4x2x8x8xbf16> to vector<8x8x8xbf16>
    %180 = vector.extract_strided_slice %169 {offsets = [0, 32], sizes = [16, 8], strides = [1, 1]} : vector<16x96xbf16> to vector<16x8xbf16>
    %181 = vector.shape_cast %180 : vector<16x8xbf16> to vector<1x2x8x8xbf16>
    %182 = vector.extract_strided_slice %169 {offsets = [0, 40], sizes = [16, 8], strides = [1, 1]} : vector<16x96xbf16> to vector<16x8xbf16>
    %183 = vector.shape_cast %182 : vector<16x8xbf16> to vector<1x2x8x8xbf16>
    %184 = vector.extract_strided_slice %169 {offsets = [0, 48], sizes = [16, 8], strides = [1, 1]} : vector<16x96xbf16> to vector<16x8xbf16>
    %185 = vector.shape_cast %184 : vector<16x8xbf16> to vector<1x2x8x8xbf16>
    %186 = vector.extract_strided_slice %169 {offsets = [0, 56], sizes = [16, 8], strides = [1, 1]} : vector<16x96xbf16> to vector<16x8xbf16>
    %187 = vector.shape_cast %186 : vector<16x8xbf16> to vector<1x2x8x8xbf16>
    %188 = tpu.concatenate %181, %183, %185, %187 in 0 : vector<1x2x8x8xbf16>, vector<1x2x8x8xbf16>, vector<1x2x8x8xbf16>, vector<1x2x8x8xbf16> -> vector<4x2x8x8xbf16>
    %189 = vector.shape_cast %188 : vector<4x2x8x8xbf16> to vector<8x8x8xbf16>
    %190 = vector.extract_strided_slice %169 {offsets = [0, 64], sizes = [16, 8], strides = [1, 1]} : vector<16x96xbf16> to vector<16x8xbf16>
    %191 = vector.shape_cast %190 : vector<16x8xbf16> to vector<1x2x8x8xbf16>
    %192 = vector.extract_strided_slice %169 {offsets = [0, 72], sizes = [16, 8], strides = [1, 1]} : vector<16x96xbf16> to vector<16x8xbf16>
    %193 = vector.shape_cast %192 : vector<16x8xbf16> to vector<1x2x8x8xbf16>
    %194 = vector.extract_strided_slice %169 {offsets = [0, 80], sizes = [16, 8], strides = [1, 1]} : vector<16x96xbf16> to vector<16x8xbf16>
    %195 = vector.shape_cast %194 : vector<16x8xbf16> to vector<1x2x8x8xbf16>
    %196 = vector.extract_strided_slice %169 {offsets = [0, 88], sizes = [16, 8], strides = [1, 1]} : vector<16x96xbf16> to vector<16x8xbf16>
    %197 = vector.shape_cast %196 : vector<16x8xbf16> to vector<1x2x8x8xbf16>
    %198 = tpu.concatenate %191, %193, %195, %197 in 0 : vector<1x2x8x8xbf16>, vector<1x2x8x8xbf16>, vector<1x2x8x8xbf16>, vector<1x2x8x8xbf16> -> vector<4x2x8x8xbf16>
    %199 = vector.shape_cast %198 : vector<4x2x8x8xbf16> to vector<8x8x8xbf16>
    "tpu.trace_start"() <{level = 10 : i32, message = "gie,gje->gij"}> : () -> ()
    %cst_67 = arith.constant dense<0.000000e+00> : vector<8x8x8xf32>
    %200 = tpu.matmul %179, %189, %cst_67 {dimension_numbers = #tpu.dot_dimension_numbers<[2], [2], [1], [1], [0, 0, 0, 1, 1, 1], [0], [0]>} : vector<8x8x8xbf16>, vector<8x8x8xbf16>, vector<8x8x8xf32> -> vector<8x8x8xf32>
    "tpu.trace_stop"() : () -> ()
    %cst_68 = arith.constant dense<0xFF800000> : vector<8x8xf32>
    %201 = vector.multi_reduction <maximumf>, %200, %cst_68 [2] : vector<8x8x8xf32> to vector<8x8xf32>
    %202 = vector.shape_cast %201 : vector<8x8xf32> to vector<8x8x1xf32>
    %203 = vector.broadcast %202 : vector<8x8x1xf32> to vector<8x8x8xf32>
    %204 = arith.subf %200, %203 : vector<8x8x8xf32>
    %205 = math.exp %204 : vector<8x8x8xf32>
    %cst_69 = arith.constant dense<0.000000e+00> : vector<8x8xf32>
    %206 = vector.multi_reduction <add>, %205, %cst_69 [2] : vector<8x8x8xf32> to vector<8x8xf32>
    %207 = vector.shape_cast %206 : vector<8x8xf32> to vector<8x8x1xf32>
    %208 = tpu.reciprocal %207 {approx = true} : vector<8x8x1xf32> -> vector<8x8x1xf32>
    %209 = vector.broadcast %208 : vector<8x8x1xf32> to vector<8x8x8xf32>
    %210 = arith.mulf %205, %209 : vector<8x8x8xf32>
    %211 = arith.truncf %210 : vector<8x8x8xf32> to vector<8x8x8xbf16>
    "tpu.trace_start"() <{level = 10 : i32, message = "gij,gje->gie"}> : () -> ()
    %cst_70 = arith.constant dense<0.000000e+00> : vector<8x8x8xf32>
    %212 = tpu.matmul %211, %199, %cst_70 {dimension_numbers = #tpu.dot_dimension_numbers<[2], [1], [1], [2], [0, 0, 0, 1, 1, 2], [0], [0]>} : vector<8x8x8xbf16>, vector<8x8x8xbf16>, vector<8x8x8xf32> -> vector<8x8x8xf32>
    "tpu.trace_stop"() : () -> ()
    %213 = arith.truncf %212 : vector<8x8x8xf32> to vector<8x8x8xbf16>
    %c1_71 = arith.constant 1 : index
    %c0_72 = arith.constant 0 : index
    %c0_73 = arith.constant 0 : index
    %c0_74 = arith.constant 0 : index
    %214 = vector.load %arg5[%c1_71, %c0_72, %c0_73, %c0_74] : memref<2x4x8x32xbf16, #tpu.memory_space<vmem>>, vector<1x4x8x32xbf16>
    %215 = vector.shape_cast %214 : vector<1x4x8x32xbf16> to vector<4x8x32xbf16>
    %216 = vector.extract_strided_slice %213 {offsets = [0, 0, 0], sizes = [2, 8, 8], strides = [1, 1, 1]} : vector<8x8x8xbf16> to vector<2x8x8xbf16>
    %217 = vector.shape_cast %216 : vector<2x8x8xbf16> to vector<16x8xbf16>
    %218 = vector.extract_strided_slice %215 {offsets = [0, 0, 0], sizes = [1, 8, 32], strides = [1, 1, 1]} : vector<4x8x32xbf16> to vector<1x8x32xbf16>
    %219 = vector.shape_cast %218 : vector<1x8x32xbf16> to vector<8x32xbf16>
    %cst_75 = arith.constant dense<0.000000e+00> : vector<16x32xf32>
    %220 = tpu.matmul %217, %219, %cst_75 {dimension_numbers = #tpu.dot_dimension_numbers<[1], [0], [0], [1], [0, 0, 1, 1], [], []>} : vector<16x8xbf16>, vector<8x32xbf16>, vector<16x32xf32> -> vector<16x32xf32>
    %221 = vector.extract_strided_slice %213 {offsets = [2, 0, 0], sizes = [2, 8, 8], strides = [1, 1, 1]} : vector<8x8x8xbf16> to vector<2x8x8xbf16>
    %222 = vector.shape_cast %221 : vector<2x8x8xbf16> to vector<16x8xbf16>
    %223 = vector.extract_strided_slice %215 {offsets = [1, 0, 0], sizes = [1, 8, 32], strides = [1, 1, 1]} : vector<4x8x32xbf16> to vector<1x8x32xbf16>
    %224 = vector.shape_cast %223 : vector<1x8x32xbf16> to vector<8x32xbf16>
    %cst_76 = arith.constant dense<0.000000e+00> : vector<16x32xf32>
    %225 = tpu.matmul %222, %224, %cst_76 {dimension_numbers = #tpu.dot_dimension_numbers<[1], [0], [0], [1], [0, 0, 1, 1], [], []>} : vector<16x8xbf16>, vector<8x32xbf16>, vector<16x32xf32> -> vector<16x32xf32>
    %226 = arith.addf %220, %225 : vector<16x32xf32>
    %227 = vector.extract_strided_slice %213 {offsets = [4, 0, 0], sizes = [2, 8, 8], strides = [1, 1, 1]} : vector<8x8x8xbf16> to vector<2x8x8xbf16>
    %228 = vector.shape_cast %227 : vector<2x8x8xbf16> to vector<16x8xbf16>
    %229 = vector.extract_strided_slice %215 {offsets = [2, 0, 0], sizes = [1, 8, 32], strides = [1, 1, 1]} : vector<4x8x32xbf16> to vector<1x8x32xbf16>
    %230 = vector.shape_cast %229 : vector<1x8x32xbf16> to vector<8x32xbf16>
    %cst_77 = arith.constant dense<0.000000e+00> : vector<16x32xf32>
    %231 = tpu.matmul %228, %230, %cst_77 {dimension_numbers = #tpu.dot_dimension_numbers<[1], [0], [0], [1], [0, 0, 1, 1], [], []>} : vector<16x8xbf16>, vector<8x32xbf16>, vector<16x32xf32> -> vector<16x32xf32>
    %232 = arith.addf %226, %231 : vector<16x32xf32>
    %233 = vector.extract_strided_slice %213 {offsets = [6, 0, 0], sizes = [2, 8, 8], strides = [1, 1, 1]} : vector<8x8x8xbf16> to vector<2x8x8xbf16>
    %234 = vector.shape_cast %233 : vector<2x8x8xbf16> to vector<16x8xbf16>
    %235 = vector.extract_strided_slice %215 {offsets = [3, 0, 0], sizes = [1, 8, 32], strides = [1, 1, 1]} : vector<4x8x32xbf16> to vector<1x8x32xbf16>
    %236 = vector.shape_cast %235 : vector<1x8x32xbf16> to vector<8x32xbf16>
    %cst_78 = arith.constant dense<0.000000e+00> : vector<16x32xf32>
    %237 = tpu.matmul %234, %236, %cst_78 {dimension_numbers = #tpu.dot_dimension_numbers<[1], [0], [0], [1], [0, 0, 1, 1], [], []>} : vector<16x8xbf16>, vector<8x32xbf16>, vector<16x32xf32> -> vector<16x32xf32>
    %238 = arith.addf %232, %237 : vector<16x32xf32>
    %c1_79 = arith.constant 1 : index
    %c0_80 = arith.constant 0 : index
    %c0_81 = arith.constant 0 : index
    %239 = vector.load %arg6[%c1_79, %c0_80, %c0_81] : memref<2x1x32xf32, #tpu.memory_space<vmem>>, vector<1x1x32xf32>
    %240 = vector.shape_cast %239 : vector<1x1x32xf32> to vector<1x32xf32>
    %241 = vector.broadcast %240 : vector<1x32xf32> to vector<16x32xf32>
    %242 = arith.addf %238, %241 : vector<16x32xf32>
    %243 = arith.addf %160, %242 : vector<16x32xf32>
    %c1_82 = arith.constant 1 : index
    %c0_83 = arith.constant 0 : index
    %c0_84 = arith.constant 0 : index
    %244 = vector.load %arg7[%c1_82, %c0_83, %c0_84] : memref<2x1x32xf32, #tpu.memory_space<vmem>>, vector<1x1x32xf32>
    %245 = vector.shape_cast %244 : vector<1x1x32xf32> to vector<1x32xf32>
    %c1_85 = arith.constant 1 : index
    %c0_86 = arith.constant 0 : index
    %c0_87 = arith.constant 0 : index
    %246 = vector.load %arg8[%c1_85, %c0_86, %c0_87] : memref<2x1x32xf32, #tpu.memory_space<vmem>>, vector<1x1x32xf32>
    %247 = vector.shape_cast %246 : vector<1x1x32xf32> to vector<1x32xf32>
    %cst_88 = arith.constant dense<0.000000e+00> : vector<16xf32>
    %248 = vector.multi_reduction <add>, %243, %cst_88 [1] : vector<16x32xf32> to vector<16xf32>
    %249 = vector.shape_cast %248 : vector<16xf32> to vector<16x1xf32>
    %cst_89 = arith.constant 3.200000e+01 : f32
    %250 = vector.broadcast %cst_89 : f32 to vector<16x1xf32>
    %251 = arith.divf %249, %250 : vector<16x1xf32>
    %252 = vector.broadcast %251 : vector<16x1xf32> to vector<16x32xf32>
    %253 = arith.subf %243, %252 : vector<16x32xf32>
    %254 = arith.mulf %253, %253 : vector<16x32xf32>
    %cst_90 = arith.constant dense<0.000000e+00> : vector<16xf32>
    %255 = vector.multi_reduction <add>, %254, %cst_90 [1] : vector<16x32xf32> to vector<16xf32>
    %256 = vector.shape_cast %255 : vector<16xf32> to vector<16x1xf32>
    %cst_91 = arith.constant 3.200000e+01 : f32
    %257 = vector.broadcast %cst_91 : f32 to vector<16x1xf32>
    %258 = arith.divf %256, %257 : vector<16x1xf32>
    %259 = vector.broadcast %251 : vector<16x1xf32> to vector<16x32xf32>
    %260 = arith.subf %243, %259 : vector<16x32xf32>
    %cst_92 = arith.constant 9.99999974E-6 : f32
    %261 = vector.broadcast %cst_92 : f32 to vector<16x1xf32>
    %262 = arith.addf %258, %261 : vector<16x1xf32>
    %263 = math.rsqrt %262 : vector<16x1xf32>
    %264 = vector.broadcast %263 : vector<16x1xf32> to vector<16x32xf32>
    %265 = arith.mulf %260, %264 : vector<16x32xf32>
    %266 = vector.broadcast %245 : vector<1x32xf32> to vector<16x32xf32>
    %267 = arith.mulf %265, %266 : vector<16x32xf32>
    %268 = vector.broadcast %247 : vector<1x32xf32> to vector<16x32xf32>
    %269 = arith.addf %267, %268 : vector<16x32xf32>
    %270 = arith.truncf %269 : vector<16x32xf32> to vector<16x32xbf16>
    %c1_93 = arith.constant 1 : index
    %c0_94 = arith.constant 0 : index
    %c0_95 = arith.constant 0 : index
    %271 = vector.load %arg9[%c1_93, %c0_94, %c0_95] : memref<2x32x256xbf16, #tpu.memory_space<vmem>>, vector<1x32x256xbf16>
    %272 = vector.shape_cast %271 : vector<1x32x256xbf16> to vector<32x256xbf16>
    %cst_96 = arith.constant dense<0.000000e+00> : vector<16x256xf32>
    %273 = tpu.matmul %270, %272, %cst_96 {dimension_numbers = #tpu.dot_dimension_numbers<[1], [0], [0], [1], [0, 0, 1, 1], [], []>} : vector<16x32xbf16>, vector<32x256xbf16>, vector<16x256xf32> -> vector<16x256xf32>
    %c1_97 = arith.constant 1 : index
    %c0_98 = arith.constant 0 : index
    %c0_99 = arith.constant 0 : index
    %274 = vector.load %arg10[%c1_97, %c0_98, %c0_99] : memref<2x1x256xf32, #tpu.memory_space<vmem>>, vector<1x1x256xf32>
    %275 = vector.shape_cast %274 : vector<1x1x256xf32> to vector<1x256xf32>
    %276 = vector.broadcast %275 : vector<1x256xf32> to vector<16x256xf32>
    %277 = arith.addf %273, %276 : vector<16x256xf32>
    %cst_100 = arith.constant 0.000000e+00 : f32
    %278 = vector.broadcast %cst_100 : f32 to vector<16x256xf32>
    %279 = arith.maximumf %277, %278 : vector<16x256xf32>
    %280 = arith.truncf %279 : vector<16x256xf32> to vector<16x256xbf16>
    %c1_101 = arith.constant 1 : index
    %c0_102 = arith.constant 0 : index
    %c0_103 = arith.constant 0 : index
    %281 = vector.load %arg11[%c1_101, %c0_102, %c0_103] : memref<2x256x32xbf16, #tpu.memory_space<vmem>>, vector<1x256x32xbf16>
    %282 = vector.shape_cast %281 : vector<1x256x32xbf16> to vector<256x32xbf16>
    %cst_104 = arith.constant dense<0.000000e+00> : vector<16x32xf32>
    %283 = tpu.matmul %280, %282, %cst_104 {dimension_numbers = #tpu.dot_dimension_numbers<[1], [0], [0], [1], [0, 0, 1, 1], [], []>} : vector<16x256xbf16>, vector<256x32xbf16>, vector<16x32xf32> -> vector<16x32xf32>
    %c1_105 = arith.constant 1 : index
    %c0_106 = arith.constant 0 : index
    %c0_107 = arith.constant 0 : index
    %284 = vector.load %arg12[%c1_105, %c0_106, %c0_107] : memref<2x1x32xf32, #tpu.memory_space<vmem>>, vector<1x1x32xf32>
    %285 = vector.shape_cast %284 : vector<1x1x32xf32> to vector<1x32xf32>
    %286 = vector.broadcast %285 : vector<1x32xf32> to vector<16x32xf32>
    %287 = arith.addf %283, %286 : vector<16x32xf32>
    %288 = arith.addf %269, %287 : vector<16x32xf32>
    %c1_108 = arith.constant 1 : index
    %c0_109 = arith.constant 0 : index
    %c0_110 = arith.constant 0 : index
    %289 = vector.load %arg13[%c1_108, %c0_109, %c0_110] : memref<2x1x32xf32, #tpu.memory_space<vmem>>, vector<1x1x32xf32>
    %290 = vector.shape_cast %289 : vector<1x1x32xf32> to vector<1x32xf32>
    %c1_111 = arith.constant 1 : index
    %c0_112 = arith.constant 0 : index
    %c0_113 = arith.constant 0 : index
    %291 = vector.load %arg14[%c1_111, %c0_112, %c0_113] : memref<2x1x32xf32, #tpu.memory_space<vmem>>, vector<1x1x32xf32>
    %292 = vector.shape_cast %291 : vector<1x1x32xf32> to vector<1x32xf32>
    %cst_114 = arith.constant dense<0.000000e+00> : vector<16xf32>
    %293 = vector.multi_reduction <add>, %288, %cst_114 [1] : vector<16x32xf32> to vector<16xf32>
    %294 = vector.shape_cast %293 : vector<16xf32> to vector<16x1xf32>
    %cst_115 = arith.constant 3.200000e+01 : f32
    %295 = vector.broadcast %cst_115 : f32 to vector<16x1xf32>
    %296 = arith.divf %294, %295 : vector<16x1xf32>
    %297 = vector.broadcast %296 : vector<16x1xf32> to vector<16x32xf32>
    %298 = arith.subf %288, %297 : vector<16x32xf32>
    %299 = arith.mulf %298, %298 : vector<16x32xf32>
    %cst_116 = arith.constant dense<0.000000e+00> : vector<16xf32>
    %300 = vector.multi_reduction <add>, %299, %cst_116 [1] : vector<16x32xf32> to vector<16xf32>
    %301 = vector.shape_cast %300 : vector<16xf32> to vector<16x1xf32>
    %cst_117 = arith.constant 3.200000e+01 : f32
    %302 = vector.broadcast %cst_117 : f32 to vector<16x1xf32>
    %303 = arith.divf %301, %302 : vector<16x1xf32>
    %304 = vector.broadcast %296 : vector<16x1xf32> to vector<16x32xf32>
    %305 = arith.subf %288, %304 : vector<16x32xf32>
    %cst_118 = arith.constant 9.99999974E-6 : f32
    %306 = vector.broadcast %cst_118 : f32 to vector<16x1xf32>
    %307 = arith.addf %303, %306 : vector<16x1xf32>
    %308 = math.rsqrt %307 : vector<16x1xf32>
    %309 = vector.broadcast %308 : vector<16x1xf32> to vector<16x32xf32>
    %310 = arith.mulf %305, %309 : vector<16x32xf32>
    %311 = vector.broadcast %290 : vector<1x32xf32> to vector<16x32xf32>
    %312 = arith.mulf %310, %311 : vector<16x32xf32>
    %313 = vector.broadcast %292 : vector<1x32xf32> to vector<16x32xf32>
    %314 = arith.addf %312, %313 : vector<16x32xf32>
    %315 = vector.shape_cast %314 : vector<16x32xf32> to vector<2x8x32xf32>
    %cst_119 = arith.constant dense<0.000000e+00> : vector<2x32xf32>
    %316 = vector.multi_reduction <add>, %315, %cst_119 [1] : vector<2x8x32xf32> to vector<2x32xf32>
    %cst_120 = arith.constant 8.000000e+00 : f32
    %317 = vector.broadcast %cst_120 : f32 to vector<2x32xf32>
    %318 = arith.divf %316, %317 : vector<2x32xf32>
    %c0_121 = arith.constant 0 : index
    %c0_122 = arith.constant 0 : index
    %319 = vector.load %arg15[%c0_121, %c0_122] : memref<2x32xf32, #tpu.memory_space<vmem>>, vector<2x32xf32>
    tpu.vector_store %arg15[%c0_121, %c0_122], %318 {strides = array<i32>} : memref<2x32xf32, #tpu.memory_space<vmem>>, vector<2x32xf32>,
    return
  }
  func.func @transform_0(%arg0: i32) -> (i32, i32) {
    %c0_i32 = arith.constant 0 : i32
    %c0_i32_0 = arith.constant 0 : i32
    return %arg0, %c0_i32 : i32, i32
  }
  func.func @transform_1(%arg0: i32) -> (i32, i32) {
    %c0_i32 = arith.constant 0 : i32
    %c0_i32_0 = arith.constant 0 : i32
    %c0_i32_1 = arith.constant 0 : i32
    return %c0_i32, %c0_i32_0 : i32, i32
  }
  func.func @transform_2(%arg0: i32) -> (i32, i32, i32) {
    %c0_i32 = arith.constant 0 : i32
    %c0_i32_0 = arith.constant 0 : i32
    %c0_i32_1 = arith.constant 0 : i32
    %c0_i32_2 = arith.constant 0 : i32
    return %c0_i32, %c0_i32_0, %c0_i32_1 : i32, i32, i32
  }
  func.func @transform_3(%arg0: i32) -> (i32, i32, i32) {
    %c0_i32 = arith.constant 0 : i32
    %c0_i32_0 = arith.constant 0 : i32
    %c0_i32_1 = arith.constant 0 : i32
    %c0_i32_2 = arith.constant 0 : i32
    return %c0_i32, %c0_i32_0, %c0_i32_1 : i32, i32, i32
  }
  func.func @transform_4(%arg0: i32) -> (i32, i32, i32, i32) {
    %c0_i32 = arith.constant 0 : i32
    %c0_i32_0 = arith.constant 0 : i32
    %c0_i32_1 = arith.constant 0 : i32
    %c0_i32_2 = arith.constant 0 : i32
    %c0_i32_3 = arith.constant 0 : i32
    return %c0_i32, %c0_i32_0, %c0_i32_1, %c0_i32_2 : i32, i32, i32, i32
  }
  func.func @transform_5(%arg0: i32) -> (i32, i32, i32) {
    %c0_i32 = arith.constant 0 : i32
    %c0_i32_0 = arith.constant 0 : i32
    %c0_i32_1 = arith.constant 0 : i32
    %c0_i32_2 = arith.constant 0 : i32
    return %c0_i32, %c0_i32_0, %c0_i32_1 : i32, i32, i32
  }
  func.func @transform_6(%arg0: i32) -> (i32, i32, i32) {
    %c0_i32 = arith.constant 0 : i32
    %c0_i32_0 = arith.constant 0 : i32
    %c0_i32_1 = arith.constant 0 : i32
    %c0_i32_2 = arith.constant 0 : i32
    return %c0_i32, %c0_i32_0, %c0_i32_1 : i32, i32, i32
  }
  func.func @transform_7(%arg0: i32) -> (i32, i32, i32) {
    %c0_i32 = arith.constant 0 : i32
    %c0_i32_0 = arith.constant 0 : i32
    %c0_i32_1 = arith.constant 0 : i32
    %c0_i32_2 = arith.constant 0 : i32
    return %c0_i32, %c0_i32_0, %c0_i32_1 : i32, i32, i32
  }
  func.func @transform_8(%arg0: i32) -> (i32, i32, i32) {
    %c0_i32 = arith.constant 0 : i32
    %c0_i32_0 = arith.constant 0 : i32
    %c0_i32_1 = arith.constant 0 : i32
    %c0_i32_2 = arith.constant 0 : i32
    return %c0_i32, %c0_i32_0, %c0_i32_1 : i32, i32, i32
  }
  func.func @transform_9(%arg0: i32) -> (i32, i32, i32) {
    %c0_i32 = arith.constant 0 : i32
    %c0_i32_0 = arith.constant 0 : i32
    %c0_i32_1 = arith.constant 0 : i32
    %c0_i32_2 = arith.constant 0 : i32
    return %c0_i32, %c0_i32_0, %c0_i32_1 : i32, i32, i32
  }
  func.func @transform_10(%arg0: i32) -> (i32, i32, i32) {
    %c0_i32 = arith.constant 0 : i32
    %c0_i32_0 = arith.constant 0 : i32
    %c0_i32_1 = arith.constant 0 : i32
    %c0_i32_2 = arith.constant 0 : i32
    return %c0_i32, %c0_i32_0, %c0_i32_1 : i32, i32, i32
  }
  func.func @transform_11(%arg0: i32) -> (i32, i32, i32) {
    %c0_i32 = arith.constant 0 : i32
    %c0_i32_0 = arith.constant 0 : i32
    %c0_i32_1 = arith.constant 0 : i32
    %c0_i32_2 = arith.constant 0 : i32
    return %c0_i32, %c0_i32_0, %c0_i32_1 : i32, i32, i32
  }
  func.func @transform_12(%arg0: i32) -> (i32, i32, i32) {
    %c0_i32 = arith.constant 0 : i32
    %c0_i32_0 = arith.constant 0 : i32
    %c0_i32_1 = arith.constant 0 : i32
    %c0_i32_2 = arith.constant 0 : i32
    return %c0_i32, %c0_i32_0, %c0_i32_1 : i32, i32, i32
  }
  func.func @transform_13(%arg0: i32) -> (i32, i32, i32) {
    %c0_i32 = arith.constant 0 : i32
    %c0_i32_0 = arith.constant 0 : i32
    %c0_i32_1 = arith.constant 0 : i32
    %c0_i32_2 = arith.constant 0 : i32
    return %c0_i32, %c0_i32_0, %c0_i32_1 : i32, i32, i32
  }
  func.func @transform_14(%arg0: i32) -> (i32, i32) {
    %c0_i32 = arith.constant 0 : i32
    %c0_i32_0 = arith.constant 0 : i32
    return %arg0, %c0_i32 : i32, i32
  }
}

</mosaic_0001>

<bundles_post_ra>
// kernel: tpu_custom_call.1
= control target key start
LH: loop header
LB: loop body
LE: loop exit
PB: predicated region body
PF: predicated region fallthrough
CT: control target
= control target key end

     0   :  { %v3662_v1 = vmov 0.0   ;;  %vm3663_vm0 = vmmov 0   ;;  %vm78_vm1 = vcmask 261120   ;;  %s4404_s0 = inlined_call_operand.vmem [shape: f32[16,32], index: 0, kind: input, shape index: {}]   ;;  %s4405_s1 = inlined_call_operand.vmem [shape: f32[8,32], index: 1, kind: input, shape index: {}]   ;;  %s4406_s2 = inlined_call_operand.vmem [shape: bf16[2,32,96], index: 2, kind: input, shape index: {}]   ;;  %s4407_s3 = inlined_call_operand.vmem [shape: f32[2,1,96], index: 3, kind: input, shape index: {}]   ;;  %s4408_s4 = inlined_call_operand.vmem [shape: bf16[2,32,32], index: 4, kind: input, shape index: {}]   ;;  %s4409_s5 = inlined_call_operand.vmem [shape: f32[2,1,32], index: 5, kind: input, shape index: {}]   ;;  %s4410_s6 = inlined_call_operand.vmem [shape: f32[2,1,32], index: 6, kind: input, shape index: {}]   ;;  %s4411_s7 = inlined_call_operand.vmem [shape: f32[2,1,32], index: 7, kind: input, shape index: {}]   ;;  %s4412_s8 = inlined_call_operand.vmem [shape: bf16[2,32,256], index: 8, kind: input, shape index: {}]   ;;  %s4413_s9 = inlined_call_operand.vmem [shape: f32[2,1,256], index: 9, kind: input, shape index: {}]   ;;  %s4414_s10 = inlined_call_operand.vmem [shape: bf16[2,256,32], index: 10, kind: input, shape index: {}]   ;;  %s4415_s11 = inlined_call_operand.vmem [shape: f32[2,1,32], index: 11, kind: input, shape index: {}]   ;;  %s4416_s12 = inlined_call_operand.vmem [shape: f32[2,1,32], index: 12, kind: input, shape index: {}]   ;;  %s4417_s13 = inlined_call_operand.vmem [shape: f32[2,1,32], index: 13, kind: input, shape index: {}]   ;;  %s4418_s14 = inlined_call_operand.hbm [shape: f32[2,32], index: 14, kind: output, shape index: {}]  }
   0x1   :  { %v3506_v0 = vld [vmem:[%s4406_s2] sm:$0xff]   ;;  %3270 = vmatprep.subr.bf16.mxu1 %v3662_v1  ;;  %v3507_v2 = vld [vmem:[%s4406_s2 + $0x8] sm:$0xff]   ;;  %3296 = vmatprep.subr.bf16.mxu0 %v3662_v1 }
   0x2   :  { %3271 = vmatpush3.bf16.msra.mxu1 %v3506_v0  ;;  %3274 = vmatprep.mubr.msk.bf16.mxu1 %vm3663_vm0, %v3662_v1  ;;  %v49_v3 = vld [vmem:[%s4404_s0] sm:$0xff]  ;;  %v50_v4 = vld [vmem:[%s4404_s0 + $0x8] sm:$0xff] }
   0x3   :  { %v51_v5 = vld [vmem:[%s4405_s1] sm:$0xff]  ;;  %3272 = vmatprep.subr.bf16.mxu1 %v3662_v1  ;;  %3298 = vmatprep.mubr.msk.bf16.mxu0 %vm3663_vm0, %v3662_v1 }
   0x4   :  { %v3769_v6 = vadd.f32 %v51_v5, %v49_v3  ;;  %v3771_v7 = vadd.f32 %v51_v5, %v50_v4 }
   0x6   :  { %v54_v8 = vpack.c.bf16 %v3771_v7, %v3769_v6  ;;  %3273 = vmatpush3.bf16.msra.mxu1 %v3507_v2 }
   0x7   :  { %3278 = vmatprep.subr.bf16.mxu1 %v3662_v1 }
   0x9   :  { %3275 = vmatmul.mubr.msk.bf16.vlgmr.msra.gmra.mrb[0].mxu1 %vm78_vm1, %v54_v8 }
   0xa   :  { %3280 = vmatprep.mubr.msk.bf16.mxu1 %vm3663_vm0, %v3662_v1 }
   0xb   :  { %19 = vsyncpa [#allocation3], 0  ;;  %v2962_v9 = vld [vmem:[%s4407_s3] ss:$0 sm:$0xff]  ;;  %s3664_s23 = smov 112   ;;  %s3665_s24 = smov 120  }
   0xc   :  { %s3666_s25 = smov 104   ;;  %s3667_s26 = smov 96   ;;  %vm143_vm2 = vcmask 64512   ;;  %vm639_vm3 = vcmask 1043456   ;;  %vm1056_vm4 = vcmask 130048   ;;  %vm1059_vm5 = vcmask 195584  }
   0xd   :  { %s3668_s27 = smov 64   ;;  %s3669_s28 = smov 8   ;;  %vm2943_vm6 = vcmask 1041409   ;;  %vm2946_vm7 = vcmask 254976  }
   0xe   :  { %s3670_s17 = smov 16   ;;  %s3671_s18 = smov 24  }
  0xdc   :  { %v116_v10 = vpop.f32.mrb[0].mxu1 }
  0xdd   :  { %v117_v11 = vadd.f32 %v2962_v9, %v116_v10  ;;  %v3276_v12 = vpop.f32.mrb[1].mxu1 }
  0xde   :  { %v119_v13 = vpop.f32.mrb[2].mxu1 }
  0xdf   :  { %v3138_v14 = vpack.c.bf16 %v117_v11, %v117_v11  ;;  %v120_v15 = vadd.f32 %v2962_v9, %v119_v13  ;;  %v3277_v16 = vpop.f32.mrb[3].mxu1 }
  0xe1   :  { %133 = vrot.lane.b32.xlu1 %v3138_v14, %s3664_s23  ;;  %129 = vrot.lane.b32.xlu0 %v3138_v14, %s3665_s24  ;;  %v3786_v17 = vpack.c.bf16 %v120_v15, %v120_v15 }
  0xe5   :  { %135 = vrot.lane.b32.xlu1 %v3786_v17, %s3664_s23  ;;  %131 = vrot.lane.b32.xlu0 %v3786_v17, %s3665_s24 }
  0xe9   :  { %139 = vrot.lane.b32.xlu1 %v3786_v17, %s3666_s25  ;;  %137 = vrot.lane.b32.xlu0 %v3138_v14, %s3666_s25 }
  0xed   :  { %190 = vrot.lane.b32.xlu1 %v3786_v17, %s3667_s26  ;;  %141 = vrot.lane.b32.xlu0 %v3138_v14, %s3667_s26 }
 0x153   :  { %v134_v18 = vpop.permute.xlu1 %133  ;;  %v130_v19 = vpop.permute.xlu0 %129 }
 0x154   :  { %v3798_v20 = vcombine.low %v130_v19, %v130_v19  ;;  %v3802_v23 = vcombine.low %v134_v18, %v134_v18 }
 0x156   :  { %240 = vrot.lane.b32.xlu0 %v3798_v20, %s3667_s26 }
 0x157   :  { %v136_v21 = vpop.permute.xlu1 %135  ;;  %v132_v22 = vpop.permute.xlu0 %131 }
 0x158   :  { %v3804_v24 = vcombine.low %v132_v22, %v132_v22  ;;  %v3810_v26 = vcombine.low %v136_v21, %v136_v21 }
 0x15a   :  { %340 = vrot.lane.b32.xlu0 %v3802_v23, %s3667_s26  ;;  %290 = vrot.lane.b32.xlu1 %v3804_v24, %s3667_s26 }
 0x15b   :  { %v138_v25 = vpop.permute.xlu0 %137  ;;  %v140_v28 = vpop.permute.xlu1 %139 }
 0x15c   :  { %v3812_v27 = vcombine.low %v138_v25, %v138_v25  ;;  %v3818_v30 = vcombine.low %v140_v28, %v140_v28 }
 0x15e   :  { %390 = vrot.lane.b32.xlu1 %v3810_v26, %s3667_s26  ;;  %440 = vrot.lane.b32.xlu0 %v3812_v27, %s3667_s26 }
 0x15f   :  { %v142_v29 = vpop.permute.xlu0 %141  ;;  %v191_v32 = vpop.permute.xlu1 %190 }
 0x160   :  { %v148_v31 = vsel %vm143_vm2, %v142_v29, 0  ;;  %v196_v33 = vsel %vm143_vm2, %v191_v32, 0 }
 0x161   :  { %3279 = vmatpush3.bf16.xpose.msra.mxu1 %v148_v31 }
 0x162   :  { %490 = vrot.lane.b32.xlu1 %v3818_v30, %s3667_s26  ;;  %3284 = vmatprep.subr.bf16.mxu1 %v3662_v1 }
 0x166   :  { %634 = vrot.lane.b32.xlu1 %v3138_v14, %s3668_s27 }
 0x168   :  { %3281 = vmatmul.mubr.msk.bf16.vlgmr.msra.gmra.mrb[4].mxu1 %vm143_vm2, %v3138_v14 }
 0x169   :  { %3285 = vmatpush3.bf16.xpose.msra.mxu1 %v196_v33  ;;  %3286 = vmatprep.mubr.msk.bf16.mxu1 %vm3663_vm0, %v3662_v1 }
 0x16a   :  { %3290 = vmatprep.subr.bf16.mxu1 %v3662_v1 }
 0x170   :  { %3287 = vmatmul.mubr.msk.bf16.vlgmr.msra.gmra.mrb[8].mxu1 %vm143_vm2, %v3786_v17 }
 0x171   :  { %3292 = vmatprep.mubr.msk.bf16.mxu1 %vm3663_vm0, %v3662_v1 }
 0x1c8   :  { %v241_v34 = vpop.permute.xlu0 %240 }
 0x1c9   :  { %v246_v35 = vsel %vm143_vm2, %v241_v34, 0 }
 0x1ca   :  { %3291 = vmatpush3.bf16.xpose.msra.mxu1 %v246_v35 }
 0x1cb   :  { %3302 = vmatprep.subr.bf16.mxu1 %v3662_v1 }
 0x1cc   :  { %v291_v36 = vpop.permute.xlu1 %290  ;;  %v341_v38 = vpop.permute.xlu0 %340 }
 0x1cd   :  { %v296_v37 = vsel %vm143_vm2, %v291_v36, 0  ;;  %v346_v39 = vsel %vm143_vm2, %v341_v38, 0 }
 0x1ce   :  { %3297 = vmatpush3.bf16.xpose.msra.mxu0 %v296_v37 }
 0x1cf   :  { %3308 = vmatprep.subr.bf16.mxu0 %v3662_v1 }
 0x1d0   :  { %v391_v40 = vpop.permute.xlu1 %390  ;;  %v441_v42 = vpop.permute.xlu0 %440 }
 0x1d1   :  { %3293 = vmatmul.mubr.msk.bf16.vlgmr.msra.gmra.mrb[12].mxu1 %vm143_vm2, %v130_v19  ;;  %v396_v41 = vsel %vm143_vm2, %v391_v40, 0  ;;  %v446_v44 = vsel %vm143_vm2, %v441_v42, 0 }
 0x1d2   :  { %3303 = vmatpush3.bf16.xpose.msra.mxu1 %v346_v39  ;;  %3304 = vmatprep.mubr.msk.bf16.mxu1 %vm3663_vm0, %v3662_v1 }
 0x1d3   :  { %3314 = vmatprep.subr.bf16.mxu1 %v3662_v1 }
 0x1d4   :  { %v491_v43 = vpop.permute.xlu1 %490 }
 0x1d5   :  { %3299 = vmatmul.mubr.msk.bf16.vlgmr.msra.gmra.mrb[0].mxu0 %vm143_vm2, %v132_v22  ;;  %v496_v45 = vsel %vm143_vm2, %v491_v43, 0 }
 0x1d6   :  { %3309 = vmatpush3.bf16.xpose.msra.mxu0 %v396_v41  ;;  %3310 = vmatprep.mubr.msk.bf16.mxu0 %vm3663_vm0, %v3662_v1 }
 0x1d7   :  { %3320 = vmatprep.subr.bf16.mxu0 %v3662_v1 }
 0x1d8   :  { %v635_v46 = vpop.permute.xlu1 %634 }
 0x1d9   :  { %3305 = vmatmul.mubr.msk.bf16.vlgmr.msra.gmra.mrb[16].mxu1 %vm143_vm2, %v134_v18  ;;  %v641_v47 = vsel %vm639_vm3, %v635_v46, 0 }
 0x1da   :  { %3315 = vmatpush3.bf16.xpose.msra.mxu1 %v446_v44  ;;  %3316 = vmatprep.mubr.msk.bf16.mxu1 %vm3663_vm0, %v3662_v1 }
 0x1db   :  { %3326 = vmatprep.subr.bf16.mxu1 %v3662_v1 }
 0x1dd   :  { %3311 = vmatmul.mubr.msk.bf16.vlgmr.msra.gmra.mrb[4].mxu0 %vm143_vm2, %v136_v21 }
 0x1de   :  { %3321 = vmatpush3.bf16.xpose.msra.mxu0 %v496_v45  ;;  %3322 = vmatprep.mubr.msk.bf16.mxu0 %vm3663_vm0, %v3662_v1 }
 0x1df   :  { %3332 = vmatprep.subr.bf16.mxu0 %v3662_v1 }
 0x1e1   :  { %3317 = vmatmul.mubr.msk.bf16.vlgmr.msra.gmra.mrb[20].mxu1 %vm143_vm2, %v138_v25 }
 0x1e2   :  { %3327 = vmatpush3.bf16.msra.mxu1 %v641_v47  ;;  %3328 = vmatprep.mubr.msk.bf16.mxu1 %vm3663_vm0, %v3662_v1 }
 0x1e3   :  { %3338 = vmatprep.subr.bf16.mxu1 %v3662_v1 }
 0x1e5   :  { %3323 = vmatmul.mubr.msk.bf16.vlgmr.msra.gmra.mrb[8].mxu0 %vm143_vm2, %v140_v28 }
 0x1e6   :  { %3334 = vmatprep.mubr.msk.bf16.mxu0 %vm3663_vm0, %v3662_v1 }
 0x23b   :  { %v184_v48 = vpop.f32.mrb[4].mxu1 }
 0x23c   :  { %v3282_v49 = vpop.f32.mrb[5].mxu1  ;;  %v538_v50 = vsel %vm143_vm2, %v184_v48, -inf }
 0x23d   :  { %539 = vmax.xlane.f32.xlu0 %v538_v50  ;;  %v187_v51 = vpop.f32.mrb[6].mxu1 }
 0x23e   :  { %v3283_v52 = vpop.f32.mrb[7].mxu1 }
 0x243   :  { %v232_v53 = vpop.f32.mrb[8].mxu1 }
 0x244   :  { %v3288_v54 = vpop.f32.mrb[9].mxu1  ;;  %v541_v55 = vsel %vm143_vm2, %v232_v53, -inf }
 0x245   :  { %542 = vmax.xlane.f32.xlu1 %v541_v55  ;;  %v235_v56 = vpop.f32.mrb[10].mxu1 }
 0x246   :  { %v3289_v57 = vpop.f32.mrb[11].mxu1 }
 0x2a4   :  { %v282_v58 = vpop.f32.mrb[12].mxu1 }
 0x2a5   :  { %v3294_v59 = vpop.f32.mrb[13].mxu1  ;;  %v544_v60 = vsel %vm143_vm2, %v282_v58, -inf }
 0x2a6   :  { %545 = vmax.xlane.f32.xlu0 %v544_v60  ;;  %v285_v61 = vpop.f32.mrb[14].mxu1 }
 0x2a7   :  { %v3295_v62 = vpop.f32.mrb[15].mxu1 }
 0x2a8   :  { %v332_v63 = vpop.f32.mrb[0].mxu0 }
 0x2a9   :  { %v3300_v0 = vpop.f32.mrb[1].mxu0  ;;  %v547_v2 = vsel %vm143_vm2, %v332_v63, -inf }
 0x2aa   :  { %v335_v3 = vpop.f32.mrb[2].mxu0  ;;  %548 = vmax.xlane.f32.xlu0 %v547_v2 }
 0x2ab   :  { %v3301_v4 = vpop.f32.mrb[3].mxu0 }
 0x2ac   :  { %v3870_v5 = vpop.f32.mrb[16].mxu1 }
 0x2ad   :  { %v3306_v8 = vpop.f32.mrb[17].mxu1  ;;  %v550_v9 = vsel %vm143_vm2, %v3870_v5, -inf }
 0x2ae   :  { %551 = vmax.xlane.f32.xlu1 %v550_v9  ;;  %v385_v10 = vpop.f32.mrb[18].mxu1 }
 0x2af   :  { %v3307_v11 = vpop.f32.mrb[19].mxu1 }
 0x2b0   :  { %v3874_v12 = vpop.f32.mrb[4].mxu0 }
 0x2b1   :  { %v3312_v13 = vpop.f32.mrb[5].mxu0  ;;  %v553_v14 = vsel %vm143_vm2, %v3874_v12, -inf }
 0x2b2   :  { %v435_v15 = vpop.f32.mrb[6].mxu0  ;;  %554 = vmax.xlane.f32.xlu0 %v553_v14 }
 0x2b3   :  { %v3313_v16 = vpop.f32.mrb[7].mxu0 }
 0x2b4   :  { %v482_v18 = vpop.f32.mrb[20].mxu1 }
 0x2b5   :  { %v3318_v19 = vpop.f32.mrb[21].mxu1  ;;  %v556_v21 = vsel %vm143_vm2, %v482_v18, -inf }
 0x2b6   :  { %557 = vmax.xlane.f32.xlu1 %v556_v21  ;;  %v485_v22 = vpop.f32.mrb[22].mxu1 }
 0x2b7   :  { %v3319_v25 = vpop.f32.mrb[23].mxu1 }
 0x2b8   :  { %v532_v28 = vpop.f32.mrb[8].mxu0 }
 0x2b9   :  { %v3324_v29 = vpop.f32.mrb[9].mxu0  ;;  %v559_v31 = vsel %vm143_vm2, %v532_v28, -inf }
 0x2ba   :  { %v535_v32 = vpop.f32.mrb[10].mxu0  ;;  %560 = vmax.xlane.f32.xlu0 %v559_v31 }
 0x2bb   :  { %v3325_v33 = vpop.f32.mrb[11].mxu0 }
 0x2c7   :  { %731 = vrot.lane.b32.xlu1 %v3798_v20, %s3668_s27 }
 0x2ca   :  { %v540_v34 = vpop.xlane.xlu0 %539 }
 0x2cb   :  { %779 = vrot.lane.b32.xlu1 %v3804_v24, %s3668_s27  ;;  %v562_v36 = vsub.f32 %v184_v48, %v540_v34 }
 0x2cd   :  { %v570_v38 = vmul.f32 1.442695, %v562_v36 }
 0x2cf   :  { %3558 = vpow2.f32 %v570_v38 }
 0x2d0   :  { %683 = vrot.lane.b32.xlu0 %v3786_v17, %s3668_s27 }
 0x2d2   :  { %v543_v35 = vpop.xlane.xlu1 %542 }
 0x2d3   :  { %v563_v37 = vsub.f32 %v232_v53, %v543_v35 }
 0x2d5   :  { %v572_v39 = vmul.f32 1.442695, %v563_v37 }
 0x2d7   :  { %3560 = vpow2.f32 %v572_v39 }
 0x2d9   :  { %v3886_v40 = vpop.eup %3558 }
 0x2da   :  { %v586_v20 = vsel %vm143_vm2, %v3886_v40, 0.0 }
 0x2e1   :  { %v3561_v41 = vpop.eup %3560 }
 0x2e2   :  { %v589_v42 = vsel %vm143_vm2, %v3561_v41, 0.0 }
 0x2ef   :  { %590 = vadd.xlane.f32.xlu0 %v589_v42  ;;  %587 = vadd.xlane.f32.xlu1 %v586_v20 }
 0x333   :  { %v546_v24 = vpop.xlane.xlu0 %545 }
 0x334   :  { %v564_v17 = vsub.f32 %v282_v58, %v546_v24 }
 0x336   :  { %v574_v43 = vmul.f32 1.442695, %v564_v17 }
 0x337   :  { %v549_v44 = vpop.xlane.xlu0 %548 }
 0x338   :  { %3562 = vpow2.f32 %v574_v43  ;;  %v565_v45 = vsub.f32 %v332_v63, %v549_v44 }
 0x33a   :  { %v576_v46 = vmul.f32 1.442695, %v565_v45 }
 0x33b   :  { %v552_v55 = vpop.xlane.xlu1 %551 }
 0x33c   :  { %3564 = vpow2.f32 %v576_v46  ;;  %v566_v56 = vsub.f32 %v3870_v5, %v552_v55 }
 0x33e   :  { %v578_v59 = vmul.f32 1.442695, %v566_v56 }
 0x33f   :  { %v555_v48 = vpop.xlane.xlu0 %554 }
 0x340   :  { %v567_v58 = vsub.f32 %v3874_v12, %v555_v48  ;;  %3566 = vpow2.f32 %v578_v59 }
 0x342   :  { %v3891_v47 = vpop.eup %3562  ;;  %v580_v61 = vmul.f32 1.442695, %v567_v58 }
 0x343   :  { %v592_v49 = vsel %vm143_vm2, %v3891_v47, 0.0  ;;  %v558_v57 = vpop.xlane.xlu1 %557 }
 0x344   :  { %593 = vadd.xlane.f32.xlu1 %v592_v49  ;;  %v568_v60 = vsub.f32 %v482_v18, %v558_v57  ;;  %3568 = vpow2.f32 %v580_v61 }
 0x346   :  { %v3895_v50 = vpop.eup %3564  ;;  %v582_v62 = vmul.f32 1.442695, %v568_v60 }
 0x347   :  { %v561_v51 = vpop.xlane.xlu0 %560  ;;  %v595_v52 = vsel %vm143_vm2, %v3895_v50, 0.0  ;;  %v732_v2 = vpop.permute.xlu1 %731 }
 0x348   :  { %596 = vadd.xlane.f32.xlu0 %v595_v52  ;;  %v569_v63 = vsub.f32 %v532_v28, %v561_v51  ;;  %3570 = vpow2.f32 %v582_v62  ;;  %v737_v25 = vsel %vm639_vm3, %v732_v2, 0 }
 0x34a   :  { %v584_v0 = vmul.f32 1.442695, %v569_v63 }
 0x34b   :  { %v684_v53 = vpop.permute.xlu0 %683  ;;  %v780_v3 = vpop.permute.xlu1 %779 }
 0x34c   :  { %v689_v54 = vsel %vm639_vm3, %v684_v53, 0  ;;  %3572 = vpow2.f32 %v584_v0  ;;  %v785_v22 = vsel %vm639_vm3, %v780_v3, 0 }
 0x34d   :  { %3333 = vmatpush3.bf16.msra.mxu0 %v689_v54 }
 0x34e   :  { %3344 = vmatprep.subr.bf16.mxu0 %v3662_v1 }
 0x355   :  { %875 = vrot.lane.b32.xlu1 %v3810_v26, %s3668_s27  ;;  %v3907_v26 = vpop.eup %3566 }
 0x356   :  { %v598_v4 = vsel %vm143_vm2, %v3907_v26, 0.0 }
 0x35e   :  { %827 = vrot.lane.b32.xlu0 %v3802_v23, %s3668_s27  ;;  %v3909_v23 = vpop.eup %3568 }
 0x35f   :  { %v3913_v5 = vpop.eup %3570  ;;  %v601_v10 = vsel %vm143_vm2, %v3909_v23, 0.0 }
 0x360   :  { %v604_v11 = vsel %vm143_vm2, %v3913_v5, 0.0  ;;  %v3919_v12 = vpop.eup %3572 }
 0x361   :  { %v607_v13 = vsel %vm143_vm2, %v3919_v12, 0.0 }
 0x379   :  { %599 = vadd.xlane.f32.xlu1 %v598_v4 }
 0x37c   :  { %v591_v8 = vpop.xlane.xlu0 %590  ;;  %v588_v9 = vpop.xlane.xlu1 %587 }
 0x37d   :  { %3574 = vrcp.f32 %v591_v8  ;;  %602 = vadd.xlane.f32.xlu0 %v601_v10  ;;  %605 = vadd.xlane.f32.xlu1 %v604_v11  ;;  %v3508_v11 = vld [vmem:[%s4408_s4] sm:$0xff]  }
 0x37e   :  { %3576 = vrcp.f32 %v588_v9 }
 0x381   :  { %608 = vadd.xlane.f32.xlu0 %v607_v13 }
 0x387   :  { %v3575_v14 = vpop.eup %3574 }
 0x388   :  { %v3577_v15 = vpop.eup %3576  ;;  %v619_v16 = vmul.f32 %v3575_v14, %v3561_v41 }
 0x389   :  { %v618_v18 = vmul.f32 %v3577_v15, %v3886_v40 }
 0x38a   :  { %v627_v19 = vpack.c.bf16 %v619_v16, %v619_v16 }
 0x38b   :  { %v626_v21 = vpack.c.bf16 %v618_v18, %v618_v18 }
 0x38c   :  { %3335 = vmatmul.mubr.msk.bf16.vlgmr.msra.gmra.mrb[12].mxu0 %vm143_vm2, %v627_v19 }
 0x38d   :  { %3329 = vmatmul.mubr.msk.bf16.vlgmr.msra.gmra.mrb[24].mxu1 %vm143_vm2, %v626_v21  ;;  %3345 = vmatpush3.bf16.msra.mxu0 %v785_v22 }
 0x38e   :  { %3339 = vmatpush3.bf16.msra.mxu1 %v737_v25  ;;  %971 = vrot.lane.b32.xlu1 %v3818_v30, %s3668_s27 }
 0x38f   :  { %3340 = vmatprep.mubr.msk.bf16.mxu1 %vm3663_vm0, %v3662_v1  ;;  %3350 = vmatprep.subr.bf16.mxu1 %v3662_v1 }
 0x390   :  { %3346 = vmatprep.mubr.msk.bf16.mxu0 %vm3663_vm0, %v3662_v1  ;;  %3356 = vmatprep.subr.bf16.mxu0 %v3662_v1 }
 0x397   :  { %923 = vrot.lane.b32.xlu0 %v3812_v27, %s3668_s27 }
 0x3d1   :  { %v594_v28 = vpop.xlane.xlu1 %593 }
 0x3d2   :  { %3578 = vrcp.f32 %v594_v28 }
 0x3d5   :  { %v597_v29 = vpop.xlane.xlu0 %596  ;;  %v876_v37 = vpop.permute.xlu1 %875 }
 0x3d6   :  { %3580 = vrcp.f32 %v597_v29  ;;  %v881_v38 = vsel %vm639_vm3, %v876_v37, 0 }
 0x3d9   :  { %v828_v32 = vpop.permute.xlu0 %827 }
 0x3da   :  { %v833_v36 = vsel %vm639_vm3, %v828_v32, 0 }
 0x3dc   :  { %v3579_v31 = vpop.eup %3578 }
 0x3dd   :  { %v620_v30 = vmul.f32 %v3579_v31, %v3891_v47 }
 0x3df   :  { %v628_v33 = vpack.c.bf16 %v620_v30, %v620_v30 }
 0x3e0   :  { %v3581_v34 = vpop.eup %3580 }
 0x3e1   :  { %v621_v35 = vmul.f32 %v3581_v34, %v3895_v50  ;;  %3341 = vmatmul.mubr.msk.bf16.vlgmr.msra.gmra.mrb[28].mxu1 %vm143_vm2, %v628_v33 }
 0x3e2   :  { %3351 = vmatpush3.bf16.msra.mxu1 %v833_v36  ;;  %3352 = vmatprep.mubr.msk.bf16.mxu1 %vm3663_vm0, %v3662_v1 }
 0x3e3   :  { %v629_v27 = vpack.c.bf16 %v621_v35, %v621_v35  ;;  %3362 = vmatprep.subr.bf16.mxu1 %v3662_v1 }
 0x3e5   :  { %3347 = vmatmul.mubr.msk.bf16.vlgmr.msra.gmra.mrb[16].mxu0 %vm143_vm2, %v629_v27 }
 0x3e6   :  { %3357 = vmatpush3.bf16.msra.mxu0 %v881_v38  ;;  %3358 = vmatprep.mubr.msk.bf16.mxu0 %vm3663_vm0, %v3662_v1 }
 0x3e7   :  { %3368 = vmatprep.subr.bf16.mxu0 %v3662_v1 }
 0x406   :  { %v600_v39 = vpop.xlane.xlu1 %599 }
 0x407   :  { %3582 = vrcp.f32 %v600_v39 }
 0x40a   :  { %v603_v40 = vpop.xlane.xlu0 %602  ;;  %v606_v41 = vpop.xlane.xlu1 %605 }
 0x40b   :  { %3584 = vrcp.f32 %v603_v40 }
 0x40c   :  { %3586 = vrcp.f32 %v606_v41 }
 0x40e   :  { %v609_v42 = vpop.xlane.xlu0 %608  ;;  %v972_v48 = vpop.permute.xlu1 %971 }
 0x40f   :  { %3588 = vrcp.f32 %v609_v42  ;;  %v977_v52 = vsel %vm639_vm3, %v972_v48, 0  ;;  %v2994_v42 = vld [vmem:[%s4409_s5] ss:$0 sm:$0xff] }
 0x411   :  { %v3583_v20 = vpop.eup %3582 }
 0x412   :  { %v622_v24 = vmul.f32 %v3583_v20, %v3907_v26  ;;  %v924_v17 = vpop.permute.xlu0 %923 }
 0x413   :  { %v929_v47 = vsel %vm639_vm3, %v924_v17, 0 }
 0x414   :  { %v630_v43 = vpack.c.bf16 %v622_v24, %v622_v24 }
 0x415   :  { %v3585_v44 = vpop.eup %3584 }
 0x416   :  { %v3587_v45 = vpop.eup %3586  ;;  %v623_v46 = vmul.f32 %v3585_v44, %v3909_v23  ;;  %3353 = vmatmul.mubr.msk.bf16.vlgmr.msra.gmra.mrb[32].mxu1 %vm143_vm2, %v630_v43 }
 0x417   :  { %3363 = vmatpush3.bf16.msra.mxu1 %v929_v47  ;;  %3364 = vmatprep.mubr.msk.bf16.mxu1 %vm3663_vm0, %v3662_v1  ;;  %v624_v49 = vmul.f32 %v3587_v45, %v3913_v5 }
 0x418   :  { %v631_v50 = vpack.c.bf16 %v623_v46, %v623_v46  ;;  %3374 = vmatprep.subr.bf16.mxu1 %v3662_v1 }
 0x419   :  { %v3589_v51 = vpop.eup %3588  ;;  %v632_v54 = vpack.c.bf16 %v624_v49, %v624_v49 }
 0x41a   :  { %3359 = vmatmul.mubr.msk.bf16.vlgmr.msra.gmra.mrb[20].mxu0 %vm143_vm2, %v631_v50  ;;  %v625_v53 = vmul.f32 %v3589_v51, %v3919_v12  ;;  %v3509_v12 = vld [vmem:[%s4408_s4 + $0x8] sm:$0xff]  }
 0x41b   :  { %3369 = vmatpush3.bf16.msra.mxu0 %v977_v52  ;;  %3370 = vmatprep.mubr.msk.bf16.mxu0 %vm3663_vm0, %v3662_v1 }
 0x41c   :  { %v633_v55 = vpack.c.bf16 %v625_v53, %v625_v53 }
 0x41e   :  { %3365 = vmatmul.mubr.msk.bf16.vlgmr.msra.gmra.mrb[36].mxu1 %vm143_vm2, %v632_v54 }
 0x41f   :  { %3378 = vmatprep.mubr.msk.bf16.mxu1 %vm3663_vm0, %v3662_v1  ;;  %3375 = vmatpush3.bf16.msra.mxu1 %v3508_v11 }
 0x420   :  { %3376 = vmatprep.subr.bf16.mxu1 %v3662_v1 }
 0x422   :  { %3371 = vmatmul.mubr.msk.bf16.vlgmr.msra.gmra.mrb[24].mxu0 %vm143_vm2, %v633_v55 }
 0x423   :  { %3377 = vmatpush3.bf16.msra.mxu1 %v3509_v12 }
 0x45f   :  { %v725_v56 = vpop.f32.mrb[12].mxu0 }
 0x460   :  { %v677_v57 = vpop.f32.mrb[24].mxu1  ;;  %v3336_v58 = vpop.f32.mrb[13].mxu0 }
 0x461   :  { %v3140_v59 = vpack.c.bf16 %v725_v56, %v677_v57  ;;  %v3330_v60 = vpop.f32.mrb[25].mxu1  ;;  %v728_v61 = vpop.f32.mrb[14].mxu0 }
 0x462   :  { %v680_v62 = vpop.f32.mrb[26].mxu1  ;;  %v3337_v63 = vpop.f32.mrb[15].mxu0  ;;  %v3515_v60 = vld [vmem:[%s4412_s8 + $0x14] ss:$8 sps:$4 sm:$0xff]   ;;  %v3513_v61 = vld [vmem:[%s4412_s8 + $0x10] ss:$8 sps:$4 sm:$0xff]  }
 0x463   :  { %v3331_v0 = vpop.f32.mrb[27].mxu1  ;;  %v3672_v62 = vmov 0   ;;  %v3516_v63 = vld [vmem:[%s4414_s10 + $0x40] sm:$0xff]  }
 0x464   :  { %1247 = vmatprep.mubr.bf16.mxu0 %v3672_v62  ;;  %v3517_v0 = vld [vmem:[%s4414_s10] sm:$0xff]   ;;  %3188 = vmatprep.subr.bf16.mxu1 %v3516_v63 }
 0x4b4   :  { %v773_v2 = vpop.f32.mrb[28].mxu1 }
 0x4b5   :  { %v3342_v26 = vpop.f32.mrb[29].mxu1 }
 0x4b6   :  { %v776_v23 = vpop.f32.mrb[30].mxu1  ;;  %v3519_v26 = vld [vmem:[%s4414_s10 + $0x8] sm:$0xff]  }
 0x4b7   :  { %v3343_v3 = vpop.f32.mrb[31].mxu1  ;;  %v3520_v23 = vld [vmem:[%s4414_s10 + $0x50] sm:$0xff]  }
 0x4b8   :  { %v821_v4 = vpop.f32.mrb[16].mxu0  ;;  %v3521_v3 = vld [vmem:[%s4414_s10 + $0x10] sm:$0xff]  }
 0x4b9   :  { %v3141_v5 = vpack.c.bf16 %v821_v4, %v773_v2  ;;  %v3348_v8 = vpop.f32.mrb[17].mxu0  ;;  %v3518_v2 = vld [vmem:[%s4414_s10 + $0x48] sm:$0xff]   ;;  %v3522_v4 = vld [vmem:[%s4414_s10 + $0x58] sm:$0xff]  }
 0x4ba   :  { %v824_v9 = vpop.f32.mrb[18].mxu0  ;;  %v3524_v8 = vld [vmem:[%s4414_s10 + $0x60] sm:$0xff]  }
 0x4bb   :  { %v3349_v10 = vpop.f32.mrb[19].mxu0  ;;  %1037 = vrot.lane.b32.xlu0 %v3141_v5, %s3669_s28  ;;  %v3523_v5 = vld [vmem:[%s4414_s10 + $0x18] sm:$0xff]   ;;  %v3525_v9 = vld [vmem:[%s4414_s10 + $0x20] sm:$0xff]  }
 0x4bc   :  { %v3526_v10 = vld [vmem:[%s4414_s10 + $0x68] sm:$0xff]  }
 0x4e9   :  { %v869_v13 = vpop.f32.mrb[32].mxu1 }
 0x4ea   :  { %v3354_v14 = vpop.f32.mrb[33].mxu1 }
 0x4eb   :  { %v872_v15 = vpop.f32.mrb[34].mxu1 }
 0x4ec   :  { %v3355_v16 = vpop.f32.mrb[35].mxu1 }
 0x4ed   :  { %v917_v18 = vpop.f32.mrb[20].mxu0 }
 0x4ee   :  { %v3142_v19 = vpack.c.bf16 %v917_v18, %v869_v13  ;;  %v3360_v21 = vpop.f32.mrb[21].mxu0 }
 0x4ef   :  { %v920_v22 = vpop.f32.mrb[22].mxu0 }
 0x4f0   :  { %v3361_v25 = vpop.f32.mrb[23].mxu0  ;;  %1044 = vrot.lane.b32.xlu1 %v3142_v19, %s3670_s17  ;;  %v2998_v19 = vld [vmem:[%s4410_s6] ss:$0 sm:$0xff] }
 0x4f1   :  { %v965_v28 = vpop.f32.mrb[36].mxu1 }
 0x4f2   :  { %v3366_v29 = vpop.f32.mrb[37].mxu1 }
 0x4f3   :  { %v968_v31 = vpop.f32.mrb[38].mxu1  ;;  %v2999_v29 = vld [vmem:[%s4411_s7] ss:$0 sm:$0xff] }
 0x4f4   :  { %v3367_v30 = vpop.f32.mrb[39].mxu1 }
 0x4f5   :  { %v1013_v32 = vpop.f32.mrb[24].mxu0 }
 0x4f6   :  { %v3143_v33 = vpack.c.bf16 %v1013_v32, %v965_v28  ;;  %v3372_v34 = vpop.f32.mrb[25].mxu0 }
 0x4f7   :  { %v1016_v35 = vpop.f32.mrb[26].mxu0  ;;  %v3527_v34 = vld [vmem:[%s4414_s10 + $0x28] sm:$0xff]  }
 0x4f8   :  { %v3373_v36 = vpop.f32.mrb[27].mxu0  ;;  %1051 = vrot.lane.b32.xlu0 %v3143_v33, %s3671_s18  ;;  %v3528_v35 = vld [vmem:[%s4414_s10 + $0x70] sm:$0xff]  }
 0x4f9   :  { %v3529_v36 = vld [vmem:[%s4414_s10 + $0x30] sm:$0xff]  }
 0x52d   :  { %v1038_v37 = vpop.permute.xlu0 %1037 }
 0x52e   :  { %v1055_v38 = vsel %vm143_vm2, %v3140_v59, %v1038_v37  ;;  %v3510_v59 = vld [vmem:[%s4412_s8] ss:$8 sps:$4 sm:$0xff]   ;;  %v3530_v37 = vld [vmem:[%s4414_s10 + $0x78] sm:$0xff]  }
 0x562   :  { %v1045_v27 = vpop.permute.xlu1 %1044 }
 0x563   :  { %v1058_v39 = vsel %vm1056_vm4, %v1055_v38, %v1045_v27  ;;  %v3531_v27 = vld [vmem:[%s4414_s10 + $0x38] sm:$0xff]   ;;  %v1182_v38 = vlaneseq }
 0x56a   :  { %v1052_v40 = vpop.permute.xlu0 %1051 }
 0x56b   :  { %v1061_v41 = vsel %vm1059_vm5, %v1058_v39, %v1052_v40  ;;  %v4062_v39 = vshrl.u32 %v1182_v38, 7 }
 0x56c   :  { %3379 = vmatmul.mubr.msk.bf16.vlgmr.msra.gmra.mrb[40].mxu1 %vm78_vm1, %v1061_v41  ;;  %v1180_v41 = vld [vmem:[%s4413_s9] sm:$0x3] }
 0x56d   :  { %3189 = vmatpush3.bf16.msra.mxu1 %v3517_v0  ;;  %v1184_v40 = vsub.s32 0, %v4062_v39 }
 0x56e   :  { %3190 = vmatprep.subr.bf16.mxu1 %v3518_v2 }
 0x571   :  { %3191 = vmatpush3.bf16.msra.mxu1 %v3519_v26 }
 0x572   :  { %3192 = vmatprep.subr.bf16.mxu1 %v3520_v23 }
 0x575   :  { %3193 = vmatpush3.bf16.msra.mxu1 %v3521_v3 }
 0x576   :  { %3194 = vmatprep.subr.bf16.mxu1 %v3522_v4 }
 0x579   :  { %3195 = vmatpush3.bf16.msra.mxu1 %v3523_v5 }
 0x57a   :  { %3196 = vmatprep.subr.bf16.mxu1 %v3524_v8 }
 0x57d   :  { %3197 = vmatpush3.bf16.msra.mxu1 %v3525_v9 }
 0x57e   :  { %3198 = vmatprep.subr.bf16.mxu1 %v3526_v10 }
 0x581   :  { %3199 = vmatpush3.bf16.msra.mxu1 %v3527_v34 }
 0x582   :  { %3200 = vmatprep.subr.bf16.mxu1 %v3528_v35  ;;  %v3023_v35 = vld [vmem:[%s4417_s13] ss:$0 sm:$0xff] }
 0x585   :  { %3201 = vmatpush3.bf16.msra.mxu1 %v3529_v36 }
 0x586   :  { %3202 = vmatprep.subr.bf16.mxu1 %v3530_v37 }
 0x589   :  { %3203 = vmatpush3.bf16.msra.mxu1 %v3531_v27 }
 0x58a   :  { %3408 = vmatprep.subr.bf16.mxu1 %v3662_v1 }
 0x63f   :  { %v1121_v20 = vpop.f32.mrb[40].mxu1 }
 0x640   :  { %v1122_v24 = vadd.f32 %v2994_v42, %v1121_v20  ;;  %v3380_v17 = vpop.f32.mrb[41].mxu1  ;;  %v1185_v20 = vrot.slane %v1180_v41, %v1184_v40 }
 0x641   :  { %v1124_v43 = vpop.f32.mrb[42].mxu1 }
 0x642   :  { %v1125_v44 = vadd.f32 %v2994_v42, %v1124_v43  ;;  %v3381_v45 = vpop.f32.mrb[43].mxu1  ;;  %v1128_v46 = vadd.f32 %v1122_v24, %v3769_v6  ;;  %v1188_v42 = vsub.s32 1, %v4062_v39  ;;  %v3117_v39 = vld [vmem:[%s4415_s11 + $0x1] ss:$0 sm:$0xff] }
 0x644   :  { %v1132_v47 = vsel %vm78_vm1, %v1128_v46, 0.0  ;;  %v1129_v48 = vadd.f32 %v1125_v44, %v3771_v7  ;;  %v3512_v7 = vld [vmem:[%s4412_s8 + $0x4] ss:$8 sps:$4 sm:$0xff]   ;;  %v1189_v24 = vrot.slane %v1180_v41, %v1188_v42  ;;  %v3029_v41 = vld [vmem:[%s4407_s3 + $0x1] ss:$0 sm:$0xff] }
 0x645   :  { %1133 = vadd.xlane.f32.xlu1 %v1132_v47  ;;  %1215 = vmatprep.subr.bf16.mxu0 %v3512_v7 }
 0x646   :  { %v1135_v49 = vsel %vm78_vm1, %v1129_v48, 0.0  ;;  %1216 = vmatpush1.bf16.msra.mxu0 %v3510_v59 }
 0x647   :  { %1136 = vadd.xlane.f32.xlu0 %v1135_v49  ;;  %1217 = vmatprep.subr.bf16.mxu0 %v3515_v60 }
 0x64a   :  { %1218 = vmatpush1.bf16.msra.mxu0 %v3513_v61 }
 0x64b   :  { %3382 = vmatprep.subr.bf16.mxu0 %v3662_v1 }
 0x6d2   :  { %v1134_v50 = vpop.xlane.xlu1 %1133 }
 0x6d3   :  { %v1139_v51 = vmul.f32 0.03125, %v1134_v50 }
 0x6d4   :  { %v1137_v52 = vpop.xlane.xlu0 %1136 }
 0x6d5   :  { %v1141_v53 = vsub.f32 %v1128_v46, %v1139_v51  ;;  %v1140_v54 = vmul.f32 0.03125, %v1137_v52 }
 0x6d7   :  { %v1142_v55 = vsub.f32 %v1129_v48, %v1140_v54  ;;  %v1143_v56 = vmul.f32 %v1141_v53, %v1141_v53 }
 0x6d9   :  { %v1145_v57 = vsel %vm78_vm1, %v1143_v56, 0.0  ;;  %v1144_v58 = vmul.f32 %v1142_v55, %v1142_v55 }
 0x6da   :  { %1146 = vadd.xlane.f32.xlu0 %v1145_v57  ;;  %v3005_v57 = vld [vmem:[%s4415_s11] ss:$0 sm:$0xff] }
 0x6db   :  { %v1148_v6 = vsel %vm78_vm1, %v1144_v58, 0.0 }
 0x6dc   :  { %1149 = vadd.xlane.f32.xlu1 %v1148_v6 }
 0x767   :  { %v1147_v11 = vpop.xlane.xlu0 %1146 }
 0x768   :  { %v1151_v12 = vmul.f32 0.03125, %v1147_v11 }
 0x769   :  { %v1150_v13 = vpop.xlane.xlu1 %1149 }
 0x76a   :  { %v1153_v14 = vadd.f32 1e-05, %v1151_v12  ;;  %v1152_v15 = vmul.f32 0.03125, %v1150_v13 }
 0x76c   :  { %3590 = vrsqrt.f32 %v1153_v14  ;;  %v1154_v16 = vadd.f32 1e-05, %v1152_v15  ;;  %v3532_v15 = vld [vmem:[%s4406_s2 + $0x10] sm:$0xff]  }
 0x76e   :  { %3592 = vrsqrt.f32 %v1154_v16  ;;  %v3533_v16 = vld [vmem:[%s4406_s2 + $0x18] sm:$0xff]  }
 0x776   :  { %v3591_v18 = vpop.eup %3590 }
 0x777   :  { %v1157_v21 = vmul.f32 %v3591_v18, %v1141_v53 }
 0x778   :  { %v3593_v22 = vpop.eup %3592 }
 0x779   :  { %v1165_v25 = vmul.f32 %v2998_v19, %v1157_v21  ;;  %v1158_v28 = vmul.f32 %v3593_v22, %v1142_v55 }
 0x77b   :  { %v1166_v31 = vmul.f32 %v2998_v19, %v1158_v28  ;;  %v1173_v30 = vadd.f32 %v2999_v29, %v1165_v25 }
 0x77d   :  { %v1174_v32 = vadd.f32 %v2999_v29, %v1166_v31  ;;  %v3022_v31 = vld [vmem:[%s4416_s12] ss:$0 sm:$0xff] }
 0x77f   :  { %v1175_v33 = vpack.c.bf16 %v1174_v32, %v1173_v30 }
 0x781   :  { %3004 = vmatmul.mubr.msk.bf16.vlgmr.msra.gmra.mrb[28].mxu0 %vm78_vm1, %v1175_v33 }
 0x782   :  { %3386 = vmatprep.mubr.msk.bf16.mxu0 %vm3663_vm0, %v3662_v1  ;;  %3383 = vmatpush3.bf16.msra.mxu0 %v3532_v15 }
 0x783   :  { %3384 = vmatprep.subr.bf16.mxu0 %v3662_v1 }
 0x786   :  { %3385 = vmatpush3.bf16.msra.mxu0 %v3533_v16 }
 0x787   :  { %3390 = vmatprep.subr.bf16.mxu0 %v3662_v1 }
 0x854   :  { %v1249_v17 = vpop.f32.mrb[28].mxu0 }
 0x855   :  { %v1250_v43 = vadd.f32 %v1249_v17, %v1185_v20  ;;  %v1251_v44 = vpop.f32.mrb[29].mxu0 }
 0x856   :  { %v1252_v45 = vadd.f32 %v1251_v44, %v1189_v24  ;;  %v1253_v46 = vpop.f32.mrb[30].mxu0 }
 0x857   :  { %v1254_v47 = vadd.f32 %v1253_v46, %v1185_v20  ;;  %v1255_v48 = vpop.f32.mrb[31].mxu0  ;;  %v1258_v50 = vmax.f32 %v1250_v43, 0.0 }
 0x858   :  { %v1256_v49 = vadd.f32 %v1255_v48, %v1189_v24  ;;  %v1259_v52 = vmax.f32 %v1252_v45, 0.0 }
 0x859   :  { %v1260_v51 = vmax.f32 %v1254_v47, 0.0 }
 0x85a   :  { %v1261_v53 = vmax.f32 %v1256_v49, 0.0 }
 0x85b   :  { %v1262_v54 = vpack.c.bf16 %v1260_v51, %v1258_v50 }
 0x85c   :  { %v1263_v55 = vpack.c.bf16 %v1261_v53, %v1259_v52 }
 0x85e   :  { %1431 = vmatprep.mubr.bf16.mxu1 %v1263_v55 }
 0x85f   :  { %1432 = vmatmul.mubr.bf16.vlgmr.msra.gmra.mrb[44].mxu1 %v1262_v54 }
 0x860   :  { %3410 = vmatprep.mubr.msk.bf16.mxu1 %vm3663_vm0, %v3662_v1 }
 0x932   :  { %v3204_v56 = vpop.f32.mrb[44].mxu1 }
 0x933   :  { %v3205_v58 = vpop.f32.mrb[45].mxu1 }
 0x934   :  { %v3206_v6 = vadd.f32 %v3205_v58, %v3204_v56  ;;  %v3207_v7 = vpop.f32.mrb[46].mxu1 }
 0x935   :  { %v3208_v59 = vpop.f32.mrb[47].mxu1 }
 0x936   :  { %v1434_v60 = vadd.f32 %v3206_v6, %v3005_v57  ;;  %v3209_v61 = vadd.f32 %v3208_v59, %v3207_v7 }
 0x938   :  { %v1437_v63 = vadd.f32 %v3209_v61, %v3005_v57  ;;  %v1440_v0 = vadd.f32 %v1434_v60, %v1173_v30 }
 0x93a   :  { %v1444_v2 = vsel %vm78_vm1, %v1440_v0, 0.0  ;;  %v1441_v26 = vadd.f32 %v1437_v63, %v1174_v32 }
 0x93b   :  { %1445 = vadd.xlane.f32.xlu0 %v1444_v2 }
 0x93c   :  { %v1447_v23 = vsel %vm78_vm1, %v1441_v26, 0.0 }
 0x93d   :  { %1448 = vadd.xlane.f32.xlu1 %v1447_v23 }
 0x9c8   :  { %v1446_v3 = vpop.xlane.xlu0 %1445 }
 0x9c9   :  { %v1450_v4 = vmul.f32 0.03125, %v1446_v3 }
 0x9ca   :  { %v1449_v5 = vpop.xlane.xlu1 %1448 }
 0x9cb   :  { %v1452_v8 = vsub.f32 %v1440_v0, %v1450_v4  ;;  %v1451_v9 = vmul.f32 0.03125, %v1449_v5 }
 0x9cd   :  { %v1453_v10 = vsub.f32 %v1441_v26, %v1451_v9  ;;  %v1454_v11 = vmul.f32 %v1452_v8, %v1452_v8 }
 0x9cf   :  { %v1456_v12 = vsel %vm78_vm1, %v1454_v11, 0.0  ;;  %v1455_v13 = vmul.f32 %v1453_v10, %v1453_v10 }
 0x9d0   :  { %1457 = vadd.xlane.f32.xlu0 %v1456_v12 }
 0x9d1   :  { %v1459_v14 = vsel %vm78_vm1, %v1455_v13, 0.0 }
 0x9d2   :  { %1460 = vadd.xlane.f32.xlu1 %v1459_v14 }
 0xa5d   :  { %v1458_v18 = vpop.xlane.xlu0 %1457 }
 0xa5e   :  { %v1462_v19 = vmul.f32 0.03125, %v1458_v18 }
 0xa5f   :  { %v1461_v21 = vpop.xlane.xlu1 %1460 }
 0xa60   :  { %v1464_v22 = vadd.f32 1e-05, %v1462_v19  ;;  %v1463_v25 = vmul.f32 0.03125, %v1461_v21 }
 0xa62   :  { %3594 = vrsqrt.f32 %v1464_v22  ;;  %v1465_v28 = vadd.f32 1e-05, %v1463_v25 }
 0xa64   :  { %3596 = vrsqrt.f32 %v1465_v28 }
 0xa6c   :  { %v3595_v29 = vpop.eup %3594 }
 0xa6d   :  { %v1468_v30 = vmul.f32 %v3595_v29, %v1452_v8 }
 0xa6e   :  { %v3597_v32 = vpop.eup %3596 }
 0xa6f   :  { %v1476_v33 = vmul.f32 %v3022_v31, %v1468_v30  ;;  %v1469_v34 = vmul.f32 %v3597_v32, %v1453_v10 }
 0xa71   :  { %v1477_v36 = vmul.f32 %v3022_v31, %v1469_v34  ;;  %v4096_v37 = vadd.f32 %v3023_v35, %v1476_v33 }
 0xa73   :  { %v4098_v27 = vadd.f32 %v3023_v35, %v1477_v36 }
 0xa75   :  { %v1486_v38 = vpack.c.bf16 %v4098_v27, %v4096_v37 }
 0xa77   :  { %3387 = vmatmul.mubr.msk.bf16.vlgmr.msra.gmra.mrb[32].mxu0 %vm78_vm1, %v1486_v38 }
 0xa78   :  { %3392 = vmatprep.mubr.msk.bf16.mxu0 %vm3663_vm0, %v3662_v1 }
 0xb4a   :  { %v1549_v20 = vpop.f32.mrb[32].mxu0 }
 0xb4b   :  { %v1550_v24 = vadd.f32 %v3029_v41, %v1549_v20  ;;  %v3388_v17 = vpop.f32.mrb[33].mxu0 }
 0xb4c   :  { %v1552_v43 = vpop.f32.mrb[34].mxu0 }
 0xb4d   :  { %v3144_v44 = vpack.c.bf16 %v1550_v24, %v1550_v24  ;;  %v1553_v45 = vadd.f32 %v3029_v41, %v1552_v43  ;;  %v3389_v46 = vpop.f32.mrb[35].mxu0 }
 0xb4f   :  { %v3145_v47 = vpack.c.bf16 %v1553_v45, %v1553_v45  ;;  %1562 = vrot.lane.b32.xlu0 %v3144_v44, %s3665_s24 }
 0xb51   :  { %1564 = vrot.lane.b32.xlu1 %v3145_v47, %s3665_s24 }
 0xb53   :  { %1568 = vrot.lane.b32.xlu0 %v3145_v47, %s3664_s23 }
 0xb55   :  { %1566 = vrot.lane.b32.xlu1 %v3144_v44, %s3664_s23 }
 0xb57   :  { %1572 = vrot.lane.b32.xlu0 %v3145_v47, %s3666_s25 }
 0xb59   :  { %1570 = vrot.lane.b32.xlu1 %v3144_v44, %s3666_s25 }
 0xb5b   :  { %1622 = vrot.lane.b32.xlu0 %v3145_v47, %s3667_s26 }
 0xb5d   :  { %1574 = vrot.lane.b32.xlu1 %v3144_v44, %s3667_s26 }
 0xbc1   :  { %v1563_v48 = vpop.permute.xlu0 %1562 }
 0xbc2   :  { %v4116_v49 = vcombine.low %v1563_v48, %v1563_v48 }
 0xbc3   :  { %v1565_v50 = vpop.permute.xlu1 %1564 }
 0xbc4   :  { %v4118_v51 = vcombine.low %v1565_v50, %v1565_v50  ;;  %1672 = vrot.lane.b32.xlu1 %v4116_v49, %s3667_s26 }
 0xbc5   :  { %v1569_v52 = vpop.permute.xlu0 %1568 }
 0xbc6   :  { %1722 = vrot.lane.b32.xlu0 %v4118_v51, %s3667_s26  ;;  %v4124_v54 = vcombine.low %v1569_v52, %v1569_v52 }
 0xbc7   :  { %v1567_v53 = vpop.permute.xlu1 %1566 }
 0xbc8   :  { %v4126_v55 = vcombine.low %v1567_v53, %v1567_v53 }
 0xbc9   :  { %v1573_v56 = vpop.permute.xlu0 %1572 }
 0xbca   :  { %1822 = vrot.lane.b32.xlu0 %v4124_v54, %s3667_s26  ;;  %1772 = vrot.lane.b32.xlu1 %v4126_v55, %s3667_s26  ;;  %v4132_v58 = vcombine.low %v1573_v56, %v1573_v56 }
 0xbcb   :  { %v1571_v57 = vpop.permute.xlu1 %1570 }
 0xbcc   :  { %v4134_v6 = vcombine.low %v1571_v57, %v1571_v57 }
 0xbcd   :  { %v1623_v60 = vpop.permute.xlu0 %1622 }
 0xbce   :  { %1922 = vrot.lane.b32.xlu0 %v4132_v58, %s3667_s26  ;;  %1872 = vrot.lane.b32.xlu1 %v4134_v6, %s3667_s26  ;;  %v1628_v61 = vsel %vm143_vm2, %v1623_v60, 0 }
 0xbcf   :  { %v1575_v7 = vpop.permute.xlu1 %1574 }
 0xbd0   :  { %v1580_v59 = vsel %vm143_vm2, %v1575_v7, 0 }
 0xbd1   :  { %3391 = vmatpush3.bf16.xpose.msra.mxu0 %v1580_v59 }
 0xbd2   :  { %2066 = vrot.lane.b32.xlu0 %v3144_v44, %s3668_s27  ;;  %2114 = vrot.lane.b32.xlu1 %v3145_v47, %s3668_s27 }
 0xbd3   :  { %3396 = vmatprep.subr.bf16.mxu0 %v3662_v1 }
 0xbd8   :  { %3393 = vmatmul.mubr.msk.bf16.vlgmr.msra.gmra.mrb[36].mxu0 %vm143_vm2, %v3144_v44 }
 0xbd9   :  { %3397 = vmatpush3.bf16.xpose.msra.mxu0 %v1628_v61  ;;  %3398 = vmatprep.mubr.msk.bf16.mxu0 %vm3663_vm0, %v3662_v1 }
 0xbda   :  { %3402 = vmatprep.subr.bf16.mxu0 %v3662_v1 }
 0xbe0   :  { %3399 = vmatmul.mubr.msk.bf16.vlgmr.msra.gmra.mrb[40].mxu0 %vm143_vm2, %v3145_v47 }
 0xbe1   :  { %3404 = vmatprep.mubr.msk.bf16.mxu0 %vm3663_vm0, %v3662_v1 }
 0xc36   :  { %v1673_v63 = vpop.permute.xlu1 %1672 }
 0xc37   :  { %v1678_v0 = vsel %vm143_vm2, %v1673_v63, 0 }
 0xc38   :  { %v1723_v2 = vpop.permute.xlu0 %1722  ;;  %3403 = vmatpush3.bf16.xpose.msra.mxu0 %v1678_v0 }
 0xc39   :  { %v1728_v26 = vsel %vm143_vm2, %v1723_v2, 0  ;;  %3414 = vmatprep.subr.bf16.mxu0 %v3662_v1 }
 0xc3a   :  { %3409 = vmatpush3.bf16.xpose.msra.mxu1 %v1728_v26 }
 0xc3b   :  { %3420 = vmatprep.subr.bf16.mxu1 %v3662_v1 }
 0xc3c   :  { %v1773_v23 = vpop.permute.xlu1 %1772  ;;  %v1823_v3 = vpop.permute.xlu0 %1822 }
 0xc3d   :  { %v1778_v4 = vsel %vm143_vm2, %v1773_v23, 0  ;;  %v1828_v5 = vsel %vm143_vm2, %v1823_v3, 0 }
 0xc3f   :  { %3405 = vmatmul.mubr.msk.bf16.vlgmr.msra.gmra.mrb[44].mxu0 %vm143_vm2, %v1563_v48 }
 0xc40   :  { %3415 = vmatpush3.bf16.xpose.msra.mxu0 %v1778_v4  ;;  %3416 = vmatprep.mubr.msk.bf16.mxu0 %vm3663_vm0, %v3662_v1  ;;  %v1873_v8 = vpop.permute.xlu1 %1872  ;;  %v1923_v9 = vpop.permute.xlu0 %1922 }
 0xc41   :  { %3411 = vmatmul.mubr.msk.bf16.vlgmr.msra.gmra.mrb[48].mxu1 %vm143_vm2, %v1565_v50  ;;  %3426 = vmatprep.subr.bf16.mxu0 %v3662_v1  ;;  %v1878_v10 = vsel %vm143_vm2, %v1873_v8, 0  ;;  %v1928_v11 = vsel %vm143_vm2, %v1923_v9, 0 }
 0xc42   :  { %3421 = vmatpush3.bf16.xpose.msra.mxu1 %v1828_v5  ;;  %3422 = vmatprep.mubr.msk.bf16.mxu1 %vm3663_vm0, %v3662_v1 }
 0xc43   :  { %3432 = vmatprep.subr.bf16.mxu1 %v3662_v1 }
 0xc44   :  { %v2067_v12 = vpop.permute.xlu0 %2066  ;;  %v2115_v13 = vpop.permute.xlu1 %2114 }
 0xc45   :  { %v2072_v14 = vsel %vm639_vm3, %v2067_v12, 0  ;;  %v2120_v15 = vsel %vm639_vm3, %v2115_v13, 0 }
 0xc47   :  { %3417 = vmatmul.mubr.msk.bf16.vlgmr.msra.gmra.mrb[48].mxu0 %vm143_vm2, %v1567_v53 }
 0xc48   :  { %3427 = vmatpush3.bf16.xpose.msra.mxu0 %v1878_v10  ;;  %3428 = vmatprep.mubr.msk.bf16.mxu0 %vm3663_vm0, %v3662_v1 }
 0xc49   :  { %3423 = vmatmul.mubr.msk.bf16.vlgmr.msra.gmra.mrb[52].mxu1 %vm143_vm2, %v1569_v52  ;;  %3438 = vmatprep.subr.bf16.mxu0 %v3662_v1 }
 0xc4a   :  { %3433 = vmatpush3.bf16.xpose.msra.mxu1 %v1928_v11  ;;  %3434 = vmatprep.mubr.msk.bf16.mxu1 %vm3663_vm0, %v3662_v1 }
 0xc4b   :  { %3444 = vmatprep.subr.bf16.mxu1 %v3662_v1 }
 0xc4f   :  { %3429 = vmatmul.mubr.msk.bf16.vlgmr.msra.gmra.mrb[52].mxu0 %vm143_vm2, %v1571_v57 }
 0xc50   :  { %3439 = vmatpush3.bf16.msra.mxu0 %v2072_v14  ;;  %3440 = vmatprep.mubr.msk.bf16.mxu0 %vm3663_vm0, %v3662_v1 }
 0xc51   :  { %3435 = vmatmul.mubr.msk.bf16.vlgmr.msra.gmra.mrb[56].mxu1 %vm143_vm2, %v1573_v56  ;;  %3450 = vmatprep.subr.bf16.mxu0 %v3662_v1 }
 0xc52   :  { %3445 = vmatpush3.bf16.msra.mxu1 %v2120_v15  ;;  %3446 = vmatprep.mubr.msk.bf16.mxu1 %vm3663_vm0, %v3662_v1 }
 0xc53   :  { %3456 = vmatprep.subr.bf16.mxu1 %v3662_v1 }
 0xcab   :  { %v1616_v16 = vpop.f32.mrb[36].mxu0 }
 0xcac   :  { %v3394_v18 = vpop.f32.mrb[37].mxu0  ;;  %v1970_v19 = vsel %vm143_vm2, %v1616_v16, -inf }
 0xcad   :  { %1971 = vmax.xlane.f32.xlu1 %v1970_v19  ;;  %v1619_v21 = vpop.f32.mrb[38].mxu0 }
 0xcae   :  { %v3395_v22 = vpop.f32.mrb[39].mxu0 }
 0xcb3   :  { %v1664_v25 = vpop.f32.mrb[40].mxu0 }
 0xcb4   :  { %v3400_v28 = vpop.f32.mrb[41].mxu0  ;;  %v1973_v29 = vsel %vm143_vm2, %v1664_v25, -inf }
 0xcb5   :  { %1974 = vmax.xlane.f32.xlu0 %v1973_v29  ;;  %v1667_v31 = vpop.f32.mrb[42].mxu0 }
 0xcb6   :  { %v3401_v30 = vpop.f32.mrb[43].mxu0 }
 0xd12   :  { %v1714_v32 = vpop.f32.mrb[44].mxu0 }
 0xd13   :  { %v3406_v33 = vpop.f32.mrb[45].mxu0  ;;  %v1976_v34 = vsel %vm143_vm2, %v1714_v32, -inf }
 0xd14   :  { %v1764_v35 = vpop.f32.mrb[48].mxu1  ;;  %1977 = vmax.xlane.f32.xlu0 %v1976_v34  ;;  %v1717_v36 = vpop.f32.mrb[46].mxu0 }
 0xd15   :  { %v3407_v38 = vpop.f32.mrb[47].mxu0  ;;  %v3412_v41 = vpop.f32.mrb[49].mxu1  ;;  %v1979_v20 = vsel %vm143_vm2, %v1764_v35, -inf }
 0xd16   :  { %v1767_v24 = vpop.f32.mrb[50].mxu1  ;;  %1980 = vmax.xlane.f32.xlu1 %v1979_v20 }
 0xd17   :  { %v3413_v17 = vpop.f32.mrb[51].mxu1 }
 0xd1a   :  { %v4190_v43 = vpop.f32.mrb[48].mxu0 }
 0xd1b   :  { %v3418_v44 = vpop.f32.mrb[49].mxu0  ;;  %v1982_v45 = vsel %vm143_vm2, %v4190_v43, -inf }
 0xd1c   :  { %v1864_v46 = vpop.f32.mrb[52].mxu1  ;;  %1983 = vmax.xlane.f32.xlu0 %v1982_v45  ;;  %v1817_v47 = vpop.f32.mrb[50].mxu0 }
 0xd1d   :  { %v3419_v48 = vpop.f32.mrb[51].mxu0  ;;  %v3424_v50 = vpop.f32.mrb[53].mxu1  ;;  %v1985_v52 = vsel %vm143_vm2, %v1864_v46, -inf }
 0xd1e   :  { %v1867_v53 = vpop.f32.mrb[54].mxu1  ;;  %1986 = vmax.xlane.f32.xlu1 %v1985_v52 }
 0xd1f   :  { %v3425_v56 = vpop.f32.mrb[55].mxu1 }
 0xd22   :  { %v4195_v57 = vpop.f32.mrb[52].mxu0 }
 0xd23   :  { %v3430_v7 = vpop.f32.mrb[53].mxu0  ;;  %v1988_v59 = vsel %vm143_vm2, %v4195_v57, -inf }
 0xd24   :  { %v1964_v60 = vpop.f32.mrb[56].mxu1  ;;  %1989 = vmax.xlane.f32.xlu0 %v1988_v59  ;;  %v1917_v61 = vpop.f32.mrb[54].mxu0 }
 0xd25   :  { %v3431_v63 = vpop.f32.mrb[55].mxu0  ;;  %v3436_v0 = vpop.f32.mrb[57].mxu1  ;;  %v1991_v2 = vsel %vm143_vm2, %v1964_v60, -inf }
 0xd26   :  { %v1967_v26 = vpop.f32.mrb[58].mxu1  ;;  %1992 = vmax.xlane.f32.xlu1 %v1991_v2 }
 0xd27   :  { %v3437_v23 = vpop.f32.mrb[59].mxu1 }
 0xd37   :  { %2162 = vrot.lane.b32.xlu1 %v4116_v49, %s3668_s27 }
 0xd3a   :  { %2210 = vrot.lane.b32.xlu0 %v4118_v51, %s3668_s27  ;;  %v1972_v3 = vpop.xlane.xlu1 %1971 }
 0xd3b   :  { %v1994_v5 = vsub.f32 %v1616_v16, %v1972_v3 }
 0xd3d   :  { %v2002_v9 = vmul.f32 1.442695, %v1994_v5 }
 0xd3f   :  { %3598 = vpow2.f32 %v2002_v9 }
 0xd42   :  { %v1975_v4 = vpop.xlane.xlu0 %1974 }
 0xd43   :  { %v1995_v8 = vsub.f32 %v1664_v25, %v1975_v4 }
 0xd45   :  { %v2004_v10 = vmul.f32 1.442695, %v1995_v8 }
 0xd47   :  { %3600 = vpow2.f32 %v2004_v10 }
 0xd49   :  { %v3599_v11 = vpop.eup %3598 }
 0xd4a   :  { %v2018_v13 = vsel %vm143_vm2, %v3599_v11, 0.0 }
 0xd51   :  { %v3601_v12 = vpop.eup %3600 }
 0xd52   :  { %v2021_v14 = vsel %vm143_vm2, %v3601_v12, 0.0 }
 0xd59   :  { %2019 = vadd.xlane.f32.xlu0 %v2018_v13 }
 0xd5b   :  { %2022 = vadd.xlane.f32.xlu1 %v2021_v14 }
 0xd6c   :  { %2258 = vrot.lane.b32.xlu1 %v4126_v55, %s3668_s27 }
 0xda1   :  { %v1978_v49 = vpop.xlane.xlu0 %1977 }
 0xda2   :  { %v1996_v51 = vsub.f32 %v1714_v32, %v1978_v49 }
 0xda3   :  { %v1981_v15 = vpop.xlane.xlu1 %1980 }
 0xda4   :  { %v2006_v16 = vmul.f32 1.442695, %v1996_v51  ;;  %v1997_v18 = vsub.f32 %v1764_v35, %v1981_v15 }
 0xda6   :  { %3602 = vpow2.f32 %v2006_v16  ;;  %v2008_v19 = vmul.f32 1.442695, %v1997_v18 }
 0xda8   :  { %3604 = vpow2.f32 %v2008_v19 }
 0xda9   :  { %v1984_v41 = vpop.xlane.xlu0 %1983 }
 0xdaa   :  { %v1998_v20 = vsub.f32 %v4190_v43, %v1984_v41 }
 0xdab   :  { %v1987_v21 = vpop.xlane.xlu1 %1986 }
 0xdac   :  { %v1999_v22 = vsub.f32 %v1864_v46, %v1987_v21  ;;  %v2010_v17 = vmul.f32 1.442695, %v1998_v20 }
 0xdae   :  { %v2012_v25 = vmul.f32 1.442695, %v1999_v22 }
 0xdb0   :  { %v4208_v28 = vpop.eup %3602  ;;  %3606 = vpow2.f32 %v2012_v25 }
 0xdb1   :  { %v2024_v29 = vsel %vm143_vm2, %v4208_v28, 0.0  ;;  %v1990_v24 = vpop.xlane.xlu0 %1989 }
 0xdb2   :  { %v4212_v31 = vpop.eup %3604  ;;  %2025 = vadd.xlane.f32.xlu0 %v2024_v29  ;;  %v2000_v44 = vsub.f32 %v4195_v57, %v1990_v24 }
 0xdb3   :  { %v1993_v55 = vpop.xlane.xlu1 %1992  ;;  %v2027_v30 = vsel %vm143_vm2, %v4212_v31, 0.0 }
 0xdb4   :  { %v2001_v32 = vsub.f32 %v1964_v60, %v1993_v55  ;;  %2028 = vadd.xlane.f32.xlu1 %v2027_v30  ;;  %v2014_v45 = vmul.f32 1.442695, %v2000_v44 }
 0xdb5   :  { %v2211_v46 = vpop.permute.xlu0 %2210 }
 0xdb6   :  { %v2016_v33 = vmul.f32 1.442695, %v2001_v32  ;;  %v2216_v63 = vsel %vm639_vm3, %v2211_v46, 0 }
 0xdb7   :  { %v2163_v48 = vpop.permute.xlu1 %2162 }
 0xdb8   :  { %3608 = vpow2.f32 %v2016_v33  ;;  %v2168_v60 = vsel %vm639_vm3, %v2163_v48, 0 }
 0xdb9   :  { %3610 = vpow2.f32 %v2010_v17 }
 0xdba   :  { %v4216_v34 = vpop.eup %3606  ;;  %3612 = vpow2.f32 %v2014_v45 }
 0xdbb   :  { %v2033_v35 = vsel %vm143_vm2, %v4216_v34, 0.0 }
 0xdbc   :  { %2034 = vadd.xlane.f32.xlu1 %v2033_v35 }
 0xdc2   :  { %v4220_v36 = vpop.eup %3608 }
 0xdc3   :  { %v2039_v38 = vsel %vm143_vm2, %v4220_v36, 0.0  ;;  %v4230_v47 = vpop.eup %3610 }
 0xdc4   :  { %2040 = vadd.xlane.f32.xlu1 %v2039_v38  ;;  %v4234_v52 = vpop.eup %3612 }
 0xdc8   :  { %2306 = vrot.lane.b32.xlu0 %v4124_v54, %s3668_s27  ;;  %v2030_v54 = vsel %vm143_vm2, %v4230_v47, 0.0 }
 0xdd5   :  { %2354 = vrot.lane.b32.xlu1 %v4134_v6, %s3668_s27  ;;  %v2036_v6 = vsel %vm143_vm2, %v4234_v52, 0.0 }
 0xde6   :  { %v2020_v50 = vpop.xlane.xlu0 %2019 }
 0xde7   :  { %3614 = vrcp.f32 %v2020_v50  ;;  %2031 = vadd.xlane.f32.xlu0 %v2030_v54 }
 0xde8   :  { %v2023_v43 = vpop.xlane.xlu1 %2022 }
 0xde9   :  { %3616 = vrcp.f32 %v2023_v43 }
 0xdeb   :  { %2037 = vadd.xlane.f32.xlu0 %v2036_v6 }
 0xdec   :  { %v2259_v0 = vpop.permute.xlu1 %2258 }
 0xdf1   :  { %v3615_v53 = vpop.eup %3614 }
 0xdf2   :  { %v2050_v56 = vmul.f32 %v3615_v53, %v3599_v11  ;;  %v2264_v11 = vsel %vm639_vm3, %v2259_v0, 0 }
 0xdf3   :  { %v3617_v57 = vpop.eup %3616 }
 0xdf4   :  { %v2051_v7 = vmul.f32 %v3617_v57, %v3601_v12  ;;  %v2058_v59 = vpack.c.bf16 %v2050_v56, %v2050_v56 }
 0xdf6   :  { %3441 = vmatmul.mubr.msk.bf16.vlgmr.msra.gmra.mrb[56].mxu0 %vm143_vm2, %v2058_v59  ;;  %v2059_v61 = vpack.c.bf16 %v2051_v7, %v2051_v7  ;;  %v3534_v59 = vld [vmem:[%s4408_s4 + $0x10] sm:$0xff]  }
 0xdf7   :  { %3451 = vmatpush3.bf16.msra.mxu0 %v2168_v60  ;;  %3452 = vmatprep.mubr.msk.bf16.mxu0 %vm3663_vm0, %v3662_v1  ;;  %v3535_v60 = vld [vmem:[%s4408_s4 + $0x18] sm:$0xff]  }
 0xdf8   :  { %3447 = vmatmul.mubr.msk.bf16.vlgmr.msra.gmra.mrb[60].mxu1 %vm143_vm2, %v2059_v61  ;;  %3462 = vmatprep.subr.bf16.mxu0 %v3662_v1 }
 0xdf9   :  { %3457 = vmatpush3.bf16.msra.mxu1 %v2216_v63  ;;  %3458 = vmatprep.mubr.msk.bf16.mxu1 %vm3663_vm0, %v3662_v1 }
 0xdfa   :  { %3468 = vmatprep.subr.bf16.mxu1 %v3662_v1 }
 0xe01   :  { %2402 = vrot.lane.b32.xlu0 %v4132_v58, %s3668_s27 }
 0xe3f   :  { %v2026_v2 = vpop.xlane.xlu0 %2025 }
 0xe40   :  { %3618 = vrcp.f32 %v2026_v2 }
 0xe41   :  { %v2029_v26 = vpop.xlane.xlu1 %2028 }
 0xe42   :  { %3620 = vrcp.f32 %v2029_v26 }
 0xe43   :  { %v2307_v10 = vpop.permute.xlu0 %2306 }
 0xe44   :  { %v2312_v12 = vsel %vm639_vm3, %v2307_v10, 0 }
 0xe49   :  { %v2035_v23 = vpop.xlane.xlu1 %2034 }
 0xe4a   :  { %v3619_v3 = vpop.eup %3618  ;;  %3622 = vrcp.f32 %v2035_v23 }
 0xe4b   :  { %v2052_v4 = vmul.f32 %v3619_v3, %v4208_v28 }
 0xe4c   :  { %v3621_v5 = vpop.eup %3620 }
 0xe4d   :  { %v2053_v8 = vmul.f32 %v3621_v5, %v4212_v31  ;;  %v2060_v9 = vpack.c.bf16 %v2052_v4, %v2052_v4 }
 0xe4f   :  { %3453 = vmatmul.mubr.msk.bf16.vlgmr.msra.gmra.mrb[60].mxu0 %vm143_vm2, %v2060_v9  ;;  %v2061_v58 = vpack.c.bf16 %v2053_v8, %v2053_v8 }
 0xe50   :  { %3463 = vmatpush3.bf16.msra.mxu0 %v2264_v11  ;;  %3464 = vmatprep.mubr.msk.bf16.mxu0 %vm3663_vm0, %v3662_v1 }
 0xe51   :  { %3459 = vmatmul.mubr.msk.bf16.vlgmr.msra.gmra.mrb[64].mxu1 %vm143_vm2, %v2061_v58  ;;  %3474 = vmatprep.subr.bf16.mxu0 %v3662_v1  ;;  %v2041_v51 = vpop.xlane.xlu1 %2040 }
 0xe52   :  { %3469 = vmatpush3.bf16.msra.mxu1 %v2312_v12  ;;  %3470 = vmatprep.mubr.msk.bf16.mxu1 %vm3663_vm0, %v3662_v1  ;;  %3624 = vrcp.f32 %v2041_v51 }
 0xe53   :  { %3480 = vmatprep.subr.bf16.mxu1 %v3662_v1 }
 0xe54   :  { %v3623_v13 = vpop.eup %3622 }
 0xe55   :  { %v2055_v14 = vmul.f32 %v3623_v13, %v4216_v34  ;;  %v2355_v31 = vpop.permute.xlu1 %2354 }
 0xe56   :  { %v2360_v32 = vsel %vm639_vm3, %v2355_v31, 0 }
 0xe57   :  { %v2063_v49 = vpack.c.bf16 %v2055_v14, %v2055_v14 }
 0xe59   :  { %3471 = vmatmul.mubr.msk.bf16.vlgmr.msra.gmra.mrb[68].mxu1 %vm143_vm2, %v2063_v49 }
 0xe5a   :  { %3482 = vmatprep.mubr.msk.bf16.mxu1 %vm3663_vm0, %v3662_v1 }
 0xe5c   :  { %v3625_v16 = vpop.eup %3624 }
 0xe5d   :  { %v2057_v19 = vmul.f32 %v3625_v16, %v4220_v36 }
 0xe5f   :  { %v2065_v28 = vpack.c.bf16 %v2057_v19, %v2057_v19 }
 0xe74   :  { %v2032_v15 = vpop.xlane.xlu0 %2031 }
 0xe75   :  { %3626 = vrcp.f32 %v2032_v15  ;;  %v3066_v15 = vld [vmem:[%s4409_s5 + $0x1] ss:$0 sm:$0xff] }
 0xe78   :  { %v2038_v18 = vpop.xlane.xlu0 %2037 }
 0xe79   :  { %3628 = vrcp.f32 %v2038_v18 }
 0xe7c   :  { %v2403_v21 = vpop.permute.xlu0 %2402 }
 0xe7d   :  { %v2408_v22 = vsel %vm639_vm3, %v2403_v21, 0 }
 0xe7e   :  { %3481 = vmatpush3.bf16.msra.mxu1 %v2408_v22 }
 0xe7f   :  { %v3627_v25 = vpop.eup %3626 }
 0xe80   :  { %v2054_v29 = vmul.f32 %v3627_v25, %v4230_v47 }
 0xe81   :  { %3483 = vmatmul.mubr.msk.bf16.vlgmr.msra.gmra.mrb[72].mxu1 %vm143_vm2, %v2065_v28 }
 0xe82   :  { %v2062_v55 = vpack.c.bf16 %v2054_v29, %v2054_v29  ;;  %2681 = vmatprep.mubr.bf16.mxu1 %v3672_v62 }
 0xe83   :  { %v3629_v30 = vpop.eup %3628 }
 0xe84   :  { %3465 = vmatmul.mubr.msk.bf16.vlgmr.msra.gmra.mrb[64].mxu0 %vm143_vm2, %v2062_v55  ;;  %v2056_v33 = vmul.f32 %v3629_v30, %v4234_v52 }
 0xe85   :  { %3475 = vmatpush3.bf16.msra.mxu0 %v2360_v32  ;;  %3476 = vmatprep.mubr.msk.bf16.mxu0 %vm3663_vm0, %v3662_v1 }
 0xe86   :  { %3486 = vmatprep.subr.bf16.mxu0 %v3662_v1  ;;  %v2064_v34 = vpack.c.bf16 %v2056_v33, %v2056_v33 }
 0xe8c   :  { %3477 = vmatmul.mubr.msk.bf16.vlgmr.msra.gmra.mrb[68].mxu0 %vm143_vm2, %v2064_v34 }
 0xe8d   :  { %3490 = vmatprep.mubr.msk.bf16.mxu0 %vm3663_vm0, %v3662_v1  ;;  %3487 = vmatpush3.bf16.msra.mxu0 %v3534_v59 }
 0xe8e   :  { %3488 = vmatprep.subr.bf16.mxu0 %v3662_v1 }
 0xe91   :  { %3489 = vmatpush3.bf16.msra.mxu0 %v3535_v60 }
 0xec9   :  { %v2108_v62 = vpop.f32.mrb[56].mxu0 }
 0xeca   :  { %v3442_v35 = vpop.f32.mrb[57].mxu0 }
 0xecb   :  { %v2111_v36 = vpop.f32.mrb[58].mxu0  ;;  %v2156_v38 = vpop.f32.mrb[60].mxu1 }
 0xecc   :  { %v3146_v41 = vpack.c.bf16 %v2156_v38, %v2108_v62  ;;  %v3443_v20 = vpop.f32.mrb[59].mxu0  ;;  %v3448_v24 = vpop.f32.mrb[61].mxu1 }
 0xecd   :  { %v2159_v17 = vpop.f32.mrb[62].mxu1  ;;  %v3536_v20 = vld [vmem:[%s4412_s8 + $0x20] ss:$8 sps:$4 sm:$0xff]   ;;  %v3541_v24 = vld [vmem:[%s4412_s8 + $0x34] ss:$8 sps:$4 sm:$0xff]  }
 0xece   :  { %v3449_v44 = vpop.f32.mrb[63].mxu1  ;;  %v3539_v17 = vld [vmem:[%s4412_s8 + $0x30] ss:$8 sps:$4 sm:$0xff]  }
 0xecf   :  { %v3542_v44 = vld [vmem:[%s4414_s10 + $0xc0] sm:$0xff]  }
 0xed0   :  { %3248 = vmatprep.subr.bf16.mxu0 %v3542_v44 }
 0xf22   :  { %v2204_v45 = vpop.f32.mrb[60].mxu0 }
 0xf23   :  { %v3454_v46 = vpop.f32.mrb[61].mxu0 }
 0xf24   :  { %v2207_v47 = vpop.f32.mrb[62].mxu0  ;;  %v2252_v48 = vpop.f32.mrb[64].mxu1  ;;  %v3544_v46 = vld [vmem:[%s4414_s10 + $0xc8] sm:$0xff]  }
 0xf25   :  { %v3147_v50 = vpack.c.bf16 %v2252_v48, %v2204_v45  ;;  %v3455_v54 = vpop.f32.mrb[63].mxu0  ;;  %v3460_v52 = vpop.f32.mrb[65].mxu1  ;;  %v3543_v45 = vld [vmem:[%s4414_s10 + $0x80] sm:$0xff]   ;;  %v3545_v47 = vld [vmem:[%s4414_s10 + $0x88] sm:$0xff]   ;;  %v3546_v48 = vld [vmem:[%s4414_s10 + $0xd0] sm:$0xff]  }
 0xf26   :  { %v2255_v43 = vpop.f32.mrb[66].mxu1  ;;  %v3548_v54 = vld [vmem:[%s4414_s10 + $0xd8] sm:$0xff]  }
 0xf27   :  { %v3461_v6 = vpop.f32.mrb[67].mxu1  ;;  %2468 = vrot.lane.b32.xlu1 %v3147_v50, %s3669_s28  ;;  %v3547_v50 = vld [vmem:[%s4414_s10 + $0x90] sm:$0xff]   ;;  %v3549_v52 = vld [vmem:[%s4414_s10 + $0x98] sm:$0xff]   ;;  %v3550_v43 = vld [vmem:[%s4414_s10 + $0xe0] sm:$0xff]  }
 0xf28   :  { %v3551_v6 = vld [vmem:[%s4414_s10 + $0xa0] sm:$0xff]  }
 0xf2c   :  { %v2348_v53 = vpop.f32.mrb[68].mxu1 }
 0xf2d   :  { %v3472_v56 = vpop.f32.mrb[69].mxu1 }
 0xf2e   :  { %v2351_v57 = vpop.f32.mrb[70].mxu1 }
 0xf2f   :  { %v3473_v7 = vpop.f32.mrb[71].mxu1 }
 0xf54   :  { %v2444_v61 = vpop.f32.mrb[72].mxu1 }
 0xf55   :  { %v3484_v63 = vpop.f32.mrb[73].mxu1 }
 0xf56   :  { %v2447_v0 = vpop.f32.mrb[74].mxu1 }
 0xf57   :  { %v2300_v2 = vpop.f32.mrb[64].mxu0  ;;  %v3485_v26 = vpop.f32.mrb[75].mxu1 }
 0xf58   :  { %v3148_v23 = vpack.c.bf16 %v2348_v53, %v2300_v2  ;;  %v3466_v3 = vpop.f32.mrb[65].mxu0  ;;  %v3552_v53 = vld [vmem:[%s4414_s10 + $0xe8] sm:$0xff]   ;;  %v3072_v2 = vld [vmem:[%s4410_s6 + $0x1] ss:$0 sm:$0xff] }
 0xf59   :  { %v2303_v4 = vpop.f32.mrb[66].mxu0 }
 0xf5a   :  { %2475 = vrot.lane.b32.xlu0 %v3148_v23, %s3670_s17  ;;  %v3467_v5 = vpop.f32.mrb[67].mxu0  ;;  %v3073_v4 = vld [vmem:[%s4411_s7 + $0x1] ss:$0 sm:$0xff] }
 0xf5f   :  { %v2396_v8 = vpop.f32.mrb[68].mxu0 }
 0xf60   :  { %v3149_v9 = vpack.c.bf16 %v2444_v61, %v2396_v8  ;;  %v3478_v10 = vpop.f32.mrb[69].mxu0 }
 0xf61   :  { %v2399_v11 = vpop.f32.mrb[70].mxu0 }
 0xf62   :  { %2482 = vrot.lane.b32.xlu1 %v3149_v9, %s3671_s18  ;;  %v3479_v58 = vpop.f32.mrb[71].mxu0  ;;  %v3553_v11 = vld [vmem:[%s4414_s10 + $0xa8] sm:$0xff]  }
 0xf63   :  { %v3554_v58 = vld [vmem:[%s4414_s10 + $0xf0] sm:$0xff]  }
 0xf99   :  { %v2469_v1 = vpop.permute.xlu1 %2468 }
 0xf9a   :  { %v2486_v13 = vsel %vm143_vm2, %v3146_v41, %v2469_v1  ;;  %v3555_v1 = vld [vmem:[%s4414_s10 + $0xb0] sm:$0xff]  }
 0xfcc   :  { %v2476_v12 = vpop.permute.xlu0 %2475 }
 0xfcd   :  { %v2488_v14 = vsel %vm1056_vm4, %v2486_v13, %v2476_v12  ;;  %v3556_v12 = vld [vmem:[%s4414_s10 + $0xf8] sm:$0xff]  }
 0xfce   :  { %v3557_v13 = vld [vmem:[%s4414_s10 + $0xb8] sm:$0xff]  }
 0xfd4   :  { %v2483_v49 = vpop.permute.xlu1 %2482 }
 0xfd5   :  { %v2490_v51 = vsel %vm1059_vm5, %v2488_v14, %v2483_v49  ;;  %v3078_v14 = vld [vmem:[%s4413_s9 + $0x2] sm:$0x3] }
 0xfd6   :  { %3491 = vmatmul.mubr.msk.bf16.vlgmr.msra.gmra.mrb[72].mxu0 %vm78_vm1, %v2490_v51  ;;  %v2619_v49 = vrot.slane %v3078_v14, %v1184_v40  ;;  %v2623_v51 = vrot.slane %v3078_v14, %v1188_v42 }
 0xfd7   :  { %3249 = vmatpush3.bf16.msra.mxu0 %v3543_v45 }
 0xfd8   :  { %3250 = vmatprep.subr.bf16.mxu0 %v3544_v46 }
 0xfdb   :  { %3251 = vmatpush3.bf16.msra.mxu0 %v3545_v47 }
 0xfdc   :  { %3252 = vmatprep.subr.bf16.mxu0 %v3546_v48 }
 0xfdf   :  { %3253 = vmatpush3.bf16.msra.mxu0 %v3547_v50 }
 0xfe0   :  { %3254 = vmatprep.subr.bf16.mxu0 %v3548_v54 }
 0xfe3   :  { %3255 = vmatpush3.bf16.msra.mxu0 %v3549_v52 }
 0xfe4   :  { %3256 = vmatprep.subr.bf16.mxu0 %v3550_v43 }
 0xfe7   :  { %3257 = vmatpush3.bf16.msra.mxu0 %v3551_v6 }
 0xfe8   :  { %3258 = vmatprep.subr.bf16.mxu0 %v3552_v53 }
 0xfeb   :  { %3259 = vmatpush3.bf16.msra.mxu0 %v3553_v11 }
 0xfec   :  { %3260 = vmatprep.subr.bf16.mxu0 %v3554_v58 }
 0xfef   :  { %3261 = vmatpush3.bf16.msra.mxu0 %v3555_v1 }
 0xff0   :  { %3262 = vmatprep.subr.bf16.mxu0 %v3556_v12 }
 0xff3   :  { %3263 = vmatpush3.bf16.msra.mxu0 %v3557_v13 }
0x10a9   :  { %v2552_v16 = vpop.f32.mrb[72].mxu0 }
0x10aa   :  { %v2553_v18 = vadd.f32 %v3066_v15, %v2552_v16  ;;  %v3492_v19 = vpop.f32.mrb[73].mxu0 }
0x10ab   :  { %v2555_v21 = vpop.f32.mrb[74].mxu0 }
0x10ac   :  { %v2556_v22 = vadd.f32 %v3066_v15, %v2555_v21  ;;  %v3493_v25 = vpop.f32.mrb[75].mxu0  ;;  %v2559_v28 = vadd.f32 %v2553_v18, %v4096_v37 }
0x10ae   :  { %v2565_v29 = vsel %vm78_vm1, %v2559_v28, 0.0  ;;  %v2560_v31 = vadd.f32 %v2556_v22, %v4098_v27  ;;  %v3538_v27 = vld [vmem:[%s4412_s8 + $0x24] ss:$8 sps:$4 sm:$0xff]  }
0x10af   :  { %2566 = vadd.xlane.f32.xlu0 %v2565_v29  ;;  %2649 = vmatprep.subr.bf16.mxu1 %v3538_v27 }
0x10b0   :  { %v2568_v55 = vsel %vm78_vm1, %v2560_v31, 0.0  ;;  %2650 = vmatpush1.bf16.msra.mxu1 %v3536_v20 }
0x10b1   :  { %2569 = vadd.xlane.f32.xlu1 %v2568_v55  ;;  %2651 = vmatprep.subr.bf16.mxu1 %v3541_v24 }
0x10b4   :  { %2652 = vmatpush1.bf16.msra.mxu1 %v3539_v17 }
0x113c   :  { %v2567_v30 = vpop.xlane.xlu0 %2566 }
0x113d   :  { %v2571_v32 = vmul.f32 0.03125, %v2567_v30 }
0x113e   :  { %v2570_v33 = vpop.xlane.xlu1 %2569 }
0x113f   :  { %v2573_v34 = vsub.f32 %v2559_v28, %v2571_v32  ;;  %v2572_v62 = vmul.f32 0.03125, %v2570_v33 }
0x1141   :  { %v2574_v35 = vsub.f32 %v2560_v31, %v2572_v62  ;;  %v2575_v36 = vmul.f32 %v2573_v34, %v2573_v34 }
0x1143   :  { %v2577_v38 = vsel %vm78_vm1, %v2575_v36, 0.0  ;;  %v2576_v41 = vmul.f32 %v2574_v35, %v2574_v35 }
0x1144   :  { %2578 = vadd.xlane.f32.xlu0 %v2577_v38 }
0x1145   :  { %v2580_v37 = vsel %vm78_vm1, %v2576_v41, 0.0 }
0x1148   :  { %2581 = vadd.xlane.f32.xlu0 %v2580_v37 }
0x11d1   :  { %v2579_v56 = vpop.xlane.xlu0 %2578 }
0x11d2   :  { %v2583_v57 = vmul.f32 0.03125, %v2579_v56 }
0x11d4   :  { %v2585_v7 = vadd.f32 1e-05, %v2583_v57 }
0x11d5   :  { %v2582_v59 = vpop.xlane.xlu0 %2581 }
0x11d6   :  { %3630 = vrsqrt.f32 %v2585_v7  ;;  %v2584_v60 = vmul.f32 0.03125, %v2582_v59 }
0x11d8   :  { %v2586_v61 = vadd.f32 1e-05, %v2584_v60 }
0x11da   :  { %3632 = vrsqrt.f32 %v2586_v61  ;;  %v3136_v61 = vld [vmem:[%s4416_s12 + $0x1] ss:$0 sm:$0xff]  ;;  %s3673_s12 = smov [#allocation2]  }
0x11e0   :  { %v3631_v63 = vpop.eup %3630 }
0x11e1   :  { %v2589_v0 = vmul.f32 %v3631_v63, %v2573_v34 }
0x11e3   :  { %v2597_v23 = vmul.f32 %v3072_v2, %v2589_v0 }
0x11e4   :  { %v3633_v26 = vpop.eup %3632 }
0x11e5   :  { %v2590_v3 = vmul.f32 %v3633_v26, %v2574_v35  ;;  %v2605_v8 = vadd.f32 %v3073_v4, %v2597_v23 }
0x11e7   :  { %v2598_v5 = vmul.f32 %v3072_v2, %v2590_v3  ;;  %v3137_v2 = vld [vmem:[%s4417_s13 + $0x1] ss:$0 sm:$0xff]  ;;  %s2954_s13 = sshll.u32 %s3673_s12, 4  ;;  %s2955_s13 = int_to_ptr.vmem [resolvable:$true] %s2954_s13 }
0x11e8   :  { %s3638_s27 = scalar_lea.vmem %s2955_s13, 32  ;;  %p3643_p1 = scmp.lt.s32.totalorder %s2955_s13, %s2955_s13 }
0x11e9   :  { %v2606_v9 = vadd.f32 %v3073_v4, %v2598_v5  ;;  %p3639_p0 = scmp.ne.s32.totalorder %s2955_s13, %s3638_s27  ;;  %p3644_p2 = scmp.lt.s32.totalorder %s3638_s27, %s3638_s27 }
0x11eb   :  { %v2607_v10 = vpack.c.bf16 %v2606_v9, %v2605_v8  ;;  %p3645_p3 = por %p3644_p2, %p3643_p1 }
0x11ed   :  { %3083 = vmatmul.mubr.msk.bf16.vlgmr.msra.gmra.mrb[76].mxu1 %vm78_vm1, %v2607_v10  ;;  %p3646_p4 = pnand %p3645_p3, %p3639_p0 }
0x12c0   :  { %v2683_v15 = vpop.f32.mrb[76].mxu1 }
0x12c1   :  { %v2684_v16 = vadd.f32 %v2683_v15, %v2619_v49  ;;  %v2685_v18 = vpop.f32.mrb[77].mxu1 }
0x12c2   :  { %v2686_v19 = vadd.f32 %v2685_v18, %v2623_v51  ;;  %v2687_v21 = vpop.f32.mrb[78].mxu1 }
0x12c3   :  { %v2688_v22 = vadd.f32 %v2687_v21, %v2619_v49  ;;  %v2689_v25 = vpop.f32.mrb[79].mxu1  ;;  %v2692_v29 = vmax.f32 %v2684_v16, 0.0 }
0x12c4   :  { %v2690_v28 = vadd.f32 %v2689_v25, %v2623_v51  ;;  %v2693_v55 = vmax.f32 %v2686_v19, 0.0 }
0x12c5   :  { %v2694_v31 = vmax.f32 %v2688_v22, 0.0 }
0x12c6   :  { %v2695_v30 = vmax.f32 %v2690_v28, 0.0 }
0x12c7   :  { %v2696_v32 = vpack.c.bf16 %v2694_v31, %v2692_v29 }
0x12c8   :  { %v2697_v33 = vpack.c.bf16 %v2695_v30, %v2693_v55 }
0x12ca   :  { %2867 = vmatprep.mubr.bf16.mxu0 %v2697_v33 }
0x12cb   :  { %2868 = vmatmul.mubr.bf16.vlgmr.msra.gmra.mrb[76].mxu0 %v2696_v32 }
0x139e   :  { %v3264_v40 = vpop.f32.mrb[76].mxu0 }
0x139f   :  { %v3265_v42 = vpop.f32.mrb[77].mxu0 }
0x13a0   :  { %v3266_v34 = vadd.f32 %v3265_v42, %v3264_v40  ;;  %v3267_v62 = vpop.f32.mrb[78].mxu0 }
0x13a1   :  { %v3268_v35 = vpop.f32.mrb[79].mxu0 }
0x13a2   :  { %v2870_v36 = vadd.f32 %v3266_v34, %v3117_v39  ;;  %v3269_v38 = vadd.f32 %v3268_v35, %v3267_v62 }
0x13a4   :  { %v2873_v41 = vadd.f32 %v3269_v38, %v3117_v39  ;;  %v2876_v37 = vadd.f32 %v2870_v36, %v2605_v8 }
0x13a6   :  { %v2882_v27 = vsel %vm78_vm1, %v2876_v37, 0.0  ;;  %v2877_v20 = vadd.f32 %v2873_v41, %v2606_v9 }
0x13a7   :  { %2883 = vadd.xlane.f32.xlu1 %v2882_v27 }
0x13a8   :  { %v2885_v24 = vsel %vm78_vm1, %v2877_v20, 0.0 }
0x13a9   :  { %2886 = vadd.xlane.f32.xlu0 %v2885_v24 }
0x1434   :  { %v2884_v17 = vpop.xlane.xlu1 %2883 }
0x1435   :  { %v2888_v44 = vmul.f32 0.03125, %v2884_v17 }
0x1436   :  { %v2887_v45 = vpop.xlane.xlu0 %2886 }
0x1437   :  { %v2890_v46 = vsub.f32 %v2876_v37, %v2888_v44  ;;  %v2889_v47 = vmul.f32 0.03125, %v2887_v45 }
0x1439   :  { %v2891_v48 = vsub.f32 %v2877_v20, %v2889_v47  ;;  %v2892_v50 = vmul.f32 %v2890_v46, %v2890_v46 }
0x143b   :  { %v2894_v54 = vsel %vm78_vm1, %v2892_v50, 0.0  ;;  %v2893_v52 = vmul.f32 %v2891_v48, %v2891_v48 }
0x143c   :  { %2895 = vadd.xlane.f32.xlu1 %v2894_v54 }
0x143d   :  { %v2897_v43 = vsel %vm78_vm1, %v2893_v52, 0.0 }
0x143e   :  { %2898 = vadd.xlane.f32.xlu0 %v2897_v43 }
0x14c9   :  { %v2896_v6 = vpop.xlane.xlu1 %2895 }
0x14ca   :  { %v2900_v53 = vmul.f32 0.03125, %v2896_v6 }
0x14cb   :  { %v2899_v56 = vpop.xlane.xlu0 %2898 }
0x14cc   :  { %v2902_v57 = vadd.f32 1e-05, %v2900_v53  ;;  %v2901_v7 = vmul.f32 0.03125, %v2899_v56 }
0x14ce   :  { %3634 = vrsqrt.f32 %v2902_v57  ;;  %v2903_v59 = vadd.f32 1e-05, %v2901_v7 }
0x14d0   :  { %3636 = vrsqrt.f32 %v2903_v59 }
0x14d8   :  { %v3635_v60 = vpop.eup %3634 }
0x14d9   :  { %v2906_v63 = vmul.f32 %v3635_v60, %v2890_v46 }
0x14da   :  { %v3637_v0 = vpop.eup %3636 }
0x14db   :  { %v2914_v26 = vmul.f32 %v3136_v61, %v2906_v63  ;;  %v2907_v23 = vmul.f32 %v3637_v0, %v2891_v48 }
0x14dd   :  { %v2915_v3 = vmul.f32 %v3136_v61, %v2907_v23  ;;  %v2922_v4 = vadd.f32 %v3137_v2, %v2914_v26 }
0x14df   :  { %v2923_v5 = vadd.f32 %v3137_v2, %v2915_v3  ;;  %v2924_v8 = vsel %vm78_vm1, %v2922_v4, 0.0 }
0x14e0   :  { %v2925_v9 = vrot.slane %v2924_v8, 4 }
0x14e1   :  { %v2931_v10 = vsel %vm78_vm1, %v2923_v5, 0.0 }
0x14e2   :  { %v2926_v11 = vadd.f32 %v2925_v9, %v2924_v8  ;;  %v2932_v58 = vrot.slane %v2931_v10, 4 }
0x14e4   :  { %v2927_v1 = vrot.slane %v2926_v11, 2  ;;  %v2933_v12 = vadd.f32 %v2932_v58, %v2931_v10 }
0x14e6   :  { %v2928_v13 = vadd.f32 %v2927_v1, %v2926_v11  ;;  %v2934_v14 = vrot.slane %v2933_v12, 2 }
0x14e8   :  { %v2929_v49 = vrot.slane %v2928_v13, 1  ;;  %v2935_v51 = vadd.f32 %v2934_v14, %v2933_v12 }
0x14ea   :  { %v2930_v15 = vadd.f32 %v2929_v49, %v2928_v13  ;;  %v2936_v16 = vrot.slane %v2935_v51, 1 }
0x14ec   :  { %v2937_v18 = vadd.f32 %v2936_v16, %v2935_v51  ;;  %v2939_v19 = vmul.f32 0.125, %v2930_v15 }
0x14ee   :  { %v2940_v21 = vmul.f32 0.125, %v2937_v18 }
0x14f0   :  { %v2944_v22 = vsel %vm2943_vm6, %v2940_v21, %v2939_v19 }
0x14f1   :  { %2947 = vst.msk [vmem:[#allocation2] sm:$0x3] %vm2946_vm7, %v2944_v22 }
0x14f2   :  { %3649 = shalt.err (!%p3646_p4)
}
0x14f3   :  { %s3650_s18 = scalar_lea.hbm %s4418_s14, 32 }
0x14f4   :  { %p3651_p5 = scmp.ne.s32.totalorder %s4418_s14, %s3650_s18  ;;  %p3654_p6 = scmp.lt.u32.totalorder %s3650_s18, %s4418_s14 }
0x14f6   :  { %p3656_p7 = pnand %p3654_p6, %p3651_p5 }
0x14f8   :  { %3659 = shalt.err (!%p3656_p7)
}
0x14f9   :  { %2957 = dma.vmem_to_hbm [thread:$0]  %s2955_s13, 32, %s4418_s14, [#allocation3]  }
0x14fa   :  { %3660 = dma.done.wait [#allocation3], 32  }
0x14fb   :  { %3661 = vsyncadd [#allocation3], 4294967264 }
0x14fc   :  { %2961 = vsyncpa [#allocation3], 1 }

// kernel: tpu_custom_call.1
= control target key start
LH: loop header
LB: loop body
LE: loop exit
PB: predicated region body
PF: predicated region fallthrough
CT: control target
= control target key end

     0   :  { %v3662_v1 = vmov 0.0   ;;  %vm3663_vm0 = vmmov 0   ;;  %vm78_vm1 = vcmask 261120   ;;  %s4404_s0 = inlined_call_operand.vmem [shape: f32[16,32], index: 0, kind: input, shape index: {}]   ;;  %s4405_s1 = inlined_call_operand.vmem [shape: f32[8,32], index: 1, kind: input, shape index: {}]   ;;  %s4406_s2 = inlined_call_operand.vmem [shape: bf16[2,32,96], index: 2, kind: input, shape index: {}]   ;;  %s4407_s3 = inlined_call_operand.vmem [shape: f32[2,1,96], index: 3, kind: input, shape index: {}]   ;;  %s4408_s4 = inlined_call_operand.vmem [shape: bf16[2,32,32], index: 4, kind: input, shape index: {}]   ;;  %s4409_s5 = inlined_call_operand.vmem [shape: f32[2,1,32], index: 5, kind: input, shape index: {}]   ;;  %s4410_s6 = inlined_call_operand.vmem [shape: f32[2,1,32], index: 6, kind: input, shape index: {}]   ;;  %s4411_s7 = inlined_call_operand.vmem [shape: f32[2,1,32], index: 7, kind: input, shape index: {}]   ;;  %s4412_s8 = inlined_call_operand.vmem [shape: bf16[2,32,256], index: 8, kind: input, shape index: {}]   ;;  %s4413_s9 = inlined_call_operand.vmem [shape: f32[2,1,256], index: 9, kind: input, shape index: {}]   ;;  %s4414_s10 = inlined_call_operand.vmem [shape: bf16[2,256,32], index: 10, kind: input, shape index: {}]   ;;  %s4415_s11 = inlined_call_operand.vmem [shape: f32[2,1,32], index: 11, kind: input, shape index: {}]   ;;  %s4416_s12 = inlined_call_operand.vmem [shape: f32[2,1,32], index: 12, kind: input, shape index: {}]   ;;  %s4417_s13 = inlined_call_operand.vmem [shape: f32[2,1,32], index: 13, kind: input, shape index: {}]   ;;  %s4418_s14 = inlined_call_operand.hbm [shape: f32[2,32], index: 14, kind: output, shape index: {}]  }
   0x1   :  { %v3506_v0 = vld [vmem:[%s4406_s2] sm:$0xff]   ;;  %3270 = vmatprep.subr.bf16.mxu1 %v3662_v1  ;;  %v3507_v2 = vld [vmem:[%s4406_s2 + $0x8] sm:$0xff]   ;;  %3296 = vmatprep.subr.bf16.mxu0 %v3662_v1 }
   0x2   :  { %3271 = vmatpush3.bf16.msra.mxu1 %v3506_v0  ;;  %3274 = vmatprep.mubr.msk.bf16.mxu1 %vm3663_vm0, %v3662_v1  ;;  %v49_v3 = vld [vmem:[%s4404_s0] sm:$0xff]  ;;  %v50_v4 = vld [vmem:[%s4404_s0 + $0x8] sm:$0xff] }
   0x3   :  { %v51_v5 = vld [vmem:[%s4405_s1] sm:$0xff]  ;;  %3272 = vmatprep.subr.bf16.mxu1 %v3662_v1  ;;  %3298 = vmatprep.mubr.msk.bf16.mxu0 %vm3663_vm0, %v3662_v1 }
   0x4   :  { %v3769_v6 = vadd.f32 %v51_v5, %v49_v3  ;;  %v3771_v7 = vadd.f32 %v51_v5, %v50_v4 }
   0x6   :  { %v54_v8 = vpack.c.bf16 %v3771_v7, %v3769_v6  ;;  %3273 = vmatpush3.bf16.msra.mxu1 %v3507_v2 }
   0x7   :  { %3278 = vmatprep.subr.bf16.mxu1 %v3662_v1 }
   0x9   :  { %3275 = vmatmul.mubr.msk.bf16.vlgmr.msra.gmra.mrb[0].mxu1 %vm78_vm1, %v54_v8 }
   0xa   :  { %3280 = vmatprep.mubr.msk.bf16.mxu1 %vm3663_vm0, %v3662_v1 }
   0xb   :  { %19 = vsyncpa [#allocation3], 0  ;;  %v2962_v9 = vld [vmem:[%s4407_s3] ss:$0 sm:$0xff]  ;;  %s3664_s23 = smov 112   ;;  %s3665_s24 = smov 120  }
   0xc   :  { %s3666_s25 = smov 104   ;;  %s3667_s26 = smov 96   ;;  %vm143_vm2 = vcmask 64512   ;;  %vm639_vm3 = vcmask 1043456   ;;  %vm1056_vm4 = vcmask 130048   ;;  %vm1059_vm5 = vcmask 195584  }
   0xd   :  { %s3668_s27 = smov 64   ;;  %s3669_s28 = smov 8   ;;  %vm2943_vm6 = vcmask 1041409   ;;  %vm2946_vm7 = vcmask 254976  }
   0xe   :  { %s3670_s17 = smov 16   ;;  %s3671_s18 = smov 24  }
  0xdc   :  { %v116_v10 = vpop.f32.mrb[0].mxu1 }
  0xdd   :  { %v117_v11 = vadd.f32 %v2962_v9, %v116_v10  ;;  %v3276_v12 = vpop.f32.mrb[1].mxu1 }
  0xde   :  { %v119_v13 = vpop.f32.mrb[2].mxu1 }
  0xdf   :  { %v3138_v14 = vpack.c.bf16 %v117_v11, %v117_v11  ;;  %v120_v15 = vadd.f32 %v2962_v9, %v119_v13  ;;  %v3277_v16 = vpop.f32.mrb[3].mxu1 }
  0xe1   :  { %133 = vrot.lane.b32.xlu1 %v3138_v14, %s3664_s23  ;;  %129 = vrot.lane.b32.xlu0 %v3138_v14, %s3665_s24  ;;  %v3786_v17 = vpack.c.bf16 %v120_v15, %v120_v15 }
  0xe5   :  { %135 = vrot.lane.b32.xlu1 %v3786_v17, %s3664_s23  ;;  %131 = vrot.lane.b32.xlu0 %v3786_v17, %s3665_s24 }
  0xe9   :  { %139 = vrot.lane.b32.xlu1 %v3786_v17, %s3666_s25  ;;  %137 = vrot.lane.b32.xlu0 %v3138_v14, %s3666_s25 }
  0xed   :  { %190 = vrot.lane.b32.xlu1 %v3786_v17, %s3667_s26  ;;  %141 = vrot.lane.b32.xlu0 %v3138_v14, %s3667_s26 }
 0x153   :  { %v134_v18 = vpop.permute.xlu1 %133  ;;  %v130_v19 = vpop.permute.xlu0 %129 }
 0x154   :  { %v3798_v20 = vcombine.low %v130_v19, %v130_v19  ;;  %v3802_v23 = vcombine.low %v134_v18, %v134_v18 }
 0x156   :  { %240 = vrot.lane.b32.xlu0 %v3798_v20, %s3667_s26 }
 0x157   :  { %v136_v21 = vpop.permute.xlu1 %135  ;;  %v132_v22 = vpop.permute.xlu0 %131 }
 0x158   :  { %v3804_v24 = vcombine.low %v132_v22, %v132_v22  ;;  %v3810_v26 = vcombine.low %v136_v21, %v136_v21 }
 0x15a   :  { %340 = vrot.lane.b32.xlu0 %v3802_v23, %s3667_s26  ;;  %290 = vrot.lane.b32.xlu1 %v3804_v24, %s3667_s26 }
 0x15b   :  { %v138_v25 = vpop.permute.xlu0 %137  ;;  %v140_v28 = vpop.permute.xlu1 %139 }
 0x15c   :  { %v3812_v27 = vcombine.low %v138_v25, %v138_v25  ;;  %v3818_v30 = vcombine.low %v140_v28, %v140_v28 }
 0x15e   :  { %390 = vrot.lane.b32.xlu1 %v3810_v26, %s3667_s26  ;;  %440 = vrot.lane.b32.xlu0 %v3812_v27, %s3667_s26 }
 0x15f   :  { %v142_v29 = vpop.permute.xlu0 %141  ;;  %v191_v32 = vpop.permute.xlu1 %190 }
 0x160   :  { %v148_v31 = vsel %vm143_vm2, %v142_v29, 0  ;;  %v196_v33 = vsel %vm143_vm2, %v191_v32, 0 }
 0x161   :  { %3279 = vmatpush3.bf16.xpose.msra.mxu1 %v148_v31 }
 0x162   :  { %490 = vrot.lane.b32.xlu1 %v3818_v30, %s3667_s26  ;;  %3284 = vmatprep.subr.bf16.mxu1 %v3662_v1 }
 0x166   :  { %634 = vrot.lane.b32.xlu1 %v3138_v14, %s3668_s27 }
 0x168   :  { %3281 = vmatmul.mubr.msk.bf16.vlgmr.msra.gmra.mrb[4].mxu1 %vm143_vm2, %v3138_v14 }
 0x169   :  { %3285 = vmatpush3.bf16.xpose.msra.mxu1 %v196_v33  ;;  %3286 = vmatprep.mubr.msk.bf16.mxu1 %vm3663_vm0, %v3662_v1 }
 0x16a   :  { %3290 = vmatprep.subr.bf16.mxu1 %v3662_v1 }
 0x170   :  { %3287 = vmatmul.mubr.msk.bf16.vlgmr.msra.gmra.mrb[8].mxu1 %vm143_vm2, %v3786_v17 }
 0x171   :  { %3292 = vmatprep.mubr.msk.bf16.mxu1 %vm3663_vm0, %v3662_v1 }
 0x1c8   :  { %v241_v34 = vpop.permute.xlu0 %240 }
 0x1c9   :  { %v246_v35 = vsel %vm143_vm2, %v241_v34, 0 }
 0x1ca   :  { %3291 = vmatpush3.bf16.xpose.msra.mxu1 %v246_v35 }
 0x1cb   :  { %3302 = vmatprep.subr.bf16.mxu1 %v3662_v1 }
 0x1cc   :  { %v291_v36 = vpop.permute.xlu1 %290  ;;  %v341_v38 = vpop.permute.xlu0 %340 }
 0x1cd   :  { %v296_v37 = vsel %vm143_vm2, %v291_v36, 0  ;;  %v346_v39 = vsel %vm143_vm2, %v341_v38, 0 }
 0x1ce   :  { %3297 = vmatpush3.bf16.xpose.msra.mxu0 %v296_v37 }
 0x1cf   :  { %3308 = vmatprep.subr.bf16.mxu0 %v3662_v1 }
 0x1d0   :  { %v391_v40 = vpop.permute.xlu1 %390  ;;  %v441_v42 = vpop.permute.xlu0 %440 }
 0x1d1   :  { %3293 = vmatmul.mubr.msk.bf16.vlgmr.msra.gmra.mrb[12].mxu1 %vm143_vm2, %v130_v19  ;;  %v396_v41 = vsel %vm143_vm2, %v391_v40, 0  ;;  %v446_v44 = vsel %vm143_vm2, %v441_v42, 0 }
 0x1d2   :  { %3303 = vmatpush3.bf16.xpose.msra.mxu1 %v346_v39  ;;  %3304 = vmatprep.mubr.msk.bf16.mxu1 %vm3663_vm0, %v3662_v1 }
 0x1d3   :  { %3314 = vmatprep.subr.bf16.mxu1 %v3662_v1 }
 0x1d4   :  { %v491_v43 = vpop.permute.xlu1 %490 }
 0x1d5   :  { %3299 = vmatmul.mubr.msk.bf16.vlgmr.msra.gmra.mrb[0].mxu0 %vm143_vm2, %v132_v22  ;;  %v496_v45 = vsel %vm143_vm2, %v491_v43, 0 }
 0x1d6   :  { %3309 = vmatpush3.bf16.xpose.msra.mxu0 %v396_v41  ;;  %3310 = vmatprep.mubr.msk.bf16.mxu0 %vm3663_vm0, %v3662_v1 }
 0x1d7   :  { %3320 = vmatprep.subr.bf16.mxu0 %v3662_v1 }
 0x1d8   :  { %v635_v46 = vpop.permute.xlu1 %634 }
 0x1d9   :  { %3305 = vmatmul.mubr.msk.bf16.vlgmr.msra.gmra.mrb[16].mxu1 %vm143_vm2, %v134_v18  ;;  %v641_v47 = vsel %vm639_vm3, %v635_v46, 0 }
 0x1da   :  { %3315 = vmatpush3.bf16.xpose.msra.mxu1 %v446_v44  ;;  %3316 = vmatprep.mubr.msk.bf16.mxu1 %vm3663_vm0, %v3662_v1 }
 0x1db   :  { %3326 = vmatprep.subr.bf16.mxu1 %v3662_v1 }
 0x1dd   :  { %3311 = vmatmul.mubr.msk.bf16.vlgmr.msra.gmra.mrb[4].mxu0 %vm143_vm2, %v136_v21 }
 0x1de   :  { %3321 = vmatpush3.bf16.xpose.msra.mxu0 %v496_v45  ;;  %3322 = vmatprep.mubr.msk.bf16.mxu0 %vm3663_vm0, %v3662_v1 }
 0x1df   :  { %3332 = vmatprep.subr.bf16.mxu0 %v3662_v1 }
 0x1e1   :  { %3317 = vmatmul.mubr.msk.bf16.vlgmr.msra.gmra.mrb[20].mxu1 %vm143_vm2, %v138_v25 }
 0x1e2   :  { %3327 = vmatpush3.bf16.msra.mxu1 %v641_v47  ;;  %3328 = vmatprep.mubr.msk.bf16.mxu1 %vm3663_vm0, %v3662_v1 }
 0x1e3   :  { %3338 = vmatprep.subr.bf16.mxu1 %v3662_v1 }
 0x1e5   :  { %3323 = vmatmul.mubr.msk.bf16.vlgmr.msra.gmra.mrb[8].mxu0 %vm143_vm2, %v140_v28 }
 0x1e6   :  { %3334 = vmatprep.mubr.msk.bf16.mxu0 %vm3663_vm0, %v3662_v1 }
 0x23b   :  { %v184_v48 = vpop.f32.mrb[4].mxu1 }
 0x23c   :  { %v3282_v49 = vpop.f32.mrb[5].mxu1  ;;  %v538_v50 = vsel %vm143_vm2, %v184_v48, -inf }
 0x23d   :  { %539 = vmax.xlane.f32.xlu0 %v538_v50  ;;  %v187_v51 = vpop.f32.mrb[6].mxu1 }
 0x23e   :  { %v3283_v52 = vpop.f32.mrb[7].mxu1 }
 0x243   :  { %v232_v53 = vpop.f32.mrb[8].mxu1 }
 0x244   :  { %v3288_v54 = vpop.f32.mrb[9].mxu1  ;;  %v541_v55 = vsel %vm143_vm2, %v232_v53, -inf }
 0x245   :  { %542 = vmax.xlane.f32.xlu1 %v541_v55  ;;  %v235_v56 = vpop.f32.mrb[10].mxu1 }
 0x246   :  { %v3289_v57 = vpop.f32.mrb[11].mxu1 }
 0x2a4   :  { %v282_v58 = vpop.f32.mrb[12].mxu1 }
 0x2a5   :  { %v3294_v59 = vpop.f32.mrb[13].mxu1  ;;  %v544_v60 = vsel %vm143_vm2, %v282_v58, -inf }
 0x2a6   :  { %545 = vmax.xlane.f32.xlu0 %v544_v60  ;;  %v285_v61 = vpop.f32.mrb[14].mxu1 }
 0x2a7   :  { %v3295_v62 = vpop.f32.mrb[15].mxu1 }
 0x2a8   :  { %v332_v63 = vpop.f32.mrb[0].mxu0 }
 0x2a9   :  { %v3300_v0 = vpop.f32.mrb[1].mxu0  ;;  %v547_v2 = vsel %vm143_vm2, %v332_v63, -inf }
 0x2aa   :  { %v335_v3 = vpop.f32.mrb[2].mxu0  ;;  %548 = vmax.xlane.f32.xlu0 %v547_v2 }
 0x2ab   :  { %v3301_v4 = vpop.f32.mrb[3].mxu0 }
 0x2ac   :  { %v3870_v5 = vpop.f32.mrb[16].mxu1 }
 0x2ad   :  { %v3306_v8 = vpop.f32.mrb[17].mxu1  ;;  %v550_v9 = vsel %vm143_vm2, %v3870_v5, -inf }
 0x2ae   :  { %551 = vmax.xlane.f32.xlu1 %v550_v9  ;;  %v385_v10 = vpop.f32.mrb[18].mxu1 }
 0x2af   :  { %v3307_v11 = vpop.f32.mrb[19].mxu1 }
 0x2b0   :  { %v3874_v12 = vpop.f32.mrb[4].mxu0 }
 0x2b1   :  { %v3312_v13 = vpop.f32.mrb[5].mxu0  ;;  %v553_v14 = vsel %vm143_vm2, %v3874_v12, -inf }
 0x2b2   :  { %v435_v15 = vpop.f32.mrb[6].mxu0  ;;  %554 = vmax.xlane.f32.xlu0 %v553_v14 }
 0x2b3   :  { %v3313_v16 = vpop.f32.mrb[7].mxu0 }
 0x2b4   :  { %v482_v18 = vpop.f32.mrb[20].mxu1 }
 0x2b5   :  { %v3318_v19 = vpop.f32.mrb[21].mxu1  ;;  %v556_v21 = vsel %vm143_vm2, %v482_v18, -inf }
 0x2b6   :  { %557 = vmax.xlane.f32.xlu1 %v556_v21  ;;  %v485_v22 = vpop.f32.mrb[22].mxu1 }
 0x2b7   :  { %v3319_v25 = vpop.f32.mrb[23].mxu1 }
 0x2b8   :  { %v532_v28 = vpop.f32.mrb[8].mxu0 }
 0x2b9   :  { %v3324_v29 = vpop.f32.mrb[9].mxu0  ;;  %v559_v31 = vsel %vm143_vm2, %v532_v28, -inf }
 0x2ba   :  { %v535_v32 = vpop.f32.mrb[10].mxu0  ;;  %560 = vmax.xlane.f32.xlu0 %v559_v31 }
 0x2bb   :  { %v3325_v33 = vpop.f32.mrb[11].mxu0 }
 0x2c7   :  { %731 = vrot.lane.b32.xlu1 %v3798_v20, %s3668_s27 }
 0x2ca   :  { %v540_v34 = vpop.xlane.xlu0 %539 }
 0x2cb   :  { %779 = vrot.lane.b32.xlu1 %v3804_v24, %s3668_s27  ;;  %v562_v36 = vsub.f32 %v184_v48, %v540_v34 }
 0x2cd   :  { %v570_v38 = vmul.f32 1.442695, %v562_v36 }
 0x2cf   :  { %3558 = vpow2.f32 %v570_v38 }
 0x2d0   :  { %683 = vrot.lane.b32.xlu0 %v3786_v17, %s3668_s27 }
 0x2d2   :  { %v543_v35 = vpop.xlane.xlu1 %542 }
 0x2d3   :  { %v563_v37 = vsub.f32 %v232_v53, %v543_v35 }
 0x2d5   :  { %v572_v39 = vmul.f32 1.442695, %v563_v37 }
 0x2d7   :  { %3560 = vpow2.f32 %v572_v39 }
 0x2d9   :  { %v3886_v40 = vpop.eup %3558 }
 0x2da   :  { %v586_v20 = vsel %vm143_vm2, %v3886_v40, 0.0 }
 0x2e1   :  { %v3561_v41 = vpop.eup %3560 }
 0x2e2   :  { %v589_v42 = vsel %vm143_vm2, %v3561_v41, 0.0 }
 0x2ef   :  { %590 = vadd.xlane.f32.xlu0 %v589_v42  ;;  %587 = vadd.xlane.f32.xlu1 %v586_v20 }
 0x333   :  { %v546_v24 = vpop.xlane.xlu0 %545 }
 0x334   :  { %v564_v17 = vsub.f32 %v282_v58, %v546_v24 }
 0x336   :  { %v574_v43 = vmul.f32 1.442695, %v564_v17 }
 0x337   :  { %v549_v44 = vpop.xlane.xlu0 %548 }
 0x338   :  { %3562 = vpow2.f32 %v574_v43  ;;  %v565_v45 = vsub.f32 %v332_v63, %v549_v44 }
 0x33a   :  { %v576_v46 = vmul.f32 1.442695, %v565_v45 }
 0x33b   :  { %v552_v55 = vpop.xlane.xlu1 %551 }
 0x33c   :  { %3564 = vpow2.f32 %v576_v46  ;;  %v566_v56 = vsub.f32 %v3870_v5, %v552_v55 }
 0x33e   :  { %v578_v59 = vmul.f32 1.442695, %v566_v56 }
 0x33f   :  { %v555_v48 = vpop.xlane.xlu0 %554 }
 0x340   :  { %v567_v58 = vsub.f32 %v3874_v12, %v555_v48  ;;  %3566 = vpow2.f32 %v578_v59 }
 0x342   :  { %v3891_v47 = vpop.eup %3562  ;;  %v580_v61 = vmul.f32 1.442695, %v567_v58 }
 0x343   :  { %v592_v49 = vsel %vm143_vm2, %v3891_v47, 0.0  ;;  %v558_v57 = vpop.xlane.xlu1 %557 }
 0x344   :  { %593 = vadd.xlane.f32.xlu1 %v592_v49  ;;  %v568_v60 = vsub.f32 %v482_v18, %v558_v57  ;;  %3568 = vpow2.f32 %v580_v61 }
 0x346   :  { %v3895_v50 = vpop.eup %3564  ;;  %v582_v62 = vmul.f32 1.442695, %v568_v60 }
 0x347   :  { %v561_v51 = vpop.xlane.xlu0 %560  ;;  %v595_v52 = vsel %vm143_vm2, %v3895_v50, 0.0  ;;  %v732_v2 = vpop.permute.xlu1 %731 }
 0x348   :  { %596 = vadd.xlane.f32.xlu0 %v595_v52  ;;  %v569_v63 = vsub.f32 %v532_v28, %v561_v51  ;;  %3570 = vpow2.f32 %v582_v62  ;;  %v737_v25 = vsel %vm639_vm3, %v732_v2, 0 }
 0x34a   :  { %v584_v0 = vmul.f32 1.442695, %v569_v63 }
 0x34b   :  { %v684_v53 = vpop.permute.xlu0 %683  ;;  %v780_v3 = vpop.permute.xlu1 %779 }
 0x34c   :  { %v689_v54 = vsel %vm639_vm3, %v684_v53, 0  ;;  %3572 = vpow2.f32 %v584_v0  ;;  %v785_v22 = vsel %vm639_vm3, %v780_v3, 0 }
 0x34d   :  { %3333 = vmatpush3.bf16.msra.mxu0 %v689_v54 }
 0x34e   :  { %3344 = vmatprep.subr.bf16.mxu0 %v3662_v1 }
 0x355   :  { %875 = vrot.lane.b32.xlu1 %v3810_v26, %s3668_s27  ;;  %v3907_v26 = vpop.eup %3566 }
 0x356   :  { %v598_v4 = vsel %vm143_vm2, %v3907_v26, 0.0 }
 0x35e   :  { %827 = vrot.lane.b32.xlu0 %v3802_v23, %s3668_s27  ;;  %v3909_v23 = vpop.eup %3568 }
 0x35f   :  { %v3913_v5 = vpop.eup %3570  ;;  %v601_v10 = vsel %vm143_vm2, %v3909_v23, 0.0 }
 0x360   :  { %v604_v11 = vsel %vm143_vm2, %v3913_v5, 0.0  ;;  %v3919_v12 = vpop.eup %3572 }
 0x361   :  { %v607_v13 = vsel %vm143_vm2, %v3919_v12, 0.0 }
 0x379   :  { %599 = vadd.xlane.f32.xlu1 %v598_v4 }
 0x37c   :  { %v591_v8 = vpop.xlane.xlu0 %590  ;;  %v588_v9 = vpop.xlane.xlu1 %587 }
 0x37d   :  { %3574 = vrcp.f32 %v591_v8  ;;  %602 = vadd.xlane.f32.xlu0 %v601_v10  ;;  %605 = vadd.xlane.f32.xlu1 %v604_v11  ;;  %v3508_v11 = vld [vmem:[%s4408_s4] sm:$0xff]  }
 0x37e   :  { %3576 = vrcp.f32 %v588_v9 }
 0x381   :  { %608 = vadd.xlane.f32.xlu0 %v607_v13 }
 0x387   :  { %v3575_v14 = vpop.eup %3574 }
 0x388   :  { %v3577_v15 = vpop.eup %3576  ;;  %v619_v16 = vmul.f32 %v3575_v14, %v3561_v41 }
 0x389   :  { %v618_v18 = vmul.f32 %v3577_v15, %v3886_v40 }
 0x38a   :  { %v627_v19 = vpack.c.bf16 %v619_v16, %v619_v16 }
 0x38b   :  { %v626_v21 = vpack.c.bf16 %v618_v18, %v618_v18 }
 0x38c   :  { %3335 = vmatmul.mubr.msk.bf16.vlgmr.msra.gmra.mrb[12].mxu0 %vm143_vm2, %v627_v19 }
 0x38d   :  { %3329 = vmatmul.mubr.msk.bf16.vlgmr.msra.gmra.mrb[24].mxu1 %vm143_vm2, %v626_v21  ;;  %3345 = vmatpush3.bf16.msra.mxu0 %v785_v22 }
 0x38e   :  { %3339 = vmatpush3.bf16.msra.mxu1 %v737_v25  ;;  %971 = vrot.lane.b32.xlu1 %v3818_v30, %s3668_s27 }
 0x38f   :  { %3340 = vmatprep.mubr.msk.bf16.mxu1 %vm3663_vm0, %v3662_v1  ;;  %3350 = vmatprep.subr.bf16.mxu1 %v3662_v1 }
 0x390   :  { %3346 = vmatprep.mubr.msk.bf16.mxu0 %vm3663_vm0, %v3662_v1  ;;  %3356 = vmatprep.subr.bf16.mxu0 %v3662_v1 }
 0x397   :  { %923 = vrot.lane.b32.xlu0 %v3812_v27, %s3668_s27 }
 0x3d1   :  { %v594_v28 = vpop.xlane.xlu1 %593 }
 0x3d2   :  { %3578 = vrcp.f32 %v594_v28 }
 0x3d5   :  { %v597_v29 = vpop.xlane.xlu0 %596  ;;  %v876_v37 = vpop.permute.xlu1 %875 }
 0x3d6   :  { %3580 = vrcp.f32 %v597_v29  ;;  %v881_v38 = vsel %vm639_vm3, %v876_v37, 0 }
 0x3d9   :  { %v828_v32 = vpop.permute.xlu0 %827 }
 0x3da   :  { %v833_v36 = vsel %vm639_vm3, %v828_v32, 0 }
 0x3dc   :  { %v3579_v31 = vpop.eup %3578 }
 0x3dd   :  { %v620_v30 = vmul.f32 %v3579_v31, %v3891_v47 }
 0x3df   :  { %v628_v33 = vpack.c.bf16 %v620_v30, %v620_v30 }
 0x3e0   :  { %v3581_v34 = vpop.eup %3580 }
 0x3e1   :  { %v621_v35 = vmul.f32 %v3581_v34, %v3895_v50  ;;  %3341 = vmatmul.mubr.msk.bf16.vlgmr.msra.gmra.mrb[28].mxu1 %vm143_vm2, %v628_v33 }
 0x3e2   :  { %3351 = vmatpush3.bf16.msra.mxu1 %v833_v36  ;;  %3352 = vmatprep.mubr.msk.bf16.mxu1 %vm3663_vm0, %v3662_v1 }
 0x3e3   :  { %v629_v27 = vpack.c.bf16 %v621_v35, %v621_v35  ;;  %3362 = vmatprep.subr.bf16.mxu1 %v3662_v1 }
 0x3e5   :  { %3347 = vmatmul.mubr.msk.bf16.vlgmr.msra.gmra.mrb[16].mxu0 %vm143_vm2, %v629_v27 }
 0x3e6   :  { %3357 = vmatpush3.bf16.msra.mxu0 %v881_v38  ;;  %3358 = vmatprep.mubr.msk.bf16.mxu0 %vm3663_vm0, %v3662_v1 }
 0x3e7   :  { %3368 = vmatprep.subr.bf16.mxu0 %v3662_v1 }
 0x406   :  { %v600_v39 = vpop.xlane.xlu1 %599 }
 0x407   :  { %3582 = vrcp.f32 %v600_v39 }
 0x40a   :  { %v603_v40 = vpop.xlane.xlu0 %602  ;;  %v606_v41 = vpop.xlane.xlu1 %605 }
 0x40b   :  { %3584 = vrcp.f32 %v603_v40 }
 0x40c   :  { %3586 = vrcp.f32 %v606_v41 }
 0x40e   :  { %v609_v42 = vpop.xlane.xlu0 %608  ;;  %v972_v48 = vpop.permute.xlu1 %971 }
 0x40f   :  { %3588 = vrcp.f32 %v609_v42  ;;  %v977_v52 = vsel %vm639_vm3, %v972_v48, 0  ;;  %v2994_v42 = vld [vmem:[%s4409_s5] ss:$0 sm:$0xff] }
 0x411   :  { %v3583_v20 = vpop.eup %3582 }
 0x412   :  { %v622_v24 = vmul.f32 %v3583_v20, %v3907_v26  ;;  %v924_v17 = vpop.permute.xlu0 %923 }
 0x413   :  { %v929_v47 = vsel %vm639_vm3, %v924_v17, 0 }
 0x414   :  { %v630_v43 = vpack.c.bf16 %v622_v24, %v622_v24 }
 0x415   :  { %v3585_v44 = vpop.eup %3584 }
 0x416   :  { %v3587_v45 = vpop.eup %3586  ;;  %v623_v46 = vmul.f32 %v3585_v44, %v3909_v23  ;;  %3353 = vmatmul.mubr.msk.bf16.vlgmr.msra.gmra.mrb[32].mxu1 %vm143_vm2, %v630_v43 }
 0x417   :  { %3363 = vmatpush3.bf16.msra.mxu1 %v929_v47  ;;  %3364 = vmatprep.mubr.msk.bf16.mxu1 %vm3663_vm0, %v3662_v1  ;;  %v624_v49 = vmul.f32 %v3587_v45, %v3913_v5 }
 0x418   :  { %v631_v50 = vpack.c.bf16 %v623_v46, %v623_v46  ;;  %3374 = vmatprep.subr.bf16.mxu1 %v3662_v1 }
 0x419   :  { %v3589_v51 = vpop.eup %3588  ;;  %v632_v54 = vpack.c.bf16 %v624_v49, %v624_v49 }
 0x41a   :  { %3359 = vmatmul.mubr.msk.bf16.vlgmr.msra.gmra.mrb[20].mxu0 %vm143_vm2, %v631_v50  ;;  %v625_v53 = vmul.f32 %v3589_v51, %v3919_v12  ;;  %v3509_v12 = vld [vmem:[%s4408_s4 + $0x8] sm:$0xff]  }
 0x41b   :  { %3369 = vmatpush3.bf16.msra.mxu0 %v977_v52  ;;  %3370 = vmatprep.mubr.msk.bf16.mxu0 %vm3663_vm0, %v3662_v1 }
 0x41c   :  { %v633_v55 = vpack.c.bf16 %v625_v53, %v625_v53 }
 0x41e   :  { %3365 = vmatmul.mubr.msk.bf16.vlgmr.msra.gmra.mrb[36].mxu1 %vm143_vm2, %v632_v54 }
 0x41f   :  { %3378 = vmatprep.mubr.msk.bf16.mxu1 %vm3663_vm0, %v3662_v1  ;;  %3375 = vmatpush3.bf16.msra.mxu1 %v3508_v11 }
 0x420   :  { %3376 = vmatprep.subr.bf16.mxu1 %v3662_v1 }
 0x422   :  { %3371 = vmatmul.mubr.msk.bf16.vlgmr.msra.gmra.mrb[24].mxu0 %vm143_vm2, %v633_v55 }
 0x423   :  { %3377 = vmatpush3.bf16.msra.mxu1 %v3509_v12 }
 0x45f   :  { %v725_v56 = vpop.f32.mrb[12].mxu0 }
 0x460   :  { %v677_v57 = vpop.f32.mrb[24].mxu1  ;;  %v3336_v58 = vpop.f32.mrb[13].mxu0 }
 0x461   :  { %v3140_v59 = vpack.c.bf16 %v725_v56, %v677_v57  ;;  %v3330_v60 = vpop.f32.mrb[25].mxu1  ;;  %v728_v61 = vpop.f32.mrb[14].mxu0 }
 0x462   :  { %v680_v62 = vpop.f32.mrb[26].mxu1  ;;  %v3337_v63 = vpop.f32.mrb[15].mxu0  ;;  %v3515_v60 = vld [vmem:[%s4412_s8 + $0x14] ss:$8 sps:$4 sm:$0xff]   ;;  %v3513_v61 = vld [vmem:[%s4412_s8 + $0x10] ss:$8 sps:$4 sm:$0xff]  }
 0x463   :  { %v3331_v0 = vpop.f32.mrb[27].mxu1  ;;  %v3672_v62 = vmov 0   ;;  %v3516_v63 = vld [vmem:[%s4414_s10 + $0x40] sm:$0xff]  }
 0x464   :  { %1247 = vmatprep.mubr.bf16.mxu0 %v3672_v62  ;;  %v3517_v0 = vld [vmem:[%s4414_s10] sm:$0xff]   ;;  %3188 = vmatprep.subr.bf16.mxu1 %v3516_v63 }
 0x4b4   :  { %v773_v2 = vpop.f32.mrb[28].mxu1 }
 0x4b5   :  { %v3342_v26 = vpop.f32.mrb[29].mxu1 }
 0x4b6   :  { %v776_v23 = vpop.f32.mrb[30].mxu1  ;;  %v3519_v26 = vld [vmem:[%s4414_s10 + $0x8] sm:$0xff]  }
 0x4b7   :  { %v3343_v3 = vpop.f32.mrb[31].mxu1  ;;  %v3520_v23 = vld [vmem:[%s4414_s10 + $0x50] sm:$0xff]  }
 0x4b8   :  { %v821_v4 = vpop.f32.mrb[16].mxu0  ;;  %v3521_v3 = vld [vmem:[%s4414_s10 + $0x10] sm:$0xff]  }
 0x4b9   :  { %v3141_v5 = vpack.c.bf16 %v821_v4, %v773_v2  ;;  %v3348_v8 = vpop.f32.mrb[17].mxu0  ;;  %v3518_v2 = vld [vmem:[%s4414_s10 + $0x48] sm:$0xff]   ;;  %v3522_v4 = vld [vmem:[%s4414_s10 + $0x58] sm:$0xff]  }
 0x4ba   :  { %v824_v9 = vpop.f32.mrb[18].mxu0  ;;  %v3524_v8 = vld [vmem:[%s4414_s10 + $0x60] sm:$0xff]  }
 0x4bb   :  { %v3349_v10 = vpop.f32.mrb[19].mxu0  ;;  %1037 = vrot.lane.b32.xlu0 %v3141_v5, %s3669_s28  ;;  %v3523_v5 = vld [vmem:[%s4414_s10 + $0x18] sm:$0xff]   ;;  %v3525_v9 = vld [vmem:[%s4414_s10 + $0x20] sm:$0xff]  }
 0x4bc   :  { %v3526_v10 = vld [vmem:[%s4414_s10 + $0x68] sm:$0xff]  }
 0x4e9   :  { %v869_v13 = vpop.f32.mrb[32].mxu1 }
 0x4ea   :  { %v3354_v14 = vpop.f32.mrb[33].mxu1 }
 0x4eb   :  { %v872_v15 = vpop.f32.mrb[34].mxu1 }
 0x4ec   :  { %v3355_v16 = vpop.f32.mrb[35].mxu1 }
 0x4ed   :  { %v917_v18 = vpop.f32.mrb[20].mxu0 }
 0x4ee   :  { %v3142_v19 = vpack.c.bf16 %v917_v18, %v869_v13  ;;  %v3360_v21 = vpop.f32.mrb[21].mxu0 }
 0x4ef   :  { %v920_v22 = vpop.f32.mrb[22].mxu0 }
 0x4f0   :  { %v3361_v25 = vpop.f32.mrb[23].mxu0  ;;  %1044 = vrot.lane.b32.xlu1 %v3142_v19, %s3670_s17  ;;  %v2998_v19 = vld [vmem:[%s4410_s6] ss:$0 sm:$0xff] }
 0x4f1   :  { %v965_v28 = vpop.f32.mrb[36].mxu1 }
 0x4f2   :  { %v3366_v29 = vpop.f32.mrb[37].mxu1 }
 0x4f3   :  { %v968_v31 = vpop.f32.mrb[38].mxu1  ;;  %v2999_v29 = vld [vmem:[%s4411_s7] ss:$0 sm:$0xff] }
 0x4f4   :  { %v3367_v30 = vpop.f32.mrb[39].mxu1 }
 0x4f5   :  { %v1013_v32 = vpop.f32.mrb[24].mxu0 }
 0x4f6   :  { %v3143_v33 = vpack.c.bf16 %v1013_v32, %v965_v28  ;;  %v3372_v34 = vpop.f32.mrb[25].mxu0 }
 0x4f7   :  { %v1016_v35 = vpop.f32.mrb[26].mxu0  ;;  %v3527_v34 = vld [vmem:[%s4414_s10 + $0x28] sm:$0xff]  }
 0x4f8   :  { %v3373_v36 = vpop.f32.mrb[27].mxu0  ;;  %1051 = vrot.lane.b32.xlu0 %v3143_v33, %s3671_s18  ;;  %v3528_v35 = vld [vmem:[%s4414_s10 + $0x70] sm:$0xff]  }
 0x4f9   :  { %v3529_v36 = vld [vmem:[%s4414_s10 + $0x30] sm:$0xff]  }
 0x52d   :  { %v1038_v37 = vpop.permute.xlu0 %1037 }
 0x52e   :  { %v1055_v38 = vsel %vm143_vm2, %v3140_v59, %v1038_v37  ;;  %v3510_v59 = vld [vmem:[%s4412_s8] ss:$8 sps:$4 sm:$0xff]   ;;  %v3530_v37 = vld [vmem:[%s4414_s10 + $0x78] sm:$0xff]  }
 0x562   :  { %v1045_v27 = vpop.permute.xlu1 %1044 }
 0x563   :  { %v1058_v39 = vsel %vm1056_vm4, %v1055_v38, %v1045_v27  ;;  %v3531_v27 = vld [vmem:[%s4414_s10 + $0x38] sm:$0xff]   ;;  %v1182_v38 = vlaneseq }
 0x56a   :  { %v1052_v40 = vpop.permute.xlu0 %1051 }
 0x56b   :  { %v1061_v41 = vsel %vm1059_vm5, %v1058_v39, %v1052_v40  ;;  %v4062_v39 = vshrl.u32 %v1182_v38, 7 }
 0x56c   :  { %3379 = vmatmul.mubr.msk.bf16.vlgmr.msra.gmra.mrb[40].mxu1 %vm78_vm1, %v1061_v41  ;;  %v1180_v41 = vld [vmem:[%s4413_s9] sm:$0x3] }
 0x56d   :  { %3189 = vmatpush3.bf16.msra.mxu1 %v3517_v0  ;;  %v1184_v40 = vsub.s32 0, %v4062_v39 }
 0x56e   :  { %3190 = vmatprep.subr.bf16.mxu1 %v3518_v2 }
 0x571   :  { %3191 = vmatpush3.bf16.msra.mxu1 %v3519_v26 }
 0x572   :  { %3192 = vmatprep.subr.bf16.mxu1 %v3520_v23 }
 0x575   :  { %3193 = vmatpush3.bf16.msra.mxu1 %v3521_v3 }
 0x576   :  { %3194 = vmatprep.subr.bf16.mxu1 %v3522_v4 }
 0x579   :  { %3195 = vmatpush3.bf16.msra.mxu1 %v3523_v5 }
 0x57a   :  { %3196 = vmatprep.subr.bf16.mxu1 %v3524_v8 }
 0x57d   :  { %3197 = vmatpush3.bf16.msra.mxu1 %v3525_v9 }
 0x57e   :  { %3198 = vmatprep.subr.bf16.mxu1 %v3526_v10 }
 0x581   :  { %3199 = vmatpush3.bf16.msra.mxu1 %v3527_v34 }
 0x582   :  { %3200 = vmatprep.subr.bf16.mxu1 %v3528_v35  ;;  %v3023_v35 = vld [vmem:[%s4417_s13] ss:$0 sm:$0xff] }
 0x585   :  { %3201 = vmatpush3.bf16.msra.mxu1 %v3529_v36 }
 0x586   :  { %3202 = vmatprep.subr.bf16.mxu1 %v3530_v37 }
 0x589   :  { %3203 = vmatpush3.bf16.msra.mxu1 %v3531_v27 }
 0x58a   :  { %3408 = vmatprep.subr.bf16.mxu1 %v3662_v1 }
 0x63f   :  { %v1121_v20 = vpop.f32.mrb[40].mxu1 }
 0x640   :  { %v1122_v24 = vadd.f32 %v2994_v42, %v1121_v20  ;;  %v3380_v17 = vpop.f32.mrb[41].mxu1  ;;  %v1185_v20 = vrot.slane %v1180_v41, %v1184_v40 }
 0x641   :  { %v1124_v43 = vpop.f32.mrb[42].mxu1 }
 0x642   :  { %v1125_v44 = vadd.f32 %v2994_v42, %v1124_v43  ;;  %v3381_v45 = vpop.f32.mrb[43].mxu1  ;;  %v1128_v46 = vadd.f32 %v1122_v24, %v3769_v6  ;;  %v1188_v42 = vsub.s32 1, %v4062_v39  ;;  %v3117_v39 = vld [vmem:[%s4415_s11 + $0x1] ss:$0 sm:$0xff] }
 0x644   :  { %v1132_v47 = vsel %vm78_vm1, %v1128_v46, 0.0  ;;  %v1129_v48 = vadd.f32 %v1125_v44, %v3771_v7  ;;  %v3512_v7 = vld [vmem:[%s4412_s8 + $0x4] ss:$8 sps:$4 sm:$0xff]   ;;  %v1189_v24 = vrot.slane %v1180_v41, %v1188_v42  ;;  %v3029_v41 = vld [vmem:[%s4407_s3 + $0x1] ss:$0 sm:$0xff] }
 0x645   :  { %1133 = vadd.xlane.f32.xlu1 %v1132_v47  ;;  %1215 = vmatprep.subr.bf16.mxu0 %v3512_v7 }
 0x646   :  { %v1135_v49 = vsel %vm78_vm1, %v1129_v48, 0.0  ;;  %1216 = vmatpush1.bf16.msra.mxu0 %v3510_v59 }
 0x647   :  { %1136 = vadd.xlane.f32.xlu0 %v1135_v49  ;;  %1217 = vmatprep.subr.bf16.mxu0 %v3515_v60 }
 0x64a   :  { %1218 = vmatpush1.bf16.msra.mxu0 %v3513_v61 }
 0x64b   :  { %3382 = vmatprep.subr.bf16.mxu0 %v3662_v1 }
 0x6d2   :  { %v1134_v50 = vpop.xlane.xlu1 %1133 }
 0x6d3   :  { %v1139_v51 = vmul.f32 0.03125, %v1134_v50 }
 0x6d4   :  { %v1137_v52 = vpop.xlane.xlu0 %1136 }
 0x6d5   :  { %v1141_v53 = vsub.f32 %v1128_v46, %v1139_v51  ;;  %v1140_v54 = vmul.f32 0.03125, %v1137_v52 }
 0x6d7   :  { %v1142_v55 = vsub.f32 %v1129_v48, %v1140_v54  ;;  %v1143_v56 = vmul.f32 %v1141_v53, %v1141_v53 }
 0x6d9   :  { %v1145_v57 = vsel %vm78_vm1, %v1143_v56, 0.0  ;;  %v1144_v58 = vmul.f32 %v1142_v55, %v1142_v55 }
 0x6da   :  { %1146 = vadd.xlane.f32.xlu0 %v1145_v57  ;;  %v3005_v57 = vld [vmem:[%s4415_s11] ss:$0 sm:$0xff] }
 0x6db   :  { %v1148_v6 = vsel %vm78_vm1, %v1144_v58, 0.0 }
 0x6dc   :  { %1149 = vadd.xlane.f32.xlu1 %v1148_v6 }
 0x767   :  { %v1147_v11 = vpop.xlane.xlu0 %1146 }
 0x768   :  { %v1151_v12 = vmul.f32 0.03125, %v1147_v11 }
 0x769   :  { %v1150_v13 = vpop.xlane.xlu1 %1149 }
 0x76a   :  { %v1153_v14 = vadd.f32 1e-05, %v1151_v12  ;;  %v1152_v15 = vmul.f32 0.03125, %v1150_v13 }
 0x76c   :  { %3590 = vrsqrt.f32 %v1153_v14  ;;  %v1154_v16 = vadd.f32 1e-05, %v1152_v15  ;;  %v3532_v15 = vld [vmem:[%s4406_s2 + $0x10] sm:$0xff]  }
 0x76e   :  { %3592 = vrsqrt.f32 %v1154_v16  ;;  %v3533_v16 = vld [vmem:[%s4406_s2 + $0x18] sm:$0xff]  }
 0x776   :  { %v3591_v18 = vpop.eup %3590 }
 0x777   :  { %v1157_v21 = vmul.f32 %v3591_v18, %v1141_v53 }
 0x778   :  { %v3593_v22 = vpop.eup %3592 }
 0x779   :  { %v1165_v25 = vmul.f32 %v2998_v19, %v1157_v21  ;;  %v1158_v28 = vmul.f32 %v3593_v22, %v1142_v55 }
 0x77b   :  { %v1166_v31 = vmul.f32 %v2998_v19, %v1158_v28  ;;  %v1173_v30 = vadd.f32 %v2999_v29, %v1165_v25 }
 0x77d   :  { %v1174_v32 = vadd.f32 %v2999_v29, %v1166_v31  ;;  %v3022_v31 = vld [vmem:[%s4416_s12] ss:$0 sm:$0xff] }
 0x77f   :  { %v1175_v33 = vpack.c.bf16 %v1174_v32, %v1173_v30 }
 0x781   :  { %3004 = vmatmul.mubr.msk.bf16.vlgmr.msra.gmra.mrb[28].mxu0 %vm78_vm1, %v1175_v33 }
 0x782   :  { %3386 = vmatprep.mubr.msk.bf16.mxu0 %vm3663_vm0, %v3662_v1  ;;  %3383 = vmatpush3.bf16.msra.mxu0 %v3532_v15 }
 0x783   :  { %3384 = vmatprep.subr.bf16.mxu0 %v3662_v1 }
 0x786   :  { %3385 = vmatpush3.bf16.msra.mxu0 %v3533_v16 }
 0x787   :  { %3390 = vmatprep.subr.bf16.mxu0 %v3662_v1 }
 0x854   :  { %v1249_v17 = vpop.f32.mrb[28].mxu0 }
 0x855   :  { %v1250_v43 = vadd.f32 %v1249_v17, %v1185_v20  ;;  %v1251_v44 = vpop.f32.mrb[29].mxu0 }
 0x856   :  { %v1252_v45 = vadd.f32 %v1251_v44, %v1189_v24  ;;  %v1253_v46 = vpop.f32.mrb[30].mxu0 }
 0x857   :  { %v1254_v47 = vadd.f32 %v1253_v46, %v1185_v20  ;;  %v1255_v48 = vpop.f32.mrb[31].mxu0  ;;  %v1258_v50 = vmax.f32 %v1250_v43, 0.0 }
 0x858   :  { %v1256_v49 = vadd.f32 %v1255_v48, %v1189_v24  ;;  %v1259_v52 = vmax.f32 %v1252_v45, 0.0 }
 0x859   :  { %v1260_v51 = vmax.f32 %v1254_v47, 0.0 }
 0x85a   :  { %v1261_v53 = vmax.f32 %v1256_v49, 0.0 }
 0x85b   :  { %v1262_v54 = vpack.c.bf16 %v1260_v51, %v1258_v50 }
 0x85c   :  { %v1263_v55 = vpack.c.bf16 %v1261_v53, %v1259_v52 }
 0x85e   :  { %1431 = vmatprep.mubr.bf16.mxu1 %v1263_v55 }
 0x85f   :  { %1432 = vmatmul.mubr.bf16.vlgmr.msra.gmra.mrb[44].mxu1 %v1262_v54 }
 0x860   :  { %3410 = vmatprep.mubr.msk.bf16.mxu1 %vm3663_vm0, %v3662_v1 }
 0x932   :  { %v3204_v56 = vpop.f32.mrb[44].mxu1 }
 0x933   :  { %v3205_v58 = vpop.f32.mrb[45].mxu1 }
 0x934   :  { %v3206_v6 = vadd.f32 %v3205_v58, %v3204_v56  ;;  %v3207_v7 = vpop.f32.mrb[46].mxu1 }
 0x935   :  { %v3208_v59 = vpop.f32.mrb[47].mxu1 }
 0x936   :  { %v1434_v60 = vadd.f32 %v3206_v6, %v3005_v57  ;;  %v3209_v61 = vadd.f32 %v3208_v59, %v3207_v7 }
 0x938   :  { %v1437_v63 = vadd.f32 %v3209_v61, %v3005_v57  ;;  %v1440_v0 = vadd.f32 %v1434_v60, %v1173_v30 }
 0x93a   :  { %v1444_v2 = vsel %vm78_vm1, %v1440_v0, 0.0  ;;  %v1441_v26 = vadd.f32 %v1437_v63, %v1174_v32 }
 0x93b   :  { %1445 = vadd.xlane.f32.xlu0 %v1444_v2 }
 0x93c   :  { %v1447_v23 = vsel %vm78_vm1, %v1441_v26, 0.0 }
 0x93d   :  { %1448 = vadd.xlane.f32.xlu1 %v1447_v23 }
 0x9c8   :  { %v1446_v3 = vpop.xlane.xlu0 %1445 }
 0x9c9   :  { %v1450_v4 = vmul.f32 0.03125, %v1446_v3 }
 0x9ca   :  { %v1449_v5 = vpop.xlane.xlu1 %1448 }
 0x9cb   :  { %v1452_v8 = vsub.f32 %v1440_v0, %v1450_v4  ;;  %v1451_v9 = vmul.f32 0.03125, %v1449_v5 }
 0x9cd   :  { %v1453_v10 = vsub.f32 %v1441_v26, %v1451_v9  ;;  %v1454_v11 = vmul.f32 %v1452_v8, %v1452_v8 }
 0x9cf   :  { %v1456_v12 = vsel %vm78_vm1, %v1454_v11, 0.0  ;;  %v1455_v13 = vmul.f32 %v1453_v10, %v1453_v10 }
 0x9d0   :  { %1457 = vadd.xlane.f32.xlu0 %v1456_v12 }
 0x9d1   :  { %v1459_v14 = vsel %vm78_vm1, %v1455_v13, 0.0 }
 0x9d2   :  { %1460 = vadd.xlane.f32.xlu1 %v1459_v14 }
 0xa5d   :  { %v1458_v18 = vpop.xlane.xlu0 %1457 }
 0xa5e   :  { %v1462_v19 = vmul.f32 0.03125, %v1458_v18 }
 0xa5f   :  { %v1461_v21 = vpop.xlane.xlu1 %1460 }
 0xa60   :  { %v1464_v22 = vadd.f32 1e-05, %v1462_v19  ;;  %v1463_v25 = vmul.f32 0.03125, %v1461_v21 }
 0xa62   :  { %3594 = vrsqrt.f32 %v1464_v22  ;;  %v1465_v28 = vadd.f32 1e-05, %v1463_v25 }
 0xa64   :  { %3596 = vrsqrt.f32 %v1465_v28 }
 0xa6c   :  { %v3595_v29 = vpop.eup %3594 }
 0xa6d   :  { %v1468_v30 = vmul.f32 %v3595_v29, %v1452_v8 }
 0xa6e   :  { %v3597_v32 = vpop.eup %3596 }
 0xa6f   :  { %v1476_v33 = vmul.f32 %v3022_v31, %v1468_v30  ;;  %v1469_v34 = vmul.f32 %v3597_v32, %v1453_v10 }
 0xa71   :  { %v1477_v36 = vmul.f32 %v3022_v31, %v1469_v34  ;;  %v4096_v37 = vadd.f32 %v3023_v35, %v1476_v33 }
 0xa73   :  { %v4098_v27 = vadd.f32 %v3023_v35, %v1477_v36 }
 0xa75   :  { %v1486_v38 = vpack.c.bf16 %v4098_v27, %v4096_v37 }
 0xa77   :  { %3387 = vmatmul.mubr.msk.bf16.vlgmr.msra.gmra.mrb[32].mxu0 %vm78_vm1, %v1486_v38 }
 0xa78   :  { %3392 = vmatprep.mubr.msk.bf16.mxu0 %vm3663_vm0, %v3662_v1 }
 0xb4a   :  { %v1549_v20 = vpop.f32.mrb[32].mxu0 }
 0xb4b   :  { %v1550_v24 = vadd.f32 %v3029_v41, %v1549_v20  ;;  %v3388_v17 = vpop.f32.mrb[33].mxu0 }
 0xb4c   :  { %v1552_v43 = vpop.f32.mrb[34].mxu0 }
 0xb4d   :  { %v3144_v44 = vpack.c.bf16 %v1550_v24, %v1550_v24  ;;  %v1553_v45 = vadd.f32 %v3029_v41, %v1552_v43  ;;  %v3389_v46 = vpop.f32.mrb[35].mxu0 }
 0xb4f   :  { %v3145_v47 = vpack.c.bf16 %v1553_v45, %v1553_v45  ;;  %1562 = vrot.lane.b32.xlu0 %v3144_v44, %s3665_s24 }
 0xb51   :  { %1564 = vrot.lane.b32.xlu1 %v3145_v47, %s3665_s24 }
 0xb53   :  { %1568 = vrot.lane.b32.xlu0 %v3145_v47, %s3664_s23 }
 0xb55   :  { %1566 = vrot.lane.b32.xlu1 %v3144_v44, %s3664_s23 }
 0xb57   :  { %1572 = vrot.lane.b32.xlu0 %v3145_v47, %s3666_s25 }
 0xb59   :  { %1570 = vrot.lane.b32.xlu1 %v3144_v44, %s3666_s25 }
 0xb5b   :  { %1622 = vrot.lane.b32.xlu0 %v3145_v47, %s3667_s26 }
 0xb5d   :  { %1574 = vrot.lane.b32.xlu1 %v3144_v44, %s3667_s26 }
 0xbc1   :  { %v1563_v48 = vpop.permute.xlu0 %1562 }
 0xbc2   :  { %v4116_v49 = vcombine.low %v1563_v48, %v1563_v48 }
 0xbc3   :  { %v1565_v50 = vpop.permute.xlu1 %1564 }
 0xbc4   :  { %v4118_v51 = vcombine.low %v1565_v50, %v1565_v50  ;;  %1672 = vrot.lane.b32.xlu1 %v4116_v49, %s3667_s26 }
 0xbc5   :  { %v1569_v52 = vpop.permute.xlu0 %1568 }
 0xbc6   :  { %1722 = vrot.lane.b32.xlu0 %v4118_v51, %s3667_s26  ;;  %v4124_v54 = vcombine.low %v1569_v52, %v1569_v52 }
 0xbc7   :  { %v1567_v53 = vpop.permute.xlu1 %1566 }
 0xbc8   :  { %v4126_v55 = vcombine.low %v1567_v53, %v1567_v53 }
 0xbc9   :  { %v1573_v56 = vpop.permute.xlu0 %1572 }
 0xbca   :  { %1822 = vrot.lane.b32.xlu0 %v4124_v54, %s3667_s26  ;;  %1772 = vrot.lane.b32.xlu1 %v4126_v55, %s3667_s26  ;;  %v4132_v58 = vcombine.low %v1573_v56, %v1573_v56 }
 0xbcb   :  { %v1571_v57 = vpop.permute.xlu1 %1570 }
 0xbcc   :  { %v4134_v6 = vcombine.low %v1571_v57, %v1571_v57 }
 0xbcd   :  { %v1623_v60 = vpop.permute.xlu0 %1622 }
 0xbce   :  { %1922 = vrot.lane.b32.xlu0 %v4132_v58, %s3667_s26  ;;  %1872 = vrot.lane.b32.xlu1 %v4134_v6, %s3667_s26  ;;  %v1628_v61 = vsel %vm143_vm2, %v1623_v60, 0 }
 0xbcf   :  { %v1575_v7 = vpop.permute.xlu1 %1574 }
 0xbd0   :  { %v1580_v59 = vsel %vm143_vm2, %v1575_v7, 0 }
 0xbd1   :  { %3391 = vmatpush3.bf16.xpose.msra.mxu0 %v1580_v59 }
 0xbd2   :  { %2066 = vrot.lane.b32.xlu0 %v3144_v44, %s3668_s27  ;;  %2114 = vrot.lane.b32.xlu1 %v3145_v47, %s3668_s27 }
 0xbd3   :  { %3396 = vmatprep.subr.bf16.mxu0 %v3662_v1 }
 0xbd8   :  { %3393 = vmatmul.mubr.msk.bf16.vlgmr.msra.gmra.mrb[36].mxu0 %vm143_vm2, %v3144_v44 }
 0xbd9   :  { %3397 = vmatpush3.bf16.xpose.msra.mxu0 %v1628_v61  ;;  %3398 = vmatprep.mubr.msk.bf16.mxu0 %vm3663_vm0, %v3662_v1 }
 0xbda   :  { %3402 = vmatprep.subr.bf16.mxu0 %v3662_v1 }
 0xbe0   :  { %3399 = vmatmul.mubr.msk.bf16.vlgmr.msra.gmra.mrb[40].mxu0 %vm143_vm2, %v3145_v47 }
 0xbe1   :  { %3404 = vmatprep.mubr.msk.bf16.mxu0 %vm3663_vm0, %v3662_v1 }
 0xc36   :  { %v1673_v63 = vpop.permute.xlu1 %1672 }
 0xc37   :  { %v1678_v0 = vsel %vm143_vm2, %v1673_v63, 0 }
 0xc38   :  { %v1723_v2 = vpop.permute.xlu0 %1722  ;;  %3403 = vmatpush3.bf16.xpose.msra.mxu0 %v1678_v0 }
 0xc39   :  { %v1728_v26 = vsel %vm143_vm2, %v1723_v2, 0  ;;  %3414 = vmatprep.subr.bf16.mxu0 %v3662_v1 }
 0xc3a   :  { %3409 = vmatpush3.bf16.xpose.msra.mxu1 %v1728_v26 }
 0xc3b   :  { %3420 = vmatprep.subr.bf16.mxu1 %v3662_v1 }
 0xc3c   :  { %v1773_v23 = vpop.permute.xlu1 %1772  ;;  %v1823_v3 = vpop.permute.xlu0 %1822 }
 0xc3d   :  { %v1778_v4 = vsel %vm143_vm2, %v1773_v23, 0  ;;  %v1828_v5 = vsel %vm143_vm2, %v1823_v3, 0 }
 0xc3f   :  { %3405 = vmatmul.mubr.msk.bf16.vlgmr.msra.gmra.mrb[44].mxu0 %vm143_vm2, %v1563_v48 }
 0xc40   :  { %3415 = vmatpush3.bf16.xpose.msra.mxu0 %v1778_v4  ;;  %3416 = vmatprep.mubr.msk.bf16.mxu0 %vm3663_vm0, %v3662_v1  ;;  %v1873_v8 = vpop.permute.xlu1 %1872  ;;  %v1923_v9 = vpop.permute.xlu0 %1922 }
 0xc41   :  { %3411 = vmatmul.mubr.msk.bf16.vlgmr.msra.gmra.mrb[48].mxu1 %vm143_vm2, %v1565_v50  ;;  %3426 = vmatprep.subr.bf16.mxu0 %v3662_v1  ;;  %v1878_v10 = vsel %vm143_vm2, %v1873_v8, 0  ;;  %v1928_v11 = vsel %vm143_vm2, %v1923_v9, 0 }
 0xc42   :  { %3421 = vmatpush3.bf16.xpose.msra.mxu1 %v1828_v5  ;;  %3422 = vmatprep.mubr.msk.bf16.mxu1 %vm3663_vm0, %v3662_v1 }
 0xc43   :  { %3432 = vmatprep.subr.bf16.mxu1 %v3662_v1 }
 0xc44   :  { %v2067_v12 = vpop.permute.xlu0 %2066  ;;  %v2115_v13 = vpop.permute.xlu1 %2114 }
 0xc45   :  { %v2072_v14 = vsel %vm639_vm3, %v2067_v12, 0  ;;  %v2120_v15 = vsel %vm639_vm3, %v2115_v13, 0 }
 0xc47   :  { %3417 = vmatmul.mubr.msk.bf16.vlgmr.msra.gmra.mrb[48].mxu0 %vm143_vm2, %v1567_v53 }
 0xc48   :  { %3427 = vmatpush3.bf16.xpose.msra.mxu0 %v1878_v10  ;;  %3428 = vmatprep.mubr.msk.bf16.mxu0 %vm3663_vm0, %v3662_v1 }
 0xc49   :  { %3423 = vmatmul.mubr.msk.bf16.vlgmr.msra.gmra.mrb[52].mxu1 %vm143_vm2, %v1569_v52  ;;  %3438 = vmatprep.subr.bf16.mxu0 %v3662_v1 }
 0xc4a   :  { %3433 = vmatpush3.bf16.xpose.msra.mxu1 %v1928_v11  ;;  %3434 = vmatprep.mubr.msk.bf16.mxu1 %vm3663_vm0, %v3662_v1 }
 0xc4b   :  { %3444 = vmatprep.subr.bf16.mxu1 %v3662_v1 }
 0xc4f   :  { %3429 = vmatmul.mubr.msk.bf16.vlgmr.msra.gmra.mrb[52].mxu0 %vm143_vm2, %v1571_v57 }
 0xc50   :  { %3439 = vmatpush3.bf16.msra.mxu0 %v2072_v14  ;;  %3440 = vmatprep.mubr.msk.bf16.mxu0 %vm3663_vm0, %v3662_v1 }
 0xc51   :  { %3435 = vmatmul.mubr.msk.bf16.vlgmr.msra.gmra.mrb[56].mxu1 %vm143_vm2, %v1573_v56  ;;  %3450 = vmatprep.subr.bf16.mxu0 %v3662_v1 }
 0xc52   :  { %3445 = vmatpush3.bf16.msra.mxu1 %v2120_v15  ;;  %3446 = vmatprep.mubr.msk.bf16.mxu1 %vm3663_vm0, %v3662_v1 }
 0xc53   :  { %3456 = vmatprep.subr.bf16.mxu1 %v3662_v1 }
 0xcab   :  { %v1616_v16 = vpop.f32.mrb[36].mxu0 }
 0xcac   :  { %v3394_v18 = vpop.f32.mrb[37].mxu0  ;;  %v1970_v19 = vsel %vm143_vm2, %v1616_v16, -inf }
 0xcad   :  { %1971 = vmax.xlane.f32.xlu1 %v1970_v19  ;;  %v1619_v21 = vpop.f32.mrb[38].mxu0 }
 0xcae   :  { %v3395_v22 = vpop.f32.mrb[39].mxu0 }
 0xcb3   :  { %v1664_v25 = vpop.f32.mrb[40].mxu0 }
 0xcb4   :  { %v3400_v28 = vpop.f32.mrb[41].mxu0  ;;  %v1973_v29 = vsel %vm143_vm2, %v1664_v25, -inf }
 0xcb5   :  { %1974 = vmax.xlane.f32.xlu0 %v1973_v29  ;;  %v1667_v31 = vpop.f32.mrb[42].mxu0 }
 0xcb6   :  { %v3401_v30 = vpop.f32.mrb[43].mxu0 }
 0xd12   :  { %v1714_v32 = vpop.f32.mrb[44].mxu0 }
 0xd13   :  { %v3406_v33 = vpop.f32.mrb[45].mxu0  ;;  %v1976_v34 = vsel %vm143_vm2, %v1714_v32, -inf }
 0xd14   :  { %v1764_v35 = vpop.f32.mrb[48].mxu1  ;;  %1977 = vmax.xlane.f32.xlu0 %v1976_v34  ;;  %v1717_v36 = vpop.f32.mrb[46].mxu0 }
 0xd15   :  { %v3407_v38 = vpop.f32.mrb[47].mxu0  ;;  %v3412_v41 = vpop.f32.mrb[49].mxu1  ;;  %v1979_v20 = vsel %vm143_vm2, %v1764_v35, -inf }
 0xd16   :  { %v1767_v24 = vpop.f32.mrb[50].mxu1  ;;  %1980 = vmax.xlane.f32.xlu1 %v1979_v20 }
 0xd17   :  { %v3413_v17 = vpop.f32.mrb[51].mxu1 }
 0xd1a   :  { %v4190_v43 = vpop.f32.mrb[48].mxu0 }
 0xd1b   :  { %v3418_v44 = vpop.f32.mrb[49].mxu0  ;;  %v1982_v45 = vsel %vm143_vm2, %v4190_v43, -inf }
 0xd1c   :  { %v1864_v46 = vpop.f32.mrb[52].mxu1  ;;  %1983 = vmax.xlane.f32.xlu0 %v1982_v45  ;;  %v1817_v47 = vpop.f32.mrb[50].mxu0 }
 0xd1d   :  { %v3419_v48 = vpop.f32.mrb[51].mxu0  ;;  %v3424_v50 = vpop.f32.mrb[53].mxu1  ;;  %v1985_v52 = vsel %vm143_vm2, %v1864_v46, -inf }
 0xd1e   :  { %v1867_v53 = vpop.f32.mrb[54].mxu1  ;;  %1986 = vmax.xlane.f32.xlu1 %v1985_v52 }
 0xd1f   :  { %v3425_v56 = vpop.f32.mrb[55].mxu1 }
 0xd22   :  { %v4195_v57 = vpop.f32.mrb[52].mxu0 }
 0xd23   :  { %v3430_v7 = vpop.f32.mrb[53].mxu0  ;;  %v1988_v59 = vsel %vm143_vm2, %v4195_v57, -inf }
 0xd24   :  { %v1964_v60 = vpop.f32.mrb[56].mxu1  ;;  %1989 = vmax.xlane.f32.xlu0 %v1988_v59  ;;  %v1917_v61 = vpop.f32.mrb[54].mxu0 }
 0xd25   :  { %v3431_v63 = vpop.f32.mrb[55].mxu0  ;;  %v3436_v0 = vpop.f32.mrb[57].mxu1  ;;  %v1991_v2 = vsel %vm143_vm2, %v1964_v60, -inf }
 0xd26   :  { %v1967_v26 = vpop.f32.mrb[58].mxu1  ;;  %1992 = vmax.xlane.f32.xlu1 %v1991_v2 }
 0xd27   :  { %v3437_v23 = vpop.f32.mrb[59].mxu1 }
 0xd37   :  { %2162 = vrot.lane.b32.xlu1 %v4116_v49, %s3668_s27 }
 0xd3a   :  { %2210 = vrot.lane.b32.xlu0 %v4118_v51, %s3668_s27  ;;  %v1972_v3 = vpop.xlane.xlu1 %1971 }
 0xd3b   :  { %v1994_v5 = vsub.f32 %v1616_v16, %v1972_v3 }
 0xd3d   :  { %v2002_v9 = vmul.f32 1.442695, %v1994_v5 }
 0xd3f   :  { %3598 = vpow2.f32 %v2002_v9 }
 0xd42   :  { %v1975_v4 = vpop.xlane.xlu0 %1974 }
 0xd43   :  { %v1995_v8 = vsub.f32 %v1664_v25, %v1975_v4 }
 0xd45   :  { %v2004_v10 = vmul.f32 1.442695, %v1995_v8 }
 0xd47   :  { %3600 = vpow2.f32 %v2004_v10 }
 0xd49   :  { %v3599_v11 = vpop.eup %3598 }
 0xd4a   :  { %v2018_v13 = vsel %vm143_vm2, %v3599_v11, 0.0 }
 0xd51   :  { %v3601_v12 = vpop.eup %3600 }
 0xd52   :  { %v2021_v14 = vsel %vm143_vm2, %v3601_v12, 0.0 }
 0xd59   :  { %2019 = vadd.xlane.f32.xlu0 %v2018_v13 }
 0xd5b   :  { %2022 = vadd.xlane.f32.xlu1 %v2021_v14 }
 0xd6c   :  { %2258 = vrot.lane.b32.xlu1 %v4126_v55, %s3668_s27 }
 0xda1   :  { %v1978_v49 = vpop.xlane.xlu0 %1977 }
 0xda2   :  { %v1996_v51 = vsub.f32 %v1714_v32, %v1978_v49 }
 0xda3   :  { %v1981_v15 = vpop.xlane.xlu1 %1980 }
 0xda4   :  { %v2006_v16 = vmul.f32 1.442695, %v1996_v51  ;;  %v1997_v18 = vsub.f32 %v1764_v35, %v1981_v15 }
 0xda6   :  { %3602 = vpow2.f32 %v2006_v16  ;;  %v2008_v19 = vmul.f32 1.442695, %v1997_v18 }
 0xda8   :  { %3604 = vpow2.f32 %v2008_v19 }
 0xda9   :  { %v1984_v41 = vpop.xlane.xlu0 %1983 }
 0xdaa   :  { %v1998_v20 = vsub.f32 %v4190_v43, %v1984_v41 }
 0xdab   :  { %v1987_v21 = vpop.xlane.xlu1 %1986 }
 0xdac   :  { %v1999_v22 = vsub.f32 %v1864_v46, %v1987_v21  ;;  %v2010_v17 = vmul.f32 1.442695, %v1998_v20 }
 0xdae   :  { %v2012_v25 = vmul.f32 1.442695, %v1999_v22 }
 0xdb0   :  { %v4208_v28 = vpop.eup %3602  ;;  %3606 = vpow2.f32 %v2012_v25 }
 0xdb1   :  { %v2024_v29 = vsel %vm143_vm2, %v4208_v28, 0.0  ;;  %v1990_v24 = vpop.xlane.xlu0 %1989 }
 0xdb2   :  { %v4212_v31 = vpop.eup %3604  ;;  %2025 = vadd.xlane.f32.xlu0 %v2024_v29  ;;  %v2000_v44 = vsub.f32 %v4195_v57, %v1990_v24 }
 0xdb3   :  { %v1993_v55 = vpop.xlane.xlu1 %1992  ;;  %v2027_v30 = vsel %vm143_vm2, %v4212_v31, 0.0 }
 0xdb4   :  { %v2001_v32 = vsub.f32 %v1964_v60, %v1993_v55  ;;  %2028 = vadd.xlane.f32.xlu1 %v2027_v30  ;;  %v2014_v45 = vmul.f32 1.442695, %v2000_v44 }
 0xdb5   :  { %v2211_v46 = vpop.permute.xlu0 %2210 }
 0xdb6   :  { %v2016_v33 = vmul.f32 1.442695, %v2001_v32  ;;  %v2216_v63 = vsel %vm639_vm3, %v2211_v46, 0 }
 0xdb7   :  { %v2163_v48 = vpop.permute.xlu1 %2162 }
 0xdb8   :  { %3608 = vpow2.f32 %v2016_v33  ;;  %v2168_v60 = vsel %vm639_vm3, %v2163_v48, 0 }
 0xdb9   :  { %3610 = vpow2.f32 %v2010_v17 }
 0xdba   :  { %v4216_v34 = vpop.eup %3606  ;;  %3612 = vpow2.f32 %v2014_v45 }
 0xdbb   :  { %v2033_v35 = vsel %vm143_vm2, %v4216_v34, 0.0 }
 0xdbc   :  { %2034 = vadd.xlane.f32.xlu1 %v2033_v35 }
 0xdc2   :  { %v4220_v36 = vpop.eup %3608 }
 0xdc3   :  { %v2039_v38 = vsel %vm143_vm2, %v4220_v36, 0.0  ;;  %v4230_v47 = vpop.eup %3610 }
 0xdc4   :  { %2040 = vadd.xlane.f32.xlu1 %v2039_v38  ;;  %v4234_v52 = vpop.eup %3612 }
 0xdc8   :  { %2306 = vrot.lane.b32.xlu0 %v4124_v54, %s3668_s27  ;;  %v2030_v54 = vsel %vm143_vm2, %v4230_v47, 0.0 }
 0xdd5   :  { %2354 = vrot.lane.b32.xlu1 %v4134_v6, %s3668_s27  ;;  %v2036_v6 = vsel %vm143_vm2, %v4234_v52, 0.0 }
 0xde6   :  { %v2020_v50 = vpop.xlane.xlu0 %2019 }
 0xde7   :  { %3614 = vrcp.f32 %v2020_v50  ;;  %2031 = vadd.xlane.f32.xlu0 %v2030_v54 }
 0xde8   :  { %v2023_v43 = vpop.xlane.xlu1 %2022 }
 0xde9   :  { %3616 = vrcp.f32 %v2023_v43 }
 0xdeb   :  { %2037 = vadd.xlane.f32.xlu0 %v2036_v6 }
 0xdec   :  { %v2259_v0 = vpop.permute.xlu1 %2258 }
 0xdf1   :  { %v3615_v53 = vpop.eup %3614 }
 0xdf2   :  { %v2050_v56 = vmul.f32 %v3615_v53, %v3599_v11  ;;  %v2264_v11 = vsel %vm639_vm3, %v2259_v0, 0 }
 0xdf3   :  { %v3617_v57 = vpop.eup %3616 }
 0xdf4   :  { %v2051_v7 = vmul.f32 %v3617_v57, %v3601_v12  ;;  %v2058_v59 = vpack.c.bf16 %v2050_v56, %v2050_v56 }
 0xdf6   :  { %3441 = vmatmul.mubr.msk.bf16.vlgmr.msra.gmra.mrb[56].mxu0 %vm143_vm2, %v2058_v59  ;;  %v2059_v61 = vpack.c.bf16 %v2051_v7, %v2051_v7  ;;  %v3534_v59 = vld [vmem:[%s4408_s4 + $0x10] sm:$0xff]  }
 0xdf7   :  { %3451 = vmatpush3.bf16.msra.mxu0 %v2168_v60  ;;  %3452 = vmatprep.mubr.msk.bf16.mxu0 %vm3663_vm0, %v3662_v1  ;;  %v3535_v60 = vld [vmem:[%s4408_s4 + $0x18] sm:$0xff]  }
 0xdf8   :  { %3447 = vmatmul.mubr.msk.bf16.vlgmr.msra.gmra.mrb[60].mxu1 %vm143_vm2, %v2059_v61  ;;  %3462 = vmatprep.subr.bf16.mxu0 %v3662_v1 }
 0xdf9   :  { %3457 = vmatpush3.bf16.msra.mxu1 %v2216_v63  ;;  %3458 = vmatprep.mubr.msk.bf16.mxu1 %vm3663_vm0, %v3662_v1 }
 0xdfa   :  { %3468 = vmatprep.subr.bf16.mxu1 %v3662_v1 }
 0xe01   :  { %2402 = vrot.lane.b32.xlu0 %v4132_v58, %s3668_s27 }
 0xe3f   :  { %v2026_v2 = vpop.xlane.xlu0 %2025 }
 0xe40   :  { %3618 = vrcp.f32 %v2026_v2 }
 0xe41   :  { %v2029_v26 = vpop.xlane.xlu1 %2028 }
 0xe42   :  { %3620 = vrcp.f32 %v2029_v26 }
 0xe43   :  { %v2307_v10 = vpop.permute.xlu0 %2306 }
 0xe44   :  { %v2312_v12 = vsel %vm639_vm3, %v2307_v10, 0 }
 0xe49   :  { %v2035_v23 = vpop.xlane.xlu1 %2034 }
 0xe4a   :  { %v3619_v3 = vpop.eup %3618  ;;  %3622 = vrcp.f32 %v2035_v23 }
 0xe4b   :  { %v2052_v4 = vmul.f32 %v3619_v3, %v4208_v28 }
 0xe4c   :  { %v3621_v5 = vpop.eup %3620 }
 0xe4d   :  { %v2053_v8 = vmul.f32 %v3621_v5, %v4212_v31  ;;  %v2060_v9 = vpack.c.bf16 %v2052_v4, %v2052_v4 }
 0xe4f   :  { %3453 = vmatmul.mubr.msk.bf16.vlgmr.msra.gmra.mrb[60].mxu0 %vm143_vm2, %v2060_v9  ;;  %v2061_v58 = vpack.c.bf16 %v2053_v8, %v2053_v8 }
 0xe50   :  { %3463 = vmatpush3.bf16.msra.mxu0 %v2264_v11  ;;  %3464 = vmatprep.mubr.msk.bf16.mxu0 %vm3663_vm0, %v3662_v1 }
 0xe51   :  { %3459 = vmatmul.mubr.msk.bf16.vlgmr.msra.gmra.mrb[64].mxu1 %vm143_vm2, %v2061_v58  ;;  %3474 = vmatprep.subr.bf16.mxu0 %v3662_v1  ;;  %v2041_v51 = vpop.xlane.xlu1 %2040 }
 0xe52   :  { %3469 = vmatpush3.bf16.msra.mxu1 %v2312_v12  ;;  %3470 = vmatprep.mubr.msk.bf16.mxu1 %vm3663_vm0, %v3662_v1  ;;  %3624 = vrcp.f32 %v2041_v51 }
 0xe53   :  { %3480 = vmatprep.subr.bf16.mxu1 %v3662_v1 }
 0xe54   :  { %v3623_v13 = vpop.eup %3622 }
 0xe55   :  { %v2055_v14 = vmul.f32 %v3623_v13, %v4216_v34  ;;  %v2355_v31 = vpop.permute.xlu1 %2354 }
 0xe56   :  { %v2360_v32 = vsel %vm639_vm3, %v2355_v31, 0 }
 0xe57   :  { %v2063_v49 = vpack.c.bf16 %v2055_v14, %v2055_v14 }
 0xe59   :  { %3471 = vmatmul.mubr.msk.bf16.vlgmr.msra.gmra.mrb[68].mxu1 %vm143_vm2, %v2063_v49 }
 0xe5a   :  { %3482 = vmatprep.mubr.msk.bf16.mxu1 %vm3663_vm0, %v3662_v1 }
 0xe5c   :  { %v3625_v16 = vpop.eup %3624 }
 0xe5d   :  { %v2057_v19 = vmul.f32 %v3625_v16, %v4220_v36 }
 0xe5f   :  { %v2065_v28 = vpack.c.bf16 %v2057_v19, %v2057_v19 }
 0xe74   :  { %v2032_v15 = vpop.xlane.xlu0 %2031 }
 0xe75   :  { %3626 = vrcp.f32 %v2032_v15  ;;  %v3066_v15 = vld [vmem:[%s4409_s5 + $0x1] ss:$0 sm:$0xff] }
 0xe78   :  { %v2038_v18 = vpop.xlane.xlu0 %2037 }
 0xe79   :  { %3628 = vrcp.f32 %v2038_v18 }
 0xe7c   :  { %v2403_v21 = vpop.permute.xlu0 %2402 }
 0xe7d   :  { %v2408_v22 = vsel %vm639_vm3, %v2403_v21, 0 }
 0xe7e   :  { %3481 = vmatpush3.bf16.msra.mxu1 %v2408_v22 }
 0xe7f   :  { %v3627_v25 = vpop.eup %3626 }
 0xe80   :  { %v2054_v29 = vmul.f32 %v3627_v25, %v4230_v47 }
 0xe81   :  { %3483 = vmatmul.mubr.msk.bf16.vlgmr.msra.gmra.mrb[72].mxu1 %vm143_vm2, %v2065_v28 }
 0xe82   :  { %v2062_v55 = vpack.c.bf16 %v2054_v29, %v2054_v29  ;;  %2681 = vmatprep.mubr.bf16.mxu1 %v3672_v62 }
 0xe83   :  { %v3629_v30 = vpop.eup %3628 }
 0xe84   :  { %3465 = vmatmul.mubr.msk.bf16.vlgmr.msra.gmra.mrb[64].mxu0 %vm143_vm2, %v2062_v55  ;;  %v2056_v33 = vmul.f32 %v3629_v30, %v4234_v52 }
 0xe85   :  { %3475 = vmatpush3.bf16.msra.mxu0 %v2360_v32  ;;  %3476 = vmatprep.mubr.msk.bf16.mxu0 %vm3663_vm0, %v3662_v1 }
 0xe86   :  { %3486 = vmatprep.subr.bf16.mxu0 %v3662_v1  ;;  %v2064_v34 = vpack.c.bf16 %v2056_v33, %v2056_v33 }
 0xe8c   :  { %3477 = vmatmul.mubr.msk.bf16.vlgmr.msra.gmra.mrb[68].mxu0 %vm143_vm2, %v2064_v34 }
 0xe8d   :  { %3490 = vmatprep.mubr.msk.bf16.mxu0 %vm3663_vm0, %v3662_v1  ;;  %3487 = vmatpush3.bf16.msra.mxu0 %v3534_v59 }
 0xe8e   :  { %3488 = vmatprep.subr.bf16.mxu0 %v3662_v1 }
 0xe91   :  { %3489 = vmatpush3.bf16.msra.mxu0 %v3535_v60 }
 0xec9   :  { %v2108_v62 = vpop.f32.mrb[56].mxu0 }
 0xeca   :  { %v3442_v35 = vpop.f32.mrb[57].mxu0 }
 0xecb   :  { %v2111_v36 = vpop.f32.mrb[58].mxu0  ;;  %v2156_v38 = vpop.f32.mrb[60].mxu1 }
 0xecc   :  { %v3146_v41 = vpack.c.bf16 %v2156_v38, %v2108_v62  ;;  %v3443_v20 = vpop.f32.mrb[59].mxu0  ;;  %v3448_v24 = vpop.f32.mrb[61].mxu1 }
 0xecd   :  { %v2159_v17 = vpop.f32.mrb[62].mxu1  ;;  %v3536_v20 = vld [vmem:[%s4412_s8 + $0x20] ss:$8 sps:$4 sm:$0xff]   ;;  %v3541_v24 = vld [vmem:[%s4412_s8 + $0x34] ss:$8 sps:$4 sm:$0xff]  }
 0xece   :  { %v3449_v44 = vpop.f32.mrb[63].mxu1  ;;  %v3539_v17 = vld [vmem:[%s4412_s8 + $0x30] ss:$8 sps:$4 sm:$0xff]  }
 0xecf   :  { %v3542_v44 = vld [vmem:[%s4414_s10 + $0xc0] sm:$0xff]  }
 0xed0   :  { %3248 = vmatprep.subr.bf16.mxu0 %v3542_v44 }
 0xf22   :  { %v2204_v45 = vpop.f32.mrb[60].mxu0 }
 0xf23   :  { %v3454_v46 = vpop.f32.mrb[61].mxu0 }
 0xf24   :  { %v2207_v47 = vpop.f32.mrb[62].mxu0  ;;  %v2252_v48 = vpop.f32.mrb[64].mxu1  ;;  %v3544_v46 = vld [vmem:[%s4414_s10 + $0xc8] sm:$0xff]  }
 0xf25   :  { %v3147_v50 = vpack.c.bf16 %v2252_v48, %v2204_v45  ;;  %v3455_v54 = vpop.f32.mrb[63].mxu0  ;;  %v3460_v52 = vpop.f32.mrb[65].mxu1  ;;  %v3543_v45 = vld [vmem:[%s4414_s10 + $0x80] sm:$0xff]   ;;  %v3545_v47 = vld [vmem:[%s4414_s10 + $0x88] sm:$0xff]   ;;  %v3546_v48 = vld [vmem:[%s4414_s10 + $0xd0] sm:$0xff]  }
 0xf26   :  { %v2255_v43 = vpop.f32.mrb[66].mxu1  ;;  %v3548_v54 = vld [vmem:[%s4414_s10 + $0xd8] sm:$0xff]  }
 0xf27   :  { %v3461_v6 = vpop.f32.mrb[67].mxu1  ;;  %2468 = vrot.lane.b32.xlu1 %v3147_v50, %s3669_s28  ;;  %v3547_v50 = vld [vmem:[%s4414_s10 + $0x90] sm:$0xff]   ;;  %v3549_v52 = vld [vmem:[%s4414_s10 + $0x98] sm:$0xff]   ;;  %v3550_v43 = vld [vmem:[%s4414_s10 + $0xe0] sm:$0xff]  }
 0xf28   :  { %v3551_v6 = vld [vmem:[%s4414_s10 + $0xa0] sm:$0xff]  }
 0xf2c   :  { %v2348_v53 = vpop.f32.mrb[68].mxu1 }
 0xf2d   :  { %v3472_v56 = vpop.f32.mrb[69].mxu1 }
 0xf2e   :  { %v2351_v57 = vpop.f32.mrb[70].mxu1 }
 0xf2f   :  { %v3473_v7 = vpop.f32.mrb[71].mxu1 }
 0xf54   :  { %v2444_v61 = vpop.f32.mrb[72].mxu1 }
 0xf55   :  { %v3484_v63 = vpop.f32.mrb[73].mxu1 }
 0xf56   :  { %v2447_v0 = vpop.f32.mrb[74].mxu1 }
 0xf57   :  { %v2300_v2 = vpop.f32.mrb[64].mxu0  ;;  %v3485_v26 = vpop.f32.mrb[75].mxu1 }
 0xf58   :  { %v3148_v23 = vpack.c.bf16 %v2348_v53, %v2300_v2  ;;  %v3466_v3 = vpop.f32.mrb[65].mxu0  ;;  %v3552_v53 = vld [vmem:[%s4414_s10 + $0xe8] sm:$0xff]   ;;  %v3072_v2 = vld [vmem:[%s4410_s6 + $0x1] ss:$0 sm:$0xff] }
 0xf59   :  { %v2303_v4 = vpop.f32.mrb[66].mxu0 }
 0xf5a   :  { %2475 = vrot.lane.b32.xlu0 %v3148_v23, %s3670_s17  ;;  %v3467_v5 = vpop.f32.mrb[67].mxu0  ;;  %v3073_v4 = vld [vmem:[%s4411_s7 + $0x1] ss:$0 sm:$0xff] }
 0xf5f   :  { %v2396_v8 = vpop.f32.mrb[68].mxu0 }
 0xf60   :  { %v3149_v9 = vpack.c.bf16 %v2444_v61, %v2396_v8  ;;  %v3478_v10 = vpop.f32.mrb[69].mxu0 }
 0xf61   :  { %v2399_v11 = vpop.f32.mrb[70].mxu0 }
 0xf62   :  { %2482 = vrot.lane.b32.xlu1 %v3149_v9, %s3671_s18  ;;  %v3479_v58 = vpop.f32.mrb[71].mxu0  ;;  %v3553_v11 = vld [vmem:[%s4414_s10 + $0xa8] sm:$0xff]  }
 0xf63   :  { %v3554_v58 = vld [vmem:[%s4414_s10 + $0xf0] sm:$0xff]  }
 0xf99   :  { %v2469_v1 = vpop.permute.xlu1 %2468 }
 0xf9a   :  { %v2486_v13 = vsel %vm143_vm2, %v3146_v41, %v2469_v1  ;;  %v3555_v1 = vld [vmem:[%s4414_s10 + $0xb0] sm:$0xff]  }
 0xfcc   :  { %v2476_v12 = vpop.permute.xlu0 %2475 }
 0xfcd   :  { %v2488_v14 = vsel %vm1056_vm4, %v2486_v13, %v2476_v12  ;;  %v3556_v12 = vld [vmem:[%s4414_s10 + $0xf8] sm:$0xff]  }
 0xfce   :  { %v3557_v13 = vld [vmem:[%s4414_s10 + $0xb8] sm:$0xff]  }
 0xfd4   :  { %v2483_v49 = vpop.permute.xlu1 %2482 }
 0xfd5   :  { %v2490_v51 = vsel %vm1059_vm5, %v2488_v14, %v2483_v49  ;;  %v3078_v14 = vld [vmem:[%s4413_s9 + $0x2] sm:$0x3] }
 0xfd6   :  { %3491 = vmatmul.mubr.msk.bf16.vlgmr.msra.gmra.mrb[72].mxu0 %vm78_vm1, %v2490_v51  ;;  %v2619_v49 = vrot.slane %v3078_v14, %v1184_v40  ;;  %v2623_v51 = vrot.slane %v3078_v14, %v1188_v42 }
 0xfd7   :  { %3249 = vmatpush3.bf16.msra.mxu0 %v3543_v45 }
 0xfd8   :  { %3250 = vmatprep.subr.bf16.mxu0 %v3544_v46 }
 0xfdb   :  { %3251 = vmatpush3.bf16.msra.mxu0 %v3545_v47 }
 0xfdc   :  { %3252 = vmatprep.subr.bf16.mxu0 %v3546_v48 }
 0xfdf   :  { %3253 = vmatpush3.bf16.msra.mxu0 %v3547_v50 }
 0xfe0   :  { %3254 = vmatprep.subr.bf16.mxu0 %v3548_v54 }
 0xfe3   :  { %3255 = vmatpush3.bf16.msra.mxu0 %v3549_v52 }
 0xfe4   :  { %3256 = vmatprep.subr.bf16.mxu0 %v3550_v43 }
 0xfe7   :  { %3257 = vmatpush3.bf16.msra.mxu0 %v3551_v6 }
 0xfe8   :  { %3258 = vmatprep.subr.bf16.mxu0 %v3552_v53 }
 0xfeb   :  { %3259 = vmatpush3.bf16.msra.mxu0 %v3553_v11 }
 0xfec   :  { %3260 = vmatprep.subr.bf16.mxu0 %v3554_v58 }
 0xfef   :  { %3261 = vmatpush3.bf16.msra.mxu0 %v3555_v1 }
 0xff0   :  { %3262 = vmatprep.subr.bf16.mxu0 %v3556_v12 }
 0xff3   :  { %3263 = vmatpush3.bf16.msra.mxu0 %v3557_v13 }
0x10a9   :  { %v2552_v16 = vpop.f32.mrb[72].mxu0 }
0x10aa   :  { %v2553_v18 = vadd.f32 %v3066_v15, %v2552_v16  ;;  %v3492_v19 = vpop.f32.mrb[73].mxu0 }
0x10ab   :  { %v2555_v21 = vpop.f32.mrb[74].mxu0 }
0x10ac   :  { %v2556_v22 = vadd.f32 %v3066_v15, %v2555_v21  ;;  %v3493_v25 = vpop.f32.mrb[75].mxu0  ;;  %v2559_v28 = vadd.f32 %v2553_v18, %v4096_v37 }
0x10ae   :  { %v2565_v29 = vsel %vm78_vm1, %v2559_v28, 0.0  ;;  %v2560_v31 = vadd.f32 %v2556_v22, %v4098_v27  ;;  %v3538_v27 = vld [vmem:[%s4412_s8 + $0x24] ss:$8 sps:$4 sm:$0xff]  }
0x10af   :  { %2566 = vadd.xlane.f32.xlu0 %v2565_v29  ;;  %2649 = vmatprep.subr.bf16.mxu1 %v3538_v27 }
0x10b0   :  { %v2568_v55 = vsel %vm78_vm1, %v2560_v31, 0.0  ;;  %2650 = vmatpush1.bf16.msra.mxu1 %v3536_v20 }
0x10b1   :  { %2569 = vadd.xlane.f32.xlu1 %v2568_v55  ;;  %2651 = vmatprep.subr.bf16.mxu1 %v3541_v24 }
0x10b4   :  { %2652 = vmatpush1.bf16.msra.mxu1 %v3539_v17 }
0x113c   :  { %v2567_v30 = vpop.xlane.xlu0 %2566 }
0x113d   :  { %v2571_v32 = vmul.f32 0.03125, %v2567_v30 }
0x113e   :  { %v2570_v33 = vpop.xlane.xlu1 %2569 }
0x113f   :  { %v2573_v34 = vsub.f32 %v2559_v28, %v2571_v32  ;;  %v2572_v62 = vmul.f32 0.03125, %v2570_v33 }
0x1141   :  { %v2574_v35 = vsub.f32 %v2560_v31, %v2572_v62  ;;  %v2575_v36 = vmul.f32 %v2573_v34, %v2573_v34 }
0x1143   :  { %v2577_v38 = vsel %vm78_vm1, %v2575_v36, 0.0  ;;  %v2576_v41 = vmul.f32 %v2574_v35, %v2574_v35 }
0x1144   :  { %2578 = vadd.xlane.f32.xlu0 %v2577_v38 }
0x1145   :  { %v2580_v37 = vsel %vm78_vm1, %v2576_v41, 0.0 }
0x1148   :  { %2581 = vadd.xlane.f32.xlu0 %v2580_v37 }
0x11d1   :  { %v2579_v56 = vpop.xlane.xlu0 %2578 }
0x11d2   :  { %v2583_v57 = vmul.f32 0.03125, %v2579_v56 }
0x11d4   :  { %v2585_v7 = vadd.f32 1e-05, %v2583_v57 }
0x11d5   :  { %v2582_v59 = vpop.xlane.xlu0 %2581 }
0x11d6   :  { %3630 = vrsqrt.f32 %v2585_v7  ;;  %v2584_v60 = vmul.f32 0.03125, %v2582_v59 }
0x11d8   :  { %v2586_v61 = vadd.f32 1e-05, %v2584_v60 }
0x11da   :  { %3632 = vrsqrt.f32 %v2586_v61  ;;  %v3136_v61 = vld [vmem:[%s4416_s12 + $0x1] ss:$0 sm:$0xff]  ;;  %s3673_s12 = smov [#allocation2]  }
0x11e0   :  { %v3631_v63 = vpop.eup %3630 }
0x11e1   :  { %v2589_v0 = vmul.f32 %v3631_v63, %v2573_v34 }
0x11e3   :  { %v2597_v23 = vmul.f32 %v3072_v2, %v2589_v0 }
0x11e4   :  { %v3633_v26 = vpop.eup %3632 }
0x11e5   :  { %v2590_v3 = vmul.f32 %v3633_v26, %v2574_v35  ;;  %v2605_v8 = vadd.f32 %v3073_v4, %v2597_v23 }
0x11e7   :  { %v2598_v5 = vmul.f32 %v3072_v2, %v2590_v3  ;;  %v3137_v2 = vld [vmem:[%s4417_s13 + $0x1] ss:$0 sm:$0xff]  ;;  %s2954_s13 = sshll.u32 %s3673_s12, 4  ;;  %s2955_s13 = int_to_ptr.vmem [resolvable:$true] %s2954_s13 }
0x11e8   :  { %s3638_s27 = scalar_lea.vmem %s2955_s13, 32  ;;  %p3643_p1 = scmp.lt.s32.totalorder %s2955_s13, %s2955_s13 }
0x11e9   :  { %v2606_v9 = vadd.f32 %v3073_v4, %v2598_v5  ;;  %p3639_p0 = scmp.ne.s32.totalorder %s2955_s13, %s3638_s27  ;;  %p3644_p2 = scmp.lt.s32.totalorder %s3638_s27, %s3638_s27 }
0x11eb   :  { %v2607_v10 = vpack.c.bf16 %v2606_v9, %v2605_v8  ;;  %p3645_p3 = por %p3644_p2, %p3643_p1 }
0x11ed   :  { %3083 = vmatmul.mubr.msk.bf16.vlgmr.msra.gmra.mrb[76].mxu1 %vm78_vm1, %v2607_v10  ;;  %p3646_p4 = pnand %p3645_p3, %p3639_p0 }
0x12c0   :  { %v2683_v15 = vpop.f32.mrb[76].mxu1 }
0x12c1   :  { %v2684_v16 = vadd.f32 %v2683_v15, %v2619_v49  ;;  %v2685_v18 = vpop.f32.mrb[77].mxu1 }
0x12c2   :  { %v2686_v19 = vadd.f32 %v2685_v18, %v2623_v51  ;;  %v2687_v21 = vpop.f32.mrb[78].mxu1 }
0x12c3   :  { %v2688_v22 = vadd.f32 %v2687_v21, %v2619_v49  ;;  %v2689_v25 = vpop.f32.mrb[79].mxu1  ;;  %v2692_v29 = vmax.f32 %v2684_v16, 0.0 }
0x12c4   :  { %v2690_v28 = vadd.f32 %v2689_v25, %v2623_v51  ;;  %v2693_v55 = vmax.f32 %v2686_v19, 0.0 }
0x12c5   :  { %v2694_v31 = vmax.f32 %v2688_v22, 0.0 }
0x12c6   :  { %v2695_v30 = vmax.f32 %v2690_v28, 0.0 }
0x12c7   :  { %v2696_v32 = vpack.c.bf16 %v2694_v31, %v2692_v29 }
0x12c8   :  { %v2697_v33 = vpack.c.bf16 %v2695_v30, %v2693_v55 }
0x12ca   :  { %2867 = vmatprep.mubr.bf16.mxu0 %v2697_v33 }
0x12cb   :  { %2868 = vmatmul.mubr.bf16.vlgmr.msra.gmra.mrb[76].mxu0 %v2696_v32 }
0x139e   :  { %v3264_v40 = vpop.f32.mrb[76].mxu0 }
0x139f   :  { %v3265_v42 = vpop.f32.mrb[77].mxu0 }
0x13a0   :  { %v3266_v34 = vadd.f32 %v3265_v42, %v3264_v40  ;;  %v3267_v62 = vpop.f32.mrb[78].mxu0 }
0x13a1   :  { %v3268_v35 = vpop.f32.mrb[79].mxu0 }
0x13a2   :  { %v2870_v36 = vadd.f32 %v3266_v34, %v3117_v39  ;;  %v3269_v38 = vadd.f32 %v3268_v35, %v3267_v62 }
0x13a4   :  { %v2873_v41 = vadd.f32 %v3269_v38, %v3117_v39  ;;  %v2876_v37 = vadd.f32 %v2870_v36, %v2605_v8 }
0x13a6   :  { %v2882_v27 = vsel %vm78_vm1, %v2876_v37, 0.0  ;;  %v2877_v20 = vadd.f32 %v2873_v41, %v2606_v9 }
0x13a7   :  { %2883 = vadd.xlane.f32.xlu1 %v2882_v27 }
0x13a8   :  { %v2885_v24 = vsel %vm78_vm1, %v2877_v20, 0.0 }
0x13a9   :  { %2886 = vadd.xlane.f32.xlu0 %v2885_v24 }
0x1434   :  { %v2884_v17 = vpop.xlane.xlu1 %2883 }
0x1435   :  { %v2888_v44 = vmul.f32 0.03125, %v2884_v17 }
0x1436   :  { %v2887_v45 = vpop.xlane.xlu0 %2886 }
0x1437   :  { %v2890_v46 = vsub.f32 %v2876_v37, %v2888_v44  ;;  %v2889_v47 = vmul.f32 0.03125, %v2887_v45 }
0x1439   :  { %v2891_v48 = vsub.f32 %v2877_v20, %v2889_v47  ;;  %v2892_v50 = vmul.f32 %v2890_v46, %v2890_v46 }
0x143b   :  { %v2894_v54 = vsel %vm78_vm1, %v2892_v50, 0.0  ;;  %v2893_v52 = vmul.f32 %v2891_v48, %v2891_v48 }
0x143c   :  { %2895 = vadd.xlane.f32.xlu1 %v2894_v54 }
0x143d   :  { %v2897_v43 = vsel %vm78_vm1, %v2893_v52, 0.0 }
0x143e   :  { %2898 = vadd.xlane.f32.xlu0 %v2897_v43 }
0x14c9   :  { %v2896_v6 = vpop.xlane.xlu1 %2895 }
0x14ca   :  { %v2900_v53 = vmul.f32 0.03125, %v2896_v6 }
0x14cb   :  { %v2899_v56 = vpop.xlane.xlu0 %2898 }
0x14cc   :  { %v2902_v57 = vadd.f32 1e-05, %v2900_v53  ;;  %v2901_v7 = vmul.f32 0.03125, %v2899_v56 }
0x14ce   :  { %3634 = vrsqrt.f32 %v2902_v57  ;;  %v2903_v59 = vadd.f32 1e-05, %v2901_v7 }
0x14d0   :  { %3636 = vrsqrt.f32 %v2903_v59 }
0x14d8   :  { %v3635_v60 = vpop.eup %3634 }
0x14d9   :  { %v2906_v63 = vmul.f32 %v3635_v60, %v2890_v46 }
0x14da   :  { %v3637_v0 = vpop.eup %3636 }
0x14db   :  { %v2914_v26 = vmul.f32 %v3136_v61, %v2906_v63  ;;  %v2907_v23 = vmul.f32 %v3637_v0, %v2891_v48 }
0x14dd   :  { %v2915_v3 = vmul.f32 %v3136_v61, %v2907_v23  ;;  %v2922_v4 = vadd.f32 %v3137_v2, %v2914_v26 }
0x14df   :  { %v2923_v5 = vadd.f32 %v3137_v2, %v2915_v3  ;;  %v2924_v8 = vsel %vm78_vm1, %v2922_v4, 0.0 }
0x14e0   :  { %v2925_v9 = vrot.slane %v2924_v8, 4 }
0x14e1   :  { %v2931_v10 = vsel %vm78_vm1, %v2923_v5, 0.0 }
0x14e2   :  { %v2926_v11 = vadd.f32 %v2925_v9, %v2924_v8  ;;  %v2932_v58 = vrot.slane %v2931_v10, 4 }
0x14e4   :  { %v2927_v1 = vrot.slane %v2926_v11, 2  ;;  %v2933_v12 = vadd.f32 %v2932_v58, %v2931_v10 }
0x14e6   :  { %v2928_v13 = vadd.f32 %v2927_v1, %v2926_v11  ;;  %v2934_v14 = vrot.slane %v2933_v12, 2 }
0x14e8   :  { %v2929_v49 = vrot.slane %v2928_v13, 1  ;;  %v2935_v51 = vadd.f32 %v2934_v14, %v2933_v12 }
0x14ea   :  { %v2930_v15 = vadd.f32 %v2929_v49, %v2928_v13  ;;  %v2936_v16 = vrot.slane %v2935_v51, 1 }
0x14ec   :  { %v2937_v18 = vadd.f32 %v2936_v16, %v2935_v51  ;;  %v2939_v19 = vmul.f32 0.125, %v2930_v15 }
0x14ee   :  { %v2940_v21 = vmul.f32 0.125, %v2937_v18 }
0x14f0   :  { %v2944_v22 = vsel %vm2943_vm6, %v2940_v21, %v2939_v19 }
0x14f1   :  { %2947 = vst.msk [vmem:[#allocation2] sm:$0x3] %vm2946_vm7, %v2944_v22 }
0x14f2   :  { %3649 = shalt.err (!%p3646_p4)
}
0x14f3   :  { %s3650_s18 = scalar_lea.hbm %s4418_s14, 32 }
0x14f4   :  { %p3651_p5 = scmp.ne.s32.totalorder %s4418_s14, %s3650_s18  ;;  %p3654_p6 = scmp.lt.u32.totalorder %s3650_s18, %s4418_s14 }
0x14f6   :  { %p3656_p7 = pnand %p3654_p6, %p3651_p5 }
0x14f8   :  { %3659 = shalt.err (!%p3656_p7)
}
0x14f9   :  { %2957 = dma.vmem_to_hbm [thread:$0]  %s2955_s13, 32, %s4418_s14, [#allocation3]  }
0x14fa   :  { %3660 = dma.done.wait [#allocation3], 32  }
0x14fb   :  { %3661 = vsyncadd [#allocation3], 4294967264 }
0x14fc   :  { %2961 = vsyncpa [#allocation3], 1 }

// kernel: tpu_custom_call.1
= control target key start
LH: loop header
LB: loop body
LE: loop exit
PB: predicated region body
PF: predicated region fallthrough
CT: control target
= control target key end

     0   :  { %v3949_v1 = vmov 0.0   ;;  %vm3950_vm0 = vmmov 0   ;;  %vm78_vm1 = vcmask 261120   ;;  %s4726_s0 = inlined_call_operand.vmem [shape: f32[16,32], index: 0, kind: input, shape index: {}]   ;;  %s4727_s1 = inlined_call_operand.vmem [shape: f32[8,32], index: 1, kind: input, shape index: {}]   ;;  %s4728_s2 = inlined_call_operand.vmem [shape: bf16[2,32,96], index: 2, kind: input, shape index: {}]   ;;  %s4729_s3 = inlined_call_operand.vmem [shape: f32[2,1,96], index: 3, kind: input, shape index: {}]   ;;  %s4730_s4 = inlined_call_operand.vmem [shape: bf16[2,4,8,32], index: 4, kind: input, shape index: {}]   ;;  %s4731_s5 = inlined_call_operand.vmem [shape: f32[2,1,32], index: 5, kind: input, shape index: {}]   ;;  %s4732_s6 = inlined_call_operand.vmem [shape: f32[2,1,32], index: 6, kind: input, shape index: {}]   ;;  %s4733_s7 = inlined_call_operand.vmem [shape: f32[2,1,32], index: 7, kind: input, shape index: {}]   ;;  %s4734_s8 = inlined_call_operand.vmem [shape: bf16[2,32,256], index: 8, kind: input, shape index: {}]   ;;  %s4735_s9 = inlined_call_operand.vmem [shape: f32[2,1,256], index: 9, kind: input, shape index: {}]   ;;  %s4736_s10 = inlined_call_operand.vmem [shape: bf16[2,256,32], index: 10, kind: input, shape index: {}]   ;;  %s4737_s11 = inlined_call_operand.vmem [shape: f32[2,1,32], index: 11, kind: input, shape index: {}]   ;;  %s4738_s12 = inlined_call_operand.vmem [shape: f32[2,1,32], index: 12, kind: input, shape index: {}]   ;;  %s4739_s13 = inlined_call_operand.vmem [shape: f32[2,1,32], index: 13, kind: input, shape index: {}]   ;;  %s4740_s14 = inlined_call_operand.hbm [shape: f32[2,32], index: 14, kind: output, shape index: {}]  }
   0x1   :  { %v3797_v0 = vld [vmem:[%s4728_s2] sm:$0xff]   ;;  %3532 = vmatprep.subr.bf16.mxu1 %v3949_v1  ;;  %v3798_v2 = vld [vmem:[%s4728_s2 + $0x8] sm:$0xff]   ;;  %3558 = vmatprep.subr.bf16.mxu0 %v3949_v1 }
   0x2   :  { %3533 = vmatpush3.bf16.msra.mxu1 %v3797_v0  ;;  %3536 = vmatprep.mubr.msk.bf16.mxu1 %vm3950_vm0, %v3949_v1  ;;  %v49_v3 = vld [vmem:[%s4726_s0] sm:$0xff]  ;;  %v50_v4 = vld [vmem:[%s4726_s0 + $0x8] sm:$0xff] }
   0x3   :  { %v51_v5 = vld [vmem:[%s4727_s1] sm:$0xff]  ;;  %3534 = vmatprep.subr.bf16.mxu1 %v3949_v1  ;;  %3560 = vmatprep.mubr.msk.bf16.mxu0 %vm3950_vm0, %v3949_v1 }
   0x4   :  { %v4053_v6 = vadd.f32 %v51_v5, %v49_v3  ;;  %v4055_v7 = vadd.f32 %v51_v5, %v50_v4 }
   0x6   :  { %v54_v8 = vpack.c.bf16 %v4055_v7, %v4053_v6  ;;  %3535 = vmatpush3.bf16.msra.mxu1 %v3798_v2 }
   0x7   :  { %3540 = vmatprep.subr.bf16.mxu1 %v3949_v1 }
   0x9   :  { %3537 = vmatmul.mubr.msk.bf16.vlgmr.msra.gmra.mrb[0].mxu1 %vm78_vm1, %v54_v8 }
   0xa   :  { %3542 = vmatprep.mubr.msk.bf16.mxu1 %vm3950_vm0, %v3949_v1 }
   0xb   :  { %19 = vsyncpa [#allocation3], 0  ;;  %v3212_v9 = vld [vmem:[%s4729_s3] ss:$0 sm:$0xff]  ;;  %s3951_s23 = smov 112   ;;  %s3952_s24 = smov 120  }
   0xc   :  { %s3953_s25 = smov 104   ;;  %s3954_s26 = smov 96   ;;  %vm143_vm2 = vcmask 64512   ;;  %vm639_vm3 = vcmask 1043456   ;;  %vm3193_vm4 = vcmask 1041409   ;;  %vm3196_vm5 = vcmask 254976  }
   0xd   :  { %s3955_s27 = smov 64  }
  0xdc   :  { %v116_v10 = vpop.f32.mrb[0].mxu1 }
  0xdd   :  { %v117_v11 = vadd.f32 %v3212_v9, %v116_v10  ;;  %v3538_v12 = vpop.f32.mrb[1].mxu1 }
  0xde   :  { %v119_v13 = vpop.f32.mrb[2].mxu1 }
  0xdf   :  { %v3390_v14 = vpack.c.bf16 %v117_v11, %v117_v11  ;;  %v120_v15 = vadd.f32 %v3212_v9, %v119_v13  ;;  %v3539_v16 = vpop.f32.mrb[3].mxu1 }
  0xe1   :  { %133 = vrot.lane.b32.xlu1 %v3390_v14, %s3951_s23  ;;  %129 = vrot.lane.b32.xlu0 %v3390_v14, %s3952_s24  ;;  %v4070_v17 = vpack.c.bf16 %v120_v15, %v120_v15 }
  0xe5   :  { %135 = vrot.lane.b32.xlu1 %v4070_v17, %s3951_s23  ;;  %131 = vrot.lane.b32.xlu0 %v4070_v17, %s3952_s24 }
  0xe9   :  { %139 = vrot.lane.b32.xlu1 %v4070_v17, %s3953_s25  ;;  %137 = vrot.lane.b32.xlu0 %v3390_v14, %s3953_s25 }
  0xed   :  { %190 = vrot.lane.b32.xlu1 %v4070_v17, %s3954_s26  ;;  %141 = vrot.lane.b32.xlu0 %v3390_v14, %s3954_s26 }
 0x153   :  { %v134_v18 = vpop.permute.xlu1 %133  ;;  %v130_v19 = vpop.permute.xlu0 %129 }
 0x154   :  { %v4082_v20 = vcombine.low %v130_v19, %v130_v19  ;;  %v4086_v23 = vcombine.low %v134_v18, %v134_v18 }
 0x156   :  { %240 = vrot.lane.b32.xlu0 %v4082_v20, %s3954_s26 }
 0x157   :  { %v136_v21 = vpop.permute.xlu1 %135  ;;  %v132_v22 = vpop.permute.xlu0 %131 }
 0x158   :  { %v4088_v24 = vcombine.low %v132_v22, %v132_v22  ;;  %v4094_v26 = vcombine.low %v136_v21, %v136_v21 }
 0x15a   :  { %340 = vrot.lane.b32.xlu0 %v4086_v23, %s3954_s26  ;;  %290 = vrot.lane.b32.xlu1 %v4088_v24, %s3954_s26 }
 0x15b   :  { %v138_v25 = vpop.permute.xlu0 %137  ;;  %v140_v28 = vpop.permute.xlu1 %139 }
 0x15c   :  { %v4096_v27 = vcombine.low %v138_v25, %v138_v25  ;;  %v4102_v30 = vcombine.low %v140_v28, %v140_v28 }
 0x15e   :  { %390 = vrot.lane.b32.xlu1 %v4094_v26, %s3954_s26  ;;  %440 = vrot.lane.b32.xlu0 %v4096_v27, %s3954_s26 }
 0x15f   :  { %v142_v29 = vpop.permute.xlu0 %141  ;;  %v191_v32 = vpop.permute.xlu1 %190 }
 0x160   :  { %v148_v31 = vsel %vm143_vm2, %v142_v29, 0  ;;  %v196_v33 = vsel %vm143_vm2, %v191_v32, 0 }
 0x161   :  { %3541 = vmatpush3.bf16.xpose.msra.mxu1 %v148_v31 }
 0x162   :  { %490 = vrot.lane.b32.xlu1 %v4102_v30, %s3954_s26  ;;  %3546 = vmatprep.subr.bf16.mxu1 %v3949_v1 }
 0x166   :  { %634 = vrot.lane.b32.xlu1 %v3390_v14, %s3955_s27 }
 0x168   :  { %3543 = vmatmul.mubr.msk.bf16.vlgmr.msra.gmra.mrb[4].mxu1 %vm143_vm2, %v3390_v14 }
 0x169   :  { %3547 = vmatpush3.bf16.xpose.msra.mxu1 %v196_v33  ;;  %3548 = vmatprep.mubr.msk.bf16.mxu1 %vm3950_vm0, %v3949_v1 }
 0x16a   :  { %3552 = vmatprep.subr.bf16.mxu1 %v3949_v1 }
 0x170   :  { %3549 = vmatmul.mubr.msk.bf16.vlgmr.msra.gmra.mrb[8].mxu1 %vm143_vm2, %v4070_v17 }
 0x171   :  { %3554 = vmatprep.mubr.msk.bf16.mxu1 %vm3950_vm0, %v3949_v1 }
 0x1c8   :  { %v241_v34 = vpop.permute.xlu0 %240 }
 0x1c9   :  { %v246_v35 = vsel %vm143_vm2, %v241_v34, 0 }
 0x1ca   :  { %3553 = vmatpush3.bf16.xpose.msra.mxu1 %v246_v35 }
 0x1cb   :  { %3564 = vmatprep.subr.bf16.mxu1 %v3949_v1 }
 0x1cc   :  { %v291_v36 = vpop.permute.xlu1 %290  ;;  %v341_v38 = vpop.permute.xlu0 %340 }
 0x1cd   :  { %v296_v37 = vsel %vm143_vm2, %v291_v36, 0  ;;  %v346_v39 = vsel %vm143_vm2, %v341_v38, 0 }
 0x1ce   :  { %3559 = vmatpush3.bf16.xpose.msra.mxu0 %v296_v37 }
 0x1cf   :  { %3570 = vmatprep.subr.bf16.mxu0 %v3949_v1 }
 0x1d0   :  { %v391_v40 = vpop.permute.xlu1 %390  ;;  %v441_v42 = vpop.permute.xlu0 %440 }
 0x1d1   :  { %3555 = vmatmul.mubr.msk.bf16.vlgmr.msra.gmra.mrb[12].mxu1 %vm143_vm2, %v130_v19  ;;  %v396_v41 = vsel %vm143_vm2, %v391_v40, 0  ;;  %v446_v44 = vsel %vm143_vm2, %v441_v42, 0 }
 0x1d2   :  { %3565 = vmatpush3.bf16.xpose.msra.mxu1 %v346_v39  ;;  %3566 = vmatprep.mubr.msk.bf16.mxu1 %vm3950_vm0, %v3949_v1 }
 0x1d3   :  { %3576 = vmatprep.subr.bf16.mxu1 %v3949_v1 }
 0x1d4   :  { %v491_v43 = vpop.permute.xlu1 %490 }
 0x1d5   :  { %3561 = vmatmul.mubr.msk.bf16.vlgmr.msra.gmra.mrb[0].mxu0 %vm143_vm2, %v132_v22  ;;  %v496_v45 = vsel %vm143_vm2, %v491_v43, 0 }
 0x1d6   :  { %3571 = vmatpush3.bf16.xpose.msra.mxu0 %v396_v41  ;;  %3572 = vmatprep.mubr.msk.bf16.mxu0 %vm3950_vm0, %v3949_v1 }
 0x1d7   :  { %3582 = vmatprep.subr.bf16.mxu0 %v3949_v1 }
 0x1d8   :  { %v635_v46 = vpop.permute.xlu1 %634 }
 0x1d9   :  { %3567 = vmatmul.mubr.msk.bf16.vlgmr.msra.gmra.mrb[16].mxu1 %vm143_vm2, %v134_v18  ;;  %v641_v47 = vsel %vm639_vm3, %v635_v46, 0 }
 0x1da   :  { %3577 = vmatpush3.bf16.xpose.msra.mxu1 %v446_v44  ;;  %3578 = vmatprep.mubr.msk.bf16.mxu1 %vm3950_vm0, %v3949_v1 }
 0x1db   :  { %3588 = vmatprep.subr.bf16.mxu1 %v3949_v1 }
 0x1dd   :  { %3573 = vmatmul.mubr.msk.bf16.vlgmr.msra.gmra.mrb[4].mxu0 %vm143_vm2, %v136_v21 }
 0x1de   :  { %3583 = vmatpush3.bf16.xpose.msra.mxu0 %v496_v45  ;;  %3584 = vmatprep.mubr.msk.bf16.mxu0 %vm3950_vm0, %v3949_v1 }
 0x1df   :  { %3594 = vmatprep.subr.bf16.mxu0 %v3949_v1 }
 0x1e1   :  { %3579 = vmatmul.mubr.msk.bf16.vlgmr.msra.gmra.mrb[20].mxu1 %vm143_vm2, %v138_v25 }
 0x1e2   :  { %3589 = vmatpush3.bf16.msra.mxu1 %v641_v47  ;;  %3590 = vmatprep.mubr.msk.bf16.mxu1 %vm3950_vm0, %v3949_v1 }
 0x1e3   :  { %3600 = vmatprep.subr.bf16.mxu1 %v3949_v1 }
 0x1e5   :  { %3585 = vmatmul.mubr.msk.bf16.vlgmr.msra.gmra.mrb[8].mxu0 %vm143_vm2, %v140_v28 }
 0x1e6   :  { %3596 = vmatprep.mubr.msk.bf16.mxu0 %vm3950_vm0, %v3949_v1 }
 0x23b   :  { %v184_v48 = vpop.f32.mrb[4].mxu1 }
 0x23c   :  { %v3544_v49 = vpop.f32.mrb[5].mxu1  ;;  %v538_v50 = vsel %vm143_vm2, %v184_v48, -inf }
 0x23d   :  { %539 = vmax.xlane.f32.xlu0 %v538_v50  ;;  %v187_v51 = vpop.f32.mrb[6].mxu1 }
 0x23e   :  { %v3545_v52 = vpop.f32.mrb[7].mxu1 }
 0x243   :  { %v232_v53 = vpop.f32.mrb[8].mxu1 }
 0x244   :  { %v3550_v54 = vpop.f32.mrb[9].mxu1  ;;  %v541_v55 = vsel %vm143_vm2, %v232_v53, -inf }
 0x245   :  { %542 = vmax.xlane.f32.xlu1 %v541_v55  ;;  %v235_v56 = vpop.f32.mrb[10].mxu1 }
 0x246   :  { %v3551_v57 = vpop.f32.mrb[11].mxu1 }
 0x2a4   :  { %v282_v58 = vpop.f32.mrb[12].mxu1 }
 0x2a5   :  { %v3556_v59 = vpop.f32.mrb[13].mxu1  ;;  %v544_v60 = vsel %vm143_vm2, %v282_v58, -inf }
 0x2a6   :  { %545 = vmax.xlane.f32.xlu0 %v544_v60  ;;  %v285_v61 = vpop.f32.mrb[14].mxu1 }
 0x2a7   :  { %v3557_v62 = vpop.f32.mrb[15].mxu1 }
 0x2a8   :  { %v332_v63 = vpop.f32.mrb[0].mxu0 }
 0x2a9   :  { %v3562_v0 = vpop.f32.mrb[1].mxu0  ;;  %v547_v2 = vsel %vm143_vm2, %v332_v63, -inf }
 0x2aa   :  { %v335_v3 = vpop.f32.mrb[2].mxu0  ;;  %548 = vmax.xlane.f32.xlu0 %v547_v2 }
 0x2ab   :  { %v3563_v4 = vpop.f32.mrb[3].mxu0 }
 0x2ac   :  { %v4154_v5 = vpop.f32.mrb[16].mxu1 }
 0x2ad   :  { %v3568_v8 = vpop.f32.mrb[17].mxu1  ;;  %v550_v9 = vsel %vm143_vm2, %v4154_v5, -inf }
 0x2ae   :  { %551 = vmax.xlane.f32.xlu1 %v550_v9  ;;  %v385_v10 = vpop.f32.mrb[18].mxu1 }
 0x2af   :  { %v3569_v11 = vpop.f32.mrb[19].mxu1 }
 0x2b0   :  { %v4158_v12 = vpop.f32.mrb[4].mxu0 }
 0x2b1   :  { %v3574_v13 = vpop.f32.mrb[5].mxu0  ;;  %v553_v14 = vsel %vm143_vm2, %v4158_v12, -inf }
 0x2b2   :  { %v435_v15 = vpop.f32.mrb[6].mxu0  ;;  %554 = vmax.xlane.f32.xlu0 %v553_v14 }
 0x2b3   :  { %v3575_v16 = vpop.f32.mrb[7].mxu0 }
 0x2b4   :  { %v482_v18 = vpop.f32.mrb[20].mxu1 }
 0x2b5   :  { %v3580_v19 = vpop.f32.mrb[21].mxu1  ;;  %v556_v21 = vsel %vm143_vm2, %v482_v18, -inf }
 0x2b6   :  { %557 = vmax.xlane.f32.xlu1 %v556_v21  ;;  %v485_v22 = vpop.f32.mrb[22].mxu1 }
 0x2b7   :  { %v3581_v25 = vpop.f32.mrb[23].mxu1 }
 0x2b8   :  { %v532_v28 = vpop.f32.mrb[8].mxu0 }
 0x2b9   :  { %v3586_v29 = vpop.f32.mrb[9].mxu0  ;;  %v559_v31 = vsel %vm143_vm2, %v532_v28, -inf }
 0x2ba   :  { %v535_v32 = vpop.f32.mrb[10].mxu0  ;;  %560 = vmax.xlane.f32.xlu0 %v559_v31 }
 0x2bb   :  { %v3587_v33 = vpop.f32.mrb[11].mxu0 }
 0x2c7   :  { %731 = vrot.lane.b32.xlu1 %v4082_v20, %s3955_s27 }
 0x2ca   :  { %v540_v34 = vpop.xlane.xlu0 %539 }
 0x2cb   :  { %779 = vrot.lane.b32.xlu1 %v4088_v24, %s3955_s27  ;;  %v562_v36 = vsub.f32 %v184_v48, %v540_v34 }
 0x2cd   :  { %v570_v38 = vmul.f32 1.442695, %v562_v36 }
 0x2cf   :  { %3845 = vpow2.f32 %v570_v38 }
 0x2d0   :  { %683 = vrot.lane.b32.xlu0 %v4070_v17, %s3955_s27 }
 0x2d2   :  { %v543_v35 = vpop.xlane.xlu1 %542 }
 0x2d3   :  { %v563_v37 = vsub.f32 %v232_v53, %v543_v35 }
 0x2d5   :  { %v572_v39 = vmul.f32 1.442695, %v563_v37 }
 0x2d7   :  { %3847 = vpow2.f32 %v572_v39 }
 0x2d9   :  { %v4170_v40 = vpop.eup %3845 }
 0x2da   :  { %v586_v20 = vsel %vm143_vm2, %v4170_v40, 0.0 }
 0x2e1   :  { %v3848_v41 = vpop.eup %3847 }
 0x2e2   :  { %v589_v42 = vsel %vm143_vm2, %v3848_v41, 0.0 }
 0x2ef   :  { %590 = vadd.xlane.f32.xlu0 %v589_v42  ;;  %587 = vadd.xlane.f32.xlu1 %v586_v20 }
 0x333   :  { %v546_v24 = vpop.xlane.xlu0 %545 }
 0x334   :  { %v564_v17 = vsub.f32 %v282_v58, %v546_v24 }
 0x336   :  { %v574_v43 = vmul.f32 1.442695, %v564_v17 }
 0x337   :  { %v549_v44 = vpop.xlane.xlu0 %548 }
 0x338   :  { %3849 = vpow2.f32 %v574_v43  ;;  %v565_v45 = vsub.f32 %v332_v63, %v549_v44 }
 0x33a   :  { %v576_v46 = vmul.f32 1.442695, %v565_v45 }
 0x33b   :  { %v552_v55 = vpop.xlane.xlu1 %551 }
 0x33c   :  { %3851 = vpow2.f32 %v576_v46  ;;  %v566_v56 = vsub.f32 %v4154_v5, %v552_v55  ;;  %v1027_v55 = vld [vmem:[%s4730_s4] sm:$0xf] }
 0x33e   :  { %v578_v59 = vmul.f32 1.442695, %v566_v56 }
 0x33f   :  { %v555_v48 = vpop.xlane.xlu0 %554 }
 0x340   :  { %v567_v58 = vsub.f32 %v4158_v12, %v555_v48  ;;  %3853 = vpow2.f32 %v578_v59 }
 0x342   :  { %v4175_v47 = vpop.eup %3849  ;;  %v580_v61 = vmul.f32 1.442695, %v567_v58  ;;  %v1028_v58 = vld [vmem:[%s4730_s4 + $0x4] sm:$0xf] }
 0x343   :  { %v592_v49 = vsel %vm143_vm2, %v4175_v47, 0.0  ;;  %v558_v57 = vpop.xlane.xlu1 %557  ;;  %v1040_v59 = vsel %vm639_vm3, %v1028_v58, 0 }
 0x344   :  { %593 = vadd.xlane.f32.xlu1 %v592_v49  ;;  %v568_v60 = vsub.f32 %v482_v18, %v558_v57  ;;  %3855 = vpow2.f32 %v580_v61  ;;  %v1092_v57 = vsel %vm639_vm3, %v1027_v55, 0 }
 0x346   :  { %v4179_v50 = vpop.eup %3851  ;;  %v582_v62 = vmul.f32 1.442695, %v568_v60 }
 0x347   :  { %v561_v51 = vpop.xlane.xlu0 %560  ;;  %v595_v52 = vsel %vm143_vm2, %v4179_v50, 0.0  ;;  %v732_v2 = vpop.permute.xlu1 %731 }
 0x348   :  { %596 = vadd.xlane.f32.xlu0 %v595_v52  ;;  %v569_v63 = vsub.f32 %v532_v28, %v561_v51  ;;  %3857 = vpow2.f32 %v582_v62  ;;  %v737_v25 = vsel %vm639_vm3, %v732_v2, 0 }
 0x34a   :  { %v584_v0 = vmul.f32 1.442695, %v569_v63 }
 0x34b   :  { %v684_v53 = vpop.permute.xlu0 %683  ;;  %v780_v3 = vpop.permute.xlu1 %779 }
 0x34c   :  { %v689_v54 = vsel %vm639_vm3, %v684_v53, 0  ;;  %3859 = vpow2.f32 %v584_v0  ;;  %v785_v22 = vsel %vm639_vm3, %v780_v3, 0 }
 0x34d   :  { %3595 = vmatpush3.bf16.msra.mxu0 %v689_v54 }
 0x34e   :  { %3606 = vmatprep.subr.bf16.mxu0 %v3949_v1 }
 0x355   :  { %875 = vrot.lane.b32.xlu1 %v4094_v26, %s3955_s27  ;;  %v4191_v26 = vpop.eup %3853 }
 0x356   :  { %v598_v4 = vsel %vm143_vm2, %v4191_v26, 0.0 }
 0x35e   :  { %827 = vrot.lane.b32.xlu0 %v4086_v23, %s3955_s27  ;;  %v4193_v23 = vpop.eup %3855 }
 0x35f   :  { %v4197_v5 = vpop.eup %3857  ;;  %v601_v10 = vsel %vm143_vm2, %v4193_v23, 0.0 }
 0x360   :  { %v604_v11 = vsel %vm143_vm2, %v4197_v5, 0.0  ;;  %v4203_v12 = vpop.eup %3859 }
 0x361   :  { %v607_v13 = vsel %vm143_vm2, %v4203_v12, 0.0 }
 0x379   :  { %599 = vadd.xlane.f32.xlu1 %v598_v4  ;;  %v1030_v4 = vld [vmem:[%s4730_s4 + $0xc] sm:$0xf] }
 0x37c   :  { %v591_v8 = vpop.xlane.xlu0 %590  ;;  %v588_v9 = vpop.xlane.xlu1 %587 }
 0x37d   :  { %3861 = vrcp.f32 %v591_v8  ;;  %602 = vadd.xlane.f32.xlu0 %v601_v10  ;;  %605 = vadd.xlane.f32.xlu1 %v604_v11  ;;  %v1029_v11 = vld [vmem:[%s4730_s4 + $0x8] sm:$0xf] }
 0x37e   :  { %3863 = vrcp.f32 %v588_v9 }
 0x381   :  { %608 = vadd.xlane.f32.xlu0 %v607_v13 }
 0x387   :  { %v3862_v14 = vpop.eup %3861 }
 0x388   :  { %v3864_v15 = vpop.eup %3863  ;;  %v619_v16 = vmul.f32 %v3862_v14, %v3848_v41 }
 0x389   :  { %v618_v18 = vmul.f32 %v3864_v15, %v4170_v40 }
 0x38a   :  { %v627_v19 = vpack.c.bf16 %v619_v16, %v619_v16  ;;  %v1144_v16 = vsel %vm639_vm3, %v1029_v11, 0 }
 0x38b   :  { %v626_v21 = vpack.c.bf16 %v618_v18, %v618_v18 }
 0x38c   :  { %3597 = vmatmul.mubr.msk.bf16.vlgmr.msra.gmra.mrb[12].mxu0 %vm143_vm2, %v627_v19 }
 0x38d   :  { %3591 = vmatmul.mubr.msk.bf16.vlgmr.msra.gmra.mrb[24].mxu1 %vm143_vm2, %v626_v21  ;;  %3607 = vmatpush3.bf16.msra.mxu0 %v785_v22 }
 0x38e   :  { %3601 = vmatpush3.bf16.msra.mxu1 %v737_v25  ;;  %971 = vrot.lane.b32.xlu1 %v4102_v30, %s3955_s27 }
 0x38f   :  { %3602 = vmatprep.mubr.msk.bf16.mxu1 %vm3950_vm0, %v3949_v1  ;;  %3612 = vmatprep.subr.bf16.mxu1 %v3949_v1 }
 0x390   :  { %3608 = vmatprep.mubr.msk.bf16.mxu0 %vm3950_vm0, %v3949_v1  ;;  %3618 = vmatprep.subr.bf16.mxu0 %v3949_v1 }
 0x397   :  { %923 = vrot.lane.b32.xlu0 %v4096_v27, %s3955_s27 }
 0x3d1   :  { %v594_v28 = vpop.xlane.xlu1 %593 }
 0x3d2   :  { %3865 = vrcp.f32 %v594_v28 }
 0x3d5   :  { %v597_v29 = vpop.xlane.xlu0 %596  ;;  %v876_v37 = vpop.permute.xlu1 %875 }
 0x3d6   :  { %3867 = vrcp.f32 %v597_v29  ;;  %v881_v38 = vsel %vm639_vm3, %v876_v37, 0 }
 0x3d9   :  { %v828_v32 = vpop.permute.xlu0 %827 }
 0x3da   :  { %v833_v36 = vsel %vm639_vm3, %v828_v32, 0 }
 0x3dc   :  { %v3866_v31 = vpop.eup %3865 }
 0x3dd   :  { %v620_v30 = vmul.f32 %v3866_v31, %v4175_v47 }
 0x3df   :  { %v628_v33 = vpack.c.bf16 %v620_v30, %v620_v30 }
 0x3e0   :  { %v3868_v34 = vpop.eup %3867 }
 0x3e1   :  { %v621_v35 = vmul.f32 %v3868_v34, %v4179_v50  ;;  %3603 = vmatmul.mubr.msk.bf16.vlgmr.msra.gmra.mrb[28].mxu1 %vm143_vm2, %v628_v33 }
 0x3e2   :  { %3613 = vmatpush3.bf16.msra.mxu1 %v833_v36  ;;  %3614 = vmatprep.mubr.msk.bf16.mxu1 %vm3950_vm0, %v3949_v1 }
 0x3e3   :  { %v629_v27 = vpack.c.bf16 %v621_v35, %v621_v35  ;;  %3624 = vmatprep.subr.bf16.mxu1 %v3949_v1 }
 0x3e5   :  { %3609 = vmatmul.mubr.msk.bf16.vlgmr.msra.gmra.mrb[16].mxu0 %vm143_vm2, %v629_v27 }
 0x3e6   :  { %3619 = vmatpush3.bf16.msra.mxu0 %v881_v38  ;;  %3620 = vmatprep.mubr.msk.bf16.mxu0 %vm3950_vm0, %v3949_v1 }
 0x3e7   :  { %3630 = vmatprep.subr.bf16.mxu0 %v3949_v1 }
 0x406   :  { %v600_v39 = vpop.xlane.xlu1 %599 }
 0x407   :  { %3869 = vrcp.f32 %v600_v39 }
 0x40a   :  { %v603_v40 = vpop.xlane.xlu0 %602  ;;  %v606_v41 = vpop.xlane.xlu1 %605 }
 0x40b   :  { %3871 = vrcp.f32 %v603_v40 }
 0x40c   :  { %3873 = vrcp.f32 %v606_v41 }
 0x40e   :  { %v609_v42 = vpop.xlane.xlu0 %608  ;;  %v972_v48 = vpop.permute.xlu1 %971 }
 0x40f   :  { %3875 = vrcp.f32 %v609_v42  ;;  %v977_v52 = vsel %vm639_vm3, %v972_v48, 0 }
 0x411   :  { %v3870_v20 = vpop.eup %3869 }
 0x412   :  { %v622_v24 = vmul.f32 %v3870_v20, %v4191_v26  ;;  %v924_v17 = vpop.permute.xlu0 %923 }
 0x413   :  { %v929_v47 = vsel %vm639_vm3, %v924_v17, 0 }
 0x414   :  { %v630_v43 = vpack.c.bf16 %v622_v24, %v622_v24 }
 0x415   :  { %v3872_v44 = vpop.eup %3871 }
 0x416   :  { %v3874_v45 = vpop.eup %3873  ;;  %v623_v46 = vmul.f32 %v3872_v44, %v4193_v23  ;;  %3615 = vmatmul.mubr.msk.bf16.vlgmr.msra.gmra.mrb[32].mxu1 %vm143_vm2, %v630_v43 }
 0x417   :  { %3625 = vmatpush3.bf16.msra.mxu1 %v929_v47  ;;  %3626 = vmatprep.mubr.msk.bf16.mxu1 %vm3950_vm0, %v3949_v1  ;;  %v624_v49 = vmul.f32 %v3874_v45, %v4197_v5  ;;  %v1198_v5 = vsel %vm639_vm3, %v1030_v4, 0 }
 0x418   :  { %v631_v50 = vpack.c.bf16 %v623_v46, %v623_v46  ;;  %3636 = vmatprep.subr.bf16.mxu1 %v3949_v1 }
 0x419   :  { %v3876_v51 = vpop.eup %3875  ;;  %v632_v54 = vpack.c.bf16 %v624_v49, %v624_v49 }
 0x41a   :  { %3621 = vmatmul.mubr.msk.bf16.vlgmr.msra.gmra.mrb[20].mxu0 %vm143_vm2, %v631_v50  ;;  %v625_v53 = vmul.f32 %v3876_v51, %v4203_v12 }
 0x41b   :  { %3631 = vmatpush3.bf16.msra.mxu0 %v977_v52  ;;  %3632 = vmatprep.mubr.msk.bf16.mxu0 %vm3950_vm0, %v3949_v1 }
 0x41c   :  { %3642 = vmatprep.subr.bf16.mxu0 %v3949_v1  ;;  %v633_v56 = vpack.c.bf16 %v625_v53, %v625_v53 }
 0x41e   :  { %3627 = vmatmul.mubr.msk.bf16.vlgmr.msra.gmra.mrb[36].mxu1 %vm143_vm2, %v632_v54 }
 0x41f   :  { %3638 = vmatprep.mubr.msk.bf16.mxu1 %vm3950_vm0, %v3949_v1  ;;  %3637 = vmatpush3.bf16.msra.mxu1 %v1040_v59 }
 0x420   :  { %3648 = vmatprep.subr.bf16.mxu1 %v3949_v1 }
 0x422   :  { %3633 = vmatmul.mubr.msk.bf16.vlgmr.msra.gmra.mrb[24].mxu0 %vm143_vm2, %v633_v56  ;;  %v3248_v56 = vld [vmem:[%s4731_s5] ss:$0 sm:$0xff] }
 0x423   :  { %3643 = vmatpush3.bf16.msra.mxu0 %v1092_v57  ;;  %3644 = vmatprep.mubr.msk.bf16.mxu0 %vm3950_vm0, %v3949_v1 }
 0x424   :  { %3654 = vmatprep.subr.bf16.mxu0 %v3949_v1 }
 0x45f   :  { %v725_v60 = vpop.f32.mrb[12].mxu0 }
 0x460   :  { %v677_v61 = vpop.f32.mrb[24].mxu1  ;;  %v3598_v62 = vpop.f32.mrb[13].mxu0 }
 0x461   :  { %v3393_v63 = vpack.c.bf16 %v725_v60, %v677_v61  ;;  %v3592_v0 = vpop.f32.mrb[25].mxu1  ;;  %v728_v2 = vpop.f32.mrb[14].mxu0 }
 0x462   :  { %v680_v26 = vpop.f32.mrb[26].mxu1  ;;  %v3599_v23 = vpop.f32.mrb[15].mxu0 }
 0x463   :  { %v3593_v3 = vpop.f32.mrb[27].mxu1  ;;  %3645 = vmatmul.mubr.msk.bf16.vlgmr.msra.gmra.mrb[28].mxu0 %vm143_vm2, %v3393_v63 }
 0x464   :  { %3656 = vmatprep.mubr.msk.bf16.mxu0 %vm3950_vm0, %v3949_v1  ;;  %3655 = vmatpush3.bf16.msra.mxu0 %v1198_v5 }
 0x4b4   :  { %v773_v8 = vpop.f32.mrb[28].mxu1 }
 0x4b5   :  { %v3604_v9 = vpop.f32.mrb[29].mxu1 }
 0x4b6   :  { %v776_v10 = vpop.f32.mrb[30].mxu1 }
 0x4b7   :  { %v3605_v12 = vpop.f32.mrb[31].mxu1 }
 0x4b8   :  { %v821_v13 = vpop.f32.mrb[16].mxu0 }
 0x4b9   :  { %v3392_v14 = vpack.c.bf16 %v821_v13, %v773_v8  ;;  %v3610_v15 = vpop.f32.mrb[17].mxu0 }
 0x4ba   :  { %v824_v18 = vpop.f32.mrb[18].mxu0  ;;  %v3804_v15 = vld [vmem:[%s4734_s8 + $0x14] ss:$8 sps:$4 sm:$0xff]  }
 0x4bb   :  { %v3611_v19 = vpop.f32.mrb[19].mxu0  ;;  %3639 = vmatmul.mubr.msk.bf16.vlgmr.msra.gmra.mrb[40].mxu1 %vm143_vm2, %v3392_v14  ;;  %v3799_v14 = vld [vmem:[%s4734_s8] ss:$8 sps:$4 sm:$0xff]   ;;  %v3956_v18 = vmov 0  }
 0x4bc   :  { %3649 = vmatpush3.bf16.msra.mxu1 %v1144_v16  ;;  %3650 = vmatprep.mubr.msk.bf16.mxu1 %vm3950_vm0, %v3949_v1  ;;  %v3802_v16 = vld [vmem:[%s4734_s8 + $0x10] ss:$8 sps:$4 sm:$0xff]   ;;  %v3805_v19 = vld [vmem:[%s4736_s10 + $0x40] sm:$0xff]  }
 0x4bd   :  { %3445 = vmatprep.subr.bf16.mxu0 %v3805_v19 }
 0x4e9   :  { %v869_v21 = vpop.f32.mrb[32].mxu1 }
 0x4ea   :  { %v3616_v22 = vpop.f32.mrb[33].mxu1 }
 0x4eb   :  { %v872_v25 = vpop.f32.mrb[34].mxu1  ;;  %v3807_v22 = vld [vmem:[%s4736_s10 + $0x48] sm:$0xff]  }
 0x4ec   :  { %v3617_v28 = vpop.f32.mrb[35].mxu1  ;;  %v3808_v25 = vld [vmem:[%s4736_s10 + $0x8] sm:$0xff]  }
 0x4ed   :  { %v917_v29 = vpop.f32.mrb[20].mxu0  ;;  %v3809_v28 = vld [vmem:[%s4736_s10 + $0x50] sm:$0xff]  }
 0x4ee   :  { %v3394_v31 = vpack.c.bf16 %v917_v29, %v869_v21  ;;  %v3622_v30 = vpop.f32.mrb[21].mxu0  ;;  %v3806_v21 = vld [vmem:[%s4736_s10] sm:$0xff]   ;;  %v3810_v29 = vld [vmem:[%s4736_s10 + $0x10] sm:$0xff]  }
 0x4ef   :  { %v920_v32 = vpop.f32.mrb[22].mxu0  ;;  %v3812_v30 = vld [vmem:[%s4736_s10 + $0x18] sm:$0xff]  }
 0x4f0   :  { %v3623_v33 = vpop.f32.mrb[23].mxu0  ;;  %3651 = vmatmul.mubr.msk.bf16.vlgmr.msra.gmra.mrb[44].mxu1 %vm143_vm2, %v3394_v31  ;;  %v3811_v31 = vld [vmem:[%s4736_s10 + $0x58] sm:$0xff]   ;;  %v3813_v32 = vld [vmem:[%s4736_s10 + $0x60] sm:$0xff]  }
 0x4f1   :  { %v965_v34 = vpop.f32.mrb[36].mxu1  ;;  %1371 = vmatprep.mubr.bf16.mxu1 %v3956_v18  ;;  %v3814_v33 = vld [vmem:[%s4736_s10 + $0x20] sm:$0xff]  }
 0x4f2   :  { %v3628_v35 = vpop.f32.mrb[37].mxu1 }
 0x4f3   :  { %v968_v36 = vpop.f32.mrb[38].mxu1 }
 0x4f4   :  { %v3629_v37 = vpop.f32.mrb[39].mxu1 }
 0x4f5   :  { %v1013_v27 = vpop.f32.mrb[24].mxu0 }
 0x4f6   :  { %v3395_v38 = vpack.c.bf16 %v1013_v27, %v965_v34  ;;  %v3634_v39 = vpop.f32.mrb[25].mxu0  ;;  %v3815_v34 = vld [vmem:[%s4736_s10 + $0x68] sm:$0xff]  }
 0x4f7   :  { %v1016_v40 = vpop.f32.mrb[26].mxu0 }
 0x4f8   :  { %v3635_v41 = vpop.f32.mrb[27].mxu0  ;;  %3657 = vmatmul.mubr.msk.bf16.vlgmr.msra.gmra.mrb[32].mxu0 %vm143_vm2, %v3395_v38 }
 0x4f9   :  { %3446 = vmatpush3.bf16.msra.mxu0 %v3806_v21 }
 0x4fa   :  { %3447 = vmatprep.subr.bf16.mxu0 %v3807_v22 }
 0x4fd   :  { %3448 = vmatpush3.bf16.msra.mxu0 %v3808_v25 }
 0x4fe   :  { %3449 = vmatprep.subr.bf16.mxu0 %v3809_v28 }
 0x501   :  { %3450 = vmatpush3.bf16.msra.mxu0 %v3810_v29 }
 0x502   :  { %3451 = vmatprep.subr.bf16.mxu0 %v3811_v31 }
 0x505   :  { %3452 = vmatpush3.bf16.msra.mxu0 %v3812_v30 }
 0x506   :  { %3453 = vmatprep.subr.bf16.mxu0 %v3813_v32 }
 0x509   :  { %3454 = vmatpush3.bf16.msra.mxu0 %v3814_v33 }
 0x50a   :  { %3455 = vmatprep.subr.bf16.mxu0 %v3815_v34 }
 0x536   :  { %v1128_v42 = vpop.f32.mrb[28].mxu0 }
 0x537   :  { %v3646_v20 = vpop.f32.mrb[29].mxu0 }
 0x538   :  { %v1131_v24 = vpop.f32.mrb[30].mxu0 }
 0x539   :  { %v3647_v17 = vpop.f32.mrb[31].mxu0 }
 0x58e   :  { %v1076_v43 = vpop.f32.mrb[40].mxu1 }
 0x58f   :  { %v1129_v44 = vadd.f32 %v1128_v42, %v1076_v43  ;;  %v3640_v45 = vpop.f32.mrb[41].mxu1  ;;  %v3249_v42 = vld [vmem:[%s4732_s6] ss:$0 sm:$0xff] }
 0x590   :  { %v1079_v46 = vpop.f32.mrb[42].mxu1  ;;  %v3250_v43 = vld [vmem:[%s4733_s7] ss:$0 sm:$0xff] }
 0x591   :  { %v1132_v47 = vadd.f32 %v1131_v24, %v1079_v46  ;;  %v3641_v48 = vpop.f32.mrb[43].mxu1 }
 0x592   :  { %v3816_v48 = vld [vmem:[%s4736_s10 + $0x28] sm:$0xff]  }
 0x593   :  { %3456 = vmatpush3.bf16.msra.mxu0 %v3816_v48 }
 0x5c3   :  { %v1180_v49 = vpop.f32.mrb[44].mxu1 }
 0x5c4   :  { %v1187_v50 = vadd.f32 %v1180_v49, %v1129_v44  ;;  %v3652_v51 = vpop.f32.mrb[45].mxu1  ;;  %v3817_v49 = vld [vmem:[%s4736_s10 + $0x70] sm:$0xff]  }
 0x5c5   :  { %v1183_v52 = vpop.f32.mrb[46].mxu1  ;;  %3457 = vmatprep.subr.bf16.mxu0 %v3817_v49  ;;  %v3819_v51 = vld [vmem:[%s4736_s10 + $0x78] sm:$0xff]   ;;  %v3274_v49 = vld [vmem:[%s4739_s13] ss:$0 sm:$0xff] }
 0x5c6   :  { %v1188_v53 = vadd.f32 %v1183_v52, %v1132_v47  ;;  %v3653_v54 = vpop.f32.mrb[47].mxu1  ;;  %v3820_v52 = vld [vmem:[%s4736_s10 + $0x38] sm:$0xff]  }
 0x5cb   :  { %v1234_v55 = vpop.f32.mrb[32].mxu0 }
 0x5cc   :  { %v1241_v57 = vadd.f32 %v1234_v55, %v1187_v50  ;;  %v3658_v58 = vpop.f32.mrb[33].mxu0  ;;  %v3818_v50 = vld [vmem:[%s4736_s10 + $0x30] sm:$0xff]  }
 0x5cd   :  { %v1237_v59 = vpop.f32.mrb[34].mxu0  ;;  %3458 = vmatpush3.bf16.msra.mxu0 %v3818_v50 }
 0x5ce   :  { %v1250_v60 = vadd.f32 %v3248_v56, %v1241_v57  ;;  %v1242_v61 = vadd.f32 %v1237_v59, %v1188_v53  ;;  %v3659_v62 = vpop.f32.mrb[35].mxu0  ;;  %3459 = vmatprep.subr.bf16.mxu0 %v3819_v51  ;;  %v1306_v53 = vlaneseq }
 0x5d0   :  { %v1251_v63 = vadd.f32 %v3248_v56, %v1242_v61  ;;  %v1252_v0 = vadd.f32 %v1250_v60, %v4053_v6  ;;  %v4361_v54 = vshrl.u32 %v1306_v53, 7  ;;  %v1304_v56 = vld [vmem:[%s4735_s9] sm:$0x3] }
 0x5d1   :  { %3460 = vmatpush3.bf16.msra.mxu0 %v3820_v52 }
 0x5d2   :  { %v1256_v2 = vsel %vm78_vm1, %v1252_v0, 0.0  ;;  %v1253_v26 = vadd.f32 %v1251_v63, %v4055_v7  ;;  %v3801_v7 = vld [vmem:[%s4734_s8 + $0x4] ss:$8 sps:$4 sm:$0xff]   ;;  %3686 = vmatprep.subr.bf16.mxu0 %v3949_v1  ;;  %v1308_v55 = vsub.s32 0, %v4361_v54  ;;  %v1312_v57 = vsub.s32 1, %v4361_v54 }
 0x5d3   :  { %1257 = vadd.xlane.f32.xlu0 %v1256_v2  ;;  %1339 = vmatprep.subr.bf16.mxu1 %v3801_v7  ;;  %v3369_v54 = vld [vmem:[%s4737_s11 + $0x1] ss:$0 sm:$0xff] }
 0x5d4   :  { %v1259_v23 = vsel %vm78_vm1, %v1253_v26, 0.0  ;;  %1340 = vmatpush1.bf16.msra.mxu1 %v3799_v14  ;;  %v1309_v58 = vrot.slane %v1304_v56, %v1308_v55  ;;  %v1313_v59 = vrot.slane %v1304_v56, %v1312_v57  ;;  %v3280_v56 = vld [vmem:[%s4729_s3 + $0x1] ss:$0 sm:$0xff] }
 0x5d5   :  { %1260 = vadd.xlane.f32.xlu1 %v1259_v23  ;;  %1341 = vmatprep.subr.bf16.mxu1 %v3804_v15 }
 0x5d8   :  { %1342 = vmatpush1.bf16.msra.mxu1 %v3802_v16 }
 0x5d9   :  { %3660 = vmatprep.subr.bf16.mxu1 %v3949_v1 }
 0x660   :  { %v1258_v3 = vpop.xlane.xlu0 %1257 }
 0x661   :  { %v1263_v4 = vmul.f32 0.03125, %v1258_v3 }
 0x662   :  { %v1261_v5 = vpop.xlane.xlu1 %1260 }
 0x663   :  { %v1265_v8 = vsub.f32 %v1252_v0, %v1263_v4  ;;  %v1264_v9 = vmul.f32 0.03125, %v1261_v5 }
 0x665   :  { %v1266_v10 = vsub.f32 %v1253_v26, %v1264_v9  ;;  %v1267_v11 = vmul.f32 %v1265_v8, %v1265_v8 }
 0x667   :  { %v1269_v12 = vsel %vm78_vm1, %v1267_v11, 0.0  ;;  %v1268_v13 = vmul.f32 %v1266_v10, %v1266_v10 }
 0x668   :  { %1270 = vadd.xlane.f32.xlu0 %v1269_v12  ;;  %v3256_v12 = vld [vmem:[%s4737_s11] ss:$0 sm:$0xff] }
 0x669   :  { %v1272_v6 = vsel %vm78_vm1, %v1268_v13, 0.0 }
 0x66c   :  { %1273 = vadd.xlane.f32.xlu0 %v1272_v6 }
 0x6f5   :  { %v1271_v35 = vpop.xlane.xlu0 %1270 }
 0x6f6   :  { %v1275_v36 = vmul.f32 0.03125, %v1271_v35 }
 0x6f8   :  { %v1277_v37 = vadd.f32 1e-05, %v1275_v36 }
 0x6f9   :  { %v1274_v27 = vpop.xlane.xlu0 %1273 }
 0x6fa   :  { %3877 = vrsqrt.f32 %v1277_v37  ;;  %v1276_v38 = vmul.f32 0.03125, %v1274_v27 }
 0x6fc   :  { %v1278_v39 = vadd.f32 1e-05, %v1276_v38  ;;  %v3821_v38 = vld [vmem:[%s4728_s2 + $0x10] sm:$0xff]  }
 0x6fe   :  { %3879 = vrsqrt.f32 %v1278_v39  ;;  %v3822_v39 = vld [vmem:[%s4728_s2 + $0x18] sm:$0xff]  }
 0x704   :  { %v3878_v40 = vpop.eup %3877 }
 0x705   :  { %v1281_v41 = vmul.f32 %v3878_v40, %v1265_v8 }
 0x707   :  { %v1289_v24 = vmul.f32 %v3249_v42, %v1281_v41 }
 0x708   :  { %v3880_v20 = vpop.eup %3879 }
 0x709   :  { %v1282_v17 = vmul.f32 %v3880_v20, %v1266_v10  ;;  %v1297_v45 = vadd.f32 %v3250_v43, %v1289_v24 }
 0x70b   :  { %v1290_v44 = vmul.f32 %v3249_v42, %v1282_v17 }
 0x70d   :  { %v1298_v46 = vadd.f32 %v3250_v43, %v1290_v44  ;;  %v3273_v44 = vld [vmem:[%s4738_s12] ss:$0 sm:$0xff] }
 0x70f   :  { %v1299_v47 = vpack.c.bf16 %v1298_v46, %v1297_v45 }
 0x711   :  { %3255 = vmatmul.mubr.msk.bf16.vlgmr.msra.gmra.mrb[48].mxu1 %vm78_vm1, %v1299_v47 }
 0x712   :  { %3664 = vmatprep.mubr.msk.bf16.mxu1 %vm3950_vm0, %v3949_v1  ;;  %3661 = vmatpush3.bf16.msra.mxu1 %v3821_v38 }
 0x713   :  { %3662 = vmatprep.subr.bf16.mxu1 %v3949_v1 }
 0x716   :  { %3663 = vmatpush3.bf16.msra.mxu1 %v3822_v39 }
 0x717   :  { %3668 = vmatprep.subr.bf16.mxu1 %v3949_v1 }
 0x7e4   :  { %v1373_v60 = vpop.f32.mrb[48].mxu1 }
 0x7e5   :  { %v1374_v61 = vadd.f32 %v1373_v60, %v1309_v58  ;;  %v1375_v62 = vpop.f32.mrb[49].mxu1 }
 0x7e6   :  { %v1376_v63 = vadd.f32 %v1375_v62, %v1313_v59  ;;  %v1377_v0 = vpop.f32.mrb[50].mxu1 }
 0x7e7   :  { %v1378_v2 = vadd.f32 %v1377_v0, %v1309_v58  ;;  %v1379_v26 = vpop.f32.mrb[51].mxu1  ;;  %v1382_v3 = vmax.f32 %v1374_v61, 0.0 }
 0x7e8   :  { %v1380_v23 = vadd.f32 %v1379_v26, %v1313_v59  ;;  %v1383_v5 = vmax.f32 %v1376_v63, 0.0 }
 0x7e9   :  { %v1384_v4 = vmax.f32 %v1378_v2, 0.0 }
 0x7ea   :  { %v1385_v8 = vmax.f32 %v1380_v23, 0.0 }
 0x7eb   :  { %v1386_v9 = vpack.c.bf16 %v1384_v4, %v1382_v3 }
 0x7ec   :  { %v1387_v10 = vpack.c.bf16 %v1385_v8, %v1383_v5 }
 0x7ee   :  { %1555 = vmatprep.mubr.bf16.mxu0 %v1387_v10 }
 0x7ef   :  { %1556 = vmatmul.mubr.bf16.vlgmr.msra.gmra.mrb[36].mxu0 %v1386_v9 }
 0x7f0   :  { %3688 = vmatprep.mubr.msk.bf16.mxu0 %vm3950_vm0, %v3949_v1 }
 0x8c2   :  { %v3461_v11 = vpop.f32.mrb[36].mxu0 }
 0x8c3   :  { %v3462_v13 = vpop.f32.mrb[37].mxu0 }
 0x8c4   :  { %v3463_v6 = vadd.f32 %v3462_v13, %v3461_v11  ;;  %v3464_v7 = vpop.f32.mrb[38].mxu0 }
 0x8c5   :  { %v3465_v14 = vpop.f32.mrb[39].mxu0 }
 0x8c6   :  { %v1558_v15 = vadd.f32 %v3463_v6, %v3256_v12  ;;  %v3466_v16 = vadd.f32 %v3465_v14, %v3464_v7 }
 0x8c8   :  { %v1561_v19 = vadd.f32 %v3466_v16, %v3256_v12  ;;  %v1564_v21 = vadd.f32 %v1558_v15, %v1297_v45 }
 0x8ca   :  { %v1568_v22 = vsel %vm78_vm1, %v1564_v21, 0.0  ;;  %v1565_v25 = vadd.f32 %v1561_v19, %v1298_v46 }
 0x8cb   :  { %1569 = vadd.xlane.f32.xlu1 %v1568_v22 }
 0x8cc   :  { %v1571_v28 = vsel %vm78_vm1, %v1565_v25, 0.0 }
 0x8cd   :  { %1572 = vadd.xlane.f32.xlu0 %v1571_v28 }
 0x958   :  { %v1570_v29 = vpop.xlane.xlu1 %1569 }
 0x959   :  { %v1574_v31 = vmul.f32 0.03125, %v1570_v29 }
 0x95a   :  { %v1573_v30 = vpop.xlane.xlu0 %1572 }
 0x95b   :  { %v1576_v32 = vsub.f32 %v1564_v21, %v1574_v31  ;;  %v1575_v33 = vmul.f32 0.03125, %v1573_v30 }
 0x95d   :  { %v1577_v34 = vsub.f32 %v1565_v25, %v1575_v33  ;;  %v1578_v35 = vmul.f32 %v1576_v32, %v1576_v32 }
 0x95f   :  { %v1580_v36 = vsel %vm78_vm1, %v1578_v35, 0.0  ;;  %v1579_v37 = vmul.f32 %v1577_v34, %v1577_v34 }
 0x960   :  { %1581 = vadd.xlane.f32.xlu1 %v1580_v36 }
 0x961   :  { %v1583_v27 = vsel %vm78_vm1, %v1579_v37, 0.0 }
 0x962   :  { %1584 = vadd.xlane.f32.xlu0 %v1583_v27 }
 0x9ed   :  { %v1582_v40 = vpop.xlane.xlu1 %1581 }
 0x9ee   :  { %v1586_v41 = vmul.f32 0.03125, %v1582_v40 }
 0x9ef   :  { %v1585_v42 = vpop.xlane.xlu0 %1584 }
 0x9f0   :  { %v1588_v20 = vadd.f32 1e-05, %v1586_v41  ;;  %v1587_v24 = vmul.f32 0.03125, %v1585_v42 }
 0x9f2   :  { %3881 = vrsqrt.f32 %v1588_v20  ;;  %v1589_v17 = vadd.f32 1e-05, %v1587_v24 }
 0x9f4   :  { %3883 = vrsqrt.f32 %v1589_v17 }
 0x9fc   :  { %v3882_v43 = vpop.eup %3881 }
 0x9fd   :  { %v1592_v45 = vmul.f32 %v3882_v43, %v1576_v32 }
 0x9fe   :  { %v3884_v46 = vpop.eup %3883 }
 0x9ff   :  { %v1600_v47 = vmul.f32 %v3273_v44, %v1592_v45  ;;  %v1593_v48 = vmul.f32 %v3884_v46, %v1577_v34 }
 0xa01   :  { %v1601_v50 = vmul.f32 %v3273_v44, %v1593_v48  ;;  %v4395_v51 = vadd.f32 %v3274_v49, %v1600_v47 }
 0xa03   :  { %v4397_v52 = vadd.f32 %v3274_v49, %v1601_v50 }
 0xa05   :  { %v1610_v53 = vpack.c.bf16 %v4397_v52, %v4395_v51 }
 0xa07   :  { %3665 = vmatmul.mubr.msk.bf16.vlgmr.msra.gmra.mrb[52].mxu1 %vm78_vm1, %v1610_v53 }
 0xa08   :  { %3670 = vmatprep.mubr.msk.bf16.mxu1 %vm3950_vm0, %v3949_v1 }
 0xada   :  { %v1673_v58 = vpop.f32.mrb[52].mxu1 }
 0xadb   :  { %v1674_v59 = vadd.f32 %v3280_v56, %v1673_v58  ;;  %v3666_v60 = vpop.f32.mrb[53].mxu1 }
 0xadc   :  { %v1676_v61 = vpop.f32.mrb[54].mxu1 }
 0xadd   :  { %v3396_v62 = vpack.c.bf16 %v1674_v59, %v1674_v59  ;;  %v1677_v63 = vadd.f32 %v3280_v56, %v1676_v61  ;;  %v3667_v0 = vpop.f32.mrb[55].mxu1 }
 0xadf   :  { %v4407_v2 = vpack.c.bf16 %v1677_v63, %v1677_v63  ;;  %1686 = vrot.lane.b32.xlu1 %v3396_v62, %s3952_s24 }
 0xae1   :  { %1688 = vrot.lane.b32.xlu0 %v4407_v2, %s3952_s24 }
 0xae3   :  { %1690 = vrot.lane.b32.xlu1 %v3396_v62, %s3951_s23 }
 0xae5   :  { %1694 = vrot.lane.b32.xlu0 %v3396_v62, %s3953_s25 }
 0xae7   :  { %1692 = vrot.lane.b32.xlu1 %v4407_v2, %s3951_s23 }
 0xae9   :  { %1698 = vrot.lane.b32.xlu0 %v3396_v62, %s3954_s26 }
 0xaeb   :  { %1696 = vrot.lane.b32.xlu1 %v4407_v2, %s3953_s25 }
 0xaef   :  { %1746 = vrot.lane.b32.xlu1 %v4407_v2, %s3954_s26 }
 0xb51   :  { %v1687_v26 = vpop.permute.xlu1 %1686 }
 0xb52   :  { %v4421_v23 = vcombine.low %v1687_v26, %v1687_v26 }
 0xb53   :  { %v1689_v3 = vpop.permute.xlu0 %1688 }
 0xb54   :  { %v4423_v4 = vcombine.low %v1689_v3, %v1689_v3  ;;  %1796 = vrot.lane.b32.xlu0 %v4421_v23, %s3954_s26 }
 0xb55   :  { %v1691_v5 = vpop.permute.xlu1 %1690 }
 0xb56   :  { %v4427_v8 = vcombine.low %v1691_v5, %v1691_v5  ;;  %1846 = vrot.lane.b32.xlu1 %v4423_v4, %s3954_s26 }
 0xb57   :  { %v1695_v9 = vpop.permute.xlu0 %1694 }
 0xb58   :  { %1896 = vrot.lane.b32.xlu0 %v4427_v8, %s3954_s26  ;;  %v4433_v11 = vcombine.low %v1695_v9, %v1695_v9 }
 0xb59   :  { %v1693_v10 = vpop.permute.xlu1 %1692 }
 0xb5a   :  { %v4435_v12 = vcombine.low %v1693_v10, %v1693_v10 }
 0xb5b   :  { %v1699_v13 = vpop.permute.xlu0 %1698 }
 0xb5c   :  { %v1704_v6 = vsel %vm143_vm2, %v1699_v13, 0  ;;  %1946 = vrot.lane.b32.xlu1 %v4435_v12, %s3954_s26  ;;  %1996 = vrot.lane.b32.xlu0 %v4433_v11, %s3954_s26 }
 0xb5d   :  { %v1697_v7 = vpop.permute.xlu1 %1696  ;;  %3669 = vmatpush3.bf16.xpose.msra.mxu1 %v1704_v6 }
 0xb5e   :  { %v4442_v14 = vcombine.low %v1697_v7, %v1697_v7  ;;  %3674 = vmatprep.subr.bf16.mxu1 %v3949_v1 }
 0xb60   :  { %2046 = vrot.lane.b32.xlu1 %v4442_v14, %s3954_s26 }
 0xb61   :  { %v1747_v15 = vpop.permute.xlu1 %1746 }
 0xb62   :  { %v1752_v16 = vsel %vm143_vm2, %v1747_v15, 0 }
 0xb64   :  { %2190 = vrot.lane.b32.xlu1 %v3396_v62, %s3955_s27  ;;  %3671 = vmatmul.mubr.msk.bf16.vlgmr.msra.gmra.mrb[56].mxu1 %vm143_vm2, %v3396_v62 }
 0xb65   :  { %3675 = vmatpush3.bf16.xpose.msra.mxu1 %v1752_v16  ;;  %3676 = vmatprep.mubr.msk.bf16.mxu1 %vm3950_vm0, %v3949_v1 }
 0xb66   :  { %3680 = vmatprep.subr.bf16.mxu1 %v3949_v1 }
 0xb6c   :  { %3677 = vmatmul.mubr.msk.bf16.vlgmr.msra.gmra.mrb[60].mxu1 %vm143_vm2, %v4407_v2 }
 0xb6d   :  { %3682 = vmatprep.mubr.msk.bf16.mxu1 %vm3950_vm0, %v3949_v1 }
 0xbc6   :  { %v1797_v19 = vpop.permute.xlu0 %1796 }
 0xbc7   :  { %v1802_v21 = vsel %vm143_vm2, %v1797_v19, 0 }
 0xbc8   :  { %v1847_v22 = vpop.permute.xlu1 %1846  ;;  %3681 = vmatpush3.bf16.xpose.msra.mxu1 %v1802_v21 }
 0xbc9   :  { %v1852_v25 = vsel %vm143_vm2, %v1847_v22, 0  ;;  %3692 = vmatprep.subr.bf16.mxu1 %v3949_v1 }
 0xbca   :  { %3687 = vmatpush3.bf16.xpose.msra.mxu0 %v1852_v25  ;;  %v1897_v28 = vpop.permute.xlu0 %1896 }
 0xbcb   :  { %3698 = vmatprep.subr.bf16.mxu0 %v3949_v1  ;;  %v1902_v31 = vsel %vm143_vm2, %v1897_v28, 0 }
 0xbce   :  { %v1947_v29 = vpop.permute.xlu1 %1946  ;;  %v1997_v32 = vpop.permute.xlu0 %1996 }
 0xbcf   :  { %3683 = vmatmul.mubr.msk.bf16.vlgmr.msra.gmra.mrb[64].mxu1 %vm143_vm2, %v1687_v26  ;;  %v1952_v30 = vsel %vm143_vm2, %v1947_v29, 0  ;;  %v2002_v34 = vsel %vm143_vm2, %v1997_v32, 0 }
 0xbd0   :  { %3693 = vmatpush3.bf16.xpose.msra.mxu1 %v1902_v31  ;;  %3694 = vmatprep.mubr.msk.bf16.mxu1 %vm3950_vm0, %v3949_v1 }
 0xbd1   :  { %3689 = vmatmul.mubr.msk.bf16.vlgmr.msra.gmra.mrb[40].mxu0 %vm143_vm2, %v1689_v3  ;;  %3704 = vmatprep.subr.bf16.mxu1 %v3949_v1 }
 0xbd2   :  { %3699 = vmatpush3.bf16.xpose.msra.mxu0 %v1952_v30  ;;  %3700 = vmatprep.mubr.msk.bf16.mxu0 %vm3950_vm0, %v3949_v1  ;;  %v2047_v33 = vpop.permute.xlu1 %2046 }
 0xbd3   :  { %3710 = vmatprep.subr.bf16.mxu0 %v3949_v1  ;;  %v2052_v35 = vsel %vm143_vm2, %v2047_v33, 0 }
 0xbd6   :  { %v2191_v36 = vpop.permute.xlu1 %2190 }
 0xbd7   :  { %3695 = vmatmul.mubr.msk.bf16.vlgmr.msra.gmra.mrb[68].mxu1 %vm143_vm2, %v1691_v5  ;;  %v2196_v37 = vsel %vm639_vm3, %v2191_v36, 0 }
 0xbd8   :  { %3705 = vmatpush3.bf16.xpose.msra.mxu1 %v2002_v34  ;;  %3706 = vmatprep.mubr.msk.bf16.mxu1 %vm3950_vm0, %v3949_v1 }
 0xbd9   :  { %3701 = vmatmul.mubr.msk.bf16.vlgmr.msra.gmra.mrb[44].mxu0 %vm143_vm2, %v1693_v10  ;;  %3716 = vmatprep.subr.bf16.mxu1 %v3949_v1 }
 0xbda   :  { %3711 = vmatpush3.bf16.xpose.msra.mxu0 %v2052_v35  ;;  %3712 = vmatprep.mubr.msk.bf16.mxu0 %vm3950_vm0, %v3949_v1 }
 0xbdb   :  { %3722 = vmatprep.subr.bf16.mxu0 %v3949_v1 }
 0xbdf   :  { %3707 = vmatmul.mubr.msk.bf16.vlgmr.msra.gmra.mrb[72].mxu1 %vm143_vm2, %v1695_v9 }
 0xbe0   :  { %3717 = vmatpush3.bf16.msra.mxu1 %v2196_v37  ;;  %3718 = vmatprep.mubr.msk.bf16.mxu1 %vm3950_vm0, %v3949_v1 }
 0xbe1   :  { %3713 = vmatmul.mubr.msk.bf16.vlgmr.msra.gmra.mrb[48].mxu0 %vm143_vm2, %v1697_v7  ;;  %3728 = vmatprep.subr.bf16.mxu1 %v3949_v1 }
 0xbe2   :  { %3724 = vmatprep.mubr.msk.bf16.mxu0 %vm3950_vm0, %v3949_v1 }
 0xc37   :  { %v1740_v27 = vpop.f32.mrb[56].mxu1 }
 0xc38   :  { %v3672_v38 = vpop.f32.mrb[57].mxu1  ;;  %v2094_v39 = vsel %vm143_vm2, %v1740_v27, -inf }
 0xc39   :  { %2095 = vmax.xlane.f32.xlu0 %v2094_v39  ;;  %v1743_v40 = vpop.f32.mrb[58].mxu1 }
 0xc3a   :  { %v3673_v41 = vpop.f32.mrb[59].mxu1 }
 0xc3f   :  { %v1788_v42 = vpop.f32.mrb[60].mxu1 }
 0xc40   :  { %v3678_v20 = vpop.f32.mrb[61].mxu1  ;;  %v2097_v24 = vsel %vm143_vm2, %v1788_v42, -inf }
 0xc41   :  { %2098 = vmax.xlane.f32.xlu1 %v2097_v24  ;;  %v1791_v17 = vpop.f32.mrb[62].mxu1 }
 0xc42   :  { %v3679_v43 = vpop.f32.mrb[63].mxu1 }
 0xca2   :  { %v1838_v44 = vpop.f32.mrb[64].mxu1 }
 0xca3   :  { %v3684_v45 = vpop.f32.mrb[65].mxu1  ;;  %v2100_v46 = vsel %vm143_vm2, %v1838_v44, -inf }
 0xca4   :  { %v1888_v47 = vpop.f32.mrb[40].mxu0  ;;  %2101 = vmax.xlane.f32.xlu0 %v2100_v46  ;;  %v1841_v48 = vpop.f32.mrb[66].mxu1 }
 0xca5   :  { %v3685_v49 = vpop.f32.mrb[67].mxu1  ;;  %v3690_v50 = vpop.f32.mrb[41].mxu0  ;;  %v2103_v58 = vsel %vm143_vm2, %v1888_v47, -inf }
 0xca6   :  { %v1891_v53 = vpop.f32.mrb[42].mxu0 }
 0xca7   :  { %v3691_v56 = vpop.f32.mrb[43].mxu0 }
 0xca8   :  { %2104 = vmax.xlane.f32.xlu0 %v2103_v58 }
 0xcaa   :  { %v4493_v59 = vpop.f32.mrb[68].mxu1 }
 0xcab   :  { %v3696_v60 = vpop.f32.mrb[69].mxu1  ;;  %v2106_v61 = vsel %vm143_vm2, %v4493_v59, -inf }
 0xcac   :  { %v4497_v62 = vpop.f32.mrb[44].mxu0  ;;  %2107 = vmax.xlane.f32.xlu1 %v2106_v61  ;;  %v1941_v63 = vpop.f32.mrb[70].mxu1 }
 0xcad   :  { %v3697_v0 = vpop.f32.mrb[71].mxu1  ;;  %v3702_v26 = vpop.f32.mrb[45].mxu0  ;;  %v2109_v3 = vsel %vm143_vm2, %v4497_v62, -inf }
 0xcae   :  { %v1991_v5 = vpop.f32.mrb[46].mxu0  ;;  %2110 = vmax.xlane.f32.xlu0 %v2109_v3 }
 0xcaf   :  { %v3703_v9 = vpop.f32.mrb[47].mxu0 }
 0xcb2   :  { %v2038_v10 = vpop.f32.mrb[72].mxu1 }
 0xcb3   :  { %v3708_v13 = vpop.f32.mrb[73].mxu1  ;;  %v2112_v6 = vsel %vm143_vm2, %v2038_v10, -inf }
 0xcb4   :  { %v2088_v7 = vpop.f32.mrb[48].mxu0  ;;  %2113 = vmax.xlane.f32.xlu1 %v2112_v6  ;;  %v2041_v15 = vpop.f32.mrb[74].mxu1 }
 0xcb5   :  { %v3709_v16 = vpop.f32.mrb[75].mxu1  ;;  %v3714_v19 = vpop.f32.mrb[49].mxu0  ;;  %v2115_v21 = vsel %vm143_vm2, %v2088_v7, -inf }
 0xcb6   :  { %v2091_v22 = vpop.f32.mrb[50].mxu0  ;;  %2116 = vmax.xlane.f32.xlu0 %v2115_v21 }
 0xcb7   :  { %v3715_v25 = vpop.f32.mrb[51].mxu0 }
 0xcc5   :  { %2286 = vrot.lane.b32.xlu1 %v4421_v23, %s3955_s27 }
 0xcc6   :  { %v2096_v29 = vpop.xlane.xlu0 %2095 }
 0xcc7   :  { %v2118_v30 = vsub.f32 %v1740_v27, %v2096_v29 }
 0xcc9   :  { %2334 = vrot.lane.b32.xlu1 %v4423_v4, %s3955_s27  ;;  %v2126_v33 = vmul.f32 1.442695, %v2118_v30 }
 0xccc   :  { %2238 = vrot.lane.b32.xlu0 %v4407_v2, %s3955_s27 }
 0xcce   :  { %v2099_v28 = vpop.xlane.xlu1 %2098 }
 0xccf   :  { %v2119_v31 = vsub.f32 %v1788_v42, %v2099_v28 }
 0xcd1   :  { %v2128_v32 = vmul.f32 1.442695, %v2119_v31 }
 0xcd3   :  { %3885 = vpow2.f32 %v2128_v32 }
 0xcd4   :  { %3887 = vpow2.f32 %v2126_v33 }
 0xcdd   :  { %v3886_v34 = vpop.eup %3885 }
 0xcde   :  { %v3888_v35 = vpop.eup %3887  ;;  %v2145_v36 = vsel %vm143_vm2, %v3886_v34, 0.0 }
 0xcdf   :  { %v2142_v23 = vsel %vm143_vm2, %v3888_v35, 0.0 }
 0xceb   :  { %2146 = vadd.xlane.f32.xlu0 %v2145_v36 }
 0xced   :  { %2143 = vadd.xlane.f32.xlu1 %v2142_v23 }
 0xd31   :  { %v2102_v4 = vpop.xlane.xlu0 %2101 }
 0xd32   :  { %v2120_v37 = vsub.f32 %v1838_v44, %v2102_v4 }
 0xd34   :  { %v2130_v38 = vmul.f32 1.442695, %v2120_v37 }
 0xd35   :  { %v2105_v2 = vpop.xlane.xlu0 %2104 }
 0xd36   :  { %3889 = vpow2.f32 %v2130_v38  ;;  %v2121_v39 = vsub.f32 %v1888_v47, %v2105_v2 }
 0xd38   :  { %v2132_v40 = vmul.f32 1.442695, %v2121_v39 }
 0xd39   :  { %v2108_v45 = vpop.xlane.xlu1 %2107 }
 0xd3a   :  { %3891 = vpow2.f32 %v2132_v40  ;;  %v2122_v46 = vsub.f32 %v4493_v59, %v2108_v45 }
 0xd3b   :  { %v2111_v27 = vpop.xlane.xlu0 %2110 }
 0xd3c   :  { %v2123_v48 = vsub.f32 %v4497_v62, %v2111_v27  ;;  %v2134_v49 = vmul.f32 1.442695, %v2122_v46 }
 0xd3e   :  { %v2136_v53 = vmul.f32 1.442695, %v2123_v48  ;;  %3893 = vpow2.f32 %v2134_v49  ;;  %v3308_v49 = vld [vmem:[%s4730_s4 + $0x10] sm:$0xf] }
 0xd40   :  { %v4511_v41 = vpop.eup %3889  ;;  %3895 = vpow2.f32 %v2136_v53  ;;  %v2648_v53 = vsel %vm639_vm3, %v3308_v49, 0 }
 0xd41   :  { %v2148_v42 = vsel %vm143_vm2, %v4511_v41, 0.0  ;;  %v2114_v47 = vpop.xlane.xlu1 %2113 }
 0xd42   :  { %2149 = vadd.xlane.f32.xlu1 %v2148_v42  ;;  %v2124_v50 = vsub.f32 %v2038_v10, %v2114_v47 }
 0xd43   :  { %v2117_v20 = vpop.xlane.xlu0 %2116 }
 0xd44   :  { %v4515_v24 = vpop.eup %3891  ;;  %v2138_v56 = vmul.f32 1.442695, %v2124_v50  ;;  %v2125_v58 = vsub.f32 %v2088_v7, %v2117_v20 }
 0xd45   :  { %v2151_v17 = vsel %vm143_vm2, %v4515_v24, 0.0  ;;  %v2287_v61 = vpop.permute.xlu1 %2286 }
 0xd46   :  { %2152 = vadd.xlane.f32.xlu0 %v2151_v17  ;;  %3897 = vpow2.f32 %v2138_v56  ;;  %v2140_v60 = vmul.f32 1.442695, %v2125_v58  ;;  %v2292_v22 = vsel %vm639_vm3, %v2287_v61, 0  ;;  %v3309_v56 = vld [vmem:[%s4730_s4 + $0x14] sm:$0xf] }
 0xd47   :  { %v2239_v43 = vpop.permute.xlu0 %2238  ;;  %v2596_v58 = vsel %vm639_vm3, %v3309_v56, 0  ;;  %v3321_v56 = vld [vmem:[%s4731_s5 + $0x1] ss:$0 sm:$0xff] }
 0xd48   :  { %v2244_v44 = vsel %vm639_vm3, %v2239_v43, 0  ;;  %3899 = vpow2.f32 %v2140_v60 }
 0xd49   :  { %3723 = vmatpush3.bf16.msra.mxu0 %v2244_v44  ;;  %v2335_v63 = vpop.permute.xlu1 %2334 }
 0xd4a   :  { %3734 = vmatprep.subr.bf16.mxu0 %v3949_v1  ;;  %v2340_v19 = vsel %vm639_vm3, %v2335_v63, 0 }
 0xd53   :  { %2430 = vrot.lane.b32.xlu1 %v4435_v12, %s3955_s27  ;;  %v4527_v12 = vpop.eup %3893 }
 0xd54   :  { %v2154_v59 = vsel %vm143_vm2, %v4527_v12, 0.0 }
 0xd5c   :  { %2382 = vrot.lane.b32.xlu0 %v4427_v8, %s3955_s27  ;;  %v4529_v8 = vpop.eup %3895 }
 0xd5d   :  { %v4533_v62 = vpop.eup %3897  ;;  %v2157_v3 = vsel %vm143_vm2, %v4529_v8, 0.0 }
 0xd5e   :  { %v2160_v5 = vsel %vm143_vm2, %v4533_v62, 0.0  ;;  %v4539_v9 = vpop.eup %3899 }
 0xd5f   :  { %v2163_v10 = vsel %vm143_vm2, %v4539_v9, 0.0 }
 0xd77   :  { %2155 = vadd.xlane.f32.xlu1 %v2154_v59 }
 0xd78   :  { %v2147_v0 = vpop.xlane.xlu0 %2146 }
 0xd79   :  { %3901 = vrcp.f32 %v2147_v0 }
 0xd7a   :  { %v2144_v26 = vpop.xlane.xlu1 %2143 }
 0xd7b   :  { %3903 = vrcp.f32 %v2144_v26  ;;  %2158 = vadd.xlane.f32.xlu0 %v2157_v3  ;;  %2161 = vadd.xlane.f32.xlu1 %v2160_v5  ;;  %v3311_v3 = vld [vmem:[%s4730_s4 + $0x1c] sm:$0xf] }
 0xd7c   :  { %v2754_v5 = vsel %vm639_vm3, %v3311_v3, 0 }
 0xd7f   :  { %2164 = vadd.xlane.f32.xlu0 %v2163_v10 }
 0xd83   :  { %v3902_v13 = vpop.eup %3901 }
 0xd84   :  { %v2175_v6 = vmul.f32 %v3902_v13, %v3886_v34 }
 0xd85   :  { %v3904_v7 = vpop.eup %3903 }
 0xd86   :  { %v2174_v15 = vmul.f32 %v3904_v7, %v3888_v35  ;;  %v2183_v16 = vpack.c.bf16 %v2175_v6, %v2175_v6  ;;  %v3310_v6 = vld [vmem:[%s4730_s4 + $0x18] sm:$0xf] }
 0xd88   :  { %3725 = vmatmul.mubr.msk.bf16.vlgmr.msra.gmra.mrb[52].mxu0 %vm143_vm2, %v2183_v16  ;;  %v2182_v21 = vpack.c.bf16 %v2174_v15, %v2174_v15 }
 0xd89   :  { %3735 = vmatpush3.bf16.msra.mxu0 %v2340_v19  ;;  %3736 = vmatprep.mubr.msk.bf16.mxu0 %vm3950_vm0, %v3949_v1 }
 0xd8a   :  { %3719 = vmatmul.mubr.msk.bf16.vlgmr.msra.gmra.mrb[76].mxu1 %vm143_vm2, %v2182_v21  ;;  %3746 = vmatprep.subr.bf16.mxu0 %v3949_v1  ;;  %v2700_v21 = vsel %vm639_vm3, %v3310_v6, 0 }
 0xd8b   :  { %3729 = vmatpush3.bf16.msra.mxu1 %v2292_v22  ;;  %3730 = vmatprep.mubr.msk.bf16.mxu1 %vm3950_vm0, %v3949_v1 }
 0xd8c   :  { %2526 = vrot.lane.b32.xlu1 %v4442_v14, %s3955_s27  ;;  %3740 = vmatprep.subr.bf16.mxu1 %v3949_v1 }
 0xd95   :  { %2478 = vrot.lane.b32.xlu0 %v4433_v11, %s3955_s27 }
 0xdcf   :  { %v2150_v25 = vpop.xlane.xlu1 %2149 }
 0xdd0   :  { %3905 = vrcp.f32 %v2150_v25 }
 0xdd3   :  { %v2153_v28 = vpop.xlane.xlu0 %2152  ;;  %v2431_v14 = vpop.permute.xlu1 %2430 }
 0xdd4   :  { %3907 = vrcp.f32 %v2153_v28  ;;  %v2436_v36 = vsel %vm639_vm3, %v2431_v14, 0 }
 0xdd7   :  { %v2383_v30 = vpop.permute.xlu0 %2382 }
 0xdd8   :  { %v2388_v35 = vsel %vm639_vm3, %v2383_v30, 0 }
 0xdda   :  { %v3906_v29 = vpop.eup %3905 }
 0xddb   :  { %v2176_v31 = vmul.f32 %v3906_v29, %v4511_v41 }
 0xddd   :  { %v2184_v32 = vpack.c.bf16 %v2176_v31, %v2176_v31 }
 0xdde   :  { %v3908_v33 = vpop.eup %3907 }
 0xddf   :  { %v2177_v34 = vmul.f32 %v3908_v33, %v4515_v24  ;;  %3731 = vmatmul.mubr.msk.bf16.vlgmr.msra.gmra.mrb[80].mxu1 %vm143_vm2, %v2184_v32 }
 0xde0   :  { %3741 = vmatpush3.bf16.msra.mxu1 %v2388_v35  ;;  %3742 = vmatprep.mubr.msk.bf16.mxu1 %vm3950_vm0, %v3949_v1 }
 0xde1   :  { %v2185_v11 = vpack.c.bf16 %v2177_v34, %v2177_v34  ;;  %3752 = vmatprep.subr.bf16.mxu1 %v3949_v1 }
 0xde3   :  { %3737 = vmatmul.mubr.msk.bf16.vlgmr.msra.gmra.mrb[56].mxu0 %vm143_vm2, %v2185_v11 }
 0xde4   :  { %3747 = vmatpush3.bf16.msra.mxu0 %v2436_v36  ;;  %3748 = vmatprep.mubr.msk.bf16.mxu0 %vm3950_vm0, %v3949_v1 }
 0xde5   :  { %3758 = vmatprep.subr.bf16.mxu0 %v3949_v1 }
 0xe04   :  { %v2156_v23 = vpop.xlane.xlu1 %2155 }
 0xe05   :  { %3909 = vrcp.f32 %v2156_v23 }
 0xe08   :  { %v2159_v4 = vpop.xlane.xlu0 %2158  ;;  %v2162_v37 = vpop.xlane.xlu1 %2161 }
 0xe09   :  { %3911 = vrcp.f32 %v2159_v4 }
 0xe0a   :  { %3913 = vrcp.f32 %v2162_v37 }
 0xe0c   :  { %v2165_v38 = vpop.xlane.xlu0 %2164  ;;  %v2527_v17 = vpop.permute.xlu1 %2526 }
 0xe0d   :  { %3915 = vrcp.f32 %v2165_v38  ;;  %v2532_v46 = vsel %vm639_vm3, %v2527_v17, 0 }
 0xe0f   :  { %v3910_v2 = vpop.eup %3909 }
 0xe10   :  { %v2178_v39 = vmul.f32 %v3910_v2, %v4527_v12  ;;  %v2479_v40 = vpop.permute.xlu0 %2478 }
 0xe11   :  { %v2484_v24 = vsel %vm639_vm3, %v2479_v40, 0 }
 0xe12   :  { %v2186_v27 = vpack.c.bf16 %v2178_v39, %v2178_v39 }
 0xe13   :  { %v3912_v41 = vpop.eup %3911 }
 0xe14   :  { %v3914_v42 = vpop.eup %3913  ;;  %v2179_v20 = vmul.f32 %v3912_v41, %v4529_v8  ;;  %3743 = vmatmul.mubr.msk.bf16.vlgmr.msra.gmra.mrb[84].mxu1 %vm143_vm2, %v2186_v27 }
 0xe15   :  { %3753 = vmatpush3.bf16.msra.mxu1 %v2484_v24  ;;  %3754 = vmatprep.mubr.msk.bf16.mxu1 %vm3950_vm0, %v3949_v1  ;;  %v2180_v43 = vmul.f32 %v3914_v42, %v4533_v62 }
 0xe16   :  { %v2187_v44 = vpack.c.bf16 %v2179_v20, %v2179_v20  ;;  %3764 = vmatprep.subr.bf16.mxu1 %v3949_v1 }
 0xe17   :  { %v3916_v45 = vpop.eup %3915  ;;  %v2188_v48 = vpack.c.bf16 %v2180_v43, %v2180_v43 }
 0xe18   :  { %3749 = vmatmul.mubr.msk.bf16.vlgmr.msra.gmra.mrb[60].mxu0 %vm143_vm2, %v2187_v44  ;;  %v2181_v47 = vmul.f32 %v3916_v45, %v4539_v9 }
 0xe19   :  { %3759 = vmatpush3.bf16.msra.mxu0 %v2532_v46  ;;  %3760 = vmatprep.mubr.msk.bf16.mxu0 %vm3950_vm0, %v3949_v1 }
 0xe1a   :  { %3770 = vmatprep.subr.bf16.mxu0 %v3949_v1  ;;  %v2189_v50 = vpack.c.bf16 %v2181_v47, %v2181_v47 }
 0xe1c   :  { %3755 = vmatmul.mubr.msk.bf16.vlgmr.msra.gmra.mrb[88].mxu1 %vm143_vm2, %v2188_v48 }
 0xe1d   :  { %3766 = vmatprep.mubr.msk.bf16.mxu1 %vm3950_vm0, %v3949_v1  ;;  %3765 = vmatpush3.bf16.msra.mxu1 %v2596_v58 }
 0xe1e   :  { %3776 = vmatprep.subr.bf16.mxu1 %v3949_v1 }
 0xe20   :  { %3761 = vmatmul.mubr.msk.bf16.vlgmr.msra.gmra.mrb[64].mxu0 %vm143_vm2, %v2189_v50 }
 0xe21   :  { %3771 = vmatpush3.bf16.msra.mxu0 %v2648_v53  ;;  %3772 = vmatprep.mubr.msk.bf16.mxu0 %vm3950_vm0, %v3949_v1 }
 0xe22   :  { %3782 = vmatprep.subr.bf16.mxu0 %v3949_v1 }
 0xe5b   :  { %v2280_v60 = vpop.f32.mrb[52].mxu0 }
 0xe5c   :  { %v3726_v61 = vpop.f32.mrb[53].mxu0 }
 0xe5d   :  { %v2232_v12 = vpop.f32.mrb[76].mxu1  ;;  %v2283_v8 = vpop.f32.mrb[54].mxu0 }
 0xe5e   :  { %v3399_v63 = vpack.c.bf16 %v2280_v60, %v2232_v12  ;;  %v3720_v59 = vpop.f32.mrb[77].mxu1  ;;  %v3727_v62 = vpop.f32.mrb[55].mxu0 }
 0xe5f   :  { %v2235_v0 = vpop.f32.mrb[78].mxu1 }
 0xe60   :  { %v3721_v26 = vpop.f32.mrb[79].mxu1  ;;  %3773 = vmatmul.mubr.msk.bf16.vlgmr.msra.gmra.mrb[68].mxu0 %vm143_vm2, %v3399_v63 }
 0xe61   :  { %3784 = vmatprep.mubr.msk.bf16.mxu0 %vm3950_vm0, %v3949_v1  ;;  %3783 = vmatpush3.bf16.msra.mxu0 %v2754_v5 }
 0xeb2   :  { %v2328_v9 = vpop.f32.mrb[80].mxu1 }
 0xeb3   :  { %v3732_v10 = vpop.f32.mrb[81].mxu1 }
 0xeb4   :  { %v2331_v13 = vpop.f32.mrb[82].mxu1 }
 0xeb5   :  { %v3733_v7 = vpop.f32.mrb[83].mxu1 }
 0xeb6   :  { %v2376_v15 = vpop.f32.mrb[56].mxu0 }
 0xeb7   :  { %v3398_v16 = vpack.c.bf16 %v2376_v15, %v2328_v9  ;;  %v3738_v19 = vpop.f32.mrb[57].mxu0 }
 0xeb8   :  { %v2379_v22 = vpop.f32.mrb[58].mxu0 }
 0xeb9   :  { %v3739_v25 = vpop.f32.mrb[59].mxu0  ;;  %3767 = vmatmul.mubr.msk.bf16.vlgmr.msra.gmra.mrb[92].mxu1 %vm143_vm2, %v3398_v16  ;;  %v3828_v22 = vld [vmem:[%s4734_s8 + $0x34] ss:$8 sps:$4 sm:$0xff]  }
 0xeba   :  { %3777 = vmatpush3.bf16.msra.mxu1 %v2700_v21  ;;  %3778 = vmatprep.mubr.msk.bf16.mxu1 %vm3950_vm0, %v3949_v1  ;;  %v3823_v21 = vld [vmem:[%s4734_s8 + $0x20] ss:$8 sps:$4 sm:$0xff]   ;;  %v3826_v25 = vld [vmem:[%s4734_s8 + $0x30] ss:$8 sps:$4 sm:$0xff]  }
 0xee7   :  { %v2424_v28 = vpop.f32.mrb[84].mxu1 }
 0xee8   :  { %v3744_v29 = vpop.f32.mrb[85].mxu1 }
 0xee9   :  { %v2427_v31 = vpop.f32.mrb[86].mxu1  ;;  %v3830_v29 = vld [vmem:[%s4736_s10 + $0x80] sm:$0xff]  }
 0xeea   :  { %v3745_v30 = vpop.f32.mrb[87].mxu1  ;;  %v3831_v31 = vld [vmem:[%s4736_s10 + $0xc8] sm:$0xff]  }
 0xeeb   :  { %v2472_v32 = vpop.f32.mrb[60].mxu0  ;;  %v3832_v30 = vld [vmem:[%s4736_s10 + $0x88] sm:$0xff]  }
 0xeec   :  { %v3400_v33 = vpack.c.bf16 %v2472_v32, %v2424_v28  ;;  %v3750_v34 = vpop.f32.mrb[61].mxu0  ;;  %v3829_v28 = vld [vmem:[%s4736_s10 + $0xc0] sm:$0xff]   ;;  %v3833_v32 = vld [vmem:[%s4736_s10 + $0xd0] sm:$0xff]  }
 0xeed   :  { %v2475_v35 = vpop.f32.mrb[62].mxu0  ;;  %3510 = vmatprep.subr.bf16.mxu0 %v3829_v28  ;;  %v3835_v34 = vld [vmem:[%s4736_s10 + $0xd8] sm:$0xff]  }
 0xeee   :  { %v3751_v14 = vpop.f32.mrb[63].mxu0  ;;  %3779 = vmatmul.mubr.msk.bf16.vlgmr.msra.gmra.mrb[96].mxu1 %vm143_vm2, %v3400_v33  ;;  %v3834_v33 = vld [vmem:[%s4736_s10 + $0x90] sm:$0xff]   ;;  %v3836_v35 = vld [vmem:[%s4736_s10 + $0x98] sm:$0xff]  }
 0xeef   :  { %v2520_v11 = vpop.f32.mrb[88].mxu1  ;;  %2931 = vmatprep.mubr.bf16.mxu1 %v3956_v18  ;;  %v3837_v14 = vld [vmem:[%s4736_s10 + $0xe0] sm:$0xff]  }
 0xef0   :  { %v3756_v36 = vpop.f32.mrb[89].mxu1 }
 0xef1   :  { %v2523_v23 = vpop.f32.mrb[90].mxu1  ;;  %v3839_v36 = vld [vmem:[%s4736_s10 + $0xe8] sm:$0xff]  }
 0xef2   :  { %v3757_v4 = vpop.f32.mrb[91].mxu1 }
 0xef3   :  { %v2568_v37 = vpop.f32.mrb[64].mxu0 }
 0xef4   :  { %v3401_v38 = vpack.c.bf16 %v2568_v37, %v2520_v11  ;;  %v3762_v1 = vpop.f32.mrb[65].mxu0  ;;  %v3838_v11 = vld [vmem:[%s4736_s10 + $0xa0] sm:$0xff]  }
 0xef5   :  { %v2571_v2 = vpop.f32.mrb[66].mxu0 }
 0xef6   :  { %v3763_v39 = vpop.f32.mrb[67].mxu0  ;;  %3785 = vmatmul.mubr.msk.bf16.vlgmr.msra.gmra.mrb[72].mxu0 %vm143_vm2, %v3401_v38 }
 0xef7   :  { %3511 = vmatpush3.bf16.msra.mxu0 %v3830_v29 }
 0xef8   :  { %3512 = vmatprep.subr.bf16.mxu0 %v3831_v31 }
 0xefb   :  { %3513 = vmatpush3.bf16.msra.mxu0 %v3832_v30 }
 0xefc   :  { %3514 = vmatprep.subr.bf16.mxu0 %v3833_v32 }
 0xeff   :  { %3515 = vmatpush3.bf16.msra.mxu0 %v3834_v33 }
 0xf00   :  { %3516 = vmatprep.subr.bf16.mxu0 %v3835_v34 }
 0xf03   :  { %3517 = vmatpush3.bf16.msra.mxu0 %v3836_v35 }
 0xf04   :  { %3518 = vmatprep.subr.bf16.mxu0 %v3837_v14 }
 0xf07   :  { %3519 = vmatpush3.bf16.msra.mxu0 %v3838_v11 }
 0xf08   :  { %3520 = vmatprep.subr.bf16.mxu0 %v3839_v36 }
 0xf33   :  { %v2684_v40 = vpop.f32.mrb[68].mxu0 }
 0xf34   :  { %v3774_v27 = vpop.f32.mrb[69].mxu0 }
 0xf35   :  { %v2687_v41 = vpop.f32.mrb[70].mxu0  ;;  %v3324_v27 = vld [vmem:[%s4732_s6 + $0x1] ss:$0 sm:$0xff] }
 0xf36   :  { %v3775_v42 = vpop.f32.mrb[71].mxu0 }
 0xf8c   :  { %v2632_v20 = vpop.f32.mrb[92].mxu1 }
 0xf8d   :  { %v2685_v24 = vadd.f32 %v2684_v40, %v2632_v20  ;;  %v3768_v17 = vpop.f32.mrb[93].mxu1 }
 0xf8e   :  { %v2635_v43 = vpop.f32.mrb[94].mxu1 }
 0xf8f   :  { %v2688_v44 = vadd.f32 %v2687_v41, %v2635_v43  ;;  %v3769_v18 = vpop.f32.mrb[95].mxu1 }
 0xfc1   :  { %v2736_v45 = vpop.f32.mrb[96].mxu1 }
 0xfc2   :  { %v2743_v46 = vadd.f32 %v2736_v45, %v2685_v24  ;;  %v3780_v47 = vpop.f32.mrb[97].mxu1  ;;  %v3325_v24 = vld [vmem:[%s4733_s7 + $0x1] ss:$0 sm:$0xff]  ;;  %v3840_v45 = vld [vmem:[%s4736_s10 + $0xa8] sm:$0xff]  }
 0xfc3   :  { %v2739_v48 = vpop.f32.mrb[98].mxu1  ;;  %3521 = vmatpush3.bf16.msra.mxu0 %v3840_v45  ;;  %v3842_v47 = vld [vmem:[%s4736_s10 + $0xb0] sm:$0xff]  }
 0xfc4   :  { %v2744_v49 = vadd.f32 %v2739_v48, %v2688_v44  ;;  %v3781_v50 = vpop.f32.mrb[99].mxu1  ;;  %v3843_v48 = vld [vmem:[%s4736_s10 + $0xf8] sm:$0xff]  }
 0xfc5   :  { %v3330_v50 = vld [vmem:[%s4735_s9 + $0x2] sm:$0x3] }
 0xfc9   :  { %v2790_v53 = vpop.f32.mrb[72].mxu0 }
 0xfca   :  { %v2797_v58 = vadd.f32 %v2790_v53, %v2743_v46  ;;  %v3786_v60 = vpop.f32.mrb[73].mxu0  ;;  %v3841_v46 = vld [vmem:[%s4736_s10 + $0xf0] sm:$0xff]   ;;  %v2869_v53 = vrot.slane %v3330_v50, %v1308_v55 }
 0xfcb   :  { %v2793_v61 = vpop.f32.mrb[74].mxu0  ;;  %3522 = vmatprep.subr.bf16.mxu0 %v3841_v46 }
 0xfcc   :  { %v2807_v12 = vadd.f32 %v3321_v56, %v2797_v58  ;;  %v2798_v8 = vadd.f32 %v2793_v61, %v2744_v49  ;;  %v3787_v63 = vpop.f32.mrb[75].mxu0  ;;  %3523 = vmatpush3.bf16.msra.mxu0 %v3842_v47  ;;  %v3844_v49 = vld [vmem:[%s4736_s10 + $0xb8] sm:$0xff]  }
 0xfcd   :  { %3524 = vmatprep.subr.bf16.mxu0 %v3843_v48 }
 0xfce   :  { %v2808_v59 = vadd.f32 %v3321_v56, %v2798_v8  ;;  %v2809_v62 = vadd.f32 %v2807_v12, %v4395_v51  ;;  %v2873_v56 = vrot.slane %v3330_v50, %v1312_v57 }
 0xfd0   :  { %v2815_v0 = vsel %vm78_vm1, %v2809_v62, 0.0  ;;  %v2810_v26 = vadd.f32 %v2808_v59, %v4397_v52  ;;  %v3825_v52 = vld [vmem:[%s4734_s8 + $0x24] ss:$8 sps:$4 sm:$0xff]   ;;  %3525 = vmatpush3.bf16.msra.mxu0 %v3844_v49 }
 0xfd1   :  { %2816 = vadd.xlane.f32.xlu0 %v2815_v0  ;;  %2899 = vmatprep.subr.bf16.mxu1 %v3825_v52 }
 0xfd2   :  { %v2818_v3 = vsel %vm78_vm1, %v2810_v26, 0.0  ;;  %2900 = vmatpush1.bf16.msra.mxu1 %v3823_v21 }
 0xfd3   :  { %2819 = vadd.xlane.f32.xlu1 %v2818_v3  ;;  %2901 = vmatprep.subr.bf16.mxu1 %v3828_v22 }
 0xfd6   :  { %2902 = vmatpush1.bf16.msra.mxu1 %v3826_v25 }
0x105e   :  { %v2817_v5 = vpop.xlane.xlu0 %2816 }
0x105f   :  { %v2821_v9 = vmul.f32 0.03125, %v2817_v5 }
0x1060   :  { %v2820_v10 = vpop.xlane.xlu1 %2819 }
0x1061   :  { %v2823_v13 = vsub.f32 %v2809_v62, %v2821_v9  ;;  %v2822_v6 = vmul.f32 0.03125, %v2820_v10 }
0x1063   :  { %v2824_v7 = vsub.f32 %v2810_v26, %v2822_v6  ;;  %v2825_v15 = vmul.f32 %v2823_v13, %v2823_v13 }
0x1065   :  { %v2827_v16 = vsel %vm78_vm1, %v2825_v15, 0.0  ;;  %v2826_v19 = vmul.f32 %v2824_v7, %v2824_v7 }
0x1066   :  { %2828 = vadd.xlane.f32.xlu0 %v2827_v16 }
0x1067   :  { %v2830_v51 = vsel %vm78_vm1, %v2826_v19, 0.0 }
0x106a   :  { %2831 = vadd.xlane.f32.xlu0 %v2830_v51 }
0x10f3   :  { %v2829_v23 = vpop.xlane.xlu0 %2828 }
0x10f4   :  { %v2833_v4 = vmul.f32 0.03125, %v2829_v23 }
0x10f6   :  { %v2835_v37 = vadd.f32 1e-05, %v2833_v4 }
0x10f7   :  { %v2832_v38 = vpop.xlane.xlu0 %2831 }
0x10f8   :  { %3917 = vrsqrt.f32 %v2835_v37  ;;  %v2834_v1 = vmul.f32 0.03125, %v2832_v38 }
0x10fa   :  { %v2836_v2 = vadd.f32 1e-05, %v2834_v1 }
0x10fc   :  { %3919 = vrsqrt.f32 %v2836_v2  ;;  %v3388_v2 = vld [vmem:[%s4738_s12 + $0x1] ss:$0 sm:$0xff]  ;;  %s3957_s12 = smov [#allocation2]  }
0x1102   :  { %v3918_v39 = vpop.eup %3917 }
0x1103   :  { %v2839_v40 = vmul.f32 %v3918_v39, %v2823_v13 }
0x1105   :  { %v2847_v42 = vmul.f32 %v3324_v27, %v2839_v40 }
0x1106   :  { %v3920_v41 = vpop.eup %3919 }
0x1107   :  { %v2840_v20 = vmul.f32 %v3920_v41, %v2824_v7  ;;  %v2855_v43 = vadd.f32 %v3325_v24, %v2847_v42 }
0x1109   :  { %v2848_v17 = vmul.f32 %v3324_v27, %v2840_v20  ;;  %v3389_v27 = vld [vmem:[%s4739_s13 + $0x1] ss:$0 sm:$0xff]  ;;  %s3204_s13 = sshll.u32 %s3957_s12, 4  ;;  %s3205_s13 = int_to_ptr.vmem [resolvable:$true] %s3204_s13 }
0x110a   :  { %s3925_s17 = scalar_lea.vmem %s3205_s13, 32  ;;  %p3930_p1 = scmp.lt.s32.totalorder %s3205_s13, %s3205_s13 }
0x110b   :  { %v2856_v44 = vadd.f32 %v3325_v24, %v2848_v17  ;;  %p3926_p0 = scmp.ne.s32.totalorder %s3205_s13, %s3925_s17  ;;  %p3931_p2 = scmp.lt.s32.totalorder %s3925_s17, %s3925_s17 }
0x110d   :  { %v2857_v18 = vpack.c.bf16 %v2856_v44, %v2855_v43  ;;  %p3932_p3 = por %p3931_p2, %p3930_p1 }
0x110f   :  { %3335 = vmatmul.mubr.msk.bf16.vlgmr.msra.gmra.mrb[100].mxu1 %vm78_vm1, %v2857_v18  ;;  %p3933_p4 = pnand %p3932_p3, %p3926_p0 }
0x11e2   :  { %v2933_v58 = vpop.f32.mrb[100].mxu1 }
0x11e3   :  { %v2934_v60 = vadd.f32 %v2933_v58, %v2869_v53  ;;  %v2935_v61 = vpop.f32.mrb[101].mxu1 }
0x11e4   :  { %v2936_v12 = vadd.f32 %v2935_v61, %v2873_v56  ;;  %v2937_v8 = vpop.f32.mrb[102].mxu1 }
0x11e5   :  { %v2938_v63 = vadd.f32 %v2937_v8, %v2869_v53  ;;  %v2939_v59 = vpop.f32.mrb[103].mxu1  ;;  %v2942_v0 = vmax.f32 %v2934_v60, 0.0 }
0x11e6   :  { %v2940_v62 = vadd.f32 %v2939_v59, %v2873_v56  ;;  %v2943_v3 = vmax.f32 %v2936_v12, 0.0 }
0x11e7   :  { %v2944_v26 = vmax.f32 %v2938_v63, 0.0 }
0x11e8   :  { %v2945_v5 = vmax.f32 %v2940_v62, 0.0 }
0x11e9   :  { %v2946_v9 = vpack.c.bf16 %v2944_v26, %v2942_v0 }
0x11ea   :  { %v2947_v10 = vpack.c.bf16 %v2945_v5, %v2943_v3 }
0x11ec   :  { %3117 = vmatprep.mubr.bf16.mxu0 %v2947_v10 }
0x11ed   :  { %3118 = vmatmul.mubr.bf16.vlgmr.msra.gmra.mrb[76].mxu0 %v2946_v9 }
0x12c0   :  { %v3526_v55 = vpop.f32.mrb[76].mxu0 }
0x12c1   :  { %v3527_v57 = vpop.f32.mrb[77].mxu0 }
0x12c2   :  { %v3528_v13 = vadd.f32 %v3527_v57, %v3526_v55  ;;  %v3529_v6 = vpop.f32.mrb[78].mxu0 }
0x12c3   :  { %v3530_v7 = vpop.f32.mrb[79].mxu0 }
0x12c4   :  { %v3120_v15 = vadd.f32 %v3528_v13, %v3369_v54  ;;  %v3531_v16 = vadd.f32 %v3530_v7, %v3529_v6 }
0x12c6   :  { %v3123_v19 = vadd.f32 %v3531_v16, %v3369_v54  ;;  %v3126_v51 = vadd.f32 %v3120_v15, %v2855_v43 }
0x12c8   :  { %v3132_v52 = vsel %vm78_vm1, %v3126_v51, 0.0  ;;  %v3127_v21 = vadd.f32 %v3123_v19, %v2856_v44 }
0x12c9   :  { %3133 = vadd.xlane.f32.xlu1 %v3132_v52 }
0x12ca   :  { %v3135_v22 = vsel %vm78_vm1, %v3127_v21, 0.0 }
0x12cb   :  { %3136 = vadd.xlane.f32.xlu0 %v3135_v22 }
0x1356   :  { %v3134_v25 = vpop.xlane.xlu1 %3133 }
0x1357   :  { %v3138_v28 = vmul.f32 0.03125, %v3134_v25 }
0x1358   :  { %v3137_v29 = vpop.xlane.xlu0 %3136 }
0x1359   :  { %v3140_v31 = vsub.f32 %v3126_v51, %v3138_v28  ;;  %v3139_v30 = vmul.f32 0.03125, %v3137_v29 }
0x135b   :  { %v3141_v32 = vsub.f32 %v3127_v21, %v3139_v30  ;;  %v3142_v33 = vmul.f32 %v3140_v31, %v3140_v31 }
0x135d   :  { %v3144_v34 = vsel %vm78_vm1, %v3142_v33, 0.0  ;;  %v3143_v35 = vmul.f32 %v3141_v32, %v3141_v32 }
0x135e   :  { %3145 = vadd.xlane.f32.xlu1 %v3144_v34 }
0x135f   :  { %v3147_v14 = vsel %vm78_vm1, %v3143_v35, 0.0 }
0x1360   :  { %3148 = vadd.xlane.f32.xlu0 %v3147_v14 }
0x13eb   :  { %v3146_v11 = vpop.xlane.xlu1 %3145 }
0x13ec   :  { %v3150_v36 = vmul.f32 0.03125, %v3146_v11 }
0x13ed   :  { %v3149_v23 = vpop.xlane.xlu0 %3148 }
0x13ee   :  { %v3152_v4 = vadd.f32 1e-05, %v3150_v36  ;;  %v3151_v37 = vmul.f32 0.03125, %v3149_v23 }
0x13f0   :  { %3921 = vrsqrt.f32 %v3152_v4  ;;  %v3153_v38 = vadd.f32 1e-05, %v3151_v37 }
0x13f2   :  { %3923 = vrsqrt.f32 %v3153_v38 }
0x13fa   :  { %v3922_v1 = vpop.eup %3921 }
0x13fb   :  { %v3156_v39 = vmul.f32 %v3922_v1, %v3140_v31 }
0x13fc   :  { %v3924_v40 = vpop.eup %3923 }
0x13fd   :  { %v3164_v41 = vmul.f32 %v3388_v2, %v3156_v39  ;;  %v3157_v42 = vmul.f32 %v3924_v40, %v3141_v32 }
0x13ff   :  { %v3165_v20 = vmul.f32 %v3388_v2, %v3157_v42  ;;  %v3172_v24 = vadd.f32 %v3389_v27, %v3164_v41 }
0x1401   :  { %v3173_v17 = vadd.f32 %v3389_v27, %v3165_v20  ;;  %v3174_v43 = vsel %vm78_vm1, %v3172_v24, 0.0 }
0x1402   :  { %v3175_v44 = vrot.slane %v3174_v43, 4 }
0x1403   :  { %v3181_v18 = vsel %vm78_vm1, %v3173_v17, 0.0 }
0x1404   :  { %v3176_v45 = vadd.f32 %v3175_v44, %v3174_v43  ;;  %v3182_v46 = vrot.slane %v3181_v18, 4 }
0x1406   :  { %v3177_v47 = vrot.slane %v3176_v45, 2  ;;  %v3183_v48 = vadd.f32 %v3182_v46, %v3181_v18 }
0x1408   :  { %v3178_v49 = vadd.f32 %v3177_v47, %v3176_v45  ;;  %v3184_v50 = vrot.slane %v3183_v48, 2 }
0x140a   :  { %v3179_v53 = vrot.slane %v3178_v49, 1  ;;  %v3185_v56 = vadd.f32 %v3184_v50, %v3183_v48 }
0x140c   :  { %v3180_v58 = vadd.f32 %v3179_v53, %v3178_v49  ;;  %v3186_v60 = vrot.slane %v3185_v56, 1 }
0x140e   :  { %v3187_v61 = vadd.f32 %v3186_v60, %v3185_v56  ;;  %v3189_v12 = vmul.f32 0.125, %v3180_v58 }
0x1410   :  { %v3190_v8 = vmul.f32 0.125, %v3187_v61 }
0x1412   :  { %v3194_v63 = vsel %vm3193_vm4, %v3190_v8, %v3189_v12 }
0x1413   :  { %3197 = vst.msk [vmem:[#allocation2] sm:$0x3] %vm3196_vm5, %v3194_v63 }
0x1414   :  { %3936 = shalt.err (!%p3933_p4)
}
0x1415   :  { %s3937_s20 = scalar_lea.hbm %s4740_s14, 32 }
0x1416   :  { %p3938_p5 = scmp.ne.s32.totalorder %s4740_s14, %s3937_s20  ;;  %p3941_p6 = scmp.lt.u32.totalorder %s3937_s20, %s4740_s14 }
0x1418   :  { %p3943_p7 = pnand %p3941_p6, %p3938_p5 }
0x141a   :  { %3946 = shalt.err (!%p3943_p7)
}
0x141b   :  { %3207 = dma.vmem_to_hbm [thread:$0]  %s3205_s13, 32, %s4740_s14, [#allocation3]  }
0x141c   :  { %3947 = dma.done.wait [#allocation3], 32  }
0x141d   :  { %3948 = vsyncadd [#allocation3], 4294967264 }
0x141e   :  { %3211 = vsyncpa [#allocation3], 1 }

</bundles_post_ra>
